<compile_context>
chip_gen: v5e
topology: v5e:2x2
jax: 0.10.0
libtpu: 0.0.40
codegen_flags: <defaults>
</compile_context>

<pallas_src>
import jax
import jax.numpy as jnp
from jax import lax
from jax.experimental import pallas as pl
from jax.experimental.pallas import tpu as pltpu


# ----------------------------------------------------------------------------
# Static network dimensions (LeNet on 32x32x3 input)
# ----------------------------------------------------------------------------
H = W = 32
HW = H * W
K = 5                       # conv kernel size
C_IN, C1, C2 = 3, 6, 16     # channels: input, conv1, conv2
H1 = H - K + 1              # 28  (conv1 output)
P1 = H1 // 2                # 14  (pool1 output)
H2 = P1 - K + 1             # 10  (conv2 output)
P2 = H2 // 2                # 5   (pool2 output)
F1, F2, F3 = 120, 84, 10

# Per-image flat lane-frame lengths.  Activations live as (channels, lanes)
# with lane = i*W + j (the original 32-wide pitch); pooled values stay at
# dilated positions (stride 2 after pool1, stride 4 after pool2).  Lengths are
# derived backwards so every slice is in bounds and every *valid* output only
# reads valid inputs (garbage lanes are finite and never consumed).
SLAB = 4 * ((P2 - 1) * W + (P2 - 1)) + 1     # 529: pool2 frame
L2 = SLAB + 2 * W + 2                        # 595: conv2 (pre-pool) frame
LH = L2 + 2 * (K - 1) * (W + 1)              # 859: pool1 frame
L1 = LH + W + 1                              # 892: conv1 (pre-pool) frame
assert L1 + (K - 1) * (W + 1) == HW          # x needs no padding per image


# ----------------------------------------------------------------------------
# The fused Pallas kernel: one invocation = one image
# ----------------------------------------------------------------------------
def _foo_net_kernel(x_ref, w1_ref, b1_ref, w2_ref, b2_ref,
                    wf1_ref, bf1_ref, wf2_ref, bf2_ref, wf3_ref, bf3_ref,
                    out_ref,
                    pk1_ref, o1_ref, h_ref, pk2_ref, o2_ref, p2_ref):
    f32 = jnp.float32

    # ---- conv1 + bias + ReLU: pack 25 shifted (3, L1) views into (75, L1),
    #      then ONE fat matmul (6,75)@(75,L1). --------------------------------
    for di in range(K):
        for dj in range(K):
            pos = di * K + dj
            off = di * W + dj
            pk1_ref[pos * C_IN:(pos + 1) * C_IN, :] = x_ref[:, off:off + L1]
    o1_ref[...] = jnp.maximum(
        jnp.dot(w1_ref[...], pk1_ref[...], preferred_element_type=f32)
        + b1_ref[...], 0.0)

    # ---- 2x2/2 max-pool #1: max of 4 lane-shifted views (output stays at
    #      stride-2 dilated positions in the same frame). -----------------------
    h_ref[...] = jnp.maximum(
        jnp.maximum(o1_ref[:, 0:LH], o1_ref[:, 1:1 + LH]),
        jnp.maximum(o1_ref[:, W:W + LH], o1_ref[:, W + 1:W + 1 + LH]))

    # ---- conv2 + bias + ReLU: same packing trick, shifts x2 (dilated input),
    #      ONE matmul (16,150)@(150,L2). ---------------------------------------
    for di in range(K):
        for dj in range(K):
            pos = di * K + dj
            off = 2 * (di * W + dj)
            pk2_ref[pos * C1:(pos + 1) * C1, :] = h_ref[:, off:off + L2]
    o2_ref[...] = jnp.maximum(
        jnp.dot(w2_ref[...], pk2_ref[...], preferred_element_type=f32)
        + b2_ref[...], 0.0)

    # ---- 2x2/2 max-pool #2 (shifts x2 again; valid outputs at 4*(r2*W+s2)) ---
    p2_ref[...] = jnp.maximum(
        jnp.maximum(o2_ref[:, 0:SLAB], o2_ref[:, 2:2 + SLAB]),
        jnp.maximum(o2_ref[:, 2 * W:2 * W + SLAB],
                    o2_ref[:, 2 * W + 2:2 * W + 2 + SLAB]))

    # ---- fc1 folded over the 25 pooled positions: 25 accumulated
    #      (120,16)@(16,1) matmuls directly from the pooled frame.
    #      (replaces the old 25*N serialized single-lane gather stores) --------
    acc = bf1_ref[...]                                   # (120, 1)
    for r2 in range(P2):
        for s2 in range(P2):
            pos = r2 * P2 + s2
            off = 4 * (r2 * W + s2)
            acc = acc + jnp.dot(wf1_ref[pos], p2_ref[:, off:off + 1],
                                preferred_element_type=f32)
    a1 = jnp.maximum(acc, 0.0)

    # ---- fc2 / fc3 ------------------------------------------------------------
    a2 = jnp.maximum(
        jnp.dot(wf2_ref[...], a1, preferred_element_type=f32) + bf2_ref[...],
        0.0)
    out_ref[0] = (jnp.dot(wf3_ref[...], a2, preferred_element_type=f32)
                  + bf3_ref[...])


# ----------------------------------------------------------------------------
# Wrapper
# ----------------------------------------------------------------------------
def _resident(arr):
    """Constant-index full-array BlockSpec (weight stays resident in VMEM)."""
    zeros = (0,) * arr.ndim
    return pl.BlockSpec(arr.shape, lambda i: zeros)


def prepare_params(params):
    """One-time host-side re-layout of PyTorch-style params."""
    f32 = jnp.float32
    # conv weights -> (Cout, k*k*Cin); column block `pos = di*K+dj` is w[:,:,di,dj]
    w1 = jnp.transpose(params["conv1_w"], (0, 2, 3, 1)).reshape(C1, K * K * C_IN)
    w2 = jnp.transpose(params["conv2_w"], (0, 2, 3, 1)).reshape(C2, K * K * C1)
    # fc1 weight split per pooled position: wf1p[pos, f, c] = fc1_w[f, c*25 + pos]
    wf1p = jnp.transpose(params["fc1_w"].reshape(F1, C2, P2 * P2), (2, 0, 1))
    return {
        "w1": w1.astype(f32), "b1": params["conv1_b"].reshape(C1, 1).astype(f32),
        "w2": w2.astype(f32), "b2": params["conv2_b"].reshape(C2, 1).astype(f32),
        "wf1": wf1p.astype(f32), "bf1": params["fc1_b"].reshape(F1, 1).astype(f32),
        "wf2": params["fc2_w"].astype(f32),
        "bf2": params["fc2_b"].reshape(F2, 1).astype(f32),
        "wf3": params["fc3_w"].astype(f32),
        "bf3": params["fc3_b"].reshape(F3, 1).astype(f32),
    }


@jax.jit
def foo_net_forward(kparams, x):
    """x: (N, 3, 32, 32) NCHW float32 -> logits (N, 10)."""
    n = x.shape[0]
    assert x.shape[1:] == (C_IN, H, W)

    # Boundary layout conversion only: NCHW -> (Cin, N*H*W); image n occupies
    # lanes [n*HW, (n+1)*HW).
    x_flat = jnp.transpose(x, (1, 0, 2, 3)).reshape(C_IN, n * HW).astype(jnp.float32)

    in_specs = [pl.BlockSpec((C_IN, HW), lambda i: (0, i))] + [
        _resident(kparams[name])
        for name in ("w1", "b1", "w2", "b2", "wf1", "bf1", "wf2", "bf2",
                     "wf3", "bf3")
    ]

    out = pl.pallas_call(
        _foo_net_kernel,
        out_shape=jax.ShapeDtypeStruct((n, F3, 1), jnp.float32),
        grid=(n,),
        in_specs=in_specs,
        out_specs=pl.BlockSpec((1, F3, 1), lambda i: (i, 0, 0)),
        scratch_shapes=[
            pltpu.VMEM((K * K * C_IN, L1), jnp.float32),  # packed conv1 operand
            pltpu.VMEM((C1, L1), jnp.float32),            # conv1 output (pre-pool)
            pltpu.VMEM((C1, LH), jnp.float32),            # pool1 output (dilated)
            pltpu.VMEM((K * K * C1, L2), jnp.float32),    # packed conv2 operand
            pltpu.VMEM((C2, L2), jnp.float32),            # conv2 output (pre-pool)
            pltpu.VMEM((C2, SLAB), jnp.float32),          # pool2 output (dilated)
        ],
        compiler_params=pltpu.CompilerParams(
            dimension_semantics=("parallel",),
            vmem_limit_bytes=32 * 1024 * 1024,
        ),
    )(x_flat,
      kparams["w1"], kparams["b1"], kparams["w2"], kparams["b2"],
      kparams["wf1"], kparams["bf1"], kparams["wf2"], kparams["bf2"],
      kparams["wf3"], kparams["bf3"])
    return out[:, :, 0]                                  # (N, 10)


# ----------------------------------------------------------------------------
# Parameter init (deterministic, PyTorch-default-style uniform)
# ----------------------------------------------------------------------------
def init_params(key):
    def uniform(key, shape, fan_in):
        bound = 1.0 / jnp.sqrt(float(fan_in))
        return jax.random.uniform(key, shape, jnp.float32, -bound, bound)

    keys = jax.random.split(key, 10)
    return {
        "conv1_w": uniform(keys[0], (C1, C_IN, K, K), C_IN * K * K),
        "conv1_b": uniform(keys[1], (C1,), C_IN * K * K),
        "conv2_w": uniform(keys[2], (C2, C1, K, K), C1 * K * K),
        "conv2_b": uniform(keys[3], (C2,), C1 * K * K),
        "fc1_w": uniform(keys[4], (F1, C2 * P2 * P2), C2 * P2 * P2),
        "fc1_b": uniform(keys[5], (F1,), C2 * P2 * P2),
        "fc2_w": uniform(keys[6], (F2, F1), F1),
        "fc2_b": uniform(keys[7], (F2,), F1),
        "fc3_w": uniform(keys[8], (F3, F2), F2),
        "fc3_b": uniform(keys[9], (F3,), F2),
    }


# ----------------------------------------------------------------------------
# Pure-JAX reference (mirrors the PyTorch module) for the correctness check
# ----------------------------------------------------------------------------
def foo_net_reference(params, x):
    hp = lax.Precision.HIGHEST
    dn = ("NCHW", "OIHW", "NCHW")
    y = lax.conv_general_dilated(x, params["conv1_w"], (1, 1), "VALID",
                                 dimension_numbers=dn, precision=hp)
    y = jax.nn.relu(y + params["conv1_b"][None, :, None, None])
    y = lax.reduce_window(y, -jnp.inf, lax.max, (1, 1, 2, 2), (1, 1, 2, 2), "VALID")
    y = lax.conv_general_dilated(y, params["conv2_w"], (1, 1), "VALID",
                                 dimension_numbers=dn, precision=hp)
    y = jax.nn.relu(y + params["conv2_b"][None, :, None, None])
    y = lax.reduce_window(y, -jnp.inf, lax.max, (1, 1, 2, 2), (1, 1, 2, 2), "VALID")
    y = y.reshape(y.shape[0], -1)
    y = jax.nn.relu(jnp.dot(y, params["fc1_w"].T, precision=hp) + params["fc1_b"])
    y = jax.nn.relu(jnp.dot(y, params["fc2_w"].T, precision=hp) + params["fc2_b"])
    return jnp.dot(y, params["fc3_w"].T, precision=hp) + params["fc3_b"]


if __name__ == "__main__":
    key = jax.random.PRNGKey(0)
    pkey, xkey = jax.random.split(key)
    params = init_params(pkey)
    kparams = prepare_params(params)

    # Input must be 32x32 so that two conv(5)+pool(2) stages yield 16x5x5.
    x = jax.random.normal(xkey, (2, 3, 32, 32), dtype=jnp.float32)

    out = jax.block_until_ready(foo_net_forward(kparams, x))
    assert out.shape == (2, F3), out.shape
    assert bool(jnp.all(jnp.isfinite(out)))

    ref = jax.block_until_ready(foo_net_reference(params, x))
    max_err = float(jnp.max(jnp.abs(out - ref)))
    assert max_err < 1e-2, f"mismatch vs reference: {max_err}"

    print("KERNEL_OK")
</pallas_src>

<mosaic_0001>
module attributes {stable_mosaic.version = 11 : i64} {
  func.func @_foo_net_kernel(%arg0: i32, %arg1: memref<3x1024xf32, #tpu.memory_space<vmem>>, %arg2: memref<6x75xf32, #tpu.memory_space<vmem>>, %arg3: memref<6x1xf32, #tpu.memory_space<vmem>>, %arg4: memref<16x150xf32, #tpu.memory_space<vmem>>, %arg5: memref<16x1xf32, #tpu.memory_space<vmem>>, %arg6: memref<25x120x16xf32, #tpu.memory_space<vmem>>, %arg7: memref<120x1xf32, #tpu.memory_space<vmem>>, %arg8: memref<84x120xf32, #tpu.memory_space<vmem>>, %arg9: memref<84x1xf32, #tpu.memory_space<vmem>>, %arg10: memref<10x84xf32, #tpu.memory_space<vmem>>, %arg11: memref<10x1xf32, #tpu.memory_space<vmem>>, %arg12: memref<1x10x1xf32, #tpu.memory_space<vmem>>, %arg13: memref<75x892xf32, #tpu.memory_space<vmem>>, %arg14: memref<6x892xf32, #tpu.memory_space<vmem>>, %arg15: memref<6x859xf32, #tpu.memory_space<vmem>>, %arg16: memref<150x595xf32, #tpu.memory_space<vmem>>, %arg17: memref<16x595xf32, #tpu.memory_space<vmem>>, %arg18: memref<16x529xf32, #tpu.memory_space<vmem>>) attributes {dimension_semantics = [#tpu.dimension_semantics<parallel>], iteration_bounds = array<i64: 2>, scalar_prefetch = 0 : i64, scratch_operands = 6 : i64, tpu.core_type = #tpu.core_type<tc>, window_params = [{transform_indices = @transform_0, window_bounds = array<i64: 3, 1024>}, {pipeline_mode = #tpu.pipeline_mode<synchronous>, transform_indices = @transform_1, window_bounds = array<i64: 6, 75>}, {pipeline_mode = #tpu.pipeline_mode<synchronous>, transform_indices = @transform_2, window_bounds = array<i64: 6, 1>}, {pipeline_mode = #tpu.pipeline_mode<synchronous>, transform_indices = @transform_3, window_bounds = array<i64: 16, 150>}, {pipeline_mode = #tpu.pipeline_mode<synchronous>, transform_indices = @transform_4, window_bounds = array<i64: 16, 1>}, {pipeline_mode = #tpu.pipeline_mode<synchronous>, transform_indices = @transform_5, window_bounds = array<i64: 25, 120, 16>}, {pipeline_mode = #tpu.pipeline_mode<synchronous>, transform_indices = @transform_6, window_bounds = array<i64: 120, 1>}, {pipeline_mode = #tpu.pipeline_mode<synchronous>, transform_indices = @transform_7, window_bounds = array<i64: 84, 120>}, {pipeline_mode = #tpu.pipeline_mode<synchronous>, transform_indices = @transform_8, window_bounds = array<i64: 84, 1>}, {pipeline_mode = #tpu.pipeline_mode<synchronous>, transform_indices = @transform_9, window_bounds = array<i64: 10, 84>}, {pipeline_mode = #tpu.pipeline_mode<synchronous>, transform_indices = @transform_10, window_bounds = array<i64: 10, 1>}, {transform_indices = @transform_11, window_bounds = array<i64: 1, 10, 1>}]} {
    %c0 = arith.constant 0 : index
    %c0_0 = arith.constant 0 : index
    %0 = vector.load %arg1[%c0, %c0_0] : memref<3x1024xf32, #tpu.memory_space<vmem>>, vector<3x892xf32>
    %c0_1 = arith.constant 0 : index
    %c0_2 = arith.constant 0 : index
    %1 = vector.load %arg13[%c0_1, %c0_2] : memref<75x892xf32, #tpu.memory_space<vmem>>, vector<3x892xf32>
    tpu.vector_store %arg13[%c0_1, %c0_2], %0 {strides = array<i32>} : memref<75x892xf32, #tpu.memory_space<vmem>>, vector<3x892xf32>,
    %c0_3 = arith.constant 0 : index
    %c1 = arith.constant 1 : index
    %2 = vector.load %arg1[%c0_3, %c1] : memref<3x1024xf32, #tpu.memory_space<vmem>>, vector<3x892xf32>
    %c3 = arith.constant 3 : index
    %c0_4 = arith.constant 0 : index
    %3 = vector.load %arg13[%c3, %c0_4] : memref<75x892xf32, #tpu.memory_space<vmem>>, vector<3x892xf32>
    tpu.vector_store %arg13[%c3, %c0_4], %2 {strides = array<i32>} : memref<75x892xf32, #tpu.memory_space<vmem>>, vector<3x892xf32>,
    %c0_5 = arith.constant 0 : index
    %c2 = arith.constant 2 : index
    %4 = vector.load %arg1[%c0_5, %c2] : memref<3x1024xf32, #tpu.memory_space<vmem>>, vector<3x892xf32>
    %c6 = arith.constant 6 : index
    %c0_6 = arith.constant 0 : index
    %5 = vector.load %arg13[%c6, %c0_6] : memref<75x892xf32, #tpu.memory_space<vmem>>, vector<3x892xf32>
    tpu.vector_store %arg13[%c6, %c0_6], %4 {strides = array<i32>} : memref<75x892xf32, #tpu.memory_space<vmem>>, vector<3x892xf32>,
    %c0_7 = arith.constant 0 : index
    %c3_8 = arith.constant 3 : index
    %6 = vector.load %arg1[%c0_7, %c3_8] : memref<3x1024xf32, #tpu.memory_space<vmem>>, vector<3x892xf32>
    %c9 = arith.constant 9 : index
    %c0_9 = arith.constant 0 : index
    %7 = vector.load %arg13[%c9, %c0_9] : memref<75x892xf32, #tpu.memory_space<vmem>>, vector<3x892xf32>
    tpu.vector_store %arg13[%c9, %c0_9], %6 {strides = array<i32>} : memref<75x892xf32, #tpu.memory_space<vmem>>, vector<3x892xf32>,
    %c0_10 = arith.constant 0 : index
    %c4 = arith.constant 4 : index
    %8 = vector.load %arg1[%c0_10, %c4] : memref<3x1024xf32, #tpu.memory_space<vmem>>, vector<3x892xf32>
    %c12 = arith.constant 12 : index
    %c0_11 = arith.constant 0 : index
    %9 = vector.load %arg13[%c12, %c0_11] : memref<75x892xf32, #tpu.memory_space<vmem>>, vector<3x892xf32>
    tpu.vector_store %arg13[%c12, %c0_11], %8 {strides = array<i32>} : memref<75x892xf32, #tpu.memory_space<vmem>>, vector<3x892xf32>,
    %c0_12 = arith.constant 0 : index
    %c32 = arith.constant 32 : index
    %10 = vector.load %arg1[%c0_12, %c32] : memref<3x1024xf32, #tpu.memory_space<vmem>>, vector<3x892xf32>
    %c15 = arith.constant 15 : index
    %c0_13 = arith.constant 0 : index
    %11 = vector.load %arg13[%c15, %c0_13] : memref<75x892xf32, #tpu.memory_space<vmem>>, vector<3x892xf32>
    tpu.vector_store %arg13[%c15, %c0_13], %10 {strides = array<i32>} : memref<75x892xf32, #tpu.memory_space<vmem>>, vector<3x892xf32>,
    %c0_14 = arith.constant 0 : index
    %c33 = arith.constant 33 : index
    %12 = vector.load %arg1[%c0_14, %c33] : memref<3x1024xf32, #tpu.memory_space<vmem>>, vector<3x892xf32>
    %c18 = arith.constant 18 : index
    %c0_15 = arith.constant 0 : index
    %13 = vector.load %arg13[%c18, %c0_15] : memref<75x892xf32, #tpu.memory_space<vmem>>, vector<3x892xf32>
    tpu.vector_store %arg13[%c18, %c0_15], %12 {strides = array<i32>} : memref<75x892xf32, #tpu.memory_space<vmem>>, vector<3x892xf32>,
    %c0_16 = arith.constant 0 : index
    %c34 = arith.constant 34 : index
    %14 = vector.load %arg1[%c0_16, %c34] : memref<3x1024xf32, #tpu.memory_space<vmem>>, vector<3x892xf32>
    %c21 = arith.constant 21 : index
    %c0_17 = arith.constant 0 : index
    %15 = vector.load %arg13[%c21, %c0_17] : memref<75x892xf32, #tpu.memory_space<vmem>>, vector<3x892xf32>
    tpu.vector_store %arg13[%c21, %c0_17], %14 {strides = array<i32>} : memref<75x892xf32, #tpu.memory_space<vmem>>, vector<3x892xf32>,
    %c0_18 = arith.constant 0 : index
    %c35 = arith.constant 35 : index
    %16 = vector.load %arg1[%c0_18, %c35] : memref<3x1024xf32, #tpu.memory_space<vmem>>, vector<3x892xf32>
    %c24 = arith.constant 24 : index
    %c0_19 = arith.constant 0 : index
    %17 = vector.load %arg13[%c24, %c0_19] : memref<75x892xf32, #tpu.memory_space<vmem>>, vector<3x892xf32>
    tpu.vector_store %arg13[%c24, %c0_19], %16 {strides = array<i32>} : memref<75x892xf32, #tpu.memory_space<vmem>>, vector<3x892xf32>,
    %c0_20 = arith.constant 0 : index
    %c36 = arith.constant 36 : index
    %18 = vector.load %arg1[%c0_20, %c36] : memref<3x1024xf32, #tpu.memory_space<vmem>>, vector<3x892xf32>
    %c27 = arith.constant 27 : index
    %c0_21 = arith.constant 0 : index
    %19 = vector.load %arg13[%c27, %c0_21] : memref<75x892xf32, #tpu.memory_space<vmem>>, vector<3x892xf32>
    tpu.vector_store %arg13[%c27, %c0_21], %18 {strides = array<i32>} : memref<75x892xf32, #tpu.memory_space<vmem>>, vector<3x892xf32>,
    %c0_22 = arith.constant 0 : index
    %c64 = arith.constant 64 : index
    %20 = vector.load %arg1[%c0_22, %c64] : memref<3x1024xf32, #tpu.memory_space<vmem>>, vector<3x892xf32>
    %c30 = arith.constant 30 : index
    %c0_23 = arith.constant 0 : index
    %21 = vector.load %arg13[%c30, %c0_23] : memref<75x892xf32, #tpu.memory_space<vmem>>, vector<3x892xf32>
    tpu.vector_store %arg13[%c30, %c0_23], %20 {strides = array<i32>} : memref<75x892xf32, #tpu.memory_space<vmem>>, vector<3x892xf32>,
    %c0_24 = arith.constant 0 : index
    %c65 = arith.constant 65 : index
    %22 = vector.load %arg1[%c0_24, %c65] : memref<3x1024xf32, #tpu.memory_space<vmem>>, vector<3x892xf32>
    %c33_25 = arith.constant 33 : index
    %c0_26 = arith.constant 0 : index
    %23 = vector.load %arg13[%c33_25, %c0_26] : memref<75x892xf32, #tpu.memory_space<vmem>>, vector<3x892xf32>
    tpu.vector_store %arg13[%c33_25, %c0_26], %22 {strides = array<i32>} : memref<75x892xf32, #tpu.memory_space<vmem>>, vector<3x892xf32>,
    %c0_27 = arith.constant 0 : index
    %c66 = arith.constant 66 : index
    %24 = vector.load %arg1[%c0_27, %c66] : memref<3x1024xf32, #tpu.memory_space<vmem>>, vector<3x892xf32>
    %c36_28 = arith.constant 36 : index
    %c0_29 = arith.constant 0 : index
    %25 = vector.load %arg13[%c36_28, %c0_29] : memref<75x892xf32, #tpu.memory_space<vmem>>, vector<3x892xf32>
    tpu.vector_store %arg13[%c36_28, %c0_29], %24 {strides = array<i32>} : memref<75x892xf32, #tpu.memory_space<vmem>>, vector<3x892xf32>,
    %c0_30 = arith.constant 0 : index
    %c67 = arith.constant 67 : index
    %26 = vector.load %arg1[%c0_30, %c67] : memref<3x1024xf32, #tpu.memory_space<vmem>>, vector<3x892xf32>
    %c39 = arith.constant 39 : index
    %c0_31 = arith.constant 0 : index
    %27 = vector.load %arg13[%c39, %c0_31] : memref<75x892xf32, #tpu.memory_space<vmem>>, vector<3x892xf32>
    tpu.vector_store %arg13[%c39, %c0_31], %26 {strides = array<i32>} : memref<75x892xf32, #tpu.memory_space<vmem>>, vector<3x892xf32>,
    %c0_32 = arith.constant 0 : index
    %c68 = arith.constant 68 : index
    %28 = vector.load %arg1[%c0_32, %c68] : memref<3x1024xf32, #tpu.memory_space<vmem>>, vector<3x892xf32>
    %c42 = arith.constant 42 : index
    %c0_33 = arith.constant 0 : index
    %29 = vector.load %arg13[%c42, %c0_33] : memref<75x892xf32, #tpu.memory_space<vmem>>, vector<3x892xf32>
    tpu.vector_store %arg13[%c42, %c0_33], %28 {strides = array<i32>} : memref<75x892xf32, #tpu.memory_space<vmem>>, vector<3x892xf32>,
    %c0_34 = arith.constant 0 : index
    %c96 = arith.constant 96 : index
    %30 = vector.load %arg1[%c0_34, %c96] : memref<3x1024xf32, #tpu.memory_space<vmem>>, vector<3x892xf32>
    %c45 = arith.constant 45 : index
    %c0_35 = arith.constant 0 : index
    %31 = vector.load %arg13[%c45, %c0_35] : memref<75x892xf32, #tpu.memory_space<vmem>>, vector<3x892xf32>
    tpu.vector_store %arg13[%c45, %c0_35], %30 {strides = array<i32>} : memref<75x892xf32, #tpu.memory_space<vmem>>, vector<3x892xf32>,
    %c0_36 = arith.constant 0 : index
    %c97 = arith.constant 97 : index
    %32 = vector.load %arg1[%c0_36, %c97] : memref<3x1024xf32, #tpu.memory_space<vmem>>, vector<3x892xf32>
    %c48 = arith.constant 48 : index
    %c0_37 = arith.constant 0 : index
    %33 = vector.load %arg13[%c48, %c0_37] : memref<75x892xf32, #tpu.memory_space<vmem>>, vector<3x892xf32>
    tpu.vector_store %arg13[%c48, %c0_37], %32 {strides = array<i32>} : memref<75x892xf32, #tpu.memory_space<vmem>>, vector<3x892xf32>,
    %c0_38 = arith.constant 0 : index
    %c98 = arith.constant 98 : index
    %34 = vector.load %arg1[%c0_38, %c98] : memref<3x1024xf32, #tpu.memory_space<vmem>>, vector<3x892xf32>
    %c51 = arith.constant 51 : index
    %c0_39 = arith.constant 0 : index
    %35 = vector.load %arg13[%c51, %c0_39] : memref<75x892xf32, #tpu.memory_space<vmem>>, vector<3x892xf32>
    tpu.vector_store %arg13[%c51, %c0_39], %34 {strides = array<i32>} : memref<75x892xf32, #tpu.memory_space<vmem>>, vector<3x892xf32>,
    %c0_40 = arith.constant 0 : index
    %c99 = arith.constant 99 : index
    %36 = vector.load %arg1[%c0_40, %c99] : memref<3x1024xf32, #tpu.memory_space<vmem>>, vector<3x892xf32>
    %c54 = arith.constant 54 : index
    %c0_41 = arith.constant 0 : index
    %37 = vector.load %arg13[%c54, %c0_41] : memref<75x892xf32, #tpu.memory_space<vmem>>, vector<3x892xf32>
    tpu.vector_store %arg13[%c54, %c0_41], %36 {strides = array<i32>} : memref<75x892xf32, #tpu.memory_space<vmem>>, vector<3x892xf32>,
    %c0_42 = arith.constant 0 : index
    %c100 = arith.constant 100 : index
    %38 = vector.load %arg1[%c0_42, %c100] : memref<3x1024xf32, #tpu.memory_space<vmem>>, vector<3x892xf32>
    %c57 = arith.constant 57 : index
    %c0_43 = arith.constant 0 : index
    %39 = vector.load %arg13[%c57, %c0_43] : memref<75x892xf32, #tpu.memory_space<vmem>>, vector<3x892xf32>
    tpu.vector_store %arg13[%c57, %c0_43], %38 {strides = array<i32>} : memref<75x892xf32, #tpu.memory_space<vmem>>, vector<3x892xf32>,
    %c0_44 = arith.constant 0 : index
    %c128 = arith.constant 128 : index
    %40 = vector.load %arg1[%c0_44, %c128] : memref<3x1024xf32, #tpu.memory_space<vmem>>, vector<3x892xf32>
    %c60 = arith.constant 60 : index
    %c0_45 = arith.constant 0 : index
    %41 = vector.load %arg13[%c60, %c0_45] : memref<75x892xf32, #tpu.memory_space<vmem>>, vector<3x892xf32>
    tpu.vector_store %arg13[%c60, %c0_45], %40 {strides = array<i32>} : memref<75x892xf32, #tpu.memory_space<vmem>>, vector<3x892xf32>,
    %c0_46 = arith.constant 0 : index
    %c129 = arith.constant 129 : index
    %42 = vector.load %arg1[%c0_46, %c129] : memref<3x1024xf32, #tpu.memory_space<vmem>>, vector<3x892xf32>
    %c63 = arith.constant 63 : index
    %c0_47 = arith.constant 0 : index
    %43 = vector.load %arg13[%c63, %c0_47] : memref<75x892xf32, #tpu.memory_space<vmem>>, vector<3x892xf32>
    tpu.vector_store %arg13[%c63, %c0_47], %42 {strides = array<i32>} : memref<75x892xf32, #tpu.memory_space<vmem>>, vector<3x892xf32>,
    %c0_48 = arith.constant 0 : index
    %c130 = arith.constant 130 : index
    %44 = vector.load %arg1[%c0_48, %c130] : memref<3x1024xf32, #tpu.memory_space<vmem>>, vector<3x892xf32>
    %c66_49 = arith.constant 66 : index
    %c0_50 = arith.constant 0 : index
    %45 = vector.load %arg13[%c66_49, %c0_50] : memref<75x892xf32, #tpu.memory_space<vmem>>, vector<3x892xf32>
    tpu.vector_store %arg13[%c66_49, %c0_50], %44 {strides = array<i32>} : memref<75x892xf32, #tpu.memory_space<vmem>>, vector<3x892xf32>,
    %c0_51 = arith.constant 0 : index
    %c131 = arith.constant 131 : index
    %46 = vector.load %arg1[%c0_51, %c131] : memref<3x1024xf32, #tpu.memory_space<vmem>>, vector<3x892xf32>
    %c69 = arith.constant 69 : index
    %c0_52 = arith.constant 0 : index
    %47 = vector.load %arg13[%c69, %c0_52] : memref<75x892xf32, #tpu.memory_space<vmem>>, vector<3x892xf32>
    tpu.vector_store %arg13[%c69, %c0_52], %46 {strides = array<i32>} : memref<75x892xf32, #tpu.memory_space<vmem>>, vector<3x892xf32>,
    %c0_53 = arith.constant 0 : index
    %c132 = arith.constant 132 : index
    %48 = vector.load %arg1[%c0_53, %c132] : memref<3x1024xf32, #tpu.memory_space<vmem>>, vector<3x892xf32>
    %c72 = arith.constant 72 : index
    %c0_54 = arith.constant 0 : index
    %49 = vector.load %arg13[%c72, %c0_54] : memref<75x892xf32, #tpu.memory_space<vmem>>, vector<3x892xf32>
    tpu.vector_store %arg13[%c72, %c0_54], %48 {strides = array<i32>} : memref<75x892xf32, #tpu.memory_space<vmem>>, vector<3x892xf32>,
    %c0_55 = arith.constant 0 : index
    %c0_56 = arith.constant 0 : index
    %50 = vector.load %arg2[%c0_55, %c0_56] : memref<6x75xf32, #tpu.memory_space<vmem>>, vector<6x75xf32>
    %c0_57 = arith.constant 0 : index
    %c0_58 = arith.constant 0 : index
    %51 = vector.load %arg13[%c0_57, %c0_58] : memref<75x892xf32, #tpu.memory_space<vmem>>, vector<75x892xf32>
    %cst = arith.constant dense<0.000000e+00> : vector<6x892xf32>
    %52 = tpu.matmul %50, %51, %cst {dimension_numbers = #tpu.dot_dimension_numbers<[1], [0], [0], [1], [0, 0, 1, 1], [], []>} : vector<6x75xf32>, vector<75x892xf32>, vector<6x892xf32> -> vector<6x892xf32>
    %c0_59 = arith.constant 0 : index
    %c0_60 = arith.constant 0 : index
    %53 = vector.load %arg3[%c0_59, %c0_60] : memref<6x1xf32, #tpu.memory_space<vmem>>, vector<6x1xf32>
    %54 = vector.broadcast %53 : vector<6x1xf32> to vector<6x892xf32>
    %55 = arith.addf %52, %54 : vector<6x892xf32>
    %cst_61 = arith.constant 0.000000e+00 : f32
    %56 = vector.broadcast %cst_61 : f32 to vector<6x892xf32>
    %57 = arith.maximumf %55, %56 : vector<6x892xf32>
    %c0_62 = arith.constant 0 : index
    %c0_63 = arith.constant 0 : index
    %58 = vector.load %arg14[%c0_62, %c0_63] : memref<6x892xf32, #tpu.memory_space<vmem>>, vector<6x892xf32>
    tpu.vector_store %arg14[%c0_62, %c0_63], %57 {strides = array<i32>} : memref<6x892xf32, #tpu.memory_space<vmem>>, vector<6x892xf32>,
    %c0_64 = arith.constant 0 : index
    %c0_65 = arith.constant 0 : index
    %59 = vector.load %arg14[%c0_64, %c0_65] : memref<6x892xf32, #tpu.memory_space<vmem>>, vector<6x859xf32>
    %c0_66 = arith.constant 0 : index
    %c1_67 = arith.constant 1 : index
    %60 = vector.load %arg14[%c0_66, %c1_67] : memref<6x892xf32, #tpu.memory_space<vmem>>, vector<6x859xf32>
    %61 = arith.maximumf %59, %60 : vector<6x859xf32>
    %c0_68 = arith.constant 0 : index
    %c32_69 = arith.constant 32 : index
    %62 = vector.load %arg14[%c0_68, %c32_69] : memref<6x892xf32, #tpu.memory_space<vmem>>, vector<6x859xf32>
    %c0_70 = arith.constant 0 : index
    %c33_71 = arith.constant 33 : index
    %63 = vector.load %arg14[%c0_70, %c33_71] : memref<6x892xf32, #tpu.memory_space<vmem>>, vector<6x859xf32>
    %64 = arith.maximumf %62, %63 : vector<6x859xf32>
    %65 = arith.maximumf %61, %64 : vector<6x859xf32>
    %c0_72 = arith.constant 0 : index
    %c0_73 = arith.constant 0 : index
    %66 = vector.load %arg15[%c0_72, %c0_73] : memref<6x859xf32, #tpu.memory_space<vmem>>, vector<6x859xf32>
    tpu.vector_store %arg15[%c0_72, %c0_73], %65 {strides = array<i32>} : memref<6x859xf32, #tpu.memory_space<vmem>>, vector<6x859xf32>,
    %c0_74 = arith.constant 0 : index
    %c0_75 = arith.constant 0 : index
    %67 = vector.load %arg15[%c0_74, %c0_75] : memref<6x859xf32, #tpu.memory_space<vmem>>, vector<6x595xf32>
    %c0_76 = arith.constant 0 : index
    %c0_77 = arith.constant 0 : index
    %68 = vector.load %arg16[%c0_76, %c0_77] : memref<150x595xf32, #tpu.memory_space<vmem>>, vector<6x595xf32>
    tpu.vector_store %arg16[%c0_76, %c0_77], %67 {strides = array<i32>} : memref<150x595xf32, #tpu.memory_space<vmem>>, vector<6x595xf32>,
    %c0_78 = arith.constant 0 : index
    %c2_79 = arith.constant 2 : index
    %69 = vector.load %arg15[%c0_78, %c2_79] : memref<6x859xf32, #tpu.memory_space<vmem>>, vector<6x595xf32>
    %c6_80 = arith.constant 6 : index
    %c0_81 = arith.constant 0 : index
    %70 = vector.load %arg16[%c6_80, %c0_81] : memref<150x595xf32, #tpu.memory_space<vmem>>, vector<6x595xf32>
    tpu.vector_store %arg16[%c6_80, %c0_81], %69 {strides = array<i32>} : memref<150x595xf32, #tpu.memory_space<vmem>>, vector<6x595xf32>,
    %c0_82 = arith.constant 0 : index
    %c4_83 = arith.constant 4 : index
    %71 = vector.load %arg15[%c0_82, %c4_83] : memref<6x859xf32, #tpu.memory_space<vmem>>, vector<6x595xf32>
    %c12_84 = arith.constant 12 : index
    %c0_85 = arith.constant 0 : index
    %72 = vector.load %arg16[%c12_84, %c0_85] : memref<150x595xf32, #tpu.memory_space<vmem>>, vector<6x595xf32>
    tpu.vector_store %arg16[%c12_84, %c0_85], %71 {strides = array<i32>} : memref<150x595xf32, #tpu.memory_space<vmem>>, vector<6x595xf32>,
    %c0_86 = arith.constant 0 : index
    %c6_87 = arith.constant 6 : index
    %73 = vector.load %arg15[%c0_86, %c6_87] : memref<6x859xf32, #tpu.memory_space<vmem>>, vector<6x595xf32>
    %c18_88 = arith.constant 18 : index
    %c0_89 = arith.constant 0 : index
    %74 = vector.load %arg16[%c18_88, %c0_89] : memref<150x595xf32, #tpu.memory_space<vmem>>, vector<6x595xf32>
    tpu.vector_store %arg16[%c18_88, %c0_89], %73 {strides = array<i32>} : memref<150x595xf32, #tpu.memory_space<vmem>>, vector<6x595xf32>,
    %c0_90 = arith.constant 0 : index
    %c8 = arith.constant 8 : index
    %75 = vector.load %arg15[%c0_90, %c8] : memref<6x859xf32, #tpu.memory_space<vmem>>, vector<6x595xf32>
    %c24_91 = arith.constant 24 : index
    %c0_92 = arith.constant 0 : index
    %76 = vector.load %arg16[%c24_91, %c0_92] : memref<150x595xf32, #tpu.memory_space<vmem>>, vector<6x595xf32>
    tpu.vector_store %arg16[%c24_91, %c0_92], %75 {strides = array<i32>} : memref<150x595xf32, #tpu.memory_space<vmem>>, vector<6x595xf32>,
    %c0_93 = arith.constant 0 : index
    %c64_94 = arith.constant 64 : index
    %77 = vector.load %arg15[%c0_93, %c64_94] : memref<6x859xf32, #tpu.memory_space<vmem>>, vector<6x595xf32>
    %c30_95 = arith.constant 30 : index
    %c0_96 = arith.constant 0 : index
    %78 = vector.load %arg16[%c30_95, %c0_96] : memref<150x595xf32, #tpu.memory_space<vmem>>, vector<6x595xf32>
    tpu.vector_store %arg16[%c30_95, %c0_96], %77 {strides = array<i32>} : memref<150x595xf32, #tpu.memory_space<vmem>>, vector<6x595xf32>,
    %c0_97 = arith.constant 0 : index
    %c66_98 = arith.constant 66 : index
    %79 = vector.load %arg15[%c0_97, %c66_98] : memref<6x859xf32, #tpu.memory_space<vmem>>, vector<6x595xf32>
    %c36_99 = arith.constant 36 : index
    %c0_100 = arith.constant 0 : index
    %80 = vector.load %arg16[%c36_99, %c0_100] : memref<150x595xf32, #tpu.memory_space<vmem>>, vector<6x595xf32>
    tpu.vector_store %arg16[%c36_99, %c0_100], %79 {strides = array<i32>} : memref<150x595xf32, #tpu.memory_space<vmem>>, vector<6x595xf32>,
    %c0_101 = arith.constant 0 : index
    %c68_102 = arith.constant 68 : index
    %81 = vector.load %arg15[%c0_101, %c68_102] : memref<6x859xf32, #tpu.memory_space<vmem>>, vector<6x595xf32>
    %c42_103 = arith.constant 42 : index
    %c0_104 = arith.constant 0 : index
    %82 = vector.load %arg16[%c42_103, %c0_104] : memref<150x595xf32, #tpu.memory_space<vmem>>, vector<6x595xf32>
    tpu.vector_store %arg16[%c42_103, %c0_104], %81 {strides = array<i32>} : memref<150x595xf32, #tpu.memory_space<vmem>>, vector<6x595xf32>,
    %c0_105 = arith.constant 0 : index
    %c70 = arith.constant 70 : index
    %83 = vector.load %arg15[%c0_105, %c70] : memref<6x859xf32, #tpu.memory_space<vmem>>, vector<6x595xf32>
    %c48_106 = arith.constant 48 : index
    %c0_107 = arith.constant 0 : index
    %84 = vector.load %arg16[%c48_106, %c0_107] : memref<150x595xf32, #tpu.memory_space<vmem>>, vector<6x595xf32>
    tpu.vector_store %arg16[%c48_106, %c0_107], %83 {strides = array<i32>} : memref<150x595xf32, #tpu.memory_space<vmem>>, vector<6x595xf32>,
    %c0_108 = arith.constant 0 : index
    %c72_109 = arith.constant 72 : index
    %85 = vector.load %arg15[%c0_108, %c72_109] : memref<6x859xf32, #tpu.memory_space<vmem>>, vector<6x595xf32>
    %c54_110 = arith.constant 54 : index
    %c0_111 = arith.constant 0 : index
    %86 = vector.load %arg16[%c54_110, %c0_111] : memref<150x595xf32, #tpu.memory_space<vmem>>, vector<6x595xf32>
    tpu.vector_store %arg16[%c54_110, %c0_111], %85 {strides = array<i32>} : memref<150x595xf32, #tpu.memory_space<vmem>>, vector<6x595xf32>,
    %c0_112 = arith.constant 0 : index
    %c128_113 = arith.constant 128 : index
    %87 = vector.load %arg15[%c0_112, %c128_113] : memref<6x859xf32, #tpu.memory_space<vmem>>, vector<6x595xf32>
    %c60_114 = arith.constant 60 : index
    %c0_115 = arith.constant 0 : index
    %88 = vector.load %arg16[%c60_114, %c0_115] : memref<150x595xf32, #tpu.memory_space<vmem>>, vector<6x595xf32>
    tpu.vector_store %arg16[%c60_114, %c0_115], %87 {strides = array<i32>} : memref<150x595xf32, #tpu.memory_space<vmem>>, vector<6x595xf32>,
    %c0_116 = arith.constant 0 : index
    %c130_117 = arith.constant 130 : index
    %89 = vector.load %arg15[%c0_116, %c130_117] : memref<6x859xf32, #tpu.memory_space<vmem>>, vector<6x595xf32>
    %c66_118 = arith.constant 66 : index
    %c0_119 = arith.constant 0 : index
    %90 = vector.load %arg16[%c66_118, %c0_119] : memref<150x595xf32, #tpu.memory_space<vmem>>, vector<6x595xf32>
    tpu.vector_store %arg16[%c66_118, %c0_119], %89 {strides = array<i32>} : memref<150x595xf32, #tpu.memory_space<vmem>>, vector<6x595xf32>,
    %c0_120 = arith.constant 0 : index
    %c132_121 = arith.constant 132 : index
    %91 = vector.load %arg15[%c0_120, %c132_121] : memref<6x859xf32, #tpu.memory_space<vmem>>, vector<6x595xf32>
    %c72_122 = arith.constant 72 : index
    %c0_123 = arith.constant 0 : index
    %92 = vector.load %arg16[%c72_122, %c0_123] : memref<150x595xf32, #tpu.memory_space<vmem>>, vector<6x595xf32>
    tpu.vector_store %arg16[%c72_122, %c0_123], %91 {strides = array<i32>} : memref<150x595xf32, #tpu.memory_space<vmem>>, vector<6x595xf32>,
    %c0_124 = arith.constant 0 : index
    %c134 = arith.constant 134 : index
    %93 = vector.load %arg15[%c0_124, %c134] : memref<6x859xf32, #tpu.memory_space<vmem>>, vector<6x595xf32>
    %c78 = arith.constant 78 : index
    %c0_125 = arith.constant 0 : index
    %94 = vector.load %arg16[%c78, %c0_125] : memref<150x595xf32, #tpu.memory_space<vmem>>, vector<6x595xf32>
    tpu.vector_store %arg16[%c78, %c0_125], %93 {strides = array<i32>} : memref<150x595xf32, #tpu.memory_space<vmem>>, vector<6x595xf32>,
    %c0_126 = arith.constant 0 : index
    %c136 = arith.constant 136 : index
    %95 = vector.load %arg15[%c0_126, %c136] : memref<6x859xf32, #tpu.memory_space<vmem>>, vector<6x595xf32>
    %c84 = arith.constant 84 : index
    %c0_127 = arith.constant 0 : index
    %96 = vector.load %arg16[%c84, %c0_127] : memref<150x595xf32, #tpu.memory_space<vmem>>, vector<6x595xf32>
    tpu.vector_store %arg16[%c84, %c0_127], %95 {strides = array<i32>} : memref<150x595xf32, #tpu.memory_space<vmem>>, vector<6x595xf32>,
    %c0_128 = arith.constant 0 : index
    %c192 = arith.constant 192 : index
    %97 = vector.load %arg15[%c0_128, %c192] : memref<6x859xf32, #tpu.memory_space<vmem>>, vector<6x595xf32>
    %c90 = arith.constant 90 : index
    %c0_129 = arith.constant 0 : index
    %98 = vector.load %arg16[%c90, %c0_129] : memref<150x595xf32, #tpu.memory_space<vmem>>, vector<6x595xf32>
    tpu.vector_store %arg16[%c90, %c0_129], %97 {strides = array<i32>} : memref<150x595xf32, #tpu.memory_space<vmem>>, vector<6x595xf32>,
    %c0_130 = arith.constant 0 : index
    %c194 = arith.constant 194 : index
    %99 = vector.load %arg15[%c0_130, %c194] : memref<6x859xf32, #tpu.memory_space<vmem>>, vector<6x595xf32>
    %c96_131 = arith.constant 96 : index
    %c0_132 = arith.constant 0 : index
    %100 = vector.load %arg16[%c96_131, %c0_132] : memref<150x595xf32, #tpu.memory_space<vmem>>, vector<6x595xf32>
    tpu.vector_store %arg16[%c96_131, %c0_132], %99 {strides = array<i32>} : memref<150x595xf32, #tpu.memory_space<vmem>>, vector<6x595xf32>,
    %c0_133 = arith.constant 0 : index
    %c196 = arith.constant 196 : index
    %101 = vector.load %arg15[%c0_133, %c196] : memref<6x859xf32, #tpu.memory_space<vmem>>, vector<6x595xf32>
    %c102 = arith.constant 102 : index
    %c0_134 = arith.constant 0 : index
    %102 = vector.load %arg16[%c102, %c0_134] : memref<150x595xf32, #tpu.memory_space<vmem>>, vector<6x595xf32>
    tpu.vector_store %arg16[%c102, %c0_134], %101 {strides = array<i32>} : memref<150x595xf32, #tpu.memory_space<vmem>>, vector<6x595xf32>,
    %c0_135 = arith.constant 0 : index
    %c198 = arith.constant 198 : index
    %103 = vector.load %arg15[%c0_135, %c198] : memref<6x859xf32, #tpu.memory_space<vmem>>, vector<6x595xf32>
    %c108 = arith.constant 108 : index
    %c0_136 = arith.constant 0 : index
    %104 = vector.load %arg16[%c108, %c0_136] : memref<150x595xf32, #tpu.memory_space<vmem>>, vector<6x595xf32>
    tpu.vector_store %arg16[%c108, %c0_136], %103 {strides = array<i32>} : memref<150x595xf32, #tpu.memory_space<vmem>>, vector<6x595xf32>,
    %c0_137 = arith.constant 0 : index
    %c200 = arith.constant 200 : index
    %105 = vector.load %arg15[%c0_137, %c200] : memref<6x859xf32, #tpu.memory_space<vmem>>, vector<6x595xf32>
    %c114 = arith.constant 114 : index
    %c0_138 = arith.constant 0 : index
    %106 = vector.load %arg16[%c114, %c0_138] : memref<150x595xf32, #tpu.memory_space<vmem>>, vector<6x595xf32>
    tpu.vector_store %arg16[%c114, %c0_138], %105 {strides = array<i32>} : memref<150x595xf32, #tpu.memory_space<vmem>>, vector<6x595xf32>,
    %c0_139 = arith.constant 0 : index
    %c256 = arith.constant 256 : index
    %107 = vector.load %arg15[%c0_139, %c256] : memref<6x859xf32, #tpu.memory_space<vmem>>, vector<6x595xf32>
    %c120 = arith.constant 120 : index
    %c0_140 = arith.constant 0 : index
    %108 = vector.load %arg16[%c120, %c0_140] : memref<150x595xf32, #tpu.memory_space<vmem>>, vector<6x595xf32>
    tpu.vector_store %arg16[%c120, %c0_140], %107 {strides = array<i32>} : memref<150x595xf32, #tpu.memory_space<vmem>>, vector<6x595xf32>,
    %c0_141 = arith.constant 0 : index
    %c258 = arith.constant 258 : index
    %109 = vector.load %arg15[%c0_141, %c258] : memref<6x859xf32, #tpu.memory_space<vmem>>, vector<6x595xf32>
    %c126 = arith.constant 126 : index
    %c0_142 = arith.constant 0 : index
    %110 = vector.load %arg16[%c126, %c0_142] : memref<150x595xf32, #tpu.memory_space<vmem>>, vector<6x595xf32>
    tpu.vector_store %arg16[%c126, %c0_142], %109 {strides = array<i32>} : memref<150x595xf32, #tpu.memory_space<vmem>>, vector<6x595xf32>,
    %c0_143 = arith.constant 0 : index
    %c260 = arith.constant 260 : index
    %111 = vector.load %arg15[%c0_143, %c260] : memref<6x859xf32, #tpu.memory_space<vmem>>, vector<6x595xf32>
    %c132_144 = arith.constant 132 : index
    %c0_145 = arith.constant 0 : index
    %112 = vector.load %arg16[%c132_144, %c0_145] : memref<150x595xf32, #tpu.memory_space<vmem>>, vector<6x595xf32>
    tpu.vector_store %arg16[%c132_144, %c0_145], %111 {strides = array<i32>} : memref<150x595xf32, #tpu.memory_space<vmem>>, vector<6x595xf32>,
    %c0_146 = arith.constant 0 : index
    %c262 = arith.constant 262 : index
    %113 = vector.load %arg15[%c0_146, %c262] : memref<6x859xf32, #tpu.memory_space<vmem>>, vector<6x595xf32>
    %c138 = arith.constant 138 : index
    %c0_147 = arith.constant 0 : index
    %114 = vector.load %arg16[%c138, %c0_147] : memref<150x595xf32, #tpu.memory_space<vmem>>, vector<6x595xf32>
    tpu.vector_store %arg16[%c138, %c0_147], %113 {strides = array<i32>} : memref<150x595xf32, #tpu.memory_space<vmem>>, vector<6x595xf32>,
    %c0_148 = arith.constant 0 : index
    %c264 = arith.constant 264 : index
    %115 = vector.load %arg15[%c0_148, %c264] : memref<6x859xf32, #tpu.memory_space<vmem>>, vector<6x595xf32>
    %c144 = arith.constant 144 : index
    %c0_149 = arith.constant 0 : index
    %116 = vector.load %arg16[%c144, %c0_149] : memref<150x595xf32, #tpu.memory_space<vmem>>, vector<6x595xf32>
    tpu.vector_store %arg16[%c144, %c0_149], %115 {strides = array<i32>} : memref<150x595xf32, #tpu.memory_space<vmem>>, vector<6x595xf32>,
    %c0_150 = arith.constant 0 : index
    %c0_151 = arith.constant 0 : index
    %117 = vector.load %arg4[%c0_150, %c0_151] : memref<16x150xf32, #tpu.memory_space<vmem>>, vector<16x150xf32>
    %c0_152 = arith.constant 0 : index
    %c0_153 = arith.constant 0 : index
    %118 = vector.load %arg16[%c0_152, %c0_153] : memref<150x595xf32, #tpu.memory_space<vmem>>, vector<150x595xf32>
    %cst_154 = arith.constant dense<0.000000e+00> : vector<16x595xf32>
    %119 = tpu.matmul %117, %118, %cst_154 {dimension_numbers = #tpu.dot_dimension_numbers<[1], [0], [0], [1], [0, 0, 1, 1], [], []>} : vector<16x150xf32>, vector<150x595xf32>, vector<16x595xf32> -> vector<16x595xf32>
    %c0_155 = arith.constant 0 : index
    %c0_156 = arith.constant 0 : index
    %120 = vector.load %arg5[%c0_155, %c0_156] : memref<16x1xf32, #tpu.memory_space<vmem>>, vector<16x1xf32>
    %121 = vector.broadcast %120 : vector<16x1xf32> to vector<16x595xf32>
    %122 = arith.addf %119, %121 : vector<16x595xf32>
    %cst_157 = arith.constant 0.000000e+00 : f32
    %123 = vector.broadcast %cst_157 : f32 to vector<16x595xf32>
    %124 = arith.maximumf %122, %123 : vector<16x595xf32>
    %c0_158 = arith.constant 0 : index
    %c0_159 = arith.constant 0 : index
    %125 = vector.load %arg17[%c0_158, %c0_159] : memref<16x595xf32, #tpu.memory_space<vmem>>, vector<16x595xf32>
    tpu.vector_store %arg17[%c0_158, %c0_159], %124 {strides = array<i32>} : memref<16x595xf32, #tpu.memory_space<vmem>>, vector<16x595xf32>,
    %c0_160 = arith.constant 0 : index
    %c0_161 = arith.constant 0 : index
    %126 = vector.load %arg17[%c0_160, %c0_161] : memref<16x595xf32, #tpu.memory_space<vmem>>, vector<16x529xf32>
    %c0_162 = arith.constant 0 : index
    %c2_163 = arith.constant 2 : index
    %127 = vector.load %arg17[%c0_162, %c2_163] : memref<16x595xf32, #tpu.memory_space<vmem>>, vector<16x529xf32>
    %128 = arith.maximumf %126, %127 : vector<16x529xf32>
    %c0_164 = arith.constant 0 : index
    %c64_165 = arith.constant 64 : index
    %129 = vector.load %arg17[%c0_164, %c64_165] : memref<16x595xf32, #tpu.memory_space<vmem>>, vector<16x529xf32>
    %c0_166 = arith.constant 0 : index
    %c66_167 = arith.constant 66 : index
    %130 = vector.load %arg17[%c0_166, %c66_167] : memref<16x595xf32, #tpu.memory_space<vmem>>, vector<16x529xf32>
    %131 = arith.maximumf %129, %130 : vector<16x529xf32>
    %132 = arith.maximumf %128, %131 : vector<16x529xf32>
    %c0_168 = arith.constant 0 : index
    %c0_169 = arith.constant 0 : index
    %133 = vector.load %arg18[%c0_168, %c0_169] : memref<16x529xf32, #tpu.memory_space<vmem>>, vector<16x529xf32>
    tpu.vector_store %arg18[%c0_168, %c0_169], %132 {strides = array<i32>} : memref<16x529xf32, #tpu.memory_space<vmem>>, vector<16x529xf32>,
    %c0_170 = arith.constant 0 : index
    %c0_171 = arith.constant 0 : index
    %134 = vector.load %arg7[%c0_170, %c0_171] : memref<120x1xf32, #tpu.memory_space<vmem>>, vector<120x1xf32>
    %c0_172 = arith.constant 0 : index
    %c0_173 = arith.constant 0 : index
    %c0_174 = arith.constant 0 : index
    %135 = vector.load %arg6[%c0_172, %c0_173, %c0_174] : memref<25x120x16xf32, #tpu.memory_space<vmem>>, vector<1x120x16xf32>
    %136 = vector.shape_cast %135 : vector<1x120x16xf32> to vector<120x16xf32>
    %c0_175 = arith.constant 0 : index
    %c0_176 = arith.constant 0 : index
    %137 = vector.load %arg18[%c0_175, %c0_176] : memref<16x529xf32, #tpu.memory_space<vmem>>, vector<16x1xf32>
    %cst_177 = arith.constant dense<0.000000e+00> : vector<120x1xf32>
    %138 = tpu.matmul %136, %137, %cst_177 {dimension_numbers = #tpu.dot_dimension_numbers<[1], [0], [0], [1], [0, 0, 1, 1], [], []>} : vector<120x16xf32>, vector<16x1xf32>, vector<120x1xf32> -> vector<120x1xf32>
    %139 = arith.addf %134, %138 : vector<120x1xf32>
    %c1_178 = arith.constant 1 : index
    %c0_179 = arith.constant 0 : index
    %c0_180 = arith.constant 0 : index
    %140 = vector.load %arg6[%c1_178, %c0_179, %c0_180] : memref<25x120x16xf32, #tpu.memory_space<vmem>>, vector<1x120x16xf32>
    %141 = vector.shape_cast %140 : vector<1x120x16xf32> to vector<120x16xf32>
    %c0_181 = arith.constant 0 : index
    %c4_182 = arith.constant 4 : index
    %142 = vector.load %arg18[%c0_181, %c4_182] : memref<16x529xf32, #tpu.memory_space<vmem>>, vector<16x1xf32>
    %cst_183 = arith.constant dense<0.000000e+00> : vector<120x1xf32>
    %143 = tpu.matmul %141, %142, %cst_183 {dimension_numbers = #tpu.dot_dimension_numbers<[1], [0], [0], [1], [0, 0, 1, 1], [], []>} : vector<120x16xf32>, vector<16x1xf32>, vector<120x1xf32> -> vector<120x1xf32>
    %144 = arith.addf %139, %143 : vector<120x1xf32>
    %c2_184 = arith.constant 2 : index
    %c0_185 = arith.constant 0 : index
    %c0_186 = arith.constant 0 : index
    %145 = vector.load %arg6[%c2_184, %c0_185, %c0_186] : memref<25x120x16xf32, #tpu.memory_space<vmem>>, vector<1x120x16xf32>
    %146 = vector.shape_cast %145 : vector<1x120x16xf32> to vector<120x16xf32>
    %c0_187 = arith.constant 0 : index
    %c8_188 = arith.constant 8 : index
    %147 = vector.load %arg18[%c0_187, %c8_188] : memref<16x529xf32, #tpu.memory_space<vmem>>, vector<16x1xf32>
    %cst_189 = arith.constant dense<0.000000e+00> : vector<120x1xf32>
    %148 = tpu.matmul %146, %147, %cst_189 {dimension_numbers = #tpu.dot_dimension_numbers<[1], [0], [0], [1], [0, 0, 1, 1], [], []>} : vector<120x16xf32>, vector<16x1xf32>, vector<120x1xf32> -> vector<120x1xf32>
    %149 = arith.addf %144, %148 : vector<120x1xf32>
    %c3_190 = arith.constant 3 : index
    %c0_191 = arith.constant 0 : index
    %c0_192 = arith.constant 0 : index
    %150 = vector.load %arg6[%c3_190, %c0_191, %c0_192] : memref<25x120x16xf32, #tpu.memory_space<vmem>>, vector<1x120x16xf32>
    %151 = vector.shape_cast %150 : vector<1x120x16xf32> to vector<120x16xf32>
    %c0_193 = arith.constant 0 : index
    %c12_194 = arith.constant 12 : index
    %152 = vector.load %arg18[%c0_193, %c12_194] : memref<16x529xf32, #tpu.memory_space<vmem>>, vector<16x1xf32>
    %cst_195 = arith.constant dense<0.000000e+00> : vector<120x1xf32>
    %153 = tpu.matmul %151, %152, %cst_195 {dimension_numbers = #tpu.dot_dimension_numbers<[1], [0], [0], [1], [0, 0, 1, 1], [], []>} : vector<120x16xf32>, vector<16x1xf32>, vector<120x1xf32> -> vector<120x1xf32>
    %154 = arith.addf %149, %153 : vector<120x1xf32>
    %c4_196 = arith.constant 4 : index
    %c0_197 = arith.constant 0 : index
    %c0_198 = arith.constant 0 : index
    %155 = vector.load %arg6[%c4_196, %c0_197, %c0_198] : memref<25x120x16xf32, #tpu.memory_space<vmem>>, vector<1x120x16xf32>
    %156 = vector.shape_cast %155 : vector<1x120x16xf32> to vector<120x16xf32>
    %c0_199 = arith.constant 0 : index
    %c16 = arith.constant 16 : index
    %157 = vector.load %arg18[%c0_199, %c16] : memref<16x529xf32, #tpu.memory_space<vmem>>, vector<16x1xf32>
    %cst_200 = arith.constant dense<0.000000e+00> : vector<120x1xf32>
    %158 = tpu.matmul %156, %157, %cst_200 {dimension_numbers = #tpu.dot_dimension_numbers<[1], [0], [0], [1], [0, 0, 1, 1], [], []>} : vector<120x16xf32>, vector<16x1xf32>, vector<120x1xf32> -> vector<120x1xf32>
    %159 = arith.addf %154, %158 : vector<120x1xf32>
    %c5 = arith.constant 5 : index
    %c0_201 = arith.constant 0 : index
    %c0_202 = arith.constant 0 : index
    %160 = vector.load %arg6[%c5, %c0_201, %c0_202] : memref<25x120x16xf32, #tpu.memory_space<vmem>>, vector<1x120x16xf32>
    %161 = vector.shape_cast %160 : vector<1x120x16xf32> to vector<120x16xf32>
    %c0_203 = arith.constant 0 : index
    %c128_204 = arith.constant 128 : index
    %162 = vector.load %arg18[%c0_203, %c128_204] : memref<16x529xf32, #tpu.memory_space<vmem>>, vector<16x1xf32>
    %cst_205 = arith.constant dense<0.000000e+00> : vector<120x1xf32>
    %163 = tpu.matmul %161, %162, %cst_205 {dimension_numbers = #tpu.dot_dimension_numbers<[1], [0], [0], [1], [0, 0, 1, 1], [], []>} : vector<120x16xf32>, vector<16x1xf32>, vector<120x1xf32> -> vector<120x1xf32>
    %164 = arith.addf %159, %163 : vector<120x1xf32>
    %c6_206 = arith.constant 6 : index
    %c0_207 = arith.constant 0 : index
    %c0_208 = arith.constant 0 : index
    %165 = vector.load %arg6[%c6_206, %c0_207, %c0_208] : memref<25x120x16xf32, #tpu.memory_space<vmem>>, vector<1x120x16xf32>
    %166 = vector.shape_cast %165 : vector<1x120x16xf32> to vector<120x16xf32>
    %c0_209 = arith.constant 0 : index
    %c132_210 = arith.constant 132 : index
    %167 = vector.load %arg18[%c0_209, %c132_210] : memref<16x529xf32, #tpu.memory_space<vmem>>, vector<16x1xf32>
    %cst_211 = arith.constant dense<0.000000e+00> : vector<120x1xf32>
    %168 = tpu.matmul %166, %167, %cst_211 {dimension_numbers = #tpu.dot_dimension_numbers<[1], [0], [0], [1], [0, 0, 1, 1], [], []>} : vector<120x16xf32>, vector<16x1xf32>, vector<120x1xf32> -> vector<120x1xf32>
    %169 = arith.addf %164, %168 : vector<120x1xf32>
    %c7 = arith.constant 7 : index
    %c0_212 = arith.constant 0 : index
    %c0_213 = arith.constant 0 : index
    %170 = vector.load %arg6[%c7, %c0_212, %c0_213] : memref<25x120x16xf32, #tpu.memory_space<vmem>>, vector<1x120x16xf32>
    %171 = vector.shape_cast %170 : vector<1x120x16xf32> to vector<120x16xf32>
    %c0_214 = arith.constant 0 : index
    %c136_215 = arith.constant 136 : index
    %172 = vector.load %arg18[%c0_214, %c136_215] : memref<16x529xf32, #tpu.memory_space<vmem>>, vector<16x1xf32>
    %cst_216 = arith.constant dense<0.000000e+00> : vector<120x1xf32>
    %173 = tpu.matmul %171, %172, %cst_216 {dimension_numbers = #tpu.dot_dimension_numbers<[1], [0], [0], [1], [0, 0, 1, 1], [], []>} : vector<120x16xf32>, vector<16x1xf32>, vector<120x1xf32> -> vector<120x1xf32>
    %174 = arith.addf %169, %173 : vector<120x1xf32>
    %c8_217 = arith.constant 8 : index
    %c0_218 = arith.constant 0 : index
    %c0_219 = arith.constant 0 : index
    %175 = vector.load %arg6[%c8_217, %c0_218, %c0_219] : memref<25x120x16xf32, #tpu.memory_space<vmem>>, vector<1x120x16xf32>
    %176 = vector.shape_cast %175 : vector<1x120x16xf32> to vector<120x16xf32>
    %c0_220 = arith.constant 0 : index
    %c140 = arith.constant 140 : index
    %177 = vector.load %arg18[%c0_220, %c140] : memref<16x529xf32, #tpu.memory_space<vmem>>, vector<16x1xf32>
    %cst_221 = arith.constant dense<0.000000e+00> : vector<120x1xf32>
    %178 = tpu.matmul %176, %177, %cst_221 {dimension_numbers = #tpu.dot_dimension_numbers<[1], [0], [0], [1], [0, 0, 1, 1], [], []>} : vector<120x16xf32>, vector<16x1xf32>, vector<120x1xf32> -> vector<120x1xf32>
    %179 = arith.addf %174, %178 : vector<120x1xf32>
    %c9_222 = arith.constant 9 : index
    %c0_223 = arith.constant 0 : index
    %c0_224 = arith.constant 0 : index
    %180 = vector.load %arg6[%c9_222, %c0_223, %c0_224] : memref<25x120x16xf32, #tpu.memory_space<vmem>>, vector<1x120x16xf32>
    %181 = vector.shape_cast %180 : vector<1x120x16xf32> to vector<120x16xf32>
    %c0_225 = arith.constant 0 : index
    %c144_226 = arith.constant 144 : index
    %182 = vector.load %arg18[%c0_225, %c144_226] : memref<16x529xf32, #tpu.memory_space<vmem>>, vector<16x1xf32>
    %cst_227 = arith.constant dense<0.000000e+00> : vector<120x1xf32>
    %183 = tpu.matmul %181, %182, %cst_227 {dimension_numbers = #tpu.dot_dimension_numbers<[1], [0], [0], [1], [0, 0, 1, 1], [], []>} : vector<120x16xf32>, vector<16x1xf32>, vector<120x1xf32> -> vector<120x1xf32>
    %184 = arith.addf %179, %183 : vector<120x1xf32>
    %c10 = arith.constant 10 : index
    %c0_228 = arith.constant 0 : index
    %c0_229 = arith.constant 0 : index
    %185 = vector.load %arg6[%c10, %c0_228, %c0_229] : memref<25x120x16xf32, #tpu.memory_space<vmem>>, vector<1x120x16xf32>
    %186 = vector.shape_cast %185 : vector<1x120x16xf32> to vector<120x16xf32>
    %c0_230 = arith.constant 0 : index
    %c256_231 = arith.constant 256 : index
    %187 = vector.load %arg18[%c0_230, %c256_231] : memref<16x529xf32, #tpu.memory_space<vmem>>, vector<16x1xf32>
    %cst_232 = arith.constant dense<0.000000e+00> : vector<120x1xf32>
    %188 = tpu.matmul %186, %187, %cst_232 {dimension_numbers = #tpu.dot_dimension_numbers<[1], [0], [0], [1], [0, 0, 1, 1], [], []>} : vector<120x16xf32>, vector<16x1xf32>, vector<120x1xf32> -> vector<120x1xf32>
    %189 = arith.addf %184, %188 : vector<120x1xf32>
    %c11 = arith.constant 11 : index
    %c0_233 = arith.constant 0 : index
    %c0_234 = arith.constant 0 : index
    %190 = vector.load %arg6[%c11, %c0_233, %c0_234] : memref<25x120x16xf32, #tpu.memory_space<vmem>>, vector<1x120x16xf32>
    %191 = vector.shape_cast %190 : vector<1x120x16xf32> to vector<120x16xf32>
    %c0_235 = arith.constant 0 : index
    %c260_236 = arith.constant 260 : index
    %192 = vector.load %arg18[%c0_235, %c260_236] : memref<16x529xf32, #tpu.memory_space<vmem>>, vector<16x1xf32>
    %cst_237 = arith.constant dense<0.000000e+00> : vector<120x1xf32>
    %193 = tpu.matmul %191, %192, %cst_237 {dimension_numbers = #tpu.dot_dimension_numbers<[1], [0], [0], [1], [0, 0, 1, 1], [], []>} : vector<120x16xf32>, vector<16x1xf32>, vector<120x1xf32> -> vector<120x1xf32>
    %194 = arith.addf %189, %193 : vector<120x1xf32>
    %c12_238 = arith.constant 12 : index
    %c0_239 = arith.constant 0 : index
    %c0_240 = arith.constant 0 : index
    %195 = vector.load %arg6[%c12_238, %c0_239, %c0_240] : memref<25x120x16xf32, #tpu.memory_space<vmem>>, vector<1x120x16xf32>
    %196 = vector.shape_cast %195 : vector<1x120x16xf32> to vector<120x16xf32>
    %c0_241 = arith.constant 0 : index
    %c264_242 = arith.constant 264 : index
    %197 = vector.load %arg18[%c0_241, %c264_242] : memref<16x529xf32, #tpu.memory_space<vmem>>, vector<16x1xf32>
    %cst_243 = arith.constant dense<0.000000e+00> : vector<120x1xf32>
    %198 = tpu.matmul %196, %197, %cst_243 {dimension_numbers = #tpu.dot_dimension_numbers<[1], [0], [0], [1], [0, 0, 1, 1], [], []>} : vector<120x16xf32>, vector<16x1xf32>, vector<120x1xf32> -> vector<120x1xf32>
    %199 = arith.addf %194, %198 : vector<120x1xf32>
    %c13 = arith.constant 13 : index
    %c0_244 = arith.constant 0 : index
    %c0_245 = arith.constant 0 : index
    %200 = vector.load %arg6[%c13, %c0_244, %c0_245] : memref<25x120x16xf32, #tpu.memory_space<vmem>>, vector<1x120x16xf32>
    %201 = vector.shape_cast %200 : vector<1x120x16xf32> to vector<120x16xf32>
    %c0_246 = arith.constant 0 : index
    %c268 = arith.constant 268 : index
    %202 = vector.load %arg18[%c0_246, %c268] : memref<16x529xf32, #tpu.memory_space<vmem>>, vector<16x1xf32>
    %cst_247 = arith.constant dense<0.000000e+00> : vector<120x1xf32>
    %203 = tpu.matmul %201, %202, %cst_247 {dimension_numbers = #tpu.dot_dimension_numbers<[1], [0], [0], [1], [0, 0, 1, 1], [], []>} : vector<120x16xf32>, vector<16x1xf32>, vector<120x1xf32> -> vector<120x1xf32>
    %204 = arith.addf %199, %203 : vector<120x1xf32>
    %c14 = arith.constant 14 : index
    %c0_248 = arith.constant 0 : index
    %c0_249 = arith.constant 0 : index
    %205 = vector.load %arg6[%c14, %c0_248, %c0_249] : memref<25x120x16xf32, #tpu.memory_space<vmem>>, vector<1x120x16xf32>
    %206 = vector.shape_cast %205 : vector<1x120x16xf32> to vector<120x16xf32>
    %c0_250 = arith.constant 0 : index
    %c272 = arith.constant 272 : index
    %207 = vector.load %arg18[%c0_250, %c272] : memref<16x529xf32, #tpu.memory_space<vmem>>, vector<16x1xf32>
    %cst_251 = arith.constant dense<0.000000e+00> : vector<120x1xf32>
    %208 = tpu.matmul %206, %207, %cst_251 {dimension_numbers = #tpu.dot_dimension_numbers<[1], [0], [0], [1], [0, 0, 1, 1], [], []>} : vector<120x16xf32>, vector<16x1xf32>, vector<120x1xf32> -> vector<120x1xf32>
    %209 = arith.addf %204, %208 : vector<120x1xf32>
    %c15_252 = arith.constant 15 : index
    %c0_253 = arith.constant 0 : index
    %c0_254 = arith.constant 0 : index
    %210 = vector.load %arg6[%c15_252, %c0_253, %c0_254] : memref<25x120x16xf32, #tpu.memory_space<vmem>>, vector<1x120x16xf32>
    %211 = vector.shape_cast %210 : vector<1x120x16xf32> to vector<120x16xf32>
    %c0_255 = arith.constant 0 : index
    %c384 = arith.constant 384 : index
    %212 = vector.load %arg18[%c0_255, %c384] : memref<16x529xf32, #tpu.memory_space<vmem>>, vector<16x1xf32>
    %cst_256 = arith.constant dense<0.000000e+00> : vector<120x1xf32>
    %213 = tpu.matmul %211, %212, %cst_256 {dimension_numbers = #tpu.dot_dimension_numbers<[1], [0], [0], [1], [0, 0, 1, 1], [], []>} : vector<120x16xf32>, vector<16x1xf32>, vector<120x1xf32> -> vector<120x1xf32>
    %214 = arith.addf %209, %213 : vector<120x1xf32>
    %c16_257 = arith.constant 16 : index
    %c0_258 = arith.constant 0 : index
    %c0_259 = arith.constant 0 : index
    %215 = vector.load %arg6[%c16_257, %c0_258, %c0_259] : memref<25x120x16xf32, #tpu.memory_space<vmem>>, vector<1x120x16xf32>
    %216 = vector.shape_cast %215 : vector<1x120x16xf32> to vector<120x16xf32>
    %c0_260 = arith.constant 0 : index
    %c388 = arith.constant 388 : index
    %217 = vector.load %arg18[%c0_260, %c388] : memref<16x529xf32, #tpu.memory_space<vmem>>, vector<16x1xf32>
    %cst_261 = arith.constant dense<0.000000e+00> : vector<120x1xf32>
    %218 = tpu.matmul %216, %217, %cst_261 {dimension_numbers = #tpu.dot_dimension_numbers<[1], [0], [0], [1], [0, 0, 1, 1], [], []>} : vector<120x16xf32>, vector<16x1xf32>, vector<120x1xf32> -> vector<120x1xf32>
    %219 = arith.addf %214, %218 : vector<120x1xf32>
    %c17 = arith.constant 17 : index
    %c0_262 = arith.constant 0 : index
    %c0_263 = arith.constant 0 : index
    %220 = vector.load %arg6[%c17, %c0_262, %c0_263] : memref<25x120x16xf32, #tpu.memory_space<vmem>>, vector<1x120x16xf32>
    %221 = vector.shape_cast %220 : vector<1x120x16xf32> to vector<120x16xf32>
    %c0_264 = arith.constant 0 : index
    %c392 = arith.constant 392 : index
    %222 = vector.load %arg18[%c0_264, %c392] : memref<16x529xf32, #tpu.memory_space<vmem>>, vector<16x1xf32>
    %cst_265 = arith.constant dense<0.000000e+00> : vector<120x1xf32>
    %223 = tpu.matmul %221, %222, %cst_265 {dimension_numbers = #tpu.dot_dimension_numbers<[1], [0], [0], [1], [0, 0, 1, 1], [], []>} : vector<120x16xf32>, vector<16x1xf32>, vector<120x1xf32> -> vector<120x1xf32>
    %224 = arith.addf %219, %223 : vector<120x1xf32>
    %c18_266 = arith.constant 18 : index
    %c0_267 = arith.constant 0 : index
    %c0_268 = arith.constant 0 : index
    %225 = vector.load %arg6[%c18_266, %c0_267, %c0_268] : memref<25x120x16xf32, #tpu.memory_space<vmem>>, vector<1x120x16xf32>
    %226 = vector.shape_cast %225 : vector<1x120x16xf32> to vector<120x16xf32>
    %c0_269 = arith.constant 0 : index
    %c396 = arith.constant 396 : index
    %227 = vector.load %arg18[%c0_269, %c396] : memref<16x529xf32, #tpu.memory_space<vmem>>, vector<16x1xf32>
    %cst_270 = arith.constant dense<0.000000e+00> : vector<120x1xf32>
    %228 = tpu.matmul %226, %227, %cst_270 {dimension_numbers = #tpu.dot_dimension_numbers<[1], [0], [0], [1], [0, 0, 1, 1], [], []>} : vector<120x16xf32>, vector<16x1xf32>, vector<120x1xf32> -> vector<120x1xf32>
    %229 = arith.addf %224, %228 : vector<120x1xf32>
    %c19 = arith.constant 19 : index
    %c0_271 = arith.constant 0 : index
    %c0_272 = arith.constant 0 : index
    %230 = vector.load %arg6[%c19, %c0_271, %c0_272] : memref<25x120x16xf32, #tpu.memory_space<vmem>>, vector<1x120x16xf32>
    %231 = vector.shape_cast %230 : vector<1x120x16xf32> to vector<120x16xf32>
    %c0_273 = arith.constant 0 : index
    %c400 = arith.constant 400 : index
    %232 = vector.load %arg18[%c0_273, %c400] : memref<16x529xf32, #tpu.memory_space<vmem>>, vector<16x1xf32>
    %cst_274 = arith.constant dense<0.000000e+00> : vector<120x1xf32>
    %233 = tpu.matmul %231, %232, %cst_274 {dimension_numbers = #tpu.dot_dimension_numbers<[1], [0], [0], [1], [0, 0, 1, 1], [], []>} : vector<120x16xf32>, vector<16x1xf32>, vector<120x1xf32> -> vector<120x1xf32>
    %234 = arith.addf %229, %233 : vector<120x1xf32>
    %c20 = arith.constant 20 : index
    %c0_275 = arith.constant 0 : index
    %c0_276 = arith.constant 0 : index
    %235 = vector.load %arg6[%c20, %c0_275, %c0_276] : memref<25x120x16xf32, #tpu.memory_space<vmem>>, vector<1x120x16xf32>
    %236 = vector.shape_cast %235 : vector<1x120x16xf32> to vector<120x16xf32>
    %c0_277 = arith.constant 0 : index
    %c512 = arith.constant 512 : index
    %237 = vector.load %arg18[%c0_277, %c512] : memref<16x529xf32, #tpu.memory_space<vmem>>, vector<16x1xf32>
    %cst_278 = arith.constant dense<0.000000e+00> : vector<120x1xf32>
    %238 = tpu.matmul %236, %237, %cst_278 {dimension_numbers = #tpu.dot_dimension_numbers<[1], [0], [0], [1], [0, 0, 1, 1], [], []>} : vector<120x16xf32>, vector<16x1xf32>, vector<120x1xf32> -> vector<120x1xf32>
    %239 = arith.addf %234, %238 : vector<120x1xf32>
    %c21_279 = arith.constant 21 : index
    %c0_280 = arith.constant 0 : index
    %c0_281 = arith.constant 0 : index
    %240 = vector.load %arg6[%c21_279, %c0_280, %c0_281] : memref<25x120x16xf32, #tpu.memory_space<vmem>>, vector<1x120x16xf32>
    %241 = vector.shape_cast %240 : vector<1x120x16xf32> to vector<120x16xf32>
    %c0_282 = arith.constant 0 : index
    %c516 = arith.constant 516 : index
    %242 = vector.load %arg18[%c0_282, %c516] : memref<16x529xf32, #tpu.memory_space<vmem>>, vector<16x1xf32>
    %cst_283 = arith.constant dense<0.000000e+00> : vector<120x1xf32>
    %243 = tpu.matmul %241, %242, %cst_283 {dimension_numbers = #tpu.dot_dimension_numbers<[1], [0], [0], [1], [0, 0, 1, 1], [], []>} : vector<120x16xf32>, vector<16x1xf32>, vector<120x1xf32> -> vector<120x1xf32>
    %244 = arith.addf %239, %243 : vector<120x1xf32>
    %c22 = arith.constant 22 : index
    %c0_284 = arith.constant 0 : index
    %c0_285 = arith.constant 0 : index
    %245 = vector.load %arg6[%c22, %c0_284, %c0_285] : memref<25x120x16xf32, #tpu.memory_space<vmem>>, vector<1x120x16xf32>
    %246 = vector.shape_cast %245 : vector<1x120x16xf32> to vector<120x16xf32>
    %c0_286 = arith.constant 0 : index
    %c520 = arith.constant 520 : index
    %247 = vector.load %arg18[%c0_286, %c520] : memref<16x529xf32, #tpu.memory_space<vmem>>, vector<16x1xf32>
    %cst_287 = arith.constant dense<0.000000e+00> : vector<120x1xf32>
    %248 = tpu.matmul %246, %247, %cst_287 {dimension_numbers = #tpu.dot_dimension_numbers<[1], [0], [0], [1], [0, 0, 1, 1], [], []>} : vector<120x16xf32>, vector<16x1xf32>, vector<120x1xf32> -> vector<120x1xf32>
    %249 = arith.addf %244, %248 : vector<120x1xf32>
    %c23 = arith.constant 23 : index
    %c0_288 = arith.constant 0 : index
    %c0_289 = arith.constant 0 : index
    %250 = vector.load %arg6[%c23, %c0_288, %c0_289] : memref<25x120x16xf32, #tpu.memory_space<vmem>>, vector<1x120x16xf32>
    %251 = vector.shape_cast %250 : vector<1x120x16xf32> to vector<120x16xf32>
    %c0_290 = arith.constant 0 : index
    %c524 = arith.constant 524 : index
    %252 = vector.load %arg18[%c0_290, %c524] : memref<16x529xf32, #tpu.memory_space<vmem>>, vector<16x1xf32>
    %cst_291 = arith.constant dense<0.000000e+00> : vector<120x1xf32>
    %253 = tpu.matmul %251, %252, %cst_291 {dimension_numbers = #tpu.dot_dimension_numbers<[1], [0], [0], [1], [0, 0, 1, 1], [], []>} : vector<120x16xf32>, vector<16x1xf32>, vector<120x1xf32> -> vector<120x1xf32>
    %254 = arith.addf %249, %253 : vector<120x1xf32>
    %c24_292 = arith.constant 24 : index
    %c0_293 = arith.constant 0 : index
    %c0_294 = arith.constant 0 : index
    %255 = vector.load %arg6[%c24_292, %c0_293, %c0_294] : memref<25x120x16xf32, #tpu.memory_space<vmem>>, vector<1x120x16xf32>
    %256 = vector.shape_cast %255 : vector<1x120x16xf32> to vector<120x16xf32>
    %c0_295 = arith.constant 0 : index
    %c528 = arith.constant 528 : index
    %257 = vector.load %arg18[%c0_295, %c528] : memref<16x529xf32, #tpu.memory_space<vmem>>, vector<16x1xf32>
    %cst_296 = arith.constant dense<0.000000e+00> : vector<120x1xf32>
    %258 = tpu.matmul %256, %257, %cst_296 {dimension_numbers = #tpu.dot_dimension_numbers<[1], [0], [0], [1], [0, 0, 1, 1], [], []>} : vector<120x16xf32>, vector<16x1xf32>, vector<120x1xf32> -> vector<120x1xf32>
    %259 = arith.addf %254, %258 : vector<120x1xf32>
    %cst_297 = arith.constant 0.000000e+00 : f32
    %260 = vector.broadcast %cst_297 : f32 to vector<120x1xf32>
    %261 = arith.maximumf %259, %260 : vector<120x1xf32>
    %c0_298 = arith.constant 0 : index
    %c0_299 = arith.constant 0 : index
    %262 = vector.load %arg8[%c0_298, %c0_299] : memref<84x120xf32, #tpu.memory_space<vmem>>, vector<84x120xf32>
    %cst_300 = arith.constant dense<0.000000e+00> : vector<84x1xf32>
    %263 = tpu.matmul %262, %261, %cst_300 {dimension_numbers = #tpu.dot_dimension_numbers<[1], [0], [0], [1], [0, 0, 1, 1], [], []>} : vector<84x120xf32>, vector<120x1xf32>, vector<84x1xf32> -> vector<84x1xf32>
    %c0_301 = arith.constant 0 : index
    %c0_302 = arith.constant 0 : index
    %264 = vector.load %arg9[%c0_301, %c0_302] : memref<84x1xf32, #tpu.memory_space<vmem>>, vector<84x1xf32>
    %265 = arith.addf %263, %264 : vector<84x1xf32>
    %cst_303 = arith.constant 0.000000e+00 : f32
    %266 = vector.broadcast %cst_303 : f32 to vector<84x1xf32>
    %267 = arith.maximumf %265, %266 : vector<84x1xf32>
    %c0_304 = arith.constant 0 : index
    %c0_305 = arith.constant 0 : index
    %268 = vector.load %arg10[%c0_304, %c0_305] : memref<10x84xf32, #tpu.memory_space<vmem>>, vector<10x84xf32>
    %cst_306 = arith.constant dense<0.000000e+00> : vector<10x1xf32>
    %269 = tpu.matmul %268, %267, %cst_306 {dimension_numbers = #tpu.dot_dimension_numbers<[1], [0], [0], [1], [0, 0, 1, 1], [], []>} : vector<10x84xf32>, vector<84x1xf32>, vector<10x1xf32> -> vector<10x1xf32>
    %c0_307 = arith.constant 0 : index
    %c0_308 = arith.constant 0 : index
    %270 = vector.load %arg11[%c0_307, %c0_308] : memref<10x1xf32, #tpu.memory_space<vmem>>, vector<10x1xf32>
    %271 = arith.addf %269, %270 : vector<10x1xf32>
    %c0_309 = arith.constant 0 : index
    %c0_310 = arith.constant 0 : index
    %c0_311 = arith.constant 0 : index
    %272 = vector.load %arg12[%c0_309, %c0_310, %c0_311] : memref<1x10x1xf32, #tpu.memory_space<vmem>>, vector<1x10x1xf32>
    %273 = vector.shape_cast %272 : vector<1x10x1xf32> to vector<10x1xf32>
    %274 = vector.shape_cast %271 : vector<10x1xf32> to vector<1x10x1xf32>
    tpu.vector_store %arg12[%c0_309, %c0_310, %c0_311], %274 {strides = array<i32>} : memref<1x10x1xf32, #tpu.memory_space<vmem>>, vector<1x10x1xf32>,
    return
  }
  func.func @transform_0(%arg0: i32) -> (i32, i32) {
    %c0_i32 = arith.constant 0 : i32
    %c0_i32_0 = arith.constant 0 : i32
    return %c0_i32, %arg0 : i32, i32
  }
  func.func @transform_1(%arg0: i32) -> (i32, i32) {
    %c0_i32 = arith.constant 0 : i32
    %c0_i32_0 = arith.constant 0 : i32
    %c0_i32_1 = arith.constant 0 : i32
    return %c0_i32, %c0_i32_0 : i32, i32
  }
  func.func @transform_2(%arg0: i32) -> (i32, i32) {
    %c0_i32 = arith.constant 0 : i32
    %c0_i32_0 = arith.constant 0 : i32
    %c0_i32_1 = arith.constant 0 : i32
    return %c0_i32, %c0_i32_0 : i32, i32
  }
  func.func @transform_3(%arg0: i32) -> (i32, i32) {
    %c0_i32 = arith.constant 0 : i32
    %c0_i32_0 = arith.constant 0 : i32
    %c0_i32_1 = arith.constant 0 : i32
    return %c0_i32, %c0_i32_0 : i32, i32
  }
  func.func @transform_4(%arg0: i32) -> (i32, i32) {
    %c0_i32 = arith.constant 0 : i32
    %c0_i32_0 = arith.constant 0 : i32
    %c0_i32_1 = arith.constant 0 : i32
    return %c0_i32, %c0_i32_0 : i32, i32
  }
  func.func @transform_5(%arg0: i32) -> (i32, i32, i32) {
    %c0_i32 = arith.constant 0 : i32
    %c0_i32_0 = arith.constant 0 : i32
    %c0_i32_1 = arith.constant 0 : i32
    %c0_i32_2 = arith.constant 0 : i32
    return %c0_i32, %c0_i32_0, %c0_i32_1 : i32, i32, i32
  }
  func.func @transform_6(%arg0: i32) -> (i32, i32) {
    %c0_i32 = arith.constant 0 : i32
    %c0_i32_0 = arith.constant 0 : i32
    %c0_i32_1 = arith.constant 0 : i32
    return %c0_i32, %c0_i32_0 : i32, i32
  }
  func.func @transform_7(%arg0: i32) -> (i32, i32) {
    %c0_i32 = arith.constant 0 : i32
    %c0_i32_0 = arith.constant 0 : i32
    %c0_i32_1 = arith.constant 0 : i32
    return %c0_i32, %c0_i32_0 : i32, i32
  }
  func.func @transform_8(%arg0: i32) -> (i32, i32) {
    %c0_i32 = arith.constant 0 : i32
    %c0_i32_0 = arith.constant 0 : i32
    %c0_i32_1 = arith.constant 0 : i32
    return %c0_i32, %c0_i32_0 : i32, i32
  }
  func.func @transform_9(%arg0: i32) -> (i32, i32) {
    %c0_i32 = arith.constant 0 : i32
    %c0_i32_0 = arith.constant 0 : i32
    %c0_i32_1 = arith.constant 0 : i32
    return %c0_i32, %c0_i32_0 : i32, i32
  }
  func.func @transform_10(%arg0: i32) -> (i32, i32) {
    %c0_i32 = arith.constant 0 : i32
    %c0_i32_0 = arith.constant 0 : i32
    %c0_i32_1 = arith.constant 0 : i32
    return %c0_i32, %c0_i32_0 : i32, i32
  }
  func.func @transform_11(%arg0: i32) -> (i32, i32, i32) {
    %c0_i32 = arith.constant 0 : i32
    %c0_i32_0 = arith.constant 0 : i32
    %c0_i32_1 = arith.constant 0 : i32
    return %arg0, %c0_i32, %c0_i32_0 : i32, i32, i32
  }
}

</mosaic_0001>

<bundles_post_ra>
// kernel: foo_net_forward.1
= control target key start
LH: loop header
LB: loop body
LE: loop exit
PB: predicated region body
PF: predicated region fallthrough
CT: control target
= control target key end

     0   :  { %s8759_s17 = smov 0   ;;  %s13031_s0 = inlined_call_operand.vmem [shape: f32[3,2048], index: 0, kind: input, shape index: {}]   ;;  %s13032_s1 = inlined_call_operand.vmem [shape: f32[6,75], index: 1, kind: input, shape index: {}]   ;;  %s13033_s2 = inlined_call_operand.vmem [shape: f32[6,1], index: 2, kind: input, shape index: {}]   ;;  %s13034_s3 = inlined_call_operand.vmem [shape: f32[16,150], index: 3, kind: input, shape index: {}]   ;;  %s13035_s4 = inlined_call_operand.vmem [shape: f32[16,1], index: 4, kind: input, shape index: {}]   ;;  %s13036_s5 = inlined_call_operand.vmem [shape: f32[25,120,16], index: 5, kind: input, shape index: {}]   ;;  %s13037_s6 = inlined_call_operand.vmem [shape: f32[120,1], index: 6, kind: input, shape index: {}]   ;;  %s13038_s7 = inlined_call_operand.vmem [shape: f32[84,120], index: 7, kind: input, shape index: {}]   ;;  %s13039_s8 = inlined_call_operand.vmem [shape: f32[84,1], index: 8, kind: input, shape index: {}]   ;;  %s13040_s9 = inlined_call_operand.vmem [shape: f32[10,84], index: 9, kind: input, shape index: {}]   ;;  %s13041_s10 = inlined_call_operand.vmem [shape: f32[10,1], index: 10, kind: input, shape index: {}]   ;;  %s13042_s11 = inlined_call_operand.vmem [shape: f32[2,10,1], index: 11, kind: output, shape index: {}]  }
   0x1 LB: > { %s8765_s18 = sadd.s32 4294967295, %s8671_s17   ;;  %p7741_p0 = scmp.ge.s32.totalorder %s8671_s17, 1  ;;  %s8671_s17 = sphi %s8759_s17, %s21_s17  }
   0x2   : > { %p338_p1 = scmp.lt.s32.totalorder %s8671_s17, 3 }
   0x4   : > { %p339_p2 = pnand %p7741_p0, %p338_p1 }
   0x6   : > { %342 = sbr.rel (%p339_p2) target bundleno = 3443 (0xd73), region = 64 }
   0xb   : > { %s7742_s19 = sshll.u32 %s8765_s18, 3  ;;  %s8673_s24 = smov 93   ;;  %vm13059_vm0 = vcmask 760832   ;;  %vm1014_vm1 = vcmask 752640   ;;  %vm1083_vm2 = vcmask 523264   ;;  %vm1159_vm3 = vcmask 515072  }
   0xc   : > { %p379_p3 = scmp.lt.s32.totalorder %s7742_s19, 15  ;;  %s8674_s25 = smov 92   ;;  %vm1221_vm4 = vcmask 506880   ;;  %vm13052_vm5 = vcmask 498688   ;;  %vm13051_vm6 = vcmask 490496   ;;  %vm13050_vm7 = vcmask 261120  }
   0xd   : > { %s8675_s26 = smov 64   ;;  %s8676_s27 = smov 63   ;;  %vm1496_vm8 = vcmask 252928   ;;  %vm1565_vm9 = vcmask 244736   ;;  %vm1634_vm10 = vcmask 236544   ;;  %vm1710_vm11 = vcmask 228352  }
   0xe   : > { %s13421_s19 = smov (!%p379_p3, %s7742_s19), 15  ;;  %s13048_s28 = smov 62   ;;  %vm13053_vm12 = vcmask 1039360   ;;  %vm13063_vm13 = vcmask 1031168   ;;  %vm424_vm14 = vcmask 1009664   ;;  %vm756_vm15 = vcmask 1014791  }
   0xf   : > { %s7743_s20 = sshll.u32 %s13421_s19, 2  ;;  %s8678_s29 = smov 61  }
  0x10   : > { %s8773_s23 = scalar_lea.vmem %s13031_s0, %s7743_s20  ;;  %s8679_s30 = smov 60  }
  0x11   : > { %v389_v0 = vld [vmem:[%s8773_s23] sm:$0x77]  ;;  %v390_v1 = vld [vmem:[%s8773_s23 + $0x8] sm:$0x77]  ;;  %v391_v2 = vld [vmem:[%s8773_s23 + $0x10] sm:$0x77] }
  0x12   : > { %397 = vst [vmem:[#allocation1] ss:$2 sm:$0xff] %v389_v0  ;;  %v426_v3 = vld [vmem:[%s8773_s23] sm:$0x77]  ;;  %v427_v6 = vld [vmem:[%s8773_s23 + $0x8] sm:$0x77] }
  0x13   : > { %399 = vst [vmem:[#allocation1 + $0x10] ss:$2 sm:$0xff] %v390_v1  ;;  %v491_v9 = vld [vmem:[%s8773_s23] sm:$0x77]  ;;  %v428_v10 = vld [vmem:[%s8773_s23 + $0x10] sm:$0x77] }
  0x14   : > { %401 = vst [vmem:[#allocation1 + $0x20] ss:$2 sm:$0xff] %v391_v2  ;;  %v492_v15 = vld [vmem:[%s8773_s23 + $0x8] sm:$0x77]  ;;  %v493_v18 = vld [vmem:[%s8773_s23 + $0x10] sm:$0x77] }
  0x15   : > { %v564_v19 = vld [vmem:[%s8773_s23] sm:$0x77]  ;;  %v392_v22 = vld [vmem:[%s8773_s23 + $0x18] sm:$0x7]  ;;  %v565_v25 = vld [vmem:[%s8773_s23 + $0x8] sm:$0x77] }
  0x16   : > { %403 = vst [vmem:[#allocation1 + $0x30] ss:$2 sm:$0xff] %v392_v22  ;;  %v566_v28 = vld [vmem:[%s8773_s23 + $0x10] sm:$0x77]  ;;  %v629_v29 = vld [vmem:[%s8773_s23] sm:$0x77] }
  0x17   : > { %v630_v34 = vld [vmem:[%s8773_s23 + $0x8] sm:$0x77]  ;;  %v429_v36 = vld [vmem:[%s8773_s23 + $0x18] sm:$0x7]  ;;  %v631_v39 = vld [vmem:[%s8773_s23 + $0x10] sm:$0x77] }
  0x18   : > { %v688_v40 = vld [vmem:[%s8773_s23] sm:$0x77]  ;;  %v689_v45 = vld [vmem:[%s8773_s23 + $0x8] sm:$0x77]  ;;  %v690_v48 = vld [vmem:[%s8773_s23 + $0x10] sm:$0x77] }
  0x19   : > { %v404_v4 = vld.sshfl [vmem:[#allocation1] sm:$0xff pattern:$0x75316420]  ;;  %v405_v5 = vld.sshfl [vmem:[#allocation1 + $0x8] sm:$0xff pattern:$0x75316420] }
  0x1a   : > { %434 = vst [vmem:[#allocation1] ss:$2 sm:$0xff] %v426_v3  ;;  %v406_v7 = vld.sshfl [vmem:[#allocation1 + $0x10] sm:$0xff pattern:$0x75316420]  ;;  %s8680_s12 = smov 32  }
  0x1b   : > { %418 = vst [vmem:[#allocation2] sm:$0x7] %v404_v4  ;;  %v407_v8 = vld.sshfl [vmem:[#allocation1 + $0x18] sm:$0xff pattern:$0x75316420]  ;;  %s8681_s13 = smov 31  }
  0x1c   : > { %419 = vst [vmem:[#allocation2 + $0x8] sm:$0x7] %v405_v5  ;;  %v408_v11 = vld.sshfl [vmem:[#allocation1 + $0x20] sm:$0xff pattern:$0x75316420]  ;;  %s8682_s14 = smov 30  }
  0x1d   : > { %436 = vst [vmem:[#allocation1 + $0x10] ss:$2 sm:$0xff] %v427_v6  ;;  %v409_v12 = vld.sshfl [vmem:[#allocation1 + $0x28] sm:$0xff pattern:$0x75316420]  ;;  %s8683_s15 = smov 29  }
  0x1e   : > { %420 = vst [vmem:[#allocation2 + $0x10] sm:$0x7] %v406_v7  ;;  %v8818_v35 = vld.sshfl [vmem:[#allocation1 + $0x30] sm:$0xff pattern:$0x75316420]  ;;  %s8684_s16 = smov 28  }
  0x1f   : > { %421 = vst [vmem:[#allocation2 + $0x18] sm:$0x7] %v407_v8  ;;  %v766_v49 = vld [vmem:[%s8773_s23] sm:$0x77]  ;;  %v494_v50 = vld [vmem:[%s8773_s23 + $0x18] sm:$0x7] }
  0x20   : > { %438 = vst [vmem:[#allocation1 + $0x20] ss:$2 sm:$0xff] %v428_v10  ;;  %v767_v56 = vld [vmem:[%s8773_s23 + $0x8] sm:$0x77]  ;;  %v768_v59 = vld [vmem:[%s8773_s23 + $0x10] sm:$0x77] }
  0x21   : > { %v8782_v13 = vld.sshfl [vmem:[#allocation1] sm:$0xff pattern:$0x75316420]  ;;  %v8784_v14 = vld.sshfl [vmem:[#allocation1 + $0x8] sm:$0xff pattern:$0x75316420] }
  0x22   : > { %13065 = vst [vmem:[#allocation8_spill] sm:$0xff] %v8782_v13  ;;  %v836_v60 = vld [vmem:[%s8773_s23] sm:$0x77]  ;;  %v837_v63 = vld [vmem:[%s8773_s23 + $0x8] sm:$0x77]  ;;  %s8685_s19 = smov 127  }
  0x23   : > { %13066 = vst [vmem:[#allocation9_spill] sm:$0xff] %v8784_v14  ;;  %v567_v0 = vld [vmem:[%s8773_s23 + $0x18] sm:$0x7]  ;;  %v838_v6 = vld [vmem:[%s8773_s23 + $0x10] sm:$0x77]  ;;  %s8686_s20 = smov 126  }
  0x24   : > { %499 = vst [vmem:[#allocation1] ss:$2 sm:$0xff] %v491_v9  ;;  %v8787_v16 = vld.sshfl [vmem:[#allocation1 + $0x10] sm:$0xff pattern:$0x75316420]  ;;  %s8687_s21 = smov 125  }
  0x25   : > { %422 = vst [vmem:[#allocation2 + $0x20] sm:$0x7] %v408_v11  ;;  %v8789_v17 = vld.sshfl [vmem:[#allocation1 + $0x18] sm:$0xff pattern:$0x75316420]  ;;  %s8688_s22 = smov 124  }
  0x26   : > { %13067 = vst [vmem:[#allocation10_spill] sm:$0xff] %v8787_v16  ;;  %v906_v7 = vld [vmem:[%s8773_s23] sm:$0x77]  ;;  %v907_v10 = vld [vmem:[%s8773_s23 + $0x8] sm:$0x77]  ;;  %p384_p4 = scmp.lt.s32.totalorder %s8765_s18, 1 }
  0x27   : > { %13068 = vst [vmem:[#allocation11_spill] sm:$0xff] %v8789_v17  ;;  %v8793_v20 = vld.sshfl [vmem:[#allocation1 + $0x20] sm:$0xff pattern:$0x75316420]  ;;  %v632_v11 = vld [vmem:[%s8773_s23 + $0x18] sm:$0x7] }
  0x28   : > { %501 = vst [vmem:[#allocation1 + $0x10] ss:$2 sm:$0xff] %v492_v15  ;;  %v8795_v21 = vld.sshfl [vmem:[#allocation1 + $0x28] sm:$0xff pattern:$0x75316420]  ;;  %s13423_s18 = smov (!%p384_p4, %s8765_s18), 1 }
  0x29   : > { %423 = vst [vmem:[#allocation2 + $0x28] sm:$0x7] %v409_v12  ;;  %v1115_v17 = vld [vmem:[%s8773_s23 + $0x18] sm:$0x77] }
  0x2a   : > { %13069 = vst [vmem:[#allocation12_spill] sm:$0xff] %v8793_v20  ;;  %v1039_v20 = vld [vmem:[%s8773_s23 + $0x18] sm:$0x77] }
  0x2b   : > { %13070 = vst [vmem:[#allocation13_spill] sm:$0xff] %v8795_v21  ;;  %v8798_v23 = vld.sshfl [vmem:[#allocation1] sm:$0xff pattern:$0x75316420]  ;;  %v1114_v21 = vld [vmem:[%s8773_s23 + $0x10] sm:$0x77] }
  0x2c   : > { %503 = vst [vmem:[#allocation1 + $0x20] ss:$2 sm:$0xff] %v493_v18  ;;  %v8800_v24 = vld.sshfl [vmem:[#allocation1 + $0x8] sm:$0xff pattern:$0x75316420] }
  0x2d   : > { %572 = vst [vmem:[#allocation1] ss:$2 sm:$0xff] %v564_v19 }
  0x2e   : > { %440 = vst [vmem:[#allocation1 + $0x30] ss:$2 sm:$0xff] %v429_v36  ;;  %v968_v36 = vld [vmem:[%s8773_s23 + $0x8] sm:$0x77] }
  0x2f   : > { %v8803_v26 = vld.sshfl [vmem:[#allocation1 + $0x10] sm:$0xff pattern:$0x75316420]  ;;  %v8805_v27 = vld.sshfl [vmem:[#allocation1 + $0x18] sm:$0xff pattern:$0x75316420] }
  0x30   : > { %574 = vst [vmem:[#allocation1 + $0x10] ss:$2 sm:$0xff] %v565_v25  ;;  %v908_v25 = vld [vmem:[%s8773_s23 + $0x10] sm:$0x77] }
  0x31   : > { %425 = vst.msk [vmem:[#allocation2 + $0x30] sm:$0x7] %vm424_vm14, %v8818_v35 }
  0x33   : > { %v8809_v30 = vld.sshfl [vmem:[#allocation1 + $0x20] sm:$0xff pattern:$0x75316420]  ;;  %v8811_v31 = vld.sshfl [vmem:[#allocation1 + $0x28] sm:$0xff pattern:$0x75316420] }
  0x34   : > { %13071 = vst [vmem:[#allocation14_spill] sm:$0xff] %v8809_v30  ;;  %v8813_v32 = vld.sshfl [vmem:[#allocation1] sm:$0xff pattern:$0x75316420]  ;;  %v1734_v30 = vld [vmem:[%s8773_s23 + $0x14] sm:$0x77] }
  0x35   : > { %13072 = vst [vmem:[#allocation15_spill] sm:$0xff] %v8811_v31  ;;  %v8815_v33 = vld.sshfl [vmem:[#allocation1 + $0x8] sm:$0xff pattern:$0x75316420]  ;;  %v1243_v31 = vld [vmem:[%s8773_s23] sm:$0x77] }
  0x36   : > { %576 = vst [vmem:[#allocation1 + $0x20] ss:$2 sm:$0xff] %v566_v28  ;;  %v8847_v53 = vld.sshfl [vmem:[#allocation1 + $0x30] sm:$0xff pattern:$0x75316420] }
  0x37   : > { %638 = vst [vmem:[#allocation1 + $0x1] ss:$2 sm:$0xff] %v629_v29  ;;  %v8821_v37 = vld.sshfl [vmem:[#allocation1 + $0x10] sm:$0xff pattern:$0x75316420] }
  0x38   : > { %13073 = vst [vmem:[#allocation16_spill] sm:$0xff] %v8821_v37  ;;  %v8823_v38 = vld.sshfl [vmem:[#allocation1 + $0x18] sm:$0xff pattern:$0x75316420]  ;;  %v967_v28 = vld [vmem:[%s8773_s23] sm:$0x77] }
  0x39   : > { %640 = vst [vmem:[#allocation1 + $0x11] ss:$2 sm:$0xff] %v630_v34 }
  0x3a   : > { %13081 = vst [vmem:[#allocation24_spill] sm:$0xff] %v8847_v53 }
  0x3b   : > { %505 = vst [vmem:[#allocation1 + $0x30] ss:$2 sm:$0xff] %v494_v50 }
  0x3d   : > { %v8827_v41 = vld.sshfl [vmem:[#allocation1 + $0x20] sm:$0xff pattern:$0x75316420]  ;;  %v8829_v42 = vld.sshfl [vmem:[#allocation1 + $0x28] sm:$0xff pattern:$0x75316420] }
  0x3e   : > { %13074 = vst [vmem:[#allocation17_spill] sm:$0xff] %v8827_v41  ;;  %v8831_v43 = vld.sshfl [vmem:[#allocation1] sm:$0xff pattern:$0x75316420]  ;;  %v1519_v41 = vld [vmem:[%s8773_s23 + $0x8] sm:$0x77] }
  0x3f   : > { %13075 = vst [vmem:[#allocation18_spill] sm:$0xff] %v8829_v42  ;;  %v8833_v44 = vld.sshfl [vmem:[#allocation1 + $0x8] sm:$0xff pattern:$0x75316420] }
  0x40   : > { %642 = vst [vmem:[#allocation1 + $0x21] ss:$2 sm:$0xff] %v631_v39  ;;  %v8836_v46 = vld.sshfl [vmem:[#allocation1 + $0x10] sm:$0xff pattern:$0x75316420] }
  0x41   : > { %13076 = vst [vmem:[#allocation19_spill] sm:$0xff] %v8831_v43  ;;  %v8838_v47 = vld.sshfl [vmem:[#allocation1 + $0x18] sm:$0xff pattern:$0x75316420] }
  0x42   : > { %13077 = vst [vmem:[#allocation20_spill] sm:$0xff] %v8833_v44  ;;  %v8870_v3 = vld.sshfl [vmem:[#allocation1 + $0x30] sm:$0xff pattern:$0x75316420]  ;;  %v691_v39 = vld [vmem:[%s8773_s23 + $0x18] sm:$0x77] }
  0x43   : > { %696 = vst [vmem:[#allocation1] ss:$2 sm:$0xff] %v688_v40 }
  0x44   : > { %13078 = vst [vmem:[#allocation21_spill] sm:$0xff] %v8838_v47 }
  0x45   : > { %698 = vst [vmem:[#allocation1 + $0x10] ss:$2 sm:$0xff] %v689_v45 }
  0x46   : > { %13084 = vst [vmem:[#allocation27_spill] sm:$0xff] %v8870_v3 }
  0x47   : > { %v8843_v51 = vld.sshfl [vmem:[#allocation1 + $0x20] sm:$0xff pattern:$0x75316420]  ;;  %v8845_v52 = vld.sshfl [vmem:[#allocation1 + $0x28] sm:$0xff pattern:$0x75316420] }
  0x48   : > { %13079 = vst [vmem:[#allocation22_spill] sm:$0xff] %v8843_v51 }
  0x49   : > { %13080 = vst [vmem:[#allocation23_spill] sm:$0xff] %v8845_v52 }
  0x4a   : > { %700 = vst [vmem:[#allocation1 + $0x20] ss:$2 sm:$0xff] %v690_v48  ;;  %v8849_v54 = vld.sshfl [vmem:[#allocation1] sm:$0xff pattern:$0x75316420] }
  0x4b   : > { %v8851_v55 = vld.sshfl [vmem:[#allocation1 + $0x8] sm:$0xff pattern:$0x75316420]  ;;  %578 = vst [vmem:[#allocation1 + $0x30] ss:$2 sm:$0xff] %v567_v0 }
  0x4c   : > { %774 = vst [vmem:[#allocation1] ss:$2 sm:$0xff] %v766_v49  ;;  %v8854_v57 = vld.sshfl [vmem:[#allocation1 + $0x10] sm:$0xff pattern:$0x75316420] }
  0x4d   : > { %v8856_v58 = vld.sshfl [vmem:[#allocation1 + $0x18] sm:$0xff pattern:$0x75316420]  ;;  %v1037_v0 = vld [vmem:[%s8773_s23 + $0x8] sm:$0x77] }
  0x4e   : > { %776 = vst [vmem:[#allocation1 + $0x10] ss:$2 sm:$0xff] %v767_v56  ;;  %v969_v56 = vld [vmem:[%s8773_s23 + $0x10] sm:$0x77] }
  0x51   : > { %v8860_v61 = vld.sshfl [vmem:[#allocation1 + $0x20] sm:$0xff pattern:$0x75316420]  ;;  %v8862_v62 = vld.sshfl [vmem:[#allocation1 + $0x28] sm:$0xff pattern:$0x75316420] }
  0x52   : > { %13082 = vst [vmem:[#allocation25_spill] sm:$0xff] %v8860_v61  ;;  %v8888_v18 = vld.sshfl [vmem:[#allocation1 + $0x30] sm:$0xff pattern:$0x75316420] }
  0x53   : > { %13083 = vst [vmem:[#allocation26_spill] sm:$0xff] %v8862_v62  ;;  %v8866_v1 = vld.sshfl [vmem:[#allocation1] sm:$0xff pattern:$0x75316420]  ;;  %v970_v62 = vld [vmem:[%s8773_s23 + $0x18] sm:$0x77] }
  0x54   : > { %778 = vst [vmem:[#allocation1 + $0x20] ss:$2 sm:$0xff] %v768_v59  ;;  %v8868_v2 = vld.sshfl [vmem:[#allocation1 + $0x8] sm:$0xff pattern:$0x75316420] }
  0x55   : > { %844 = vst [vmem:[#allocation1] ss:$2 sm:$0xff] %v836_v60  ;;  %v8872_v4 = vld.sshfl [vmem:[#allocation1 + $0x10] sm:$0xff pattern:$0x75316420] }
  0x56   : > { %v8874_v5 = vld.sshfl [vmem:[#allocation1 + $0x18] sm:$0xff pattern:$0x75316420]  ;;  %13087 = vst [vmem:[#allocation30_spill] sm:$0xff] %v8888_v18  ;;  %v1036_v59 = vld [vmem:[%s8773_s23] sm:$0x77] }
  0x57   : > { %846 = vst [vmem:[#allocation1 + $0x10] ss:$2 sm:$0xff] %v837_v63  ;;  %v839_v18 = vld [vmem:[%s8773_s23 + $0x18] sm:$0x77] }
  0x58   : > { %644 = vst [vmem:[#allocation1 + $0x31] ss:$2 sm:$0xff] %v632_v11 }
  0x5b   : > { %v8878_v8 = vld.sshfl [vmem:[#allocation1 + $0x20] sm:$0xff pattern:$0x75316420]  ;;  %v8880_v9 = vld.sshfl [vmem:[#allocation1 + $0x28] sm:$0xff pattern:$0x75316420] }
  0x5c   : > { %13085 = vst [vmem:[#allocation28_spill] sm:$0xff] %v8878_v8  ;;  %v8884_v12 = vld.sshfl [vmem:[#allocation1] sm:$0xff pattern:$0x75316420] }
  0x5d   : > { %13086 = vst [vmem:[#allocation29_spill] sm:$0xff] %v8880_v9  ;;  %v8886_v15 = vld.sshfl [vmem:[#allocation1 + $0x8] sm:$0xff pattern:$0x75316420] }
  0x5e   : > { %848 = vst [vmem:[#allocation1 + $0x20] ss:$2 sm:$0xff] %v838_v6  ;;  %v8890_v19 = vld.sshfl [vmem:[#allocation1 + $0x10] sm:$0xff pattern:$0x75316420] }
  0x5f   : > { %914 = vst [vmem:[#allocation1] ss:$2 sm:$0xff] %v906_v7  ;;  %v8892_v22 = vld.sshfl [vmem:[#allocation1 + $0x18] sm:$0xff pattern:$0x75316420] }
  0x60   : > { %916 = vst [vmem:[#allocation1 + $0x10] ss:$2 sm:$0xff] %v907_v10  ;;  %v8904_v48 = vld.sshfl [vmem:[#allocation1 + $0x30] sm:$0xff pattern:$0x75316420] }
  0x61   : > { %13090 = vst [vmem:[#allocation33_spill] sm:$0xff] %v8904_v48 }
  0x62   : > { %702 = vst [vmem:[#allocation1 + $0x30] ss:$2 sm:$0xff] %v691_v39 }
  0x65   : > { %v8896_v29 = vld.sshfl [vmem:[#allocation1 + $0x20] sm:$0xff pattern:$0x75316420]  ;;  %v8898_v34 = vld.sshfl [vmem:[#allocation1 + $0x28] sm:$0xff pattern:$0x75316420] }
  0x66   : > { %13088 = vst [vmem:[#allocation31_spill] sm:$0xff] %v8896_v29  ;;  %v921_v40 = vld.sshfl [vmem:[#allocation1] sm:$0xff pattern:$0x75316420] }
  0x67   : > { %13089 = vst [vmem:[#allocation32_spill] sm:$0xff] %v8898_v34  ;;  %v922_v45 = vld.sshfl [vmem:[#allocation1 + $0x8] sm:$0xff pattern:$0x75316420]  ;;  %929 = vrot.lane.b32.xlu0 %v921_v40, %s8673_s24  ;;  %v909_v34 = vld [vmem:[%s8773_s23 + $0x18] sm:$0x77] }
  0x68   : > { %918 = vst [vmem:[#allocation1 + $0x20] ss:$2 sm:$0xff] %v908_v25  ;;  %931 = vrot.lane.b32.xlu1 %v922_v45, %s8673_s24  ;;  %v923_v49 = vld.sshfl [vmem:[#allocation1 + $0x10] sm:$0xff pattern:$0x75316420] }
  0x69   : > { %975 = vst [vmem:[#allocation1] ss:$2 sm:$0xff] %v967_v28  ;;  %v924_v50 = vld.sshfl [vmem:[#allocation1 + $0x18] sm:$0xff pattern:$0x75316420]  ;;  %933 = vrot.lane.b32.xlu2 %v923_v49, %s8673_s24 }
  0x6a   : > { %977 = vst [vmem:[#allocation1 + $0x10] ss:$2 sm:$0xff] %v968_v36  ;;  %v769_v25 = vld [vmem:[%s8773_s23 + $0x18] sm:$0x77]  ;;  %v1038_v45 = vld [vmem:[%s8773_s23 + $0x10] sm:$0x77] }
  0x6b   : > { %v8916_v28 = vld.sshfl [vmem:[#allocation1 + $0x30] sm:$0xff pattern:$0x75316420]  ;;  %v8918_v36 = vld.sshfl [vmem:[#allocation1 + $0x38] sm:$0xff pattern:$0x75316420] }
  0x6c   : > { %13092 = vst [vmem:[#allocation35_spill] sm:$0xff] %v8916_v28  ;;  %v1112_v49 = vld [vmem:[%s8773_s23] sm:$0x77] }
  0x6d   : > { %13093 = vst [vmem:[#allocation36_spill] sm:$0xff] %v8918_v36  ;;  %v1388_v28 = vld [vmem:[%s8773_s23] sm:$0x77] }
  0x6e   : > { %780 = vst [vmem:[#allocation1 + $0x30] ss:$2 sm:$0xff] %v769_v25  ;;  %v1181_v25 = vld [vmem:[%s8773_s23] sm:$0x77] }
  0x6f   : > { %v8909_v60 = vld.sshfl [vmem:[#allocation1 + $0x20] sm:$0xff pattern:$0x75316420]  ;;  %v8911_v63 = vld.sshfl [vmem:[#allocation1 + $0x28] sm:$0xff pattern:$0x75316420]  ;;  %935 = vrot.lane.b32.xlu0 %v924_v50, %s8673_s24 }
  0x70   : > { %13091 = vst [vmem:[#allocation34_spill] sm:$0xff] %v8911_v63  ;;  %v983_v6 = vld.sshfl [vmem:[#allocation1 + $0x8] sm:$0xff pattern:$0x75316420] }
  0x71   : > { %979 = vst [vmem:[#allocation1 + $0x20] ss:$2 sm:$0xff] %v969_v56  ;;  %v982_v7 = vld.sshfl [vmem:[#allocation1] sm:$0xff pattern:$0x75316420]  ;;  %v991_v10 = vrot.slane %v983_v6, 5 }
  0x72   : > { %v990_v11 = vrot.slane %v982_v7, 5  ;;  %1044 = vst [vmem:[#allocation1] ss:$2 sm:$0xff] %v1036_v59  ;;  %v8920_v39 = vld.sshfl [vmem:[#allocation1 + $0x10] sm:$0xff pattern:$0x75316420] }
  0x73   : > { %v8922_v40 = vld.sshfl [vmem:[#allocation1 + $0x18] sm:$0xff pattern:$0x75316420]  ;;  %1000 = vrot.lane.b32.xlu2 %v991_v10, %s8674_s25 }
  0x74   : > { %998 = vrot.lane.b32.xlu1 %v990_v11, %s8674_s25  ;;  %1046 = vst [vmem:[#allocation1 + $0x10] ss:$2 sm:$0xff] %v1037_v0  ;;  %v1113_v11 = vld [vmem:[%s8773_s23 + $0x8] sm:$0x77] }
  0x78   : > { %v8928_v50 = vld.sshfl [vmem:[#allocation1 + $0x20] sm:$0xff pattern:$0x75316420]  ;;  %v8930_v56 = vld.sshfl [vmem:[#allocation1 + $0x28] sm:$0xff pattern:$0x75316420] }
  0x79   : > { %13094 = vst [vmem:[#allocation37_spill] sm:$0xff] %v8930_v56  ;;  %v1051_v59 = vld.sshfl [vmem:[#allocation1] sm:$0xff pattern:$0x75316420] }
  0x7a   : > { %1048 = vst [vmem:[#allocation1 + $0x20] ss:$2 sm:$0xff] %v1038_v45  ;;  %v1052_v6 = vld.sshfl [vmem:[#allocation1 + $0x8] sm:$0xff pattern:$0x75316420]  ;;  %v1059_v7 = vrot.slane %v1051_v59, 2 }
  0x7b   : > { %v1060_v53 = vrot.slane %v1052_v6, 2  ;;  %1120 = vst [vmem:[#allocation1] ss:$2 sm:$0xff] %v1112_v49  ;;  %v1053_v52 = vld.sshfl [vmem:[#allocation1 + $0x10] sm:$0xff pattern:$0x75316420] }
  0x7c   : > { %1067 = vrot.lane.b32.xlu0 %v1059_v7, %s8675_s26  ;;  %v1054_v0 = vld.sshfl [vmem:[#allocation1 + $0x18] sm:$0xff pattern:$0x75316420]  ;;  %v1061_v10 = vrot.slane %v1053_v52, 2 }
  0x7d   : > { %1069 = vrot.lane.b32.xlu1 %v1060_v53, %s8675_s26  ;;  %1122 = vst [vmem:[#allocation1 + $0x10] ss:$2 sm:$0xff] %v1113_v11  ;;  %v8937_v45 = vld.sshfl [vmem:[#allocation1 + $0x30] sm:$0xff pattern:$0x75316420]  ;;  %v1062_v6 = vrot.slane %v1054_v0, 2 }
  0x7e   : > { %13095 = vst [vmem:[#allocation38_spill] sm:$0xff] %v8937_v45  ;;  %1071 = vrot.lane.b32.xlu2 %v1061_v10, %s8675_s26  ;;  %v8945_v53 = vld.sshfl [vmem:[#allocation1 + $0x38] sm:$0xff pattern:$0x75316420]  ;;  %v1182_v11 = vld [vmem:[%s8773_s23 + $0x8] sm:$0x77] }
  0x7f   : > { %13097 = vst [vmem:[#allocation40_spill] sm:$0xff] %v8945_v53 }
  0x80   : > { %850 = vst [vmem:[#allocation1 + $0x30] ss:$2 sm:$0xff] %v839_v18 }
  0x81   : > { %v8941_v59 = vld.sshfl [vmem:[#allocation1 + $0x20] sm:$0xff pattern:$0x75316420]  ;;  %v8943_v49 = vld.sshfl [vmem:[#allocation1 + $0x28] sm:$0xff pattern:$0x75316420] }
  0x82   : > { %13096 = vst [vmem:[#allocation39_spill] sm:$0xff] %v8943_v49  ;;  %v1128_v52 = vld.sshfl [vmem:[#allocation1 + $0x8] sm:$0xff pattern:$0x75316420] }
  0x83   : > { %1124 = vst [vmem:[#allocation1 + $0x20] ss:$2 sm:$0xff] %v1114_v21  ;;  %v1127_v7 = vld.sshfl [vmem:[#allocation1] sm:$0xff pattern:$0x75316420]  ;;  %v1136_v3 = vrot.slane %v1128_v52, 7 }
  0x84   : > { %v1135_v48 = vrot.slane %v1127_v7, 7  ;;  %1190 = vst [vmem:[#allocation1 + $0x1] ss:$2 sm:$0xff] %v1181_v25  ;;  %1073 = vrot.lane.b32.xlu0 %v1062_v6, %s8675_s26  ;;  %v1129_v0 = vld.sshfl [vmem:[#allocation1 + $0x10] sm:$0xff pattern:$0x75316420] }
  0x85   : > { %v1130_v10 = vld.sshfl [vmem:[#allocation1 + $0x18] sm:$0xff pattern:$0x75316420]  ;;  %v1183_v21 = vld [vmem:[%s8773_s23 + $0x10] sm:$0x77]  ;;  %v1137_v18 = vrot.slane %v1129_v0, 7 }
  0x86   : > { %1143 = vrot.lane.b32.xlu1 %v1135_v48, %s8676_s27  ;;  %1192 = vst [vmem:[#allocation1 + $0x11] ss:$2 sm:$0xff] %v1182_v11  ;;  %1145 = vrot.lane.b32.xlu2 %v1136_v3, %s8676_s27  ;;  %v1138_v6 = vrot.slane %v1130_v10, 7  ;;  %v1244_v48 = vld [vmem:[%s8773_s23 + $0x8] sm:$0x77] }
  0x87   : > { %v8959_v45 = vld.sshfl [vmem:[#allocation1 + $0x30] sm:$0xff pattern:$0x75316420]  ;;  %v8961_v11 = vld.sshfl [vmem:[#allocation1 + $0x38] sm:$0xff pattern:$0x75316420] }
  0x88   : > { %13099 = vst [vmem:[#allocation42_spill] sm:$0xff] %v8959_v45  ;;  %v1245_v0 = vld [vmem:[%s8773_s23 + $0x10] sm:$0x77]  ;;  %v1319_v10 = vld [vmem:[%s8773_s23] sm:$0x77] }
  0x89   : > { %13100 = vst [vmem:[#allocation43_spill] sm:$0xff] %v8961_v11  ;;  %v1321_v11 = vld [vmem:[%s8773_s23 + $0x10] sm:$0x77] }
  0x8a   : > { %v8953_v42 = vld.sshfl [vmem:[#allocation1 + $0x20] sm:$0xff pattern:$0x75316420]  ;;  %v8955_v25 = vld.sshfl [vmem:[#allocation1 + $0x28] sm:$0xff pattern:$0x75316420] }
  0x8b   : > { %13098 = vst [vmem:[#allocation41_spill] sm:$0xff] %v8955_v25  ;;  %v1197_v52 = vld.sshfl [vmem:[#allocation1] sm:$0xff pattern:$0x75316420] }
  0x8c   : > { %1194 = vst [vmem:[#allocation1 + $0x21] ss:$2 sm:$0xff] %v1183_v21  ;;  %v1198_v7 = vld.sshfl [vmem:[#allocation1 + $0x8] sm:$0xff pattern:$0x75316420]  ;;  %1147 = vrot.lane.b32.xlu0 %v1137_v18, %s8676_s27 }
  0x8d   : > { %1251 = vst [vmem:[#allocation1] ss:$2 sm:$0xff] %v1243_v31  ;;  %v1200_v3 = vld.sshfl [vmem:[#allocation1 + $0x18] sm:$0xff pattern:$0x75316420] }
  0x8e   : > { %1149 = vrot.lane.b32.xlu1 %v1138_v6, %s8676_s27  ;;  %v1199_v9 = vld.sshfl [vmem:[#allocation1 + $0x10] sm:$0xff pattern:$0x75316420]  ;;  %920 = vst [vmem:[#allocation1 + $0x30] ss:$2 sm:$0xff] %v909_v34  ;;  %1205 = vrot.lane.b32.xlu2 %v1197_v52, %s13048_s28 }
  0x8f   : > { %1253 = vst [vmem:[#allocation1 + $0x10] ss:$2 sm:$0xff] %v1244_v48  ;;  %v1320_v6 = vld [vmem:[%s8773_s23 + $0x8] sm:$0x77] }
  0x93   : > { %v8968_v31 = vld.sshfl [vmem:[#allocation1 + $0x20] sm:$0xff pattern:$0x75316420]  ;;  %v8970_v21 = vld.sshfl [vmem:[#allocation1 + $0x28] sm:$0xff pattern:$0x75316420] }
  0x94   : > { %13101 = vst [vmem:[#allocation44_spill] sm:$0xff] %v8970_v21  ;;  %v1258_v18 = vld.sshfl [vmem:[#allocation1] sm:$0xff pattern:$0x75316420]  ;;  %1207 = vrot.lane.b32.xlu0 %v1198_v7, %s13048_s28  ;;  %v1458_v21 = vld [vmem:[%s8773_s23 + $0x8] sm:$0x77] }
  0x95   : > { %1255 = vst [vmem:[#allocation1 + $0x20] ss:$2 sm:$0xff] %v1245_v0  ;;  %v1259_v45 = vld.sshfl [vmem:[#allocation1 + $0x8] sm:$0xff pattern:$0x75316420] }
  0x96   : > { %1327 = vst [vmem:[#allocation1] ss:$2 sm:$0xff] %v1319_v10  ;;  %1209 = vrot.lane.b32.xlu1 %v1199_v9, %s13048_s28  ;;  %v1260_v48 = vld.sshfl [vmem:[#allocation1 + $0x10] sm:$0xff pattern:$0x75316420]  ;;  %v1267_v52 = vrot.slane %v1259_v45, 1  ;;  %1211 = vrot.lane.b32.xlu2 %v1200_v3, %s13048_s28 }
  0x97   : > { %v1261_v34 = vld.sshfl [vmem:[#allocation1 + $0x18] sm:$0xff pattern:$0x75316420]  ;;  %v8977_v53 = vld.sshfl [vmem:[#allocation1 + $0x30] sm:$0xff pattern:$0x75316420] }
  0x98   : > { %1329 = vst [vmem:[#allocation1 + $0x10] ss:$2 sm:$0xff] %v1320_v6  ;;  %v1268_v36 = vrot.slane %v1260_v48, 1  ;;  %v8983_v9 = vld.sshfl [vmem:[#allocation1 + $0x38] sm:$0xff pattern:$0x75316420] }
  0x99   : > { %13102 = vst [vmem:[#allocation45_spill] sm:$0xff] %v8977_v53  ;;  %v1389_v6 = vld [vmem:[%s8773_s23 + $0x8] sm:$0x77]  ;;  %v1266_v45 = vrot.slane %v1258_v18, 1  ;;  %v1390_v48 = vld [vmem:[%s8773_s23 + $0x10] sm:$0x77] }
  0x9a   : > { %13104 = vst [vmem:[#allocation47_spill] sm:$0xff] %v8983_v9 }
  0x9b   : > { %981 = vst [vmem:[#allocation1 + $0x30] ss:$2 sm:$0xff] %v970_v62 }
  0x9c   : > { %v1262_v0 = vld.sshfl [vmem:[#allocation1 + $0x20] sm:$0xff pattern:$0x75316420]  ;;  %v8981_v10 = vld.sshfl [vmem:[#allocation1 + $0x28] sm:$0xff pattern:$0x75316420]  ;;  %1276 = vrot.lane.b32.xlu0 %v1267_v52, %s8678_s29 }
  0x9d   : > { %13103 = vst [vmem:[#allocation46_spill] sm:$0xff] %v8981_v10  ;;  %v1335_v7 = vld.sshfl [vmem:[#allocation1 + $0x8] sm:$0xff pattern:$0x75316420] }
  0x9e   : > { %1331 = vst [vmem:[#allocation1 + $0x20] ss:$2 sm:$0xff] %v1321_v11  ;;  %v1334_v56 = vld.sshfl [vmem:[#allocation1] sm:$0xff pattern:$0x75316420]  ;;  %1278 = vrot.lane.b32.xlu1 %v1268_v36, %s8678_s29  ;;  %1274 = vrot.lane.b32.xlu2 %v1266_v45, %s8678_s29  ;;  %v1343_v18 = vrot.slane %v1335_v7, 6 }
  0x9f   : > { %1396 = vst [vmem:[#allocation1] ss:$2 sm:$0xff] %v1388_v28  ;;  %v1336_v3 = vld.sshfl [vmem:[#allocation1 + $0x10] sm:$0xff pattern:$0x75316420]  ;;  %v1270_v28 = vrot.slane %v1262_v0, 1 }
  0xa0   : > { %v1337_v53 = vld.sshfl [vmem:[#allocation1 + $0x18] sm:$0xff pattern:$0x75316420]  ;;  %v1457_v11 = vld [vmem:[%s8773_s23] sm:$0x77]  ;;  %v1269_v36 = vrot.slane %v1261_v34, 1 }
  0xa1   : > { %1398 = vst [vmem:[#allocation1 + $0x10] ss:$2 sm:$0xff] %v1389_v6  ;;  %v1459_v45 = vld [vmem:[%s8773_s23 + $0x10] sm:$0x77]  ;;  %v1344_v25 = vrot.slane %v1336_v3, 6  ;;  %v1345_v49 = vrot.slane %v1337_v53, 6 }
  0xa2   : > { %v8995_v51 = vld.sshfl [vmem:[#allocation1 + $0x30] sm:$0xff pattern:$0x75316420]  ;;  %v8997_v6 = vld.sshfl [vmem:[#allocation1 + $0x38] sm:$0xff pattern:$0x75316420] }
  0xa3   : > { %13106 = vst [vmem:[#allocation49_spill] sm:$0xff] %v8995_v51  ;;  %v1342_v51 = vrot.slane %v1334_v56, 6  ;;  %v1770_v10 = vld [vmem:[%s8773_s23 + $0xc] sm:$0x77] }
  0xa4   : > { %13107 = vst [vmem:[#allocation50_spill] sm:$0xff] %v8997_v6  ;;  %1282 = vrot.lane.b32.xlu0 %v1270_v28, %s8678_s29 }
  0xa5   : > { %v1338_v63 = vld.sshfl [vmem:[#allocation1 + $0x20] sm:$0xff pattern:$0x75316420]  ;;  %v8991_v9 = vld.sshfl [vmem:[#allocation1 + $0x28] sm:$0xff pattern:$0x75316420] }
  0xa6   : > { %13105 = vst [vmem:[#allocation48_spill] sm:$0xff] %v8991_v9  ;;  %v1404_v62 = vld.sshfl [vmem:[#allocation1 + $0x8] sm:$0xff pattern:$0x75316420]  ;;  %1352 = vrot.lane.b32.xlu1 %v1343_v18, %s8679_s30  ;;  %1280 = vrot.lane.b32.xlu2 %v1269_v36, %s8678_s29  ;;  %v1346_v6 = vrot.slane %v1338_v63, 6 }
  0xa7   : > { %1400 = vst [vmem:[#allocation1 + $0x20] ss:$2 sm:$0xff] %v1390_v48  ;;  %v1403_v52 = vld.sshfl [vmem:[#allocation1] sm:$0xff pattern:$0x75316420] }
  0xa8   : > { %1465 = vst [vmem:[#allocation1] ss:$2 sm:$0xff] %v1457_v11  ;;  %v1405_v0 = vld.sshfl [vmem:[#allocation1 + $0x10] sm:$0xff pattern:$0x75316420] }
  0xa9   : > { %v1406_v7 = vld.sshfl [vmem:[#allocation1 + $0x18] sm:$0xff pattern:$0x75316420]  ;;  %v1518_v48 = vld [vmem:[%s8773_s23] sm:$0x77] }
  0xaa   : > { %1467 = vst [vmem:[#allocation1 + $0x10] ss:$2 sm:$0xff] %v1458_v21  ;;  %v1520_v36 = vld [vmem:[%s8773_s23 + $0x10] sm:$0x77] }
  0xab   : > { %1050 = vst [vmem:[#allocation1 + $0x30] ss:$2 sm:$0xff] %v1039_v20 }
  0xac   : > { %1350 = vrot.lane.b32.xlu0 %v1342_v51, %s8679_s30  ;;  %v1411_v51 = vrot.slane %v1403_v52, 3 }
  0xae   : > { %v1407_v34 = vld.sshfl [vmem:[#allocation1 + $0x20] sm:$0xff pattern:$0x75316420]  ;;  %v9004_v11 = vld.sshfl [vmem:[#allocation1 + $0x28] sm:$0xff pattern:$0x75316420]  ;;  %1358 = vrot.lane.b32.xlu1 %v1346_v6, %s8679_s30  ;;  %1354 = vrot.lane.b32.xlu2 %v1344_v25, %s8679_s30 }
  0xaf   : > { %13108 = vst [vmem:[#allocation51_spill] sm:$0xff] %v9004_v11  ;;  %v9006_v28 = vld.sshfl [vmem:[#allocation1 + $0x8] sm:$0xff pattern:$0x75316420]  ;;  %v1322_v11 = vld [vmem:[%s8773_s23 + $0x18] sm:$0x77] }
  0xb0   : > { %1469 = vst [vmem:[#allocation1 + $0x20] ss:$2 sm:$0xff] %v1459_v45  ;;  %v1472_v18 = vld.sshfl [vmem:[#allocation1] sm:$0xff pattern:$0x75316420]  ;;  %v1412_v45 = vrot.slane %v1404_v62, 3 }
  0xb1   : > { %1526 = vst [vmem:[#allocation1] ss:$2 sm:$0xff] %v1518_v48  ;;  %v1474_v20 = vld.sshfl [vmem:[#allocation1 + $0x10] sm:$0xff pattern:$0x75316420]  ;;  %v1413_v62 = vrot.slane %v1405_v0, 3 }
  0xb2   : > { %v9010_v21 = vld.sshfl [vmem:[#allocation1 + $0x18] sm:$0xff pattern:$0x75316420]  ;;  %v9015_v63 = vld.sshfl [vmem:[#allocation1 + $0x30] sm:$0xff pattern:$0x75316420] }
  0xb3   : > { %1528 = vst [vmem:[#allocation1 + $0x10] ss:$2 sm:$0xff] %v1519_v41  ;;  %v9022_v6 = vld.sshfl [vmem:[#allocation1 + $0x38] sm:$0xff pattern:$0x75316420] }
  0xb4   : > { %13109 = vst [vmem:[#allocation52_spill] sm:$0xff] %v9015_v63  ;;  %1356 = vrot.lane.b32.xlu0 %v1345_v49, %s8679_s30  ;;  %v1587_v41 = vld [vmem:[%s8773_s23] sm:$0x77]  ;;  %v1588_v25 = vld [vmem:[%s8773_s23 + $0x8] sm:$0x77] }
  0xb5   : > { %13110 = vst [vmem:[#allocation53_spill] sm:$0xff] %v9022_v6 }
  0xb6   : > { %1126 = vst [vmem:[#allocation1 + $0x30] ss:$2 sm:$0xff] %v1115_v17  ;;  %1419 = vrot.lane.b32.xlu1 %v1411_v51, %s8680_s12  ;;  %1421 = vrot.lane.b32.xlu2 %v1412_v45, %s8680_s12  ;;  %v1184_v17 = vld [vmem:[%s8773_s23 + $0x18] sm:$0x77]  ;;  %v1415_v51 = vrot.slane %v1407_v34, 3 }
  0xb7   : > { %v9018_v56 = vld.sshfl [vmem:[#allocation1 + $0x20] sm:$0xff pattern:$0x75316420]  ;;  %v9020_v3 = vld.sshfl [vmem:[#allocation1 + $0x28] sm:$0xff pattern:$0x75316420] }
  0xb8   : > { %1530 = vst [vmem:[#allocation1 + $0x20] ss:$2 sm:$0xff] %v1520_v36  ;;  %v1534_v48 = vld.sshfl [vmem:[#allocation1 + $0x8] sm:$0xff pattern:$0x75316420]  ;;  %v1414_v36 = vrot.slane %v1406_v7, 3 }
  0xb9   : > { %v9024_v53 = vld.sshfl [vmem:[#allocation1] sm:$0xff pattern:$0x75316420]  ;;  %v1589_v45 = vld [vmem:[%s8773_s23 + $0x10] sm:$0x77] }
  0xba   : > { %v9030_v63 = vld.sshfl [vmem:[#allocation1 + $0x10] sm:$0xff pattern:$0x75316420]  ;;  %v9032_v52 = vld.sshfl [vmem:[#allocation1 + $0x18] sm:$0xff pattern:$0x75316420] }
  0xbb   : > { %1595 = vst [vmem:[#allocation1] ss:$2 sm:$0xff] %v1587_v41  ;;  %v1663_v41 = vld [vmem:[%s8773_s23] sm:$0x77]  ;;  %v1543_v9 = vrot.slane %v9030_v63, 5  ;;  %v1541_v61 = vrot.slane %v9024_v53, 5 }
  0xbc   : > { %1597 = vst [vmem:[#allocation1 + $0x10] ss:$2 sm:$0xff] %v1588_v25  ;;  %1423 = vrot.lane.b32.xlu0 %v1413_v62, %s8680_s12  ;;  %v1664_v25 = vld [vmem:[%s8773_s23 + $0x8] sm:$0x77]  ;;  %v1246_v62 = vld [vmem:[%s8773_s23 + $0x18] sm:$0x77] }
  0xbd   : > { %v9036_v49 = vld.sshfl [vmem:[#allocation1 + $0x30] sm:$0xff pattern:$0x75316420]  ;;  %v9038_v6 = vld.sshfl [vmem:[#allocation1 + $0x38] sm:$0xff pattern:$0x75316420] }
  0xbe   : > { %13111 = vst [vmem:[#allocation54_spill] sm:$0xff] %v9036_v49  ;;  %1425 = vrot.lane.b32.xlu1 %v1414_v36, %s8680_s12  ;;  %1427 = vrot.lane.b32.xlu2 %v1415_v51, %s8680_s12 }
  0xbf   : > { %13112 = vst [vmem:[#allocation55_spill] sm:$0xff] %v9038_v6  ;;  %v1537_v16 = vld.sshfl [vmem:[#allocation1 + $0x20] sm:$0xff pattern:$0x75316420] }
  0xc0   : > { %1196 = vst [vmem:[#allocation1 + $0x31] ss:$2 sm:$0xff] %v1184_v17  ;;  %v9040_v13 = vld.sshfl [vmem:[#allocation1 + $0x28] sm:$0xff pattern:$0x75316420] }
  0xc1   : > { %1599 = vst [vmem:[#allocation1 + $0x20] ss:$2 sm:$0xff] %v1589_v45  ;;  %v1665_v45 = vld [vmem:[%s8773_s23 + $0x10] sm:$0x77] }
  0xc2   : > { %v9046_v0 = vld.sshfl [vmem:[#allocation1 + $0x8] sm:$0xff pattern:$0x75316420]  ;;  %v9048_v7 = vld.sshfl [vmem:[#allocation1] sm:$0xff pattern:$0x75316420] }
  0xc3   : > { %v9052_v34 = vld.sshfl [vmem:[#allocation1 + $0x10] sm:$0xff pattern:$0x75316420]  ;;  %1671 = vst [vmem:[#allocation1] ss:$2 sm:$0xff] %v1663_v41  ;;  %v9070_v41 = vpop.permute.xlu2 %933 }
  0xc4   : > { %v9054_v17 = vld.sshfl [vmem:[#allocation1 + $0x18] sm:$0xff pattern:$0x75316420]  ;;  %1484 = vrot.lane.b32.xlu0 %v1474_v20, %s8681_s13  ;;  %v1612_v63 = vrot.slane %v9052_v34, 2 }
  0xc5   : > { %1673 = vst [vmem:[#allocation1 + $0x10] ss:$2 sm:$0xff] %v1664_v25  ;;  %v1733_v25 = vld [vmem:[%s8773_s23 + $0xc] sm:$0x77] }
  0xc6   : > { %1480 = vrot.lane.b32.xlu1 %v1472_v18, %s8681_s13  ;;  %1482 = vrot.lane.b32.xlu2 %v9006_v28, %s8681_s13 }
  0xc7   : > { %v9057_v36 = vld.sshfl [vmem:[#allocation1 + $0x30] sm:$0xff pattern:$0x75316420]  ;;  %v9059_v6 = vld.sshfl [vmem:[#allocation1 + $0x38] sm:$0xff pattern:$0x75316420] }
  0xc8   : > { %13113 = vst [vmem:[#allocation56_spill] sm:$0xff] %v9057_v36  ;;  %v9064_v51 = vld.sshfl [vmem:[#allocation1 + $0x20] sm:$0xff pattern:$0x75316420] }
  0xc9   : > { %13114 = vst [vmem:[#allocation57_spill] sm:$0xff] %v9059_v6  ;;  %v9066_v49 = vld.sshfl [vmem:[#allocation1 + $0x28] sm:$0xff pattern:$0x75316420] }
  0xca   : > { %1257 = vst [vmem:[#allocation1 + $0x30] ss:$2 sm:$0xff] %v1246_v62  ;;  %v1542_v62 = vrot.slane %v1534_v48, 5  ;;  %v9080_v28 = vld.sshfl [vmem:[#allocation1 + $0x8] sm:$0xff pattern:$0x75316420] }
  0xcb   : > { %1675 = vst [vmem:[#allocation1 + $0x20] ss:$2 sm:$0xff] %v1665_v45  ;;  %v9082_v18 = vld.sshfl [vmem:[#allocation1] sm:$0xff pattern:$0x75316420] }
  0xcc   : > { %v9073_v6 = vld.sshfl [vmem:[#allocation1 + $0x10] sm:$0xff pattern:$0x75316420]  ;;  %v9075_v20 = vld.sshfl [vmem:[#allocation1 + $0x18] sm:$0xff pattern:$0x75316420]  ;;  %1551 = vrot.lane.b32.xlu0 %v1542_v62, %s8682_s14 }
  0xcd   : > { %1743 = vst [vmem:[#allocation1 + $0x11] ss:$2 sm:$0xff] %v1733_v25  ;;  %v1732_v48 = vld [vmem:[%s8773_s23 + $0x4] sm:$0x77]  ;;  %v1545_v62 = vrot.slane %v1537_v16, 5 }
  0xce   : > { %1486 = vrot.lane.b32.xlu1 %v9010_v21, %s8681_s13  ;;  %1488 = vrot.lane.b32.xlu2 %v9018_v56, %s8681_s13  ;;  %v9097_v21 = vpop.permute.xlu2 %1000  ;;  %1741 = vst [vmem:[#allocation1 + $0x1] ss:$2 sm:$0xff] %v1732_v48  ;;  %v1769_v56 = vld [vmem:[%s8773_s23 + $0x4] sm:$0x77]  ;;  %v1771_v48 = vld [vmem:[%s8773_s23 + $0x14] sm:$0x77] }
  0xcf   : > { %13117 = vst [vmem:[#allocation60_spill] sm:$0xff] %v9097_v21 }
  0xd1   : > { %v9084_v36 = vld.sshfl [vmem:[#allocation1 + $0x30] sm:$0xff pattern:$0x75316420]  ;;  %v9086_v45 = vld.sshfl [vmem:[#allocation1 + $0x38] sm:$0xff pattern:$0x75316420] }
  0xd2   : > { %13115 = vst [vmem:[#allocation58_spill] sm:$0xff] %v9084_v36  ;;  %v9091_v14 = vld.sshfl [vmem:[#allocation1 + $0x20] sm:$0xff pattern:$0x75316420]  ;;  %v1905_v36 = vld [vmem:[%s8773_s23 + $0x1c] sm:$0x7] }
  0xd3   : > { %13116 = vst [vmem:[#allocation59_spill] sm:$0xff] %v9086_v45  ;;  %v9093_v25 = vld.sshfl [vmem:[#allocation1 + $0x28] sm:$0xff pattern:$0x75316420] }
  0xd4   : > { %1745 = vst [vmem:[#allocation1 + $0x21] ss:$2 sm:$0xff] %v1734_v30  ;;  %v1750_v45 = vld.sshfl [vmem:[#allocation1 + $0x10] sm:$0xff pattern:$0x75316420]  ;;  %1557 = vrot.lane.b32.xlu0 %v1545_v62, %s8682_s14  ;;  %v1611_v30 = vrot.slane %v9046_v0, 2 }
  0xd5   : > { %1333 = vst [vmem:[#allocation1 + $0x30] ss:$2 sm:$0xff] %v1322_v11  ;;  %v1751_v29 = vld.sshfl [vmem:[#allocation1 + $0x18] sm:$0xff pattern:$0x75316420] }
  0xd6   : > { %1764 = vst [vmem:[#allocation2 + $0x198] sm:$0x70] %v1750_v45  ;;  %1553 = vrot.lane.b32.xlu1 %v1543_v9, %s8682_s14  ;;  %v1748_v16 = vld.sshfl [vmem:[#allocation1] sm:$0xff pattern:$0x75316420]  ;;  %1549 = vrot.lane.b32.xlu2 %v1541_v61, %s8682_s14  ;;  %v1544_v9 = vrot.slane %v9032_v52, 5 }
  0xd7   : > { %1779 = vst [vmem:[#allocation1 + $0x10] ss:$2 sm:$0xff] %v1770_v10  ;;  %v1749_v47 = vld.sshfl [vmem:[#allocation1 + $0x8] sm:$0xff pattern:$0x75316420]  ;;  %v1614_v52 = vrot.slane %v9064_v51, 2 }
  0xd8   : > { %1765 = vst [vmem:[#allocation2 + $0x1a0] sm:$0x70] %v1751_v29  ;;  %v9109_v53 = vpop.permute.xlu2 %1071  ;;  %v1391_v45 = vld [vmem:[%s8773_s23 + $0x18] sm:$0x77] }
  0xd9   : > { %1777 = vst [vmem:[#allocation1] ss:$2 sm:$0xff] %v1769_v56  ;;  %v930_v0 = vpop.permute.xlu0 %929  ;;  %v1687_v56 = vrot.slane %v9080_v28, 7 }
  0xda   : > { %1762 = vst [vmem:[#allocation2 + $0x188] sm:$0x70] %v1748_v16  ;;  %v932_v34 = vpop.permute.xlu1 %931  ;;  %v1610_v16 = vrot.slane %v9048_v7, 2 }
  0xdb   : > { %v1752_v11 = vld.sshfl [vmem:[#allocation1 + $0x20] sm:$0xff pattern:$0x75316420]  ;;  %v1753_v10 = vld.sshfl [vmem:[#allocation1 + $0x28] sm:$0xff pattern:$0x75316420]  ;;  %v947_v62 = vsel %vm13059_vm0, %v932_v34, %v9070_v41 }
  0xdc   : > { %1763 = vst [vmem:[#allocation2 + $0x190] sm:$0x70] %v1749_v47  ;;  %v9112_v29 = vld.sshfl [vmem:[#allocation1 + $0x30] sm:$0xff pattern:$0x75316420]  ;;  %1620 = vrot.lane.b32.xlu0 %v1611_v30, %s8683_s15  ;;  %v946_v47 = vsel %vm13059_vm0, %v930_v0, %v932_v34  ;;  %v1613_v34 = vrot.slane %v9054_v17, 2 }
  0xdd   : > { %1781 = vst [vmem:[#allocation1 + $0x20] ss:$2 sm:$0xff] %v1771_v48  ;;  %v9115_v61 = vld.sshfl [vmem:[#allocation1 + $0x38] sm:$0xff pattern:$0x75316420] }
  0xde   : > { %13118 = vst [vmem:[#allocation61_spill] sm:$0xff] %v9112_v29  ;;  %1622 = vrot.lane.b32.xlu1 %v1612_v63, %s8683_s15  ;;  %1555 = vrot.lane.b32.xlu2 %v1544_v9, %s8682_s14  ;;  %v1460_v63 = vld [vmem:[%s8773_s23 + $0x18] sm:$0x77]  ;;  %v1690_v9 = vrot.slane %v9091_v14, 7 }
  0xdf   : > { %1766 = vst [vmem:[#allocation2 + $0x1a8] sm:$0x70] %v1752_v11 }
  0xe0   : > { %13119 = vst [vmem:[#allocation62_spill] sm:$0xff] %v9115_v61  ;;  %v9125_v48 = vpop.permute.xlu2 %1145 }
  0xe1   : > { %1767 = vst [vmem:[#allocation2 + $0x1b0] sm:$0x70] %v1753_v10  ;;  %v9128_v30 = vpop.permute.xlu0 %935 }
  0xe2   : > { %1402 = vst [vmem:[#allocation1 + $0x30] ss:$2 sm:$0xff] %v1391_v45  ;;  %v948_v51 = vsel %vm13059_vm0, %v9070_v41, %v9128_v30  ;;  %v1686_v45 = vrot.slane %v9082_v18, 7  ;;  %v1521_v41 = vld [vmem:[%s8773_s23 + $0x18] sm:$0x77]  ;;  %v1689_v18 = vrot.slane %v9075_v20, 7 }
  0xe3   : > { %960 = vst [vmem:[#allocation2 + $0xa8] sm:$0x7] %v946_v47  ;;  %v1787_v47 = vld.sshfl [vmem:[#allocation1 + $0x18] sm:$0xff pattern:$0x75316420] }
  0xe4   : > { %961 = vst [vmem:[#allocation2 + $0xb0] sm:$0x7] %v947_v62  ;;  %1626 = vrot.lane.b32.xlu0 %v1614_v52, %s8683_s15 }
  0xe5   : > { %13120 = vst [vmem:[#allocation63_spill] sm:$0xff] %v9128_v30  ;;  %v1840_v30 = vld [vmem:[%s8773_s23 + $0xc] sm:$0x77] }
  0xe6   : > { %1696 = vrot.lane.b32.xlu1 %v1687_v56, %s8684_s16  ;;  %962 = vst [vmem:[#allocation2 + $0xb8] sm:$0x7] %v948_v51  ;;  %v999_v7 = vpop.permute.xlu1 %998  ;;  %1618 = vrot.lane.b32.xlu2 %v1610_v16, %s8683_s15 }
  0xe7   : > { %v1015_v10 = vsel %vm1014_vm1, %v999_v7, %v9097_v21  ;;  %v1688_v7 = vrot.slane %v9073_v6, 7 }
  0xe8   : > { %1029 = vst [vmem:[#allocation2 + $0xa8] sm:$0x38] %v1015_v10  ;;  %v9145_v0 = vpop.permute.xlu2 %1205  ;;  %v1590_v10 = vld [vmem:[%s8773_s23 + $0x18] sm:$0x77] }
  0xe9   : > { %v9132_v11 = vld.sshfl [vmem:[#allocation1 + $0x30] sm:$0xff pattern:$0x75316420]  ;;  %v9138_v28 = vld.sshfl [vmem:[#allocation1 + $0x38] sm:$0xff pattern:$0x75316420] }
  0xea   : > { %13121 = vst [vmem:[#allocation64_spill] sm:$0xff] %v9132_v11 }
  0xeb   : > { %13122 = vst [vmem:[#allocation65_spill] sm:$0xff] %v9138_v28 }
  0xec   : > { %1471 = vst [vmem:[#allocation1 + $0x30] ss:$2 sm:$0xff] %v1460_v63  ;;  %1694 = vrot.lane.b32.xlu0 %v1686_v45, %s8684_s16  ;;  %v1794_v63 = vrot.slane %v1787_v47, 1  ;;  %v1786_v45 = vld.sshfl [vmem:[#allocation1 + $0x10] sm:$0xff pattern:$0x75316420] }
  0xed   : > { %1849 = vst [vmem:[#allocation1 + $0x10] ss:$2 sm:$0xff] %v1840_v30 }
  0xee   : > { %1702 = vrot.lane.b32.xlu1 %v1690_v9, %s8684_s16  ;;  %v1068_v62 = vpop.permute.xlu0 %1067  ;;  %1624 = vrot.lane.b32.xlu2 %v1613_v34, %s8683_s15  ;;  %v1788_v9 = vld.sshfl [vmem:[#allocation1 + $0x20] sm:$0xff pattern:$0x75316420] }
  0xef   : > { %v1070_v52 = vpop.permute.xlu1 %1069 }
  0xf0   : > { %v1084_v14 = vsel %vm1083_vm2, %v1068_v62, %v1070_v52  ;;  %v1085_v17 = vsel %vm1083_vm2, %v1070_v52, %v9109_v53  ;;  %v9160_v51 = vpop.permute.xlu2 %1211 }
  0xf1   : > { %1098 = vst [vmem:[#allocation2 + $0xa8] sm:$0xc0] %v1084_v14 }
  0xf2   : > { %13123 = vst [vmem:[#allocation66_spill] sm:$0xff] %v9160_v51 }
  0xf3   : > { %v9151_v56 = vld.sshfl [vmem:[#allocation1 + $0x30] sm:$0xff pattern:$0x75316420]  ;;  %v9153_v16 = vld.sshfl [vmem:[#allocation1 + $0x38] sm:$0xff pattern:$0x75316420] }
  0xf4   : > { %1532 = vst [vmem:[#allocation1 + $0x30] ss:$2 sm:$0xff] %v1521_v41  ;;  %1700 = vrot.lane.b32.xlu0 %v1689_v18, %s8684_s16  ;;  %v1784_v41 = vld.sshfl [vmem:[#allocation1] sm:$0xff pattern:$0x75316420]  ;;  %v1795_v18 = vrot.slane %v1788_v9, 1 }
  0xf5   : > { %1099 = vst [vmem:[#allocation2 + $0xb0] sm:$0xc0] %v1085_v17 }
  0xf6   : > { %1105 = vst [vmem:[#allocation2 + $0xe0] sm:$0x1] %v1084_v14  ;;  %1804 = vrot.lane.b32.xlu1 %v1794_v63, %s8685_s19  ;;  %v9166_v34 = vpop.permute.xlu0 %1073  ;;  %1698 = vrot.lane.b32.xlu2 %v1688_v7, %s8684_s16  ;;  %v1785_v14 = vld.sshfl [vmem:[#allocation1 + $0x8] sm:$0xff pattern:$0x75316420]  ;;  %v1791_v7 = vrot.slane %v1784_v41, 1 }
  0xf7   : > { %1106 = vst [vmem:[#allocation2 + $0xe8] sm:$0x1] %v1085_v17  ;;  %v1086_v6 = vsel %vm1083_vm2, %v9109_v53, %v9166_v34  ;;  %v1793_v17 = vrot.slane %v1786_v45, 1  ;;  %v1839_v63 = vld [vmem:[%s8773_s23 + $0x4] sm:$0x77]  ;;  %v1792_v29 = vrot.slane %v1785_v14, 1 }
  0xf8   : > { %v1144_v20 = vpop.permute.xlu1 %1143  ;;  %1100 = vst [vmem:[#allocation2 + $0xb8] sm:$0xc0] %v1086_v6  ;;  %v9179_v28 = vpop.permute.xlu2 %1274  ;;  %v1666_v53 = vld [vmem:[%s8773_s23 + $0x18] sm:$0x77] }
  0xf9   : > { %v1160_v52 = vsel %vm1159_vm3, %v1144_v20, %v9125_v48  ;;  %1107 = vst [vmem:[#allocation2 + $0xf0] sm:$0x1] %v1086_v6 }
  0xfa   : > { %1174 = vst [vmem:[#allocation2 + $0xe0] sm:$0xe] %v1160_v52 }
  0xfb   : > { %v9168_v47 = vld.sshfl [vmem:[#allocation1 + $0x30] sm:$0xff pattern:$0x75316420]  ;;  %v9170_v62 = vld.sshfl [vmem:[#allocation1 + $0x38] sm:$0xff pattern:$0x75316420] }
  0xfc   : > { %1601 = vst [vmem:[#allocation1 + $0x30] ss:$2 sm:$0xff] %v1590_v10  ;;  %1802 = vrot.lane.b32.xlu0 %v1793_v17, %s8685_s19  ;;  %v1789_v10 = vld.sshfl [vmem:[#allocation1 + $0x28] sm:$0xff pattern:$0x75316420] }
  0xfd   : > { %1847 = vst [vmem:[#allocation1] ss:$2 sm:$0xff] %v1839_v63  ;;  %v1796_v30 = vrot.slane %v1789_v10, 1  ;;  %v1841_v63 = vld [vmem:[%s8773_s23 + $0x14] sm:$0x77] }
  0xfe   : > { %1806 = vrot.lane.b32.xlu1 %v1795_v18, %s8685_s19  ;;  %v1148_v20 = vpop.permute.xlu0 %1147  ;;  %1798 = vrot.lane.b32.xlu2 %v1791_v7, %s8685_s19  ;;  %v1902_v18 = vld [vmem:[%s8773_s23 + $0x4] sm:$0x77]  ;;  %v1735_v7 = vld [vmem:[%s8773_s23 + $0x1c] sm:$0x7]  ;;  %1851 = vst [vmem:[#allocation1 + $0x20] ss:$2 sm:$0xff] %v1841_v63 }
  0xff   : > { %v1161_v41 = vsel %vm1159_vm3, %v9125_v48, %v1148_v20  ;;  %v1772_v63 = vld [vmem:[%s8773_s23 + $0x1c] sm:$0x7] }
 0x100   : > { %v9185_v45 = vpop.permute.xlu1 %1149  ;;  %1175 = vst [vmem:[#allocation2 + $0xe8] sm:$0xe] %v1161_v41  ;;  %v9196_v17 = vpop.permute.xlu2 %1280 }
 0x101   : > { %13124 = vst [vmem:[#allocation67_spill] sm:$0xff] %v9185_v45  ;;  %v1162_v52 = vsel %vm1159_vm3, %v1148_v20, %v9185_v45  ;;  %v1903_v45 = vld [vmem:[%s8773_s23 + $0xc] sm:$0x77] }
 0x102   : > { %1176 = vst [vmem:[#allocation2 + $0xf0] sm:$0xe] %v1162_v52 }
 0x103   : > { %v9187_v9 = vld.sshfl [vmem:[#allocation1 + $0x30] sm:$0xff pattern:$0x75316420]  ;;  %v9189_v6 = vld.sshfl [vmem:[#allocation1 + $0x38] sm:$0xff pattern:$0x75316420] }
 0x104   : > { %1677 = vst [vmem:[#allocation1 + $0x30] ss:$2 sm:$0xff] %v1666_v53  ;;  %v1854_v61 = vld.sshfl [vmem:[#allocation1] sm:$0xff pattern:$0x75316420]  ;;  %1808 = vrot.lane.b32.xlu0 %v1796_v30, %s8685_s19 }
 0x105   : > { %v1855_v11 = vld.sshfl [vmem:[#allocation1 + $0x8] sm:$0xff pattern:$0x75316420]  ;;  %v1861_v21 = vrot.slane %v1854_v61, 6 }
 0x106   : > { %1910 = vst [vmem:[#allocation1] ss:$2 sm:$0xff] %v1902_v18  ;;  %v1208_v10 = vpop.permute.xlu0 %1207  ;;  %1800 = vrot.lane.b32.xlu2 %v1792_v29, %s8685_s19  ;;  %v1862_v30 = vrot.slane %v1855_v11, 6  ;;  %v1856_v29 = vld.sshfl [vmem:[#allocation1 + $0x10] sm:$0xff pattern:$0x75316420] }
 0x107   : > { %v1222_v14 = vsel %vm1221_vm4, %v9145_v0, %v1208_v10  ;;  %v1857_v0 = vld.sshfl [vmem:[#allocation1 + $0x18] sm:$0xff pattern:$0x75316420]  ;;  %v9218_v44 = vld.sshfl [vmem:[#allocation1 + $0x28] sm:$0xff pattern:$0x75316420] }
 0x108   : > { %v1210_v20 = vpop.permute.xlu1 %1209  ;;  %1236 = vst [vmem:[#allocation2 + $0xe0] sm:$0x70] %v1222_v14  ;;  %v9212_v18 = vpop.permute.xlu2 %1354  ;;  %v1866_v8 = vrot.slane %v9218_v44, 6  ;;  %v1968_v44 = vld [vmem:[%s8773_s23 + $0x1c] sm:$0x7] }
 0x109   : > { %v1223_v41 = vsel %vm1221_vm4, %v1208_v10, %v1210_v20  ;;  %v1224_v52 = vsel %vm1221_vm4, %v1210_v20, %v9160_v51  ;;  %v1858_v10 = vld.sshfl [vmem:[#allocation1 + $0x20] sm:$0xff pattern:$0x75316420]  ;;  %1912 = vst [vmem:[#allocation1 + $0x10] ss:$2 sm:$0xff] %v1903_v45 }
 0x10a   : > { %1237 = vst [vmem:[#allocation2 + $0xe8] sm:$0x70] %v1223_v41  ;;  %v1966_v51 = vld [vmem:[%s8773_s23 + $0xc] sm:$0x77] }
 0x10b   : > { %v9202_v48 = vld.sshfl [vmem:[#allocation1 + $0x30] sm:$0xff pattern:$0x75316420]  ;;  %v9204_v53 = vld.sshfl [vmem:[#allocation1 + $0x38] sm:$0xff pattern:$0x75316420] }
 0x10c   : > { %1747 = vst [vmem:[#allocation1 + $0x31] ss:$2 sm:$0xff] %v1735_v7  ;;  %v1904_v7 = vld [vmem:[%s8773_s23 + $0x14] sm:$0x77]  ;;  %1870 = vrot.lane.b32.xlu0 %v1862_v30, %s8686_s20  ;;  %v1864_v30 = vrot.slane %v1857_v0, 6 }
 0x10d   : > { %1238 = vst [vmem:[#allocation2 + $0xf0] sm:$0x70] %v1224_v52  ;;  %v1917_v37 = vld.sshfl [vmem:[#allocation1] sm:$0xff pattern:$0x75316420] }
 0x10e   : > { %v1277_v11 = vpop.permute.xlu0 %1276  ;;  %1914 = vst [vmem:[#allocation1 + $0x20] ss:$2 sm:$0xff] %v1904_v7  ;;  %1868 = vrot.lane.b32.xlu2 %v1861_v21, %s8686_s20 }
 0x10f   : > { %v1291_v61 = vsel %vm13052_vm5, %v9179_v28, %v1277_v11 }
 0x110   : > { %v1279_v14 = vpop.permute.xlu1 %1278  ;;  %1305 = vst [vmem:[#allocation2 + $0xe0] sm:$0x80] %v1291_v61  ;;  %v9228_v45 = vpop.permute.xlu2 %1421 }
 0x111   : > { %v1292_v41 = vsel %vm13052_vm5, %v1277_v11, %v1279_v14  ;;  %v1293_v52 = vsel %vm13052_vm5, %v1279_v14, %v9196_v17  ;;  %1312 = vst [vmem:[#allocation2 + $0x118] sm:$0x3] %v1291_v61  ;;  %v1919_v61 = vld.sshfl [vmem:[#allocation1 + $0x10] sm:$0xff pattern:$0x75316420] }
 0x112   : > { %1306 = vst [vmem:[#allocation2 + $0xe8] sm:$0x80] %v1292_v41 }
 0x113   : > { %v9220_v20 = vld.sshfl [vmem:[#allocation1 + $0x30] sm:$0xff pattern:$0x75316420]  ;;  %1307 = vst [vmem:[#allocation2 + $0xf0] sm:$0x80] %v1293_v52 }
 0x114   : > { %13125 = vst [vmem:[#allocation68_spill] sm:$0xff] %v9220_v20 }
 0x115   : > { %1783 = vst [vmem:[#allocation1 + $0x30] ss:$2 sm:$0xff] %v1772_v63  ;;  %v1842_v63 = vld [vmem:[%s8773_s23 + $0x1c] sm:$0x7] }
 0x116   : > { %1313 = vst [vmem:[#allocation2 + $0x120] sm:$0x3] %v1292_v41  ;;  %v9231_v7 = vpop.permute.xlu0 %1282  ;;  %1874 = vrot.lane.b32.xlu2 %v1864_v30, %s8686_s20  ;;  %v1920_v41 = vld.sshfl [vmem:[#allocation1 + $0x18] sm:$0xff pattern:$0x75316420]  ;;  %v1865_v30 = vrot.slane %v1858_v10, 6 }
 0x117   : > { %1314 = vst [vmem:[#allocation2 + $0x128] sm:$0x3] %v1293_v52  ;;  %v1294_v14 = vsel %vm13052_vm5, %v9196_v17, %v9231_v7  ;;  %v1918_v17 = vld.sshfl [vmem:[#allocation1 + $0x8] sm:$0xff pattern:$0x75316420]  ;;  %vm13055_vm5 = vcmask 1011714  }
 0x118   : > { %13126 = vst [vmem:[#allocation69_spill] sm:$0xff] %v9231_v7  ;;  %v1353_v28 = vpop.permute.xlu1 %1352  ;;  %v9241_v52 = vpop.permute.xlu2 %1427  ;;  %v1921_v10 = vld.sshfl [vmem:[#allocation1 + $0x20] sm:$0xff pattern:$0x75316420] }
 0x119   : > { %v1368_v0 = vsel %vm13051_vm6, %v1353_v28, %v9212_v18  ;;  %1308 = vst [vmem:[#allocation2 + $0xf8] sm:$0x80] %v1294_v14 }
 0x11a   : > { %1315 = vst [vmem:[#allocation2 + $0x130] sm:$0x3] %v1294_v14  ;;  %v1965_v14 = vld [vmem:[%s8773_s23 + $0x4] sm:$0x77] }
 0x11b   : > { %1382 = vst [vmem:[#allocation2 + $0x120] sm:$0x1c] %v1368_v0  ;;  %v1967_v0 = vld [vmem:[%s8773_s23 + $0x14] sm:$0x77]  ;;  %s8689_s23 = smov 96  }
 0x11c   : > { %v1790_v21 = vld.sshfl [vmem:[#allocation1 + $0x30] sm:$0xff pattern:$0x75316420]  ;;  %1975 = vst [vmem:[#allocation1 + $0x10] ss:$2 sm:$0xff] %v1966_v51 }
 0x11d   : > { %v1797_v11 = vrot.slane %v1790_v21, 1  ;;  %1853 = vst [vmem:[#allocation1 + $0x30] ss:$2 sm:$0xff] %v1842_v63  ;;  %v1863_v63 = vrot.slane %v1856_v29, 6 }
 0x11e   : > { %v1351_v7 = vpop.permute.xlu0 %1350  ;;  %1876 = vrot.lane.b32.xlu2 %v1865_v30, %s8686_s20  ;;  %1973 = vst [vmem:[#allocation1] ss:$2 sm:$0xff] %v1965_v14  ;;  %v1922_v29 = vld.sshfl [vmem:[#allocation1 + $0x28] sm:$0xff pattern:$0x75316420]  ;;  %v1925_v30 = vrot.slane %v1918_v17, 3 }
 0x11f   : > { %1810 = vrot.lane.b32.xlu1 %v1797_v11, %s8685_s19  ;;  %v1367_v11 = vsel %vm13051_vm6, %v1351_v7, %v1353_v28  ;;  %1977 = vst [vmem:[#allocation1 + $0x20] ss:$2 sm:$0xff] %v1967_v0  ;;  %v1926_v17 = vrot.slane %v1919_v61, 3 }
 0x120   : > { %v9243_v20 = vpop.permute.xlu1 %1358  ;;  %1381 = vst [vmem:[#allocation2 + $0x118] sm:$0x1c] %v1367_v11  ;;  %v1483_v51 = vpop.permute.xlu2 %1482  ;;  %v1927_v11 = vrot.slane %v1920_v41, 3 }
 0x124   : > { %v1860_v21 = vld.sshfl [vmem:[#allocation1 + $0x30] sm:$0xff pattern:$0x75316420] }
 0x125   : > { %v1867_v43 = vrot.slane %v1860_v21, 6  ;;  %1916 = vst [vmem:[#allocation1 + $0x30] ss:$2 sm:$0xff] %v1905_v36  ;;  %v1924_v21 = vrot.slane %v1917_v37, 3 }
 0x126   : > { %v1357_v7 = vpop.permute.xlu0 %1356  ;;  %1878 = vrot.lane.b32.xlu2 %v1866_v8, %s8686_s20 }
 0x127   : > { %1872 = vrot.lane.b32.xlu1 %v1863_v63, %s8686_s20  ;;  %1880 = vrot.lane.b32.xlu0 %v1867_v43, %s8686_s20  ;;  %v1369_v28 = vsel %vm13051_vm6, %v9212_v18, %v1357_v7  ;;  %v1370_v43 = vsel %vm13051_vm6, %v1357_v7, %v9243_v20  ;;  %v1929_v18 = vrot.slane %v1922_v29, 3  ;;  %v1928_v29 = vrot.slane %v1921_v10, 3  ;;  %v1983_v10 = vld.sshfl [vmem:[#allocation1 + $0x18] sm:$0xff pattern:$0x75316420] }
 0x128   : > { %v1420_v36 = vpop.permute.xlu1 %1419  ;;  %1383 = vst [vmem:[#allocation2 + $0x128] sm:$0x1c] %v1369_v28  ;;  %v9262_v37 = vpop.permute.xlu2 %1488  ;;  %vm13054_vm6 = vcmask 1014789  }
 0x129   : > { %v1436_v63 = vsel %vm13050_vm7, %v1420_v36, %v9228_v45  ;;  %1384 = vst [vmem:[#allocation2 + $0x130] sm:$0x1c] %v1370_v43  ;;  %v1982_v36 = vld.sshfl [vmem:[#allocation1 + $0x10] sm:$0xff pattern:$0x75316420] }
 0x12a   : > { %1450 = vst [vmem:[#allocation2 + $0x118] sm:$0xe0] %v1436_v63 }
 0x12c   : > { %v1923_v8 = vld.sshfl [vmem:[#allocation1 + $0x30] sm:$0xff pattern:$0x75316420] }
 0x12d   : > { %1979 = vst [vmem:[#allocation1 + $0x30] ss:$2 sm:$0xff] %v1968_v44  ;;  %v1930_v41 = vrot.slane %v1923_v8, 3 }
 0x12e   : > { %v1424_v14 = vpop.permute.xlu0 %1423  ;;  %1935 = vrot.lane.b32.xlu2 %v1926_v17, %s8687_s21  ;;  %v1980_v17 = vld.sshfl [vmem:[#allocation1] sm:$0xff pattern:$0x75316420] }
 0x12f   : > { %1933 = vrot.lane.b32.xlu1 %v1925_v30, %s8687_s21  ;;  %1931 = vrot.lane.b32.xlu0 %v1924_v21, %s8687_s21  ;;  %v1437_v7 = vsel %vm13050_vm7, %v9228_v45, %v1424_v14 }
 0x130   : > { %v1426_v0 = vpop.permute.xlu1 %1425  ;;  %1451 = vst [vmem:[#allocation2 + $0x120] sm:$0xe0] %v1437_v7  ;;  %v1550_v61 = vpop.permute.xlu2 %1549 }
 0x131   : > { %v1438_v30 = vsel %vm13050_vm7, %v1424_v14, %v1426_v0  ;;  %v1439_v21 = vsel %vm13050_vm7, %v1426_v0, %v9241_v52  ;;  %vm13056_vm7 = vcmask 1008640  }
 0x132   : > { %1452 = vst [vmem:[#allocation2 + $0x128] sm:$0xe0] %v1438_v30  ;;  %v1063_v30 = vrot.slane %v8941_v59, 2 }
 0x133   : > { %1453 = vst [vmem:[#allocation2 + $0x130] sm:$0xe0] %v1439_v21  ;;  %v1984_v21 = vld.sshfl [vmem:[#allocation1 + $0x20] sm:$0xff pattern:$0x75316420] }
 0x134   : > { %v1986_v8 = vld.sshfl [vmem:[#allocation1 + $0x30] sm:$0xff pattern:$0x75316420] }
 0x136   : > { %v1485_v28 = vpop.permute.xlu0 %1484  ;;  %1943 = vrot.lane.b32.xlu2 %v1930_v41, %s8687_s21  ;;  %v1981_v41 = vld.sshfl [vmem:[#allocation1 + $0x8] sm:$0xff pattern:$0x75316420] }
 0x137   : > { %1941 = vrot.lane.b32.xlu1 %v1929_v18, %s8687_s21  ;;  %1937 = vrot.lane.b32.xlu0 %v1927_v11, %s8687_s21  ;;  %v1498_v45 = vsel %vm1496_vm8, %v1483_v51, %v1485_v28 }
 0x138   : > { %v1481_v43 = vpop.permute.xlu1 %1480  ;;  %1512 = vst [vmem:[#allocation2 + $0x158] sm:$0x7] %v1498_v45  ;;  %v1556_v44 = vpop.permute.xlu2 %1555  ;;  %v1615_v45 = vrot.slane %v9066_v49, 2 }
 0x139   : > { %v1497_v63 = vsel %vm1496_vm8, %v1481_v43, %v1483_v51 }
 0x13a   : > { %1511 = vst [vmem:[#allocation2 + $0x150] sm:$0x7] %v1497_v63  ;;  %v992_v63 = vrot.slane %v8920_v39, 5  ;;  %v1691_v39 = vrot.slane %v9093_v25, 7 }
 0x13e   : > { %v1552_v18 = vpop.permute.xlu0 %1551  ;;  %1999 = vrot.lane.b32.xlu2 %v1986_v8, %s8688_s22  ;;  %v1985_v8 = vld.sshfl [vmem:[#allocation1 + $0x28] sm:$0xff pattern:$0x75316420] }
 0x13f   : > { %1991 = vrot.lane.b32.xlu1 %v1982_v36, %s8688_s22  ;;  %1939 = vrot.lane.b32.xlu0 %v1928_v29, %s8687_s21  ;;  %v1566_v14 = vsel %vm1565_vm9, %v1550_v61, %v1552_v18 }
 0x140   : > { %v1487_v11 = vpop.permute.xlu1 %1486  ;;  %1580 = vst [vmem:[#allocation2 + $0x150] sm:$0x38] %v1566_v14  ;;  %v1619_v7 = vpop.permute.xlu2 %1618  ;;  %v993_v14 = vrot.slane %v8922_v40, 5  ;;  %v1616_v40 = vrot.slane %v9187_v9, 2  ;;  %v714_v9 = vrot.slane %v8856_v58, 1 }
 0x141   : > { %v1499_v51 = vsel %vm1496_vm8, %v1485_v28, %v1487_v11  ;;  %v1500_v0 = vsel %vm1496_vm8, %v1487_v11, %v9262_v37 }
 0x142   : > { %1513 = vst [vmem:[#allocation2 + $0x160] sm:$0x7] %v1499_v51  ;;  %v1139_v51 = vrot.slane %v8953_v42, 7  ;;  %v711_v42 = vrot.slane %v8849_v54, 1 }
 0x143   : > { %1514 = vst [vmem:[#allocation2 + $0x168] sm:$0x7] %v1500_v0 }
 0x146   : > { %v9286_v29 = vpop.permute.xlu0 %1557  ;;  %1075 = vrot.lane.b32.xlu2 %v1063_v30, %s8675_s26 }
 0x147   : > { %1993 = vrot.lane.b32.xlu1 %v1983_v10, %s8688_s22  ;;  %1987 = vrot.lane.b32.xlu0 %v1980_v17, %s8688_s22  ;;  %v1569_v36 = vsel %vm1565_vm9, %v1556_v44, %v9286_v29 }
 0x148   : > { %v1554_v61 = vpop.permute.xlu1 %1553  ;;  %1583 = vst [vmem:[#allocation2 + $0x168] sm:$0x38] %v1569_v36  ;;  %v1625_v59 = vpop.permute.xlu2 %1624 }
 0x149   : > { %v1567_v28 = vsel %vm1565_vm9, %v1552_v18, %v1554_v61  ;;  %v1568_v43 = vsel %vm1565_vm9, %v1554_v61, %v1556_v44 }
 0x14a   : > { %1581 = vst [vmem:[#allocation2 + $0x158] sm:$0x38] %v1567_v28 }
 0x14b   : > { %1582 = vst [vmem:[#allocation2 + $0x160] sm:$0x38] %v1568_v43  ;;  %v1617_v43 = vrot.slane %v9189_v6, 2  ;;  %v791_v6 = vrot.slane %v8872_v4, 6 }
 0x14e   : > { %v1621_v10 = vpop.permute.xlu0 %1620  ;;  %1628 = vrot.lane.b32.xlu2 %v1615_v45, %s8683_s15 }
 0x14f   : > { %1995 = vrot.lane.b32.xlu1 %v1984_v21, %s8688_s22  ;;  %1989 = vrot.lane.b32.xlu0 %v1981_v41, %s8688_s22  ;;  %v1635_v44 = vsel %vm1634_vm10, %v1619_v7, %v1621_v10 }
 0x150   : > { %v1623_v17 = vpop.permute.xlu1 %1622  ;;  %1649 = vst [vmem:[#allocation2 + $0x150] sm:$0xc0] %v1635_v44  ;;  %v1699_v49 = vpop.permute.xlu2 %1698 }
 0x151   : > { %v1636_v18 = vsel %vm1634_vm10, %v1621_v10, %v1623_v17  ;;  %v1637_v11 = vsel %vm1634_vm10, %v1623_v17, %v1625_v59  ;;  %1656 = vst [vmem:[#allocation2 + $0x188] sm:$0x1] %v1635_v44  ;;  %v712_v10 = vrot.slane %v8851_v55, 1  ;;  %v860_v55 = vrot.slane %v8886_v15, 3 }
 0x152   : > { %1650 = vst [vmem:[#allocation2 + $0x158] sm:$0xc0] %v1636_v18  ;;  %v792_v15 = vrot.slane %v8874_v5, 6 }
 0x153   : > { %1651 = vst [vmem:[#allocation2 + $0x160] sm:$0xc0] %v1637_v11 }
 0x154   : > { %1657 = vst [vmem:[#allocation2 + $0x190] sm:$0x1] %v1636_v18 }
 0x155   : > { %1658 = vst [vmem:[#allocation2 + $0x198] sm:$0x1] %v1637_v11 }
 0x156   : > { %v9306_v0 = vpop.permute.xlu0 %1626  ;;  %1704 = vrot.lane.b32.xlu2 %v1691_v39, %s8684_s16  ;;  %v789_v39 = vrot.slane %v8866_v1, 6  ;;  %v790_v1 = vrot.slane %v8868_v2, 6  ;;  %v861_v2 = vrot.slane %v8890_v19, 3  ;;  %v862_v19 = vrot.slane %v8892_v22, 3 }
 0x157   : > { %1997 = vrot.lane.b32.xlu1 %v1985_v8, %s8688_s22  ;;  %1002 = vrot.lane.b32.xlu0 %v992_v63, %s8674_s25  ;;  %v1638_v30 = vsel %vm1634_vm10, %v1625_v59, %v9306_v0  ;;  %v1692_v59 = vrot.slane %v9202_v48, 7  ;;  %v1693_v48 = vrot.slane %v9204_v53, 7  ;;  %v713_v53 = vrot.slane %v8854_v57, 1 }
 0x158   : > { %v1697_v7 = vpop.permute.xlu1 %1696  ;;  %1652 = vst [vmem:[#allocation2 + $0x168] sm:$0xc0] %v1638_v30  ;;  %v1799_v25 = vpop.permute.xlu2 %1798  ;;  %v514_v22 = vrot.slane %v8800_v24, 2 }
 0x159   : > { %v1712_v21 = vsel %vm1710_vm11, %v1697_v7, %v1699_v49  ;;  %1659 = vst [vmem:[#allocation2 + $0x1a0] sm:$0x1] %v1638_v30 }
 0x15a   : > { %1726 = vst [vmem:[#allocation2 + $0x190] sm:$0xe] %v1712_v21 }
 0x15e   : > { %v1695_v41 = vpop.permute.xlu0 %1694  ;;  %719 = vrot.lane.b32.xlu2 %v711_v42, %s8689_s23 }
 0x15f   : > { %1004 = vrot.lane.b32.xlu1 %v993_v14, %s8674_s25  ;;  %1151 = vrot.lane.b32.xlu0 %v1139_v51, %s8676_s27  ;;  %v1711_v36 = vsel %vm1710_vm11, %v1695_v41, %v1697_v7  ;;  %v1547_v41 = vrot.slane %v9168_v47, 5 }
 0x160   : > { %v9316_v61 = vpop.permute.xlu1 %1702  ;;  %1725 = vst [vmem:[#allocation2 + $0x188] sm:$0xe] %v1711_v36  ;;  %v1801_v28 = vpop.permute.xlu2 %1800 }
 0x161   : > { %v1812_v54 = vsel %vm13053_vm12, %v1799_v25, %v1801_v28 }
 0x162   : > { %1825 = vst [vmem:[#allocation2 + $0x188] sm:$0x80] %v1812_v54 }
 0x163   : > { %1832 = vst [vmem:[#allocation2 + $0x1c0] sm:$0x3] %v1812_v54 }
 0x166   : > { %v1701_v45 = vpop.permute.xlu0 %1700  ;;  %725 = vrot.lane.b32.xlu2 %v714_v9, %s8689_s23 }
 0x167   : > { %1213 = vrot.lane.b32.xlu1 %v8968_v31, %s13048_s28  ;;  %1630 = vrot.lane.b32.xlu0 %v1616_v40, %s8683_s15  ;;  %v1713_v8 = vsel %vm1710_vm11, %v1699_v49, %v1701_v45  ;;  %v1714_v31 = vsel %vm1710_vm11, %v1701_v45, %v9316_v61  ;;  %s8690_s28 = smov 95   ;;  %v859_v40 = vrot.slane %v8884_v12, 3 }
 0x168   : > { %v1805_v63 = vpop.permute.xlu1 %1804  ;;  %1727 = vst [vmem:[#allocation2 + $0x198] sm:$0xe] %v1713_v8  ;;  %v1869_v58 = vpop.permute.xlu2 %1868  ;;  %v1548_v8 = vrot.slane %v9170_v62, 5 }
 0x169   : > { %1728 = vst [vmem:[#allocation2 + $0x1a0] sm:$0xe] %v1714_v31 }
 0x16e   : > { %v1803_v17 = vpop.permute.xlu0 %1802  ;;  %801 = vrot.lane.b32.xlu2 %v791_v6, %s8690_s28 }
 0x16f   : > { %1632 = vrot.lane.b32.xlu1 %v1617_v43, %s8683_s15  ;;  %1706 = vrot.lane.b32.xlu0 %v1692_v59, %s8684_s16  ;;  %v1813_v18 = vsel %vm13053_vm12, %v1801_v28, %v1803_v17  ;;  %v1814_v11 = vsel %vm13053_vm12, %v1803_v17, %v1805_v63  ;;  %s8691_s15 = smov 94   ;;  %v586_v59 = vrot.slane %v8813_v32, 7 }
 0x170   : > { %v1807_v44 = vpop.permute.xlu1 %1806  ;;  %1826 = vst [vmem:[#allocation2 + $0x190] sm:$0x80] %v1813_v18  ;;  %v9341_v49 = vpop.permute.xlu2 %1874 }
 0x171   : > { %1827 = vst [vmem:[#allocation2 + $0x198] sm:$0x80] %v1814_v11  ;;  %v1815_v4 = vsel %vm13053_vm12, %v1805_v63, %v1807_v44 }
 0x172   : > { %1833 = vst [vmem:[#allocation2 + $0x1c8] sm:$0x3] %v1813_v18  ;;  %v516_v18 = vrot.slane %v8805_v27, 2 }
 0x173   : > { %1834 = vst [vmem:[#allocation2 + $0x1d0] sm:$0x3] %v1814_v11  ;;  %v587_v11 = vrot.slane %v8815_v33, 7 }
 0x174   : > { %1828 = vst [vmem:[#allocation2 + $0x1a0] sm:$0x80] %v1815_v4 }
 0x175   : > { %1835 = vst [vmem:[#allocation2 + $0x1d8] sm:$0x3] %v1815_v4 }
 0x176   : > { %v1809_v14 = vpop.permute.xlu0 %1808  ;;  %869 = vrot.lane.b32.xlu2 %v860_v55, %s8691_s15  ;;  %v13127_v55 = vld [vmem:[#allocation28_spill] sm:$0xff] }
 0x177   : > { %1708 = vrot.lane.b32.xlu1 %v1693_v48, %s8684_s16  ;;  %721 = vrot.lane.b32.xlu0 %v712_v10, %s8689_s23  ;;  %v1816_v51 = vsel %vm13053_vm12, %v1807_v44, %v1809_v14  ;;  %v513_v48 = vrot.slane %v8798_v23, 2  ;;  %v515_v10 = vrot.slane %v8803_v26, 2  ;;  %v793_v33 = vrot.slane %v13127_v55, 6  ;;  %v2057_v55 = vld [vmem:[#allocation2 + $0x118] sm:$0xff]  ;;  %s8696_s16 = smov 122  }
 0x178   : > { %1829 = vst [vmem:[#allocation2 + $0x1a8] sm:$0x80] %v1816_v51  ;;  %v1877_v7 = vpop.permute.xlu2 %1876 }
 0x179   : > { %1836 = vst [vmem:[#allocation2 + $0x1e0] sm:$0x3] %v1816_v51  ;;  %v1885_v57 = vsel %vm13063_vm13, %v9341_v49, %v1877_v7 }
 0x17a   : > { %1898 = vst [vmem:[#allocation2 + $0x1d8] sm:$0x1c] %v1885_v57  ;;  %v13130_v57 = vld [vmem:[#allocation58_spill] sm:$0xff] }
 0x17e   : > { %v1871_v30 = vpop.permute.xlu0 %1870  ;;  %937 = vrot.lane.b32.xlu2 %v8909_v60, %s8673_s24 }
 0x17f   : > { %723 = vrot.lane.b32.xlu1 %v713_v53, %s8689_s23  ;;  %797 = vrot.lane.b32.xlu0 %v789_v39, %s8690_s28  ;;  %v1882_v21 = vsel %vm13063_vm13, %v1869_v58, %v1871_v30 }
 0x180   : > { %1895 = vst [vmem:[#allocation2 + $0x1c0] sm:$0x1c] %v1882_v21  ;;  %v1879_v25 = vpop.permute.xlu2 %1878 }
 0x181   : > { %v1886_v42 = vsel %vm13063_vm13, %v1877_v7, %v1879_v25 }
 0x182   : > { %1899 = vst [vmem:[#allocation2 + $0x1e0] sm:$0x1c] %v1886_v42 }
 0x186   : > { %1492 = vrot.lane.b32.xlu2 %v9151_v56, %s8681_s13  ;;  %v994_v56 = vrot.slane %v8928_v50, 5 }
 0x187   : > { %799 = vrot.lane.b32.xlu1 %v790_v1, %s8690_s28  ;;  %803 = vrot.lane.b32.xlu0 %v792_v15, %s8690_s28  ;;  %v1272_v1 = vrot.slane %v13130_v57, 1 }
 0x188   : > { %v1936_v5 = vpop.permute.xlu2 %1935 }
 0x18e   : > { %1561 = vrot.lane.b32.xlu2 %v1547_v41, %s8682_s14  ;;  %v13132_v41 = vld [vmem:[#allocation21_spill] sm:$0xff] }
 0x18f   : > { %867 = vrot.lane.b32.xlu1 %v859_v40, %s8691_s15  ;;  %871 = vrot.lane.b32.xlu0 %v861_v2, %s8691_s15  ;;  %v2073_v40 = vld [vmem:[#allocation2 + $0x198] sm:$0xff] }
 0x190   : > { %v1944_v35 = vpop.permute.xlu2 %1943  ;;  %v13131_v2 = vld [vmem:[#allocation20_spill] sm:$0xff] }
 0x191   : > { %v1811_v60 = vpop.permute.xlu1 %1810  ;;  %1964 = vst.msk [vmem:[#allocation2 + $0x1f0] sm:$0xe0] %vm13054_vm6, %v1944_v35  ;;  %vm666_vm6 = vcmask 1014784  }
 0x192   : > { %v1817_v12 = vsel %vm13053_vm12, %v1809_v14, %v1811_v60  ;;  %1831 = vst.msk [vmem:[#allocation2 + $0x1b8] sm:$0x80] %vm756_vm15, %v1811_v60  ;;  %vm607_vm12 = vcmask 1022976   ;;  %v13129_v14 = vld [vmem:[#allocation19_spill] sm:$0xff] }
 0x193   : > { %1830 = vst [vmem:[#allocation2 + $0x1b0] sm:$0x80] %v1817_v12 }
 0x194   : > { %1837 = vst [vmem:[#allocation2 + $0x1e8] sm:$0x3] %v1817_v12 }
 0x195   : > { %1838 = vst.msk [vmem:[#allocation2 + $0x1f0] sm:$0x3] %vm13056_vm7, %v1811_v60  ;;  %v2066_v60 = vld [vmem:[#allocation2 + $0x160] sm:$0xff]  ;;  %vm13057_vm7 = vcmask 1013764  }
 0x196   : > { %522 = vrot.lane.b32.xlu2 %v514_v22, %s8686_s20  ;;  %v13133_v22 = vld [vmem:[#allocation60_spill] sm:$0xff] }
 0x197   : > { %873 = vrot.lane.b32.xlu1 %v862_v19, %s8691_s15  ;;  %1006 = vrot.lane.b32.xlu0 %v994_v56, %s8674_s25 }
 0x198   : > { %v9390_v24 = vpop.permute.xlu2 %1999 }
 0x199   : > { %v1873_v47 = vpop.permute.xlu1 %1872  ;;  %v1881_v36 = vpop.permute.xlu0 %1880  ;;  %2020 = vst.msk [vmem:[#allocation2 + $0x228] sm:$0x7] %vm424_vm14, %v9390_v24 }
 0x19a   : > { %v1883_v50 = vsel %vm13063_vm13, %v1871_v30, %v1873_v47  ;;  %v1884_v28 = vsel %vm13063_vm13, %v1873_v47, %v9341_v49  ;;  %v1887_v54 = vsel %vm13063_vm13, %v1879_v25, %v1881_v36  ;;  %1901 = vst.msk [vmem:[#allocation2 + $0x1f0] sm:$0x1c] %vm13055_vm5, %v1881_v36  ;;  %vm13058_vm5 = vcmask 1042432   ;;  %v2059_v47 = vld [vmem:[#allocation2 + $0x128] sm:$0xff] }
 0x19b   : > { %1896 = vst [vmem:[#allocation2 + $0x1c8] sm:$0x1c] %v1883_v50 }
 0x19c   : > { %1897 = vst [vmem:[#allocation2 + $0x1d0] sm:$0x1c] %v1884_v28  ;;  %v13134_v28 = vld [vmem:[#allocation25_spill] sm:$0xff] }
 0x19d   : > { %1900 = vst [vmem:[#allocation2 + $0x1e8] sm:$0x1c] %v1887_v54  ;;  %v715_v54 = vrot.slane %v13134_v28, 1 }
 0x19e   : > { %593 = vrot.lane.b32.xlu2 %v586_v59, %s8687_s21 }
 0x19f   : > { %1490 = vrot.lane.b32.xlu1 %v9020_v3, %s8681_s13  ;;  %1494 = vrot.lane.b32.xlu0 %v9153_v16, %s8681_s13  ;;  %v1546_v3 = vrot.slane %v9040_v13, 5  ;;  %v589_v13 = vrot.slane %v8823_v38, 7  ;;  %s8694_s13 = smov 120  }
 0x1a0   : > { %v9402_v16 = vpop.permute.xlu2 %1075 }
 0x1a1   : > { %v1934_v9 = vpop.permute.xlu1 %1933  ;;  %v1932_v43 = vpop.permute.xlu0 %1931  ;;  %v1087_v32 = vsel %vm1083_vm2, %v9166_v34, %v9402_v16 }
 0x1a2   : > { %v1946_v45 = vsel %vm607_vm12, %v1934_v9, %v1936_v5  ;;  %v1945_v63 = vsel %vm607_vm12, %v1932_v43, %v1934_v9  ;;  %1101 = vst [vmem:[#allocation2 + $0xc0] sm:$0xc0] %v1087_v32  ;;  %v2052_v43 = vld [vmem:[#allocation2 + $0xf0] sm:$0xff] }
 0x1a3   : > { %1959 = vst [vmem:[#allocation2 + $0x1c8] sm:$0xe0] %v1946_v45 }
 0x1a4   : > { %1958 = vst [vmem:[#allocation2 + $0x1c0] sm:$0xe0] %v1945_v63  ;;  %v13135_v63 = vld [vmem:[#allocation31_spill] sm:$0xff] }
 0x1a5   : > { %1108 = vst [vmem:[#allocation2 + $0xf8] sm:$0x1] %v1087_v32  ;;  %v13136_v32 = vld [vmem:[#allocation68_spill] sm:$0xff] }
 0x1a6   : > { %599 = vrot.lane.b32.xlu2 %v589_v13, %s8687_s21  ;;  %1768 = vst.msk [vmem:[#allocation2 + $0x1b8] sm:$0x70] %vm13057_vm7, %v13136_v32  ;;  %v13137_v13 = vld [vmem:[#allocation61_spill] sm:$0xff]  ;;  %vm554_vm7 = vcmask 1014790  }
 0x1a7   : > { %1559 = vrot.lane.b32.xlu1 %v1546_v3, %s8682_s14  ;;  %1563 = vrot.lane.b32.xlu0 %v1548_v8, %s8682_s14  ;;  %v863_v3 = vrot.slane %v13135_v63, 3  ;;  %v2074_v8 = vld [vmem:[#allocation2 + $0x1a0] sm:$0xff]  ;;  %v13149_v63 = vld [vmem:[#allocation14_spill] sm:$0xff]  ;;  %s8695_s14 = smov 56  }
 0x1a8   : > { %v9415_v34 = vpop.permute.xlu2 %1628 }
 0x1a9   : > { %v1942_v31 = vpop.permute.xlu1 %1941  ;;  %v1938_v58 = vpop.permute.xlu0 %1937  ;;  %v1639_v38 = vsel %vm1634_vm10, %v9306_v0, %v9415_v34 }
 0x1aa   : > { %v1950_v62 = vsel %vm607_vm12, %v1942_v31, %v1944_v35  ;;  %v1947_v6 = vsel %vm607_vm12, %v1936_v5, %v1938_v58  ;;  %1653 = vst [vmem:[#allocation2 + $0x170] sm:$0xc0] %v1639_v38 }
 0x1ab   : > { %1963 = vst [vmem:[#allocation2 + $0x1e8] sm:$0xe0] %v1950_v62  ;;  %v1348_v62 = vrot.slane %v13137_v13, 6  ;;  %v13150_v13 = vld [vmem:[#allocation8_spill] sm:$0xff] }
 0x1ac   : > { %1960 = vst [vmem:[#allocation2 + $0x1d0] sm:$0xe0] %v1947_v6 }
 0x1ad   : > { %1660 = vst [vmem:[#allocation2 + $0x1a8] sm:$0x1] %v1639_v38  ;;  %v2072_v38 = vld [vmem:[#allocation2 + $0x190] sm:$0xff] }
 0x1ae   : > { %656 = vrot.lane.b32.xlu2 %v8836_v46, %s8688_s22  ;;  %v13128_v46 = vld [vmem:[#allocation16_spill] sm:$0xff] }
 0x1af   : > { %520 = vrot.lane.b32.xlu1 %v513_v48, %s8686_s20  ;;  %524 = vrot.lane.b32.xlu0 %v515_v10, %s8686_s20  ;;  %v588_v39 = vrot.slane %v13128_v46, 7  ;;  %v2067_v48 = vld [vmem:[#allocation2 + $0x168] sm:$0xff]  ;;  %v13140_v46 = vld [vmem:[#allocation59_spill] sm:$0xff] }
 0x1b0   : > { %v9428_v0 = vpop.permute.xlu2 %1704 }
 0x1b1   : > { %v1992_v17 = vpop.permute.xlu1 %1991  ;;  %v1940_v44 = vpop.permute.xlu0 %1939  ;;  %v1715_v49 = vsel %vm1710_vm11, %v9316_v61, %v9428_v0 }
 0x1b2   : > { %v1948_v23 = vsel %vm607_vm12, %v1938_v58, %v1940_v44  ;;  %v1949_v26 = vsel %vm607_vm12, %v1940_v44, %v1942_v31  ;;  %1729 = vst [vmem:[#allocation2 + $0x1a8] sm:$0xe] %v1715_v49  ;;  %v2079_v31 = vld [vmem:[#allocation2 + $0x1c8] sm:$0xff]  ;;  %v2064_v44 = vld [vmem:[#allocation2 + $0x150] sm:$0xff] }
 0x1b3   : > { %1961 = vst [vmem:[#allocation2 + $0x1d8] sm:$0xe0] %v1948_v23  ;;  %v2080_v42 = vld [vmem:[#allocation2 + $0x1d0] sm:$0xff]  ;;  %v2071_v58 = vld [vmem:[#allocation2 + $0x188] sm:$0xff] }
 0x1b4   : > { %1962 = vst [vmem:[#allocation2 + $0x1e0] sm:$0xe0] %v1949_v26  ;;  %v2060_v26 = vld [vmem:[#allocation2 + $0x130] sm:$0xff]  ;;  %v13139_v49 = vld [vmem:[#allocation46_spill] sm:$0xff] }
 0x1b6   : > { %805 = vrot.lane.b32.xlu2 %v793_v33, %s8690_s28  ;;  %v2058_v33 = vld [vmem:[#allocation2 + $0x120] sm:$0xff] }
 0x1b7   : > { %526 = vrot.lane.b32.xlu1 %v516_v18, %s8686_s20  ;;  %595 = vrot.lane.b32.xlu0 %v587_v11, %s8687_s21  ;;  %v13138_v18 = vld [vmem:[#allocation67_spill] sm:$0xff] }
 0x1b8   : > { %v9440_v51 = vpop.permute.xlu2 %719 }
 0x1b9   : > { %v1994_v4 = vpop.permute.xlu1 %1993  ;;  %v1988_v27 = vpop.permute.xlu0 %1987 }
 0x1ba   : > { %v2003_v53 = vsel %vm666_vm6, %v1992_v17, %v1994_v4  ;;  %v2081_v59 = vld [vmem:[#allocation2 + $0x1d8] sm:$0xff] }
 0x1bb   : > { %2016 = vst [vmem:[#allocation2 + $0x208] sm:$0x7] %v2003_v53  ;;  %v2050_v53 = vld [vmem:[#allocation2 + $0xe0] sm:$0xff] }
 0x1be   : > { %1286 = vrot.lane.b32.xlu2 %v1272_v1, %s8678_s29 }
 0x1bf   : > { %597 = vrot.lane.b32.xlu1 %v588_v39, %s8687_s21  ;;  %652 = vrot.lane.b32.xlu0 %v13129_v14, %s8688_s22  ;;  %v1273_v39 = vrot.slane %v13140_v46, 1  ;;  %v2051_v14 = vld [vmem:[#allocation2 + $0xe8] sm:$0xff] }
 0x1c0   : > { %v9450_v5 = vpop.permute.xlu2 %725 }
 0x1c1   : > { %v1996_v61 = vpop.permute.xlu1 %1995  ;;  %v1990_v7 = vpop.permute.xlu0 %1989 }
 0x1c2   : > { %v2004_v15 = vsel %vm666_vm6, %v1994_v4, %v1996_v61  ;;  %v2087_v30 = vld [vmem:[#allocation2 + $0x208] sm:$0x7]  ;;  %v2001_v21 = vsel %vm666_vm6, %v1988_v27, %v1990_v7  ;;  %v2002_v25 = vsel %vm666_vm6, %v1990_v7, %v1992_v17  ;;  %v1271_v4 = vrot.slane %v13139_v49, 1  ;;  %v2065_v27 = vld [vmem:[#allocation2 + $0x158] sm:$0xff] }
 0x1c3   : > { %2017 = vst [vmem:[#allocation2 + $0x210] sm:$0x7] %v2004_v15  ;;  %7750 = vmatpush.msk.msra.mxu2 %vm13058_vm5, %v2087_v30  ;;  %v13141_v7 = vld [vmem:[#allocation64_spill] sm:$0xff] }
 0x1c4   : > { %2014 = vst [vmem:[#allocation2 + $0x1f8] sm:$0x7] %v2001_v21  ;;  %v1417_v57 = vrot.slane %v13141_v7, 3 }
 0x1c5   : > { %2171 = vmatpush.msra.mxu2 %v2080_v42  ;;  %2015 = vst [vmem:[#allocation2 + $0x200] sm:$0x7] %v2002_v25  ;;  %v13142_v25 = vld [vmem:[#allocation66_spill] sm:$0xff] }
 0x1c6   : > { %1362 = vrot.lane.b32.xlu2 %v1348_v62, %s8679_s30  ;;  %v448_v62 = vrot.slane %v13150_v13, 5 }
 0x1c7   : > { %2172 = vmatpush.msra.mxu2 %v2073_v40  ;;  %654 = vrot.lane.b32.xlu1 %v13131_v2, %s8688_s22 }
 0x1c8   : > { %658 = vrot.lane.b32.xlu0 %v13132_v41, %s8688_s22  ;;  %v9468_v6 = vpop.permute.xlu2 %801 }
 0x1c9   : > { %2173 = vmatpush.msra.mxu2 %v2066_v60  ;;  %v1998_v12 = vpop.permute.xlu1 %1997  ;;  %v1003_v19 = vpop.permute.xlu0 %1002  ;;  %v13143_v60 = vld [vmem:[#allocation48_spill] sm:$0xff] }
 0x1ca   : > { %v2005_v56 = vsel %vm666_vm6, %v1996_v61, %v1998_v12  ;;  %v2006_v35 = vsel %vm666_vm6, %v1998_v12, %v9390_v24  ;;  %v2088_v36 = vld [vmem:[#allocation2 + $0x210] sm:$0x7]  ;;  %v1016_v50 = vsel %vm1014_vm1, %v13133_v22, %v1003_v19  ;;  %v2078_v24 = vld [vmem:[#allocation2 + $0x1c0] sm:$0xff]  ;;  %v2043_v61 = vld [vmem:[#allocation2 + $0xa8] sm:$0xff]  ;;  %v1347_v41 = vrot.slane %v13143_v60, 6 }
 0x1cb   : > { %2018 = vst [vmem:[#allocation2 + $0x218] sm:$0x7] %v2005_v56  ;;  %2174 = vmatpush.msra.mxu2 %v2059_v47  ;;  %7752 = vmatpush.msk.msra.mxu3 %vm13058_vm5, %v2088_v36  ;;  %v2085_v9 = vld [vmem:[#allocation2 + $0x1f8] sm:$0x7]  ;;  %v13144_v12 = vld [vmem:[#allocation62_spill] sm:$0xff]  ;;  %v13145_v56 = vld [vmem:[#allocation9_spill] sm:$0xff] }
 0x1cc   : > { %2019 = vst [vmem:[#allocation2 + $0x220] sm:$0x7] %v2006_v35  ;;  %7746 = vmatpush.msk.msra.mxu0 %vm13058_vm5, %v2085_v9  ;;  %v2086_v45 = vld [vmem:[#allocation2 + $0x200] sm:$0x7]  ;;  %v449_v35 = vrot.slane %v13145_v56, 5  ;;  %v13146_v36 = vld [vmem:[#allocation63_spill] sm:$0xff] }
 0x1cd   : > { %2175 = vmatpush.msra.mxu2 %v2052_v43  ;;  %2191 = vmatpush.msra.mxu3 %v2081_v59  ;;  %1030 = vst [vmem:[#allocation2 + $0xb0] sm:$0x38] %v1016_v50  ;;  %v13147_v43 = vld [vmem:[#allocation51_spill] sm:$0xff]  ;;  %v13160_v56 = vld [vmem:[#allocation44_spill] sm:$0xff] }
 0x1ce   : > { %7748 = vmatpush.msk.msra.mxu1 %vm13058_vm5, %v2086_v45  ;;  %2131 = vmatpush.msra.mxu0 %v2078_v24  ;;  %vm562_vm5 = vcmask 1007616   ;;  %v1416_v59 = vrot.slane %v13147_v43, 3  ;;  %v13148_v45 = vld [vmem:[#allocation65_spill] sm:$0xff] }
 0x1cf   : > { %2192 = vmatpush.msra.mxu3 %v2074_v8  ;;  %727 = vrot.lane.b32.xlu1 %v715_v54, %s8689_s23  ;;  %v1418_v24 = vrot.slane %v13148_v45, 3 }
 0x1d0   : > { %2151 = vmatpush.msra.mxu1 %v2079_v31  ;;  %2132 = vmatpush.msra.mxu0 %v2071_v58  ;;  %v9485_v1 = vpop.permute.xlu2 %869 }
 0x1d1   : > { %2193 = vmatpush.msra.mxu3 %v2067_v48  ;;  %v9470_v10 = vpop.permute.xlu1 %1004  ;;  %875 = vrot.lane.b32.xlu0 %v863_v3, %s8691_s15  ;;  %v9473_v17 = vpop.permute.xlu0 %1151  ;;  %v517_v3 = vrot.slane %v13149_v63, 2  ;;  %v13151_v48 = vld [vmem:[#allocation10_spill] sm:$0xff] }
 0x1d2   : > { %v1017_v23 = vsel %vm1014_vm1, %v1003_v19, %v9470_v10  ;;  %2152 = vmatpush.msra.mxu1 %v2072_v38  ;;  %v1163_v11 = vsel %vm1159_vm3, %v13138_v18, %v9473_v17  ;;  %2133 = vmatpush.msra.mxu0 %v2064_v44  ;;  %v1349_v19 = vrot.slane %v13144_v12, 6  ;;  %v450_v38 = vrot.slane %v13151_v48, 5  ;;  %v13152_v44 = vld [vmem:[#allocation39_spill] sm:$0xff]  ;;  %v13158_v12 = vld [vmem:[#allocation53_spill] sm:$0xff] }
 0x1d3   : > { %1031 = vst [vmem:[#allocation2 + $0xb8] sm:$0x38] %v1017_v23  ;;  %2194 = vmatpush.msra.mxu3 %v2060_v26  ;;  %1431 = vrot.lane.b32.xlu2 %v1417_v57, %s8680_s12  ;;  %v1064_v23 = vrot.slane %v13152_v44, 2  ;;  %v13165_v48 = vld [vmem:[#allocation47_spill] sm:$0xff] }
 0x1d4   : > { %1177 = vst [vmem:[#allocation2 + $0xf8] sm:$0xe] %v1163_v11  ;;  %2153 = vmatpush.msra.mxu1 %v2065_v27  ;;  %2134 = vmatpush.msra.mxu0 %v2057_v55  ;;  %v2044_v30 = vld [vmem:[#allocation2 + $0xb0] sm:$0xff]  ;;  %v13154_v55 = vld [vmem:[#allocation17_spill] sm:$0xff] }
 0x1d6   : > { %2154 = vmatpush.msra.mxu1 %v2058_v33  ;;  %2135 = vmatpush.msra.mxu0 %v2050_v53  ;;  %v590_v33 = vrot.slane %v13154_v55, 7  ;;  %v13155_v53 = vld [vmem:[#allocation41_spill] sm:$0xff] }
 0x1d7   : > { %1284 = vrot.lane.b32.xlu1 %v1271_v4, %s8678_s29  ;;  %v13153_v4 = vld [vmem:[#allocation11_spill] sm:$0xff]  ;;  %v1140_v46 = vrot.slane %v13155_v53, 7  ;;  %v13169_v55 = vld [vmem:[#allocation37_spill] sm:$0xff] }
 0x1d8   : > { %2155 = vmatpush.msra.mxu1 %v2051_v14  ;;  %2136 = vmatpush.msra.mxu0 %v2043_v61  ;;  %v9500_v47 = vpop.permute.xlu2 %937  ;;  %v451_v27 = vrot.slane %v13153_v4, 5  ;;  %v13170_v53 = vld [vmem:[#allocation45_spill] sm:$0xff] }
 0x1d9   : > { %v9487_v15 = vpop.permute.xlu1 %1213  ;;  %1288 = vrot.lane.b32.xlu0 %v1273_v39, %s8678_s29  ;;  %v1631_v21 = vpop.permute.xlu0 %1630  ;;  %s13159_s29 = smov 62  }
 0x1da   : > { %v1225_v42 = vsel %vm1221_vm4, %v13142_v25, %v9487_v15  ;;  %v2045_v40 = vld [vmem:[#allocation2 + $0xb8] sm:$0xff]  ;;  %2156 = vmatpush.msra.mxu1 %v2044_v30  ;;  %v1640_v2 = vsel %vm1634_vm10, %v9415_v34, %v1631_v21  ;;  %v949_v34 = vsel %vm13059_vm0, %v13146_v36, %v9500_v47  ;;  %vm735_vm0 = vcmask 785408  }
 0x1db   : > { %1239 = vst [vmem:[#allocation2 + $0xf8] sm:$0x70] %v1225_v42  ;;  %2176 = vmatpush.msra.mxu2 %v2045_v40  ;;  %457 = vrot.lane.b32.xlu2 %v449_v35, %s8685_s19  ;;  %v13157_v42 = vld [vmem:[#allocation22_spill] sm:$0xff] }
 0x1dc   : > { %1654 = vst [vmem:[#allocation2 + $0x178] sm:$0xc0] %v1640_v2  ;;  %v13161_v35 = vld [vmem:[#allocation54_spill] sm:$0xff] }
 0x1dd   : > { %1661 = vst [vmem:[#allocation2 + $0x1b0] sm:$0x1] %v1640_v2  ;;  %v1141_v36 = vrot.slane %v13161_v35, 7  ;;  %v13176_v35 = vld [vmem:[#allocation29_spill] sm:$0xff] }
 0x1de   : > { %963 = vst [vmem:[#allocation2 + $0xc0] sm:$0x7] %v949_v34  ;;  %v13162_v34 = vld [vmem:[#allocation12_spill] sm:$0xff] }
 0x1df   : > { %1360 = vrot.lane.b32.xlu1 %v1347_v41, %s8679_s30 }
 0x1e0   : > { %v9516_v8 = vpop.permute.xlu2 %1492 }
 0x1e1   : > { %v1633_v22 = vpop.permute.xlu1 %1632  ;;  %1364 = vrot.lane.b32.xlu0 %v1349_v19, %s8679_s30  ;;  %v1707_v50 = vpop.permute.xlu0 %1706  ;;  %v1066_v19 = vrot.slane %v13158_v12, 2 }
 0x1e2   : > { %v1641_v28 = vsel %vm1634_vm10, %v1631_v21, %v1633_v22  ;;  %v2053_v54 = vld [vmem:[#allocation2 + $0xf8] sm:$0xff]  ;;  %v1716_v9 = vsel %vm1710_vm11, %v9428_v0, %v1707_v50  ;;  %vm13060_vm10 = vcmask 1010689   ;;  %v452_v22 = vrot.slane %v13162_v34, 5 }
 0x1e3   : > { %1655 = vst.msk [vmem:[#allocation2 + $0x180] sm:$0xc0] %vm554_vm7, %v1641_v28  ;;  %2195 = vmatpush.msra.mxu3 %v2053_v54  ;;  %528 = vrot.lane.b32.xlu2 %v517_v3, %s8686_s20  ;;  %v13156_v21 = vld [vmem:[#allocation52_spill] sm:$0xff] }
 0x1e4   : > { %1662 = vst.msk [vmem:[#allocation2 + $0x1b8] sm:$0x1] %vm562_vm5, %v1641_v28  ;;  %v1065_v25 = vrot.slane %v13156_v21, 2 }
 0x1e5   : > { %1730 = vst [vmem:[#allocation2 + $0x1b0] sm:$0xe] %v1716_v9 }
 0x1e7   : > { %1429 = vrot.lane.b32.xlu1 %v1416_v59, %s8680_s12  ;;  %v13163_v59 = vld [vmem:[#allocation55_spill] sm:$0xff] }
 0x1e8   : > { %v9528_v26 = vpop.permute.xlu2 %1561  ;;  %v1142_v45 = vrot.slane %v13163_v59, 7 }
 0x1e9   : > { %v1709_v0 = vpop.permute.xlu1 %1708  ;;  %1433 = vrot.lane.b32.xlu0 %v1418_v24, %s8680_s12  ;;  %v722_v32 = vpop.permute.xlu0 %721  ;;  %s8693_s12 = smov 58  }
 0x1ea   : > { %v1717_v31 = vsel %vm1710_vm11, %v1707_v50, %v1709_v0  ;;  %v736_v58 = vsel %vm735_vm0, %v9440_v51, %v722_v32  ;;  %vm13062_vm11 = vcmask 777216   ;;  %v13164_v0 = vld [vmem:[#allocation56_spill] sm:$0xff] }
 0x1eb   : > { %1731 = vst.msk [vmem:[#allocation2 + $0x1b8] sm:$0xe] %vm13060_vm10, %v1717_v31  ;;  %1077 = vrot.lane.b32.xlu2 %v1064_v23, %s8675_s26  ;;  %vm13061_vm10 = vcmask 769024  }
 0x1ec   : > { %750 = vst [vmem:[#allocation2 + $0x38] sm:$0x80] %v736_v58 }
 0x1ed   : > { %758 = vst [vmem:[#allocation2 + $0x70] sm:$0x3] %v736_v58 }
 0x1ef   : > { %455 = vrot.lane.b32.xlu1 %v448_v62, %s8685_s19 }
 0x1f0   : > { %v9539_v39 = vpop.permute.xlu2 %522 }
 0x1f1   : > { %v724_v18 = vpop.permute.xlu1 %723  ;;  %459 = vrot.lane.b32.xlu0 %v450_v38, %s8685_s19  ;;  %v798_v51 = vpop.permute.xlu0 %797  ;;  %v13166_v38 = vld [vmem:[#allocation57_spill] sm:$0xff] }
 0x1f2   : > { %v737_v11 = vsel %vm735_vm0, %v722_v32, %v724_v18  ;;  %v738_v49 = vsel %vm735_vm0, %v724_v18, %v9450_v5 }
 0x1f3   : > { %751 = vst [vmem:[#allocation2 + $0x40] sm:$0x80] %v737_v11  ;;  %1153 = vrot.lane.b32.xlu2 %v1140_v46, %s8676_s27  ;;  %v13171_v46 = vld [vmem:[#allocation36_spill] sm:$0xff] }
 0x1f4   : > { %752 = vst [vmem:[#allocation2 + $0x48] sm:$0x80] %v738_v49 }
 0x1f5   : > { %759 = vst [vmem:[#allocation2 + $0x78] sm:$0x3] %v737_v11 }
 0x1f6   : > { %760 = vst [vmem:[#allocation2 + $0x80] sm:$0x3] %v738_v49 }
 0x1f7   : > { %461 = vrot.lane.b32.xlu1 %v451_v27, %s8685_s19 }
 0x1f8   : > { %v9551_v40 = vpop.permute.xlu2 %593 }
 0x1f9   : > { %v800_v14 = vpop.permute.xlu1 %799  ;;  %601 = vrot.lane.b32.xlu0 %v590_v33, %s8687_s21  ;;  %v804_v61 = vpop.permute.xlu0 %803  ;;  %v995_v33 = vrot.slane %v13169_v55, 5 }
 0x1fa   : > { %v815_v7 = vsel %vm13062_vm11, %v800_v14, %v9468_v6  ;;  %v814_v57 = vsel %vm13062_vm11, %v798_v51, %v800_v14  ;;  %v816_v30 = vsel %vm13062_vm11, %v9468_v6, %v804_v61  ;;  %v13168_v51 = vld [vmem:[#allocation34_spill] sm:$0xff] }
 0x1fb   : > { %829 = vst [vmem:[#allocation2 + $0x78] sm:$0x1c] %v815_v7  ;;  %1215 = vrot.lane.b32.xlu2 %v13160_v56, %s13159_s29 }
 0x1fc   : > { %828 = vst [vmem:[#allocation2 + $0x70] sm:$0x1c] %v814_v57  ;;  %v13172_v57 = vld [vmem:[#allocation49_spill] sm:$0xff] }
 0x1fd   : > { %830 = vst [vmem:[#allocation2 + $0x80] sm:$0x1c] %v816_v30  ;;  %v996_v30 = vrot.slane %v13172_v57, 5  ;;  %v13186_v57 = vld [vmem:[#allocation69_spill] sm:$0xff] }
 0x1ff   : > { %660 = vrot.lane.b32.xlu1 %v13157_v42, %s8688_s22 }
 0x200   : > { %v9564_v50 = vpop.permute.xlu2 %599 }
 0x201   : > { %v868_v2 = vpop.permute.xlu1 %867  ;;  %1079 = vrot.lane.b32.xlu0 %v1065_v25, %s8675_s26  ;;  %v872_v60 = vpop.permute.xlu0 %871  ;;  %v13173_v25 = vld [vmem:[#allocation26_spill] sm:$0xff] }
 0x202   : > { %v884_v6 = vsel %vm13061_vm10, %v868_v2, %v9485_v1  ;;  %v885_v41 = vsel %vm13061_vm10, %v9485_v1, %v872_v60  ;;  %v716_v42 = vrot.slane %v13173_v25, 1  ;;  %v13174_v2 = vld [vmem:[#allocation40_spill] sm:$0xff] }
 0x203   : > { %898 = vst [vmem:[#allocation2 + $0x70] sm:$0xe0] %v884_v6  ;;  %463 = vrot.lane.b32.xlu2 %v452_v22, %s8685_s19  ;;  %v13177_v22 = vld [vmem:[#allocation43_spill] sm:$0xff] }
 0x204   : > { %899 = vst [vmem:[#allocation2 + $0x78] sm:$0xe0] %v885_v41 }
 0x207   : > { %1081 = vrot.lane.b32.xlu1 %v1066_v19, %s8675_s26  ;;  %v13175_v19 = vld [vmem:[#allocation35_spill] sm:$0xff] }
 0x208   : > { %v9579_v63 = vpop.permute.xlu2 %656  ;;  %v717_v56 = vrot.slane %v13175_v19, 1 }
 0x209   : > { %v9566_v28 = vpop.permute.xlu1 %873  ;;  %1155 = vrot.lane.b32.xlu0 %v1141_v36, %s8676_s27  ;;  %v9569_v1 = vpop.permute.xlu0 %1006  ;;  %v794_v36 = vrot.slane %v13176_v35, 6 }
 0x20a   : > { %v886_v54 = vsel %vm13061_vm10, %v872_v60, %v9566_v28  ;;  %v2036_v9 = vld [vmem:[#allocation2 + $0x70] sm:$0xff]  ;;  %v1018_v43 = vsel %vm1014_vm1, %v9470_v10, %v9569_v1  ;;  %v796_v60 = vrot.slane %v13174_v2, 6 }
 0x20b   : > { %900 = vst [vmem:[#allocation2 + $0x80] sm:$0xe0] %v886_v54  ;;  %2137 = vmatpush.msra.mxu0 %v2036_v9  ;;  %v2037_v24 = vld [vmem:[#allocation2 + $0x78] sm:$0xff]  ;;  %943 = vrot.lane.b32.xlu2 %v13165_v48, %s8673_s24  ;;  %v866_v54 = vrot.slane %v13177_v22, 3 }
 0x20c   : > { %1032 = vst [vmem:[#allocation2 + $0xc0] sm:$0x38] %v1018_v43  ;;  %2157 = vmatpush.msra.mxu1 %v2037_v24 }
 0x20f   : > { %1157 = vrot.lane.b32.xlu1 %v1142_v45, %s8676_s27  ;;  %v13178_v45 = vld [vmem:[#allocation38_spill] sm:$0xff] }
 0x210   : > { %v9595_v23 = vpop.permute.xlu2 %805  ;;  %v795_v24 = vrot.slane %v13178_v45, 6 }
 0x211   : > { %v1491_v3 = vpop.permute.xlu1 %1490  ;;  %1217 = vrot.lane.b32.xlu0 %v13164_v0, %s13159_s29  ;;  %v1495_v32 = vpop.permute.xlu0 %1494 }
 0x212   : > { %v1501_v10 = vsel %vm1496_vm8, %v9262_v37, %v1491_v3  ;;  %v1502_v31 = vsel %vm1496_vm8, %v1491_v3, %v9516_v8  ;;  %v2038_v58 = vld [vmem:[#allocation2 + $0x80] sm:$0xff]  ;;  %v1503_v13 = vsel %vm1496_vm8, %v9516_v8, %v1495_v32  ;;  %v13167_v37 = vld [vmem:[#allocation50_spill] sm:$0xff]  ;;  %v817_v8 = vsel %vm13062_vm11, %v804_v61, %v9595_v23  ;;  %v13179_v3 = vld [vmem:[#allocation32_spill] sm:$0xff] }
 0x213   : > { %1515 = vst [vmem:[#allocation2 + $0x170] sm:$0x7] %v1501_v10  ;;  %2177 = vmatpush.msra.mxu2 %v2038_v58  ;;  %v2046_v62 = vld [vmem:[#allocation2 + $0xc0] sm:$0xff]  ;;  %v997_v44 = vrot.slane %v13167_v37, 5  ;;  %vm489_vm8 = vcmask 1012739   ;;  %v864_v0 = vrot.slane %v13179_v3, 3 }
 0x214   : > { %1516 = vst [vmem:[#allocation2 + $0x178] sm:$0x7] %v1502_v31  ;;  %2196 = vmatpush.msra.mxu3 %v2046_v62  ;;  %v13180_v10 = vld [vmem:[#allocation18_spill] sm:$0xff] }
 0x215   : > { %1517 = vst.msk [vmem:[#allocation2 + $0x180] sm:$0x7] %vm424_vm14, %v1503_v13  ;;  %1012 = vrot.lane.b32.xlu2 %v997_v44, %s8674_s25  ;;  %v591_v31 = vrot.slane %v13180_v10, 7 }
 0x216   : > { %831 = vst [vmem:[#allocation2 + $0x88] sm:$0x1c] %v817_v8  ;;  %v13182_v8 = vld [vmem:[#allocation15_spill] sm:$0xff] }
 0x217   : > { %1219 = vrot.lane.b32.xlu1 %v13166_v38, %s13159_s29  ;;  %v13181_v38 = vld [vmem:[#allocation42_spill] sm:$0xff] }
 0x218   : > { %v9620_v21 = vpop.permute.xlu2 %1286  ;;  %v865_v37 = vrot.slane %v13181_v38, 3 }
 0x219   : > { %v1560_v18 = vpop.permute.xlu1 %1559  ;;  %939 = vrot.lane.b32.xlu0 %v13168_v51, %s8673_s24  ;;  %v1564_v11 = vpop.permute.xlu0 %1563 }
 0x21a   : > { %v1570_v49 = vsel %vm1565_vm9, %v9286_v29, %v1560_v18  ;;  %v1571_v4 = vsel %vm1565_vm9, %v1560_v18, %v9528_v26  ;;  %v1572_v27 = vsel %vm1565_vm9, %v9528_v26, %v1564_v11  ;;  %v718_v29 = vrot.slane %v13171_v46, 1 }
 0x21b   : > { %1584 = vst [vmem:[#allocation2 + $0x170] sm:$0x38] %v1570_v49  ;;  %v518_v18 = vrot.slane %v13182_v8, 2  ;;  %vm13187_vm9 = vcmask 498688   ;;  %v2082_v8 = vld [vmem:[#allocation2 + $0x1e0] sm:$0xff] }
 0x21c   : > { %1585 = vst [vmem:[#allocation2 + $0x178] sm:$0x38] %v1571_v4  ;;  %vm13189_vm11 = vmmov %vm13187_vm9 }
 0x21d   : > { %1586 = vst.msk [vmem:[#allocation2 + $0x180] sm:$0x38] %vm489_vm8, %v1572_v27  ;;  %733 = vrot.lane.b32.xlu2 %v718_v29, %s8689_s23  ;;  %v13183_v27 = vld [vmem:[#allocation27_spill] sm:$0xff] }
 0x21e   : > { %v519_v55 = vrot.slane %v13183_v27, 2 }
 0x21f   : > { %941 = vrot.lane.b32.xlu1 %v13170_v53, %s8673_s24  ;;  %v13184_v53 = vld [vmem:[#allocation33_spill] sm:$0xff] }
 0x220   : > { %v9632_v34 = vpop.permute.xlu2 %1362 }
 0x221   : > { %v521_v14 = vpop.permute.xlu1 %520  ;;  %1008 = vrot.lane.b32.xlu0 %v995_v33, %s8674_s25  ;;  %v525_v61 = vpop.permute.xlu0 %524 }
 0x222   : > { %v535_v26 = vsel %vm13063_vm13, %v521_v14, %v9539_v39  ;;  %v536_v7 = vsel %vm13063_vm13, %v9539_v39, %v525_v61 }
 0x223   : > { %548 = vst [vmem:[#allocation2] sm:$0xc0] %v535_v26 }
 0x224   : > { %556 = vst [vmem:[#allocation2 + $0x38] sm:$0x1] %v535_v26 }
 0x225   : > { %549 = vst [vmem:[#allocation2 + $0x8] sm:$0xc0] %v536_v7  ;;  %811 = vrot.lane.b32.xlu2 %v796_v60, %s8690_s28  ;;  %v13190_v60 = vld [vmem:[#allocation13_spill] sm:$0xff] }
 0x226   : > { %557 = vst [vmem:[#allocation2 + $0x40] sm:$0x1] %v536_v7 }
 0x227   : > { %1010 = vrot.lane.b32.xlu1 %v996_v30, %s8674_s25 }
 0x229   : > { %v527_v6 = vpop.permute.xlu1 %526  ;;  %729 = vrot.lane.b32.xlu0 %v716_v42, %s8689_s23  ;;  %v596_v39 = vpop.permute.xlu0 %595 }
 0x22a   : > { %v537_v41 = vsel %vm13063_vm13, %v525_v61, %v527_v6  ;;  %v608_v12 = vsel %vm607_vm12, %v9551_v40, %v596_v39 }
 0x22b   : > { %550 = vst [vmem:[#allocation2 + $0x10] sm:$0xc0] %v537_v41 }
 0x22c   : > { %558 = vst [vmem:[#allocation2 + $0x48] sm:$0x1] %v537_v41 }
 0x22d   : > { %621 = vst [vmem:[#allocation2 + $0x38] sm:$0xe] %v608_v12  ;;  %881 = vrot.lane.b32.xlu2 %v866_v54, %s8691_s15  ;;  %v9643_v32 = vpop.permute.xlu2 %1431  ;;  %v13191_v12 = vld [vmem:[#allocation23_spill] sm:$0xff] }
 0x22f   : > { %731 = vrot.lane.b32.xlu1 %v717_v56, %s8689_s23 }
 0x231   : > { %v598_v9 = vpop.permute.xlu1 %597  ;;  %807 = vrot.lane.b32.xlu0 %v794_v36, %s8690_s28  ;;  %v653_v43 = vpop.permute.xlu0 %652 }
 0x232   : > { %v609_v40 = vsel %vm607_vm12, %v596_v39, %v598_v9  ;;  %v610_v59 = vsel %vm607_vm12, %v598_v9, %v9564_v50 }
 0x233   : > { %622 = vst [vmem:[#allocation2 + $0x40] sm:$0xe] %v609_v40 }
 0x234   : > { %623 = vst [vmem:[#allocation2 + $0x48] sm:$0xe] %v610_v59 }
 0x235   : > { %603 = vrot.lane.b32.xlu2 %v591_v31, %s8687_s21  ;;  %v9659_v51 = vpop.permute.xlu2 %457 }
 0x237   : > { %809 = vrot.lane.b32.xlu1 %v795_v24, %s8690_s28 }
 0x239   : > { %v655_v58 = vpop.permute.xlu1 %654  ;;  %877 = vrot.lane.b32.xlu0 %v864_v0, %s8691_s15 }
 0x23a   : > { %v667_v13 = vsel %vm666_vm6, %v653_v43, %v655_v58  ;;  %v668_v62 = vsel %vm666_vm6, %v655_v58, %v9579_v63  ;;  %v9651_v48 = vpop.permute.xlu0 %658 }
 0x23b   : > { %680 = vst [vmem:[#allocation2 + $0x38] sm:$0x70] %v667_v13  ;;  %v669_v44 = vsel %vm666_vm6, %v9579_v63, %v9651_v48  ;;  %v9738_v13 = vld [vmem:[%s13032_s1] sm:$0x3f] }
 0x23c   : > { %681 = vst [vmem:[#allocation2 + $0x40] sm:$0x70] %v668_v62  ;;  %v2089_v62 = vld [vmem:[#allocation2 + $0x218] sm:$0x7] }
 0x23d   : > { %682 = vst [vmem:[#allocation2 + $0x48] sm:$0x70] %v669_v44  ;;  %664 = vrot.lane.b32.xlu2 %v13184_v53, %s8688_s22  ;;  %v9677_v61 = vpop.permute.xlu2 %528  ;;  %v2076_v53 = vld [vmem:[#allocation2 + $0x1b0] sm:$0xff] }
 0x23e   : > { %v538_v26 = vsel %vm13063_vm13, %v527_v6, %v9677_v61  ;;  %v453_v6 = vrot.slane %v13190_v60, 5 }
 0x23f   : > { %879 = vrot.lane.b32.xlu1 %v865_v37, %s8691_s15  ;;  %551 = vst [vmem:[#allocation2 + $0x18] sm:$0xc0] %v538_v26 }
 0x240   : > { %559 = vst [vmem:[#allocation2 + $0x50] sm:$0x1] %v538_v26  ;;  %v2069_v26 = vld [vmem:[#allocation2 + $0x178] sm:$0xff] }
 0x241   : > { %v9662_v11 = vpop.permute.xlu1 %727  ;;  %530 = vrot.lane.b32.xlu0 %v518_v18, %s8686_s20 }
 0x242   : > { %v739_v49 = vsel %vm735_vm0, %v9450_v5, %v9662_v11  ;;  %v2029_v4 = vld [vmem:[#allocation2 + $0x38] sm:$0xff]  ;;  %v13185_v5 = vld [vmem:[#allocation30_spill] sm:$0xff] }
 0x243   : > { %753 = vst [vmem:[#allocation2 + $0x50] sm:$0x80] %v739_v49  ;;  %2138 = vmatpush.msra.mxu0 %v2029_v4  ;;  %v2030_v63 = vld [vmem:[#allocation2 + $0x40] sm:$0xff]  ;;  %v9669_v33 = vpop.permute.xlu0 %875  ;;  %v592_v14 = vrot.slane %v13185_v5, 7  ;;  %v2091_v5 = vld [vmem:[#allocation2 + $0x228] sm:$0x7] }
 0x244   : > { %761 = vst [vmem:[#allocation2 + $0x88] sm:$0x3] %v739_v49  ;;  %2158 = vmatpush.msra.mxu1 %v2030_v63  ;;  %v887_v46 = vsel %vm13061_vm10, %v9566_v28, %v9669_v33  ;;  %v2031_v29 = vld [vmem:[#allocation2 + $0x48] sm:$0xff]  ;;  %vm13188_vm10 = vmmov %vm13187_vm9  ;;  %v2068_v63 = vld [vmem:[#allocation2 + $0x170] sm:$0xff] }
 0x245   : > { %901 = vst [vmem:[#allocation2 + $0x88] sm:$0xe0] %v887_v46  ;;  %2178 = vmatpush.msra.mxu2 %v2031_v29  ;;  %v9690_v39 = vpop.permute.xlu2 %1077  ;;  %v2075_v49 = vld [vmem:[#allocation2 + $0x1a8] sm:$0xff] }
 0x246   : > { %v1088_v41 = vsel %vm1083_vm2, %v9402_v16, %v9690_v39  ;;  %v13195_v16 = vld [vmem:[#allocation24_spill] sm:$0xff] }
 0x247   : > { %532 = vrot.lane.b32.xlu1 %v519_v55, %s8686_s20  ;;  %1102 = vst [vmem:[#allocation2 + $0xc8] sm:$0xc0] %v1088_v41  ;;  %v454_v35 = vrot.slane %v13195_v16, 5 }
 0x248   : > { %1109 = vst [vmem:[#allocation2 + $0x100] sm:$0x1] %v1088_v41 }
 0x249   : > { %v1285_v7 = vpop.permute.xlu1 %1284  ;;  %605 = vrot.lane.b32.xlu0 %v592_v14, %s8687_s21 }
 0x24a   : > { %v1295_v28 = vsel %vm13187_vm9, %v13186_v57, %v1285_v7  ;;  %v1296_v30 = vsel %vm13188_vm10, %v1285_v7, %v9620_v21  ;;  %vm13192_vm10 = vcmask 1008640   ;;  %v2092_v57 = vld [vmem:[%s13033_s2] sm:$0x3f] }
 0x24b   : > { %1309 = vst [vmem:[#allocation2 + $0x100] sm:$0x80] %v1295_v28  ;;  %v1289_v25 = vpop.permute.xlu0 %1288 }
 0x24c   : > { %1310 = vst [vmem:[#allocation2 + $0x108] sm:$0x80] %v1296_v30  ;;  %v1297_v42 = vsel %vm13189_vm11, %v9620_v21, %v1289_v25  ;;  %v2039_v2 = vld [vmem:[#allocation2 + $0x88] sm:$0xff]  ;;  %vm13193_vm11 = vcmask 490496   ;;  %v8692_v25 = vmov 0  }
 0x24d   : > { %1316 = vst [vmem:[#allocation2 + $0x138] sm:$0x3] %v1295_v28  ;;  %2197 = vmatpush.msra.mxu3 %v2039_v2  ;;  %vm13194_vm9 = vmmov %vm13193_vm11  ;;  %v9708_v54 = vpop.permute.xlu2 %1153  ;;  %v2084_v28 = vld [vmem:[#allocation2 + $0x1f0] sm:$0xff]  ;;  %8563 = vset.pattern.permute.xlu2 %v8692_v25 }
 0x24e   : > { %1317 = vst [vmem:[#allocation2 + $0x140] sm:$0x3] %v1296_v30  ;;  %vm13196_vm13 = vmmov %vm13194_vm9  ;;  %2095 = vperm.xlu2 %8563, %v2092_v57   ;;  %8664 = vset.pattern.permute.xlu0 %v8692_v25 }
 0x24f   : > { %662 = vrot.lane.b32.xlu1 %v13191_v12, %s8688_s22  ;;  %1311 = vst.msk [vmem:[#allocation2 + $0x110] sm:$0x80] %vm756_vm15, %v1297_v42 }
 0x250   : > { %1318 = vst.msk [vmem:[#allocation2 + $0x148] sm:$0x3] %vm13192_vm10, %v1297_v42  ;;  %vm13197_vm10 = vcmask 1011714   ;;  %v2077_v42 = vld [vmem:[#allocation2 + $0x1b8] sm:$0xff] }
 0x251   : > { %v1361_v21 = vpop.permute.xlu1 %1360  ;;  %465 = vrot.lane.b32.xlu0 %v453_v6, %s8685_s19  ;;  %v2070_v6 = vld [vmem:[#allocation2 + $0x180] sm:$0xff] }
 0x252   : > { %v1371_v19 = vsel %vm13193_vm11, %v9243_v20, %v1361_v21  ;;  %v1372_v56 = vsel %vm13194_vm9, %v1361_v21, %v9632_v34  ;;  %v1164_v20 = vsel %vm1159_vm3, %v9473_v17, %v9708_v54  ;;  %vm13198_vm11 = vcmask 261120  }
 0x253   : > { %1385 = vst [vmem:[#allocation2 + $0x138] sm:$0x1c] %v1371_v19  ;;  %v1365_v36 = vpop.permute.xlu0 %1364  ;;  %vm13199_vm9 = vmmov %vm13198_vm11 }
 0x254   : > { %1386 = vst [vmem:[#allocation2 + $0x140] sm:$0x1c] %v1372_v56  ;;  %v1373_v22 = vsel %vm13196_vm13, %v9632_v34, %v1365_v36  ;;  %vm13200_vm13 = vmmov %vm13199_vm9 }
 0x255   : > { %1387 = vst.msk [vmem:[#allocation2 + $0x148] sm:$0x1c] %vm13197_vm10, %v1373_v22  ;;  %vm13201_vm10 = vcmask 1014789   ;;  %v9721_v45 = vpop.permute.xlu2 %1215 }
 0x256   : > { %1178 = vst [vmem:[#allocation2 + $0x100] sm:$0xe] %v1164_v20  ;;  %v1226_v17 = vsel %vm1221_vm4, %v9487_v15, %v9721_v45 }
 0x257   : > { %467 = vrot.lane.b32.xlu1 %v454_v35, %s8685_s19  ;;  %1240 = vst [vmem:[#allocation2 + $0x100] sm:$0x70] %v1226_v17 }
 0x259   : > { %v1430_v9 = vpop.permute.xlu1 %1429 }
 0x25a   : > { %v1440_v43 = vsel %vm13198_vm11, %v9241_v52, %v1430_v9  ;;  %v1441_v40 = vsel %vm13199_vm9, %v1430_v9, %v9643_v32  ;;  %vm13202_vm11 = vcmask 1039360  }
 0x25b   : > { %1454 = vst [vmem:[#allocation2 + $0x138] sm:$0xe0] %v1440_v43  ;;  %v1434_v34 = vpop.permute.xlu0 %1433  ;;  %vm13203_vm9 = vmmov %vm13202_vm11 }
 0x25c   : > { %1455 = vst [vmem:[#allocation2 + $0x140] sm:$0xe0] %v1441_v40  ;;  %v1442_v59 = vsel %vm13200_vm13, %v9643_v32, %v1434_v34  ;;  %vm13204_vm13 = vmmov %vm13203_vm9 }
 0x25d   : > { %1456 = vst.msk [vmem:[#allocation2 + $0x148] sm:$0xe0] %vm13201_vm10, %v1442_v59  ;;  %v9730_v32 = vpop.permute.xlu2 %463  ;;  %vm13205_vm10 = vmmov %vm13203_vm9 }
 0x261   : > { %v456_v24 = vpop.permute.xlu1 %455 }
 0x262   : > { %v470_v52 = vsel %vm13202_vm11, %v456_v24, %v9659_v51  ;;  %vm2098_vm11 = vcmask 613376   ;;  %v2061_v46 = vld [vmem:[#allocation2 + $0x138] sm:$0xff] }
 0x263   : > { %483 = vst [vmem:[#allocation2] sm:$0x38] %v470_v52  ;;  %v460_v3 = vpop.permute.xlu0 %459  ;;  %v2062_v30 = vld [vmem:[#allocation2 + $0x140] sm:$0xff] }
 0x264   : > { %v471_v0 = vsel %vm13203_vm9, %v9659_v51, %v460_v3  ;;  %vm13206_vm9 = vcmask 1042432   ;;  %v2090_v51 = vld [vmem:[#allocation2 + $0x220] sm:$0x7]  ;;  %v2063_v12 = vld [vmem:[#allocation2 + $0x148] sm:$0xff] }
 0x265   : > { %484 = vst [vmem:[#allocation2 + $0x8] sm:$0x38] %v471_v0  ;;  %v9748_v18 = vpop.permute.xlu2 %943 }
 0x269   : > { %v462_v10 = vpop.permute.xlu1 %461 }
 0x26a   : > { %v472_v31 = vsel %vm13204_vm13, %v460_v3, %v462_v10  ;;  %v2022_v58 = vld [vmem:[#allocation2] sm:$0xff]  ;;  %v473_v15 = vsel %vm13205_vm10, %v462_v10, %v9730_v32  ;;  %vm13207_vm13 = vmmov %vm13206_vm9 }
 0x26b   : > { %485 = vst [vmem:[#allocation2 + $0x10] sm:$0x38] %v472_v31  ;;  %2139 = vmatpush.msra.mxu0 %v2022_v58  ;;  %v9740_v38 = vpop.permute.xlu0 %601  ;;  %vm13208_vm10 = vmmov %vm13206_vm9 }
 0x26c   : > { %v611_v37 = vsel %vm607_vm12, %v9564_v50, %v9740_v38  ;;  %486 = vst [vmem:[#allocation2 + $0x18] sm:$0x38] %v473_v15  ;;  %v2023_v44 = vld [vmem:[#allocation2 + $0x8] sm:$0xff]  ;;  %7747 = vmatmul.msk.f32.vlgmr.msra.gmra.mxu0 %vm2098_vm11, %v9738_v13 }
 0x26d   : > { %7754 = vmatpush.msk.msrb.mxu0 %vm13206_vm9, %v2089_v62  ;;  %624 = vst [vmem:[#allocation2 + $0x50] sm:$0xe] %v611_v37  ;;  %2159 = vmatpush.msra.mxu1 %v2023_v44  ;;  %v2083_v50 = vld [vmem:[#allocation2 + $0x1e8] sm:$0xff]  ;;  %vm13209_vm9 = vcmask 1010689  }
 0x26e   : > { %7749 = vmatmul.msk.f32.vlgmr.msra.gmra.mxu1 %vm2098_vm11, %v9738_v13 }
 0x26f   : > { %2211 = vmatpush.msrb.mxu0 %v2082_v8  ;;  %7756 = vmatpush.msk.msrb.mxu1 %vm13207_vm13, %v2090_v51  ;;  %v9763_v7 = vpop.permute.xlu2 %1012  ;;  %vm13210_vm13 = vcmask 1013764  }
 0x271   : > { %2212 = vmatpush.msrb.mxu0 %v2075_v49  ;;  %v9753_v4 = vpop.permute.xlu1 %660  ;;  %2231 = vmatpush.msrb.mxu1 %v2083_v50 }
 0x272   : > { %v670_v27 = vsel %vm666_vm6, %v9651_v48, %v9753_v4  ;;  %v2024_v55 = vld [vmem:[#allocation2 + $0x10] sm:$0xff]  ;;  %v2054_v48 = vld [vmem:[#allocation2 + $0x100] sm:$0xff] }
 0x273   : > { %2213 = vmatpush.msrb.mxu0 %v2068_v63  ;;  %683 = vst [vmem:[#allocation2 + $0x50] sm:$0x70] %v670_v27  ;;  %2179 = vmatpush.msra.mxu2 %v2024_v55  ;;  %v1080_v29 = vpop.permute.xlu0 %1079  ;;  %v2025_v21 = vld [vmem:[#allocation2 + $0x18] sm:$0xff] }
 0x274   : > { %2232 = vmatpush.msrb.mxu1 %v2076_v53  ;;  %7751 = vmatmul.msk.f32.vlgmr.msra.gmra.mxu2 %vm2098_vm11, %v9738_v13  ;;  %v1089_v14 = vsel %vm1083_vm2, %v9690_v39, %v1080_v29 }
 0x275   : > { %2214 = vmatpush.msrb.mxu0 %v2061_v46  ;;  %7758 = vmatpush.msk.msrb.mxu2 %vm13208_vm10, %v2091_v5  ;;  %1103 = vst [vmem:[#allocation2 + $0xd0] sm:$0xc0] %v1089_v14  ;;  %vm13211_vm10 = vcmask 760832  }
 0x276   : > { %2233 = vmatpush.msrb.mxu1 %v2069_v26  ;;  %1110 = vst [vmem:[#allocation2 + $0x108] sm:$0x1] %v1089_v14 }
 0x277   : > { %2215 = vmatpush.msrb.mxu0 %v2054_v48  ;;  %2251 = vmatpush.msrb.mxu2 %v2084_v28  ;;  %v734_v56 = vpop.permute.xlu2 %733 }
 0x278   : > { %2234 = vmatpush.msrb.mxu1 %v2062_v30 }
 0x279   : > { %2252 = vmatpush.msrb.mxu2 %v2077_v42  ;;  %v1082_v2 = vpop.permute.xlu1 %1081 }
 0x27a   : > { %v1090_v60 = vsel %vm1083_vm2, %v1080_v29, %v1082_v2  ;;  %v2032_v39 = vld [vmem:[#allocation2 + $0x50] sm:$0xff] }
 0x27b   : > { %1104 = vst.msk [vmem:[#allocation2 + $0xd8] sm:$0xc0] %vm554_vm7, %v1090_v60  ;;  %2253 = vmatpush.msrb.mxu2 %v2070_v6  ;;  %2198 = vmatpush.msra.mxu3 %v2032_v39  ;;  %v1156_v41 = vpop.permute.xlu0 %1155 }
 0x27c   : > { %1111 = vst.msk [vmem:[#allocation2 + $0x110] sm:$0x1] %vm562_vm5, %v1090_v60  ;;  %v1165_v19 = vsel %vm1159_vm3, %v9708_v54, %v1156_v41 }
 0x27d   : > { %2254 = vmatpush.msrb.mxu2 %v2063_v12  ;;  %2199 = vmatpush.msra.mxu3 %v2025_v21  ;;  %1179 = vst [vmem:[#allocation2 + $0x108] sm:$0xe] %v1165_v19 }
 0x27e   : > { %7753 = vmatmul.msk.f32.vlgmr.msra.gmra.mxu3 %vm2098_vm11, %v9738_v13 }
 0x27f   : > { %v812_v20 = vpop.permute.xlu2 %811 }
 0x281   : > { %v1158_v16 = vpop.permute.xlu1 %1157 }
 0x282   : > { %v1166_v35 = vsel %vm1159_vm3, %v1156_v41, %v1158_v16  ;;  %vm13212_vm3 = vmmov %vm13211_vm10 }
 0x283   : > { %1180 = vst.msk [vmem:[#allocation2 + $0x110] sm:$0xe] %vm13209_vm9, %v1166_v35  ;;  %v1218_v36 = vpop.permute.xlu0 %1217  ;;  %vm13213_vm9 = vmmov %vm13212_vm3 }
 0x284   : > { %v1227_v22 = vsel %vm1221_vm4, %v9721_v45, %v1218_v36 }
 0x285   : > { %1241 = vst [vmem:[#allocation2 + $0x108] sm:$0x70] %v1227_v22 }
 0x287   : > { %v882_v59 = vpop.permute.xlu2 %881 }
 0x289   : > { %v1220_v9 = vpop.permute.xlu1 %1219 }
 0x28a   : > { %v1228_v54 = vsel %vm1221_vm4, %v1218_v36, %v1220_v9 }
 0x28b   : > { %1242 = vst.msk [vmem:[#allocation2 + $0x110] sm:$0x70] %vm13210_vm13, %v1228_v54  ;;  %v940_v43 = vpop.permute.xlu0 %939 }
 0x28c   : > { %v950_v40 = vsel %vm13211_vm10, %v9500_v47, %v940_v43  ;;  %v2055_v34 = vld [vmem:[#allocation2 + $0x108] sm:$0xff] }
 0x28d   : > { %964 = vst [vmem:[#allocation2 + $0xc8] sm:$0x7] %v950_v40  ;;  %2235 = vmatpush.msrb.mxu1 %v2055_v34 }
 0x28f   : > { %v604_v47 = vpop.permute.xlu2 %603 }
 0x290   : > { %v612_v10 = vsel %vm607_vm12, %v9740_v38, %v604_v47 }
 0x291   : > { %v942_v17 = vpop.permute.xlu1 %941  ;;  %625 = vst [vmem:[#allocation2 + $0x58] sm:$0xe] %v612_v10 }
 0x292   : > { %v951_v24 = vsel %vm13212_vm3, %v940_v43, %v942_v17  ;;  %v952_v45 = vsel %vm13213_vm9, %v942_v17, %v9748_v18  ;;  %v2056_v52 = vld [vmem:[#allocation2 + $0x110] sm:$0xff]  ;;  %vm13219_vm9 = vcmask 1011714  }
 0x293   : > { %965 = vst [vmem:[#allocation2 + $0xd0] sm:$0x7] %v951_v24  ;;  %2255 = vmatpush.msrb.mxu2 %v2056_v52  ;;  %v1009_v3 = vpop.permute.xlu0 %1008 }
 0x294   : > { %966 = vst.msk [vmem:[#allocation2 + $0xd8] sm:$0x7] %vm424_vm14, %v952_v45  ;;  %v1019_v0 = vsel %vm1014_vm1, %v9569_v1, %v1009_v3  ;;  %vm13214_vm14 = vmmov %vm13210_vm13  ;;  %vm13216_vm13 = vcmask 1008640  }
 0x295   : > { %1033 = vst [vmem:[#allocation2 + $0xc8] sm:$0x38] %v1019_v0 }
 0x297   : > { %v665_v44 = vpop.permute.xlu2 %664 }
 0x298   : > { %687 = vst.msk [vmem:[#allocation2 + $0x68] sm:$0x70] %vm13214_vm14, %v665_v44  ;;  %vm13220_vm14 = vcmask 769024  }
 0x299   : > { %v1011_v31 = vpop.permute.xlu1 %1010 }
 0x29a   : > { %v1020_v58 = vsel %vm1014_vm1, %v1009_v3, %v1011_v31  ;;  %v1021_v15 = vsel %vm1014_vm1, %v1011_v31, %v9763_v7  ;;  %vm13215_vm1 = vcmask 777216  }
 0x29b   : > { %1034 = vst [vmem:[#allocation2 + $0xd0] sm:$0x38] %v1020_v58  ;;  %v730_v62 = vpop.permute.xlu0 %729  ;;  %vm13217_vm10 = vmmov %vm13215_vm1 }
 0x29c   : > { %1035 = vst.msk [vmem:[#allocation2 + $0xd8] sm:$0x38] %vm489_vm8, %v1021_v15  ;;  %v740_v37 = vsel %vm735_vm0, %v9662_v11, %v730_v62  ;;  %v2047_v1 = vld [vmem:[#allocation2 + $0xc8] sm:$0xff]  ;;  %vm13218_vm3 = vmmov %vm13215_vm1 }
 0x29d   : > { %754 = vst [vmem:[#allocation2 + $0x58] sm:$0x80] %v740_v37  ;;  %2216 = vmatpush.msrb.mxu0 %v2047_v1 }
 0x29e   : > { %762 = vst [vmem:[#allocation2 + $0x90] sm:$0x3] %v740_v37 }
 0x2a1   : > { %v732_v38 = vpop.permute.xlu1 %731 }
 0x2a2   : > { %v741_v8 = vsel %vm735_vm0, %v730_v62, %v732_v38  ;;  %v742_v18 = vsel %vm735_vm0, %v732_v38, %v734_v56  ;;  %v2048_v51 = vld [vmem:[#allocation2 + $0xd0] sm:$0xff] }
 0x2a3   : > { %755 = vst [vmem:[#allocation2 + $0x60] sm:$0x80] %v741_v8  ;;  %2236 = vmatpush.msrb.mxu1 %v2048_v51  ;;  %v2049_v49 = vld [vmem:[#allocation2 + $0xd8] sm:$0xff]  ;;  %v808_v50 = vpop.permute.xlu0 %807 }
 0x2a4   : > { %757 = vst.msk [vmem:[#allocation2 + $0x68] sm:$0x80] %vm756_vm15, %v742_v18  ;;  %2256 = vmatpush.msrb.mxu2 %v2049_v49  ;;  %v818_v11 = vsel %vm13215_vm1, %v9595_v23, %v808_v50  ;;  %vm13221_vm15 = vmmov %vm13220_vm14 }
 0x2a5   : > { %763 = vst [vmem:[#allocation2 + $0x98] sm:$0x3] %v741_v8  ;;  %vm13222_vm1 = vmmov %vm13220_vm14 }
 0x2a6   : > { %765 = vst.msk [vmem:[#allocation2 + $0xa0] sm:$0x3] %vm13216_vm13, %v742_v18  ;;  %vm13223_vm13 = vcmask 1014789  }
 0x2a7   : > { %832 = vst [vmem:[#allocation2 + $0x90] sm:$0x1c] %v818_v11 }
 0x2a8   : > { %v2096_v16 = vpop.permute.xlu2 %2095 }
 0x2a9   : > { %v810_v63 = vpop.permute.xlu1 %809 }
 0x2aa   : > { %v819_v27 = vsel %vm13217_vm10, %v808_v50, %v810_v63  ;;  %v820_v55 = vsel %vm13218_vm3, %v810_v63, %v812_v20  ;;  %vm13224_vm10 = vcmask 1031168  }
 0x2ab   : > { %833 = vst [vmem:[#allocation2 + $0x98] sm:$0x1c] %v819_v27  ;;  %v878_v53 = vpop.permute.xlu0 %877  ;;  %vm13225_vm3 = vmmov %vm13224_vm10 }
 0x2ac   : > { %835 = vst.msk [vmem:[#allocation2 + $0xa0] sm:$0x1c] %vm13219_vm9, %v820_v55  ;;  %v888_v46 = vsel %vm13220_vm14, %v9669_v33, %v878_v53  ;;  %vm13226_vm9 = vcmask 1010689  }
 0x2ad   : > { %902 = vst [vmem:[#allocation2 + $0x90] sm:$0xe0] %v888_v46 }
 0x2b1   : > { %v880_v29 = vpop.permute.xlu1 %879 }
 0x2b2   : > { %v889_v23 = vsel %vm13221_vm15, %v878_v53, %v880_v29  ;;  %v890_v5 = vsel %vm13222_vm1, %v880_v29, %v882_v59 }
 0x2b3   : > { %903 = vst [vmem:[#allocation2 + $0x98] sm:$0xe0] %v889_v23  ;;  %v531_v14 = vpop.permute.xlu0 %530 }
 0x2b4   : > { %905 = vst.msk [vmem:[#allocation2 + $0xa0] sm:$0xe0] %vm13223_vm13, %v890_v5  ;;  %v539_v26 = vsel %vm13224_vm10, %v9677_v61, %v531_v14  ;;  %v2040_v48 = vld [vmem:[#allocation2 + $0x90] sm:$0xff]  ;;  %vm2374_vm10 = vcmask 742400  }
 0x2b5   : > { %552 = vst [vmem:[#allocation2 + $0x20] sm:$0xc0] %v539_v26  ;;  %2217 = vmatpush.msrb.mxu0 %v2040_v48 }
 0x2b6   : > { %560 = vst [vmem:[#allocation2 + $0x58] sm:$0x1] %v539_v26 }
 0x2b9   : > { %v533_v7 = vpop.permute.xlu1 %532 }
 0x2ba   : > { %v540_v33 = vsel %vm13225_vm3, %v531_v14, %v533_v7  ;;  %555 = vst.msk [vmem:[#allocation2 + $0x30] sm:$0xc0] %vm554_vm7, %v533_v7  ;;  %v2041_v57 = vld [vmem:[#allocation2 + $0x98] sm:$0xff]  ;;  %vm13227_vm7 = vcmask 1039360   ;;  %vm2471_vm3 = vcmask 678916  }
 0x2bb   : > { %553 = vst [vmem:[#allocation2 + $0x28] sm:$0xc0] %v540_v33  ;;  %2237 = vmatpush.msrb.mxu1 %v2041_v57  ;;  %v2042_v28 = vld [vmem:[#allocation2 + $0xa0] sm:$0xff]  ;;  %v606_v30 = vpop.permute.xlu0 %605 }
 0x2bc   : > { %561 = vst [vmem:[#allocation2 + $0x60] sm:$0x1] %v540_v33  ;;  %2257 = vmatpush.msrb.mxu2 %v2042_v28  ;;  %v613_v25 = vsel %vm607_vm12, %v604_v47, %v606_v30  ;;  %vm2277_vm12 = vcmask 1012736  }
 0x2bd   : > { %563 = vst.msk [vmem:[#allocation2 + $0x68] sm:$0x1] %vm562_vm5, %v533_v7  ;;  %vm13228_vm5 = vmmov %vm13227_vm7 }
 0x2be   : > { %626 = vst [vmem:[#allocation2 + $0x60] sm:$0xe] %v613_v25  ;;  %vm13231_vm14 = vmmov %vm13228_vm5 }
 0x2bf   : > { %628 = vst.msk [vmem:[#allocation2 + $0x68] sm:$0xe] %vm13226_vm9, %v606_v30  ;;  %vm13232_vm15 = vmmov %vm13228_vm5  ;;  %vm2477_vm9 = vcmask 672768  }
 0x2c0   : > { %vm13233_vm1 = vmmov %vm13228_vm5 }
 0x2c1   : > { %v663_v61 = vpop.permute.xlu1 %662  ;;  %vm13234_vm13 = vmmov %vm13233_vm1 }
 0x2c2   : > { %v671_v42 = vsel %vm666_vm6, %v9753_v4, %v663_v61  ;;  %v672_v2 = vsel %vm666_vm6, %v663_v61, %v665_v44 }
 0x2c3   : > { %684 = vst [vmem:[#allocation2 + $0x58] sm:$0x70] %v671_v42  ;;  %v466_v60 = vpop.permute.xlu0 %465 }
 0x2c4   : > { %685 = vst [vmem:[#allocation2 + $0x60] sm:$0x70] %v672_v2  ;;  %v474_v6 = vsel %vm13227_vm7, %v9730_v32, %v466_v60  ;;  %vm13064_vm7 = vcmask 474112  }
 0x2c5   : > { %487 = vst [vmem:[#allocation2 + $0x20] sm:$0x38] %v474_v6 }
 0x2c6   : > { %v2035_v39 = vld [vmem:[#allocation2 + $0x68] sm:$0xff] }
 0x2c7   : > { %2258 = vmatpush.msrb.mxu2 %v2035_v39 }
 0x2c9   : > { %v468_v41 = vpop.permute.xlu1 %467 }
 0x2ca   : > { %v475_v12 = vsel %vm13228_vm5, %v466_v60, %v468_v41  ;;  %490 = vst.msk [vmem:[#allocation2 + $0x30] sm:$0x38] %vm489_vm8, %v468_v41  ;;  %v2033_v21 = vld [vmem:[#allocation2 + $0x58] sm:$0xff]  ;;  %vm13229_vm8 = vmmov %vm13228_vm5 }
 0x2cb   : > { %488 = vst [vmem:[#allocation2 + $0x28] sm:$0x38] %v475_v12  ;;  %2218 = vmatpush.msrb.mxu0 %v2033_v21  ;;  %v2034_v4 = vld [vmem:[#allocation2 + $0x60] sm:$0xff] }
 0x2cc   : > { %2238 = vmatpush.msrb.mxu1 %v2034_v4  ;;  %v2026_v19 = vld [vmem:[#allocation2 + $0x20] sm:$0xff] }
 0x2cd   : > { %2219 = vmatpush.msrb.mxu0 %v2026_v19 }
 0x2ce   : > { %7755 = vmatmul.msk.f32.vlgmr.msrb.gmra.mxu0 %vm2098_vm11, %v9738_v13 }
 0x2d1   : > { %v2028_v56 = vld [vmem:[#allocation2 + $0x30] sm:$0xff] }
 0x2d2   : > { %2259 = vmatpush.msrb.mxu2 %v2028_v56  ;;  %v2027_v32 = vld [vmem:[#allocation2 + $0x28] sm:$0xff] }
 0x2d3   : > { %2239 = vmatpush.msrb.mxu1 %v2027_v32  ;;  %7759 = vmatmul.msk.f32.vlgmr.msrb.gmra.mxu2 %vm2098_vm11, %v9738_v13 }
 0x2d4   : > { %7757 = vmatmul.msk.f32.vlgmr.msrb.gmra.mxu1 %vm2098_vm11, %v9738_v13  ;;  %vm13230_vm11 = vmmov %vm13228_vm5  ;;  %vm2540_vm5 = vcmask 982016  }
 0x2e9   : > { %v2141_v35 = vpop.f32.mrf.mxu0 }
 0x2ea   : > { %v2142_v36 = vadd.f32 %v2141_v35, %v2096_v16 }
 0x2eb   : > { %v2161_v22 = vpop.f32.mrf.mxu1 }
 0x2ec   : > { %v2162_v20 = vadd.f32 %v2161_v22, %v2096_v16  ;;  %v2264_v9 = vmax.f32 %v2142_v36, 0.0 }
 0x2ee   : > { %v2265_v54 = vmax.f32 %v2162_v20, 0.0  ;;  %2271 = vst [vmem:[#allocation3] sm:$0x3f] %v2264_v9 }
 0x2f0   : > { %2272 = vst [vmem:[#allocation3 + $0x8] sm:$0x3f] %v2265_v54 }
 0x2f5   : > { %v2279_v43 = vld [vmem:[#allocation3] sm:$0x3f] }
 0x2f6   : > { %2293 = vrot.lane.b32.xlu0 %v2279_v43, %s8685_s19 }
 0x2f7   : > { %v2181_v40 = vpop.f32.mrf.mxu2  ;;  %v2280_v34 = vld [vmem:[#allocation3 + $0x8] sm:$0x3f] }
 0x2f8   : > { %v2182_v59 = vadd.f32 %v2181_v40, %v2096_v16  ;;  %2295 = vrot.lane.b32.xlu1 %v2280_v34, %s8685_s19 }
 0x2fa   : > { %v2266_v17 = vmax.f32 %v2182_v59, 0.0 }
 0x2fc   : > { %2273 = vst [vmem:[#allocation3 + $0x10] sm:$0x3f] %v2266_v17 }
 0x301   : > { %v2201_v13 = vpop.f32.mrf.mxu3 }
 0x302   : > { %v2202_v24 = vadd.f32 %v2201_v13, %v2096_v16 }
 0x303   : > { %v2281_v45 = vld [vmem:[#allocation3 + $0x10] sm:$0x3f] }
 0x304   : > { %v2267_v52 = vmax.f32 %v2202_v24, 0.0  ;;  %2297 = vrot.lane.b32.xlu0 %v2281_v45, %s8685_s19 }
 0x306   : > { %2274 = vst [vmem:[#allocation3 + $0x18] sm:$0x3f] %v2267_v52 }
 0x30d   : > { %v2282_v3 = vld [vmem:[#allocation3 + $0x18] sm:$0x3f] }
 0x30e   : > { %2299 = vrot.lane.b32.xlu1 %v2282_v3, %s8685_s19 }
 0x34b   : > { %v2221_v0 = vpop.f32.mrf.mxu0 }
 0x34c   : > { %v2222_v47 = vadd.f32 %v2221_v0, %v2096_v16 }
 0x34e   : > { %v2268_v10 = vmax.f32 %v2222_v47, 0.0 }
 0x350   : > { %2275 = vst [vmem:[#allocation3 + $0x20] sm:$0x3f] %v2268_v10 }
 0x351   : > { %v2241_v31 = vpop.f32.mrf.mxu1 }
 0x352   : > { %v2242_v58 = vadd.f32 %v2241_v31, %v2096_v16 }
 0x354   : > { %v2269_v15 = vmax.f32 %v2242_v58, 0.0 }
 0x356   : > { %2276 = vst [vmem:[#allocation3 + $0x28] sm:$0x3f] %v2269_v15  ;;  %v2261_v62 = vpop.f32.mrf.mxu2 }
 0x357   : > { %v2262_v37 = vadd.f32 %v2261_v62, %v2096_v16  ;;  %v2283_v1 = vld [vmem:[#allocation3 + $0x20] sm:$0x3f] }
 0x358   : > { %2301 = vrot.lane.b32.xlu2 %v2283_v1, %s8685_s19 }
 0x359   : > { %v2270_v44 = vmax.f32 %v2262_v37, 0.0 }
 0x35b   : > { %2278 = vst.msk [vmem:[#allocation3 + $0x30] sm:$0x3f] %vm2277_vm12, %v2270_v44  ;;  %vm2770_vm12 = vcmask 457728  }
 0x35d   : > { %v2284_v38 = vld [vmem:[#allocation3 + $0x28] sm:$0x3f] }
 0x35e   : > { %2303 = vrot.lane.b32.xlu0 %v2284_v38, %s8685_s19 }
 0x362   : > { %v2285_v8 = vld [vmem:[#allocation3 + $0x30] sm:$0x3f] }
 0x363   : > { %2305 = vrot.lane.b32.xlu2 %v2285_v8, %s8685_s19 }
 0x368   : > { %v2294_v18 = vpop.permute.xlu0 %2293 }
 0x36a   : > { %v2296_v51 = vpop.permute.xlu1 %2295 }
 0x36b   : > { %v2307_v49 = vsel %vm13229_vm8, %v2294_v18, %v2296_v51  ;;  %vm3500_vm8 = vcmask 1045504  }
 0x36c   : > { %v2320_v50 = vmax.f32 %v2279_v43, %v2307_v49 }
 0x36e   : > { %2334 = vrot.lane.b32.xlu1 %v2320_v50, %s8689_s23 }
 0x376   : > { %v2298_v11 = vpop.permute.xlu0 %2297 }
 0x377   : > { %v2308_v53 = vsel %vm13231_vm14, %v2296_v51, %v2298_v11  ;;  %vm13235_vm14 = vcmask 490496  }
 0x378   : > { %v2321_v46 = vmax.f32 %v2280_v34, %v2308_v53 }
 0x380   : > { %v2300_v63 = vpop.permute.xlu1 %2299 }
 0x381   : > { %v2309_v27 = vsel %vm13230_vm11, %v2298_v11, %v2300_v63  ;;  %vm2504_vm11 = vcmask 998400  }
 0x382   : > { %v2322_v55 = vmax.f32 %v2281_v45, %v2309_v27 }
 0x384   : > { %2338 = vrot.lane.b32.xlu1 %v2322_v55, %s8689_s23 }
 0x38c   : > { %2336 = vrot.lane.b32.xlu1 %v2321_v46, %s8689_s23 }
 0x3b2   : > { %v2302_v29 = vpop.permute.xlu2 %2301 }
 0x3b3   : > { %v2310_v23 = vsel %vm13232_vm15, %v2300_v63, %v2302_v29  ;;  %vm13236_vm15 = vcmask 1031168  }
 0x3b4   : > { %v9846_v5 = vmax.f32 %v2282_v3, %v2310_v23 }
 0x3b6   : > { %2340 = vrot.lane.b32.xlu2 %v9846_v5, %s8689_s23 }
 0x3bd   : > { %v2306_v14 = vpop.permute.xlu2 %2305 }
 0x3be   : > { %v9860_v28 = vmax.f32 %v2285_v8, %v2306_v14 }
 0x3d0   : > { %v2304_v26 = vpop.permute.xlu0 %2303 }
 0x3d1   : > { %v2311_v48 = vsel %vm13233_vm1, %v2302_v29, %v2304_v26  ;;  %v2312_v7 = vsel %vm13234_vm13, %v2304_v26, %v2306_v14  ;;  %vm13237_vm1 = vmmov %vm13236_vm15 }
 0x3d2   : > { %v9852_v33 = vmax.f32 %v2283_v1, %v2311_v48  ;;  %v9854_v57 = vmax.f32 %v2284_v38, %v2312_v7  ;;  %vm13238_vm13 = vmmov %vm13235_vm14 }
 0x3d4   : > { %2344 = vrot.lane.b32.xlu2 %v9854_v57, %s8689_s23  ;;  %2342 = vrot.lane.b32.xlu0 %v9852_v33, %s8689_s23 }
 0x3dc   : > { %2346 = vrot.lane.b32.xlu0 %v9860_v28, %s8689_s23 }
 0x3e0   : > { %v2335_v30 = vpop.permute.xlu1 %2334 }
 0x3f6   : > { %v2339_v25 = vpop.permute.xlu1 %2338 }
 0x3fe   : > { %v2337_v61 = vpop.permute.xlu1 %2336 }
 0x3ff   : > { %v2348_v42 = vsel %vm735_vm0, %v2335_v30, %v2337_v61  ;;  %v2349_v2 = vsel %vm735_vm0, %v2337_v61, %v2339_v25 }
 0x400   : > { %v2361_v60 = vmax.f32 %v2320_v50, %v2348_v42  ;;  %v2362_v6 = vmax.f32 %v2321_v46, %v2349_v2 }
 0x402   : > { %2368 = vst [vmem:[#allocation4] sm:$0x3f] %v2361_v60 }
 0x403   : > { %2369 = vst [vmem:[#allocation4 + $0x8] sm:$0x3f] %v2362_v6 }
 0x409   : > { %v2700_v56 = vld [vmem:[#allocation4] sm:$0x3f] }
 0x40a   : > { %v3027_v39 = vld [vmem:[#allocation4 + $0x8] sm:$0x3f]  ;;  %v2520_v16 = vld [vmem:[#allocation4] sm:$0x3f] }
 0x40b   : > { %v2860_v41 = vld [vmem:[#allocation4 + $0x8] sm:$0x3f]  ;;  %3039 = vrot.lane.b32.xlu1 %v3027_v39, %s13159_s29  ;;  %v2376_v9 = vld [vmem:[#allocation4] sm:$0x3f] }
 0x40c   : > { %v2701_v12 = vld [vmem:[#allocation4 + $0x8] sm:$0x3f]  ;;  %2870 = vrot.lane.b32.xlu2 %v2860_v41, %s8688_s22  ;;  %2381 = vst [vmem:[#allocation5] sm:$0x3f] %v2376_v9  ;;  %v2605_v1 = vld [vmem:[#allocation4] sm:$0x3f] }
 0x40d   : > { %2714 = vrot.lane.b32.xlu0 %v2701_v12, %s8693_s12  ;;  %v2521_v19 = vld [vmem:[#allocation4 + $0x8] sm:$0x3f]  ;;  %v2617_v44 = vrot.slane %v2605_v1, 4  ;;  %v2555_v49 = vld [vmem:[#allocation4] sm:$0x3f] }
 0x40e   : > { %v3116_v35 = vld [vmem:[#allocation4 + $0x8] sm:$0x3f]  ;;  %v2740_v48 = vld [vmem:[#allocation4] sm:$0x3f] }
 0x40f   : > { %v3066_v36 = vld [vmem:[#allocation4 + $0x8] sm:$0x3f]  ;;  %v3128_v40 = vrot.slane %v3116_v35, 4  ;;  %v2752_v30 = vrot.slane %v2740_v48, 2 }
 0x410   : > { %v9869_v21 = vpop.permute.xlu2 %2340  ;;  %v3166_v22 = vld [vmem:[#allocation4 + $0x8] sm:$0x3f]  ;;  %v3078_v34 = vrot.slane %v3066_v36, 2 }
 0x411   : > { %v2350_v4 = vsel %vm735_vm0, %v2339_v25, %v9869_v21  ;;  %v2791_v20 = vld [vmem:[#allocation4 + $0x8] sm:$0x3f]  ;;  %v3178_v59 = vrot.slane %v3166_v22, 6 }
 0x412   : > { %v2363_v32 = vmax.f32 %v2322_v55, %v2350_v4  ;;  %v2801_v54 = vrot.slane %v2791_v20, 4  ;;  %v2377_v43 = vld [vmem:[#allocation4 + $0x8] sm:$0x3f]  ;;  %v2567_v55 = vrot.slane %v2555_v49, 2  ;;  %v2655_v4 = vld [vmem:[#allocation4] sm:$0x3f] }
 0x413   : > { %2532 = vrot.lane.b32.xlu1 %v2521_v19, %s8694_s13  ;;  %2382 = vst [vmem:[#allocation5 + $0x8] sm:$0x3f] %v2377_v43  ;;  %v2982_v17 = vld [vmem:[#allocation4 + $0x8] sm:$0x3f] }
 0x414   : > { %2712 = vrot.lane.b32.xlu2 %v2700_v56, %s8693_s12  ;;  %2370 = vst [vmem:[#allocation4 + $0x10] sm:$0x3f] %v2363_v32  ;;  %v2994_v24 = vrot.slane %v2982_v17, 6  ;;  %v2894_v52 = vld [vmem:[#allocation4 + $0x8] sm:$0x3f]  ;;  %v2667_v32 = vrot.slane %v2655_v4, 6 }
 0x415   : > { %2530 = vrot.lane.b32.xlu0 %v2520_v16, %s8694_s13  ;;  %2816 = vst [vmem:[#allocation5 + $0x140] sm:$0x3] %v2801_v54  ;;  %v2938_v3 = vld [vmem:[#allocation4 + $0x8] sm:$0x3f]  ;;  %v2904_v58 = vrot.slane %v2894_v52, 2 }
 0x416   : > { %2811 = vst [vmem:[#allocation5 + $0x118] sm:$0xf0] %v2801_v54  ;;  %v2948_v15 = vrot.slane %v2938_v3, 4  ;;  %v2821_v62 = vld [vmem:[#allocation4 + $0x8] sm:$0x3f] }
 0x417   : > { %v2831_v37 = vrot.slane %v2821_v62, 6  ;;  %v2656_v38 = vld [vmem:[#allocation4 + $0x8] sm:$0x3f]  ;;  %v2433_v17 = vld [vmem:[#allocation4] sm:$0x3f] }
 0x418   : > { %v2668_v8 = vrot.slane %v2656_v38, 6  ;;  %v2741_v7 = vld [vmem:[#allocation4 + $0x8] sm:$0x3f] }
 0x419   : > { %v2753_v25 = vrot.slane %v2741_v7, 2  ;;  %v2556_v6 = vld [vmem:[#allocation4 + $0x8] sm:$0x3f] }
 0x41a   : > { %v2568_v41 = vrot.slane %v2556_v6, 2  ;;  %v2480_v62 = vld [vmem:[#allocation4 + $0x8] sm:$0x3f] }
 0x41b   : > { %3134 = vrot.lane.b32.xlu1 %v3128_v40, %s8693_s12  ;;  %v3028_v13 = vld [vmem:[#allocation4 + $0x10] sm:$0x3f] }
 0x41c   : > { %3084 = vrot.lane.b32.xlu2 %v3078_v34, %s8679_s30  ;;  %v2861_v45 = vld [vmem:[#allocation4 + $0x10] sm:$0x3f] }
 0x41d   : > { %3184 = vrot.lane.b32.xlu0 %v3178_v59, %s8695_s14  ;;  %v3211_v0 = vld [vmem:[#allocation4 + $0x10] sm:$0x3f] }
 0x41e   : > { %v2792_v47 = vld [vmem:[#allocation4 + $0x10] sm:$0x3f]  ;;  %3216 = vst [vmem:[#allocation5 + $0x258] sm:$0x3f] %v3211_v0  ;;  %v2443_v0 = vrot.slane %v2433_v17, 4 }
 0x41f   : > { %v2802_v10 = vrot.slane %v2792_v47, 4  ;;  %v2378_v31 = vld [vmem:[#allocation4 + $0x10] sm:$0x3f] }
 0x420   : > { %2383 = vst [vmem:[#allocation5 + $0x10] sm:$0x3f] %v2378_v31  ;;  %v3348_v42 = vld [vmem:[#allocation4 + $0x10] sm:$0x3f] }
 0x421   : > { %2817 = vst [vmem:[#allocation5 + $0x148] sm:$0x3] %v2802_v10  ;;  %v2522_v2 = vld [vmem:[#allocation4 + $0x10] sm:$0x3f] }
 0x422   : > { %2812 = vst [vmem:[#allocation5 + $0x120] sm:$0xf0] %v2802_v10  ;;  %v3221_v39 = vld [vmem:[#allocation4 + $0x10] sm:$0x3f] }
 0x423   : > { %3000 = vrot.lane.b32.xlu1 %v2994_v24, %s8675_s26  ;;  %v3231_v12 = vrot.slane %v3221_v39, 2  ;;  %v3117_v19 = vld [vmem:[#allocation4 + $0x10] sm:$0x3f] }
 0x424   : > { %3041 = vrot.lane.b32.xlu2 %v3028_v13, %s13159_s29  ;;  %v3129_v16 = vrot.slane %v3117_v19, 4  ;;  %v2479_v13 = vld [vmem:[#allocation4] sm:$0x3f]  ;;  %v2983_v3 = vld [vmem:[#allocation4 + $0x10] sm:$0x3f] }
 0x425   : > { %2872 = vrot.lane.b32.xlu0 %v2861_v45, %s8688_s22  ;;  %v2489_v47 = vrot.slane %v2479_v13, 6  ;;  %v2995_v31 = vrot.slane %v2983_v3, 6  ;;  %v2939_v19 = vld [vmem:[#allocation4 + $0x10] sm:$0x3f] }
 0x42b   : > { %2909 = vrot.lane.b32.xlu1 %v2904_v58, %s8696_s16 }
 0x42c   : > { %2953 = vrot.lane.b32.xlu2 %v2948_v15, %s8694_s13 }
 0x42e   : > { %v2345_v18 = vpop.permute.xlu2 %2344 }
 0x434   : > { %2836 = vrot.lane.b32.xlu2 %v2831_v37, %s8686_s20  ;;  %v2387_v37 = vld [vmem:[#allocation4] sm:$0x3f] }
 0x43c   : > { %2623 = vrot.lane.b32.xlu2 %v2617_v44, %s13159_s29 }
 0x444   : > { %2675 = vrot.lane.b32.xlu2 %v2668_v8, %s8679_s30 }
 0x446   : > { %v2343_v51 = vpop.permute.xlu0 %2342 }
 0x447   : > { %v2351_v50 = vsel %vm735_vm0, %v9869_v21, %v2343_v51  ;;  %v2352_v11 = vsel %vm735_vm0, %v2343_v51, %v2345_v18  ;;  %v2397_v51 = vrot.slane %v2387_v37, 2 }
 0x448   : > { %v2364_v63 = vmax.f32 %v9846_v5, %v2351_v50  ;;  %v2365_v27 = vmax.f32 %v9852_v33, %v2352_v11  ;;  %v2702_v5 = vld [vmem:[#allocation4 + $0x10] sm:$0x3f]  ;;  %v2434_v33 = vld [vmem:[#allocation4 + $0x8] sm:$0x3f] }
 0x449   : > { %v2444_v61 = vrot.slane %v2434_v33, 4 }
 0x44a   : > { %2371 = vst [vmem:[#allocation4 + $0x18] sm:$0x3f] %v2364_v63  ;;  %v2388_v63 = vld [vmem:[#allocation4 + $0x8] sm:$0x3f] }
 0x44b   : > { %2372 = vst [vmem:[#allocation4 + $0x20] sm:$0x3f] %v2365_v27 }
 0x44c   : > { %2573 = vrot.lane.b32.xlu2 %v2567_v55, %s8675_s26  ;;  %v2895_v55 = vld [vmem:[#allocation4 + $0x10] sm:$0x3f] }
 0x44e   : > { %v2347_v53 = vpop.permute.xlu0 %2346 }
 0x44f   : > { %v2353_v46 = vsel %vm735_vm0, %v2345_v18, %v2347_v53  ;;  %v2367_v29 = vmax.f32 %v9860_v28, %v2347_v53  ;;  %vm2385_vm0 = vcmask 676864   ;;  %v2490_v18 = vrot.slane %v2480_v62, 6  ;;  %v2557_v62 = vld [vmem:[#allocation4 + $0x10] sm:$0x3f] }
 0x450   : > { %v2366_v23 = vmax.f32 %v9854_v57, %v2353_v46  ;;  %v2606_v57 = vld [vmem:[#allocation4 + $0x8] sm:$0x3f]  ;;  %v2398_v46 = vrot.slane %v2388_v63, 2 }
 0x451   : > { %2375 = vst.msk [vmem:[#allocation4 + $0x30] sm:$0x3f] %vm2374_vm10, %v2367_v29  ;;  %v3349_v14 = vld [vmem:[#allocation4 + $0x18] sm:$0x3f]  ;;  %v2618_v28 = vrot.slane %v2606_v57, 4  ;;  %v2905_v29 = vrot.slane %v2895_v55, 2  ;;  %vm13239_vm10 = vmmov %vm13238_vm13 }
 0x452   : > { %v3029_v26 = vld [vmem:[#allocation4 + $0x18] sm:$0x3f]  ;;  %2373 = vst [vmem:[#allocation4 + $0x28] sm:$0x3f] %v2366_v23  ;;  %3360 = vrot.lane.b32.xlu0 %v3349_v14, %s8694_s13  ;;  %v2380_v36 = vld [vmem:[#allocation4 + $0x20] sm:$0x3f] }
 0x453   : > { %3043 = vrot.lane.b32.xlu1 %v3029_v26, %s13159_s29  ;;  %v2862_v21 = vld [vmem:[#allocation4 + $0x18] sm:$0x3f]  ;;  %2386 = vst.msk [vmem:[#allocation5 + $0x20] sm:$0x3f] %vm2385_vm0, %v2380_v36  ;;  %v3213_v43 = vld [vmem:[#allocation4 + $0x20] sm:$0x3f] }
 0x454   : > { %2716 = vrot.lane.b32.xlu2 %v2702_v5, %s8693_s12  ;;  %v2703_v9 = vld [vmem:[#allocation4 + $0x18] sm:$0x3f]  ;;  %v2794_v59 = vld [vmem:[#allocation4 + $0x20] sm:$0x3f]  ;;  %3218 = vst [vmem:[#allocation5 + $0x268] sm:$0x3f] %v3213_v43 }
 0x455   : > { %v3212_v54 = vld [vmem:[#allocation4 + $0x18] sm:$0x3f]  ;;  %v2804_v52 = vrot.slane %v2794_v59, 4  ;;  %v3167_v26 = vld [vmem:[#allocation4 + $0x10] sm:$0x3f] }
 0x456   : > { %v2793_v40 = vld [vmem:[#allocation4 + $0x18] sm:$0x3f]  ;;  %3217 = vst [vmem:[#allocation5 + $0x260] sm:$0x3f] %v3212_v54  ;;  %v3179_v33 = vrot.slane %v3167_v26, 6 }
 0x457   : > { %v2803_v34 = vrot.slane %v2793_v40, 4  ;;  %v2379_v10 = vld [vmem:[#allocation4 + $0x18] sm:$0x3f]  ;;  %2819 = vst [vmem:[#allocation5 + $0x158] sm:$0x3] %v2804_v52 }
 0x458   : > { %v3215_v20 = vld [vmem:[#allocation4 + $0x30] sm:$0x3f]  ;;  %2814 = vst [vmem:[#allocation5 + $0x130] sm:$0xf0] %v2804_v52  ;;  %v3168_v38 = vld [vmem:[#allocation4 + $0x18] sm:$0x3f] }
 0x459   : > { %v2795_v35 = vld [vmem:[#allocation4 + $0x28] sm:$0x3f]  ;;  %3220 = vst.msk [vmem:[#allocation5 + $0x278] sm:$0x3f] %vm2385_vm0, %v3215_v20  ;;  %v3180_v49 = vrot.slane %v3168_v38, 6 }
 0x45a   : > { %2758 = vrot.lane.b32.xlu0 %v2752_v30, %s8695_s14  ;;  %v2805_v22 = vrot.slane %v2795_v35, 4  ;;  %v3214_v45 = vld [vmem:[#allocation4 + $0x28] sm:$0x3f]  ;;  %2818 = vst [vmem:[#allocation5 + $0x150] sm:$0x3] %v2803_v34 }
 0x45b   : > { %2760 = vrot.lane.b32.xlu1 %v2753_v25, %s8695_s14  ;;  %2813 = vst [vmem:[#allocation5 + $0x128] sm:$0xf0] %v2803_v34  ;;  %v2523_v23 = vld [vmem:[#allocation4 + $0x18] sm:$0x3f]  ;;  %v3309_v36 = vld [vmem:[#allocation4 + $0x10] sm:$0x3f] }
 0x45c   : > { %2450 = vrot.lane.b32.xlu2 %v2444_v61, %s8688_s22  ;;  %2815 = vst.msk [vmem:[#allocation5 + $0x138] sm:$0xf0] %vm2471_vm3, %v2805_v22  ;;  %v3222_v5 = vld [vmem:[#allocation4 + $0x18] sm:$0x3f]  ;;  %v2607_v20 = vld [vmem:[#allocation4 + $0x10] sm:$0x3f] }
 0x45d   : > { %2820 = vst.msk [vmem:[#allocation5 + $0x160] sm:$0x3] %vm2477_vm9, %v2805_v22  ;;  %v3266_v7 = vld [vmem:[#allocation4 + $0x18] sm:$0x3f]  ;;  %v3232_v30 = vrot.slane %v3222_v5, 2  ;;  %v3319_v54 = vrot.slane %v3309_v36, 6 }
 0x45e   : > { %3219 = vst [vmem:[#allocation5 + $0x270] sm:$0x3f] %v3214_v45  ;;  %v3276_v25 = vrot.slane %v3266_v7, 4  ;;  %v2940_v57 = vld [vmem:[#allocation4 + $0x18] sm:$0x3f]  ;;  %v2619_v40 = vrot.slane %v2607_v20, 4 }
 0x45f   : > { %2384 = vst [vmem:[#allocation5 + $0x18] sm:$0x3f] %v2379_v10  ;;  %v2950_v39 = vrot.slane %v2940_v57, 4  ;;  %v3310_v4 = vld [vmem:[#allocation4 + $0x18] sm:$0x3f] }
 0x460   : > { %v3118_v22 = vld [vmem:[#allocation4 + $0x18] sm:$0x3f]  ;;  %v2742_v59 = vld [vmem:[#allocation4 + $0x10] sm:$0x3f]  ;;  %v3350_v63 = vld [vmem:[#allocation4 + $0x20] sm:$0x3f] }
 0x461   : > { %v3130_v43 = vrot.slane %v3118_v22, 4  ;;  %v3068_v17 = vld [vmem:[#allocation4 + $0x18] sm:$0x3f]  ;;  %v2754_v52 = vrot.slane %v2742_v59, 2  ;;  %v3351_v26 = vld [vmem:[#allocation4 + $0x28] sm:$0x3f] }
 0x462   : > { %2625 = vrot.lane.b32.xlu0 %v2618_v28, %s13159_s29  ;;  %v3067_v28 = vld [vmem:[#allocation4 + $0x10] sm:$0x3f]  ;;  %v2658_v45 = vld [vmem:[#allocation4 + $0x18] sm:$0x3f]  ;;  %v3080_v3 = vrot.slane %v3068_v17, 2 }
 0x463   : > { %3358 = vrot.lane.b32.xlu1 %v3348_v42, %s8694_s13  ;;  %v2863_v5 = vld [vmem:[#allocation4 + $0x20] sm:$0x3f]  ;;  %v3224_v57 = vld [vmem:[#allocation4 + $0x28] sm:$0x3f] }
 0x464   : > { %2534 = vrot.lane.b32.xlu2 %v2522_v2, %s8694_s13  ;;  %v2896_v2 = vld [vmem:[#allocation4 + $0x18] sm:$0x3f]  ;;  %v3311_v22 = vld [vmem:[#allocation4 + $0x20] sm:$0x3f] }
 0x466   : > { %v9905_v60 = vpop.permute.xlu2 %2870 }
 0x46a   : > { %2575 = vrot.lane.b32.xlu0 %v2568_v41, %s8675_s26  ;;  %v3079_v41 = vrot.slane %v3067_v28, 2 }
 0x46b   : > { %2874 = vrot.lane.b32.xlu1 %v2862_v21, %s8688_s22 }
 0x46c   : > { %3236 = vrot.lane.b32.xlu2 %v3231_v12, %s8686_s20  ;;  %v2906_v12 = vrot.slane %v2896_v2, 2  ;;  %v2941_v2 = vld [vmem:[#allocation4 + $0x20] sm:$0x3f] }
 0x46e   : > { %v2713_v56 = vpop.permute.xlu2 %2712 }
 0x472   : > { %2718 = vrot.lane.b32.xlu0 %v2703_v9, %s8693_s12 }
 0x473   : > { %2673 = vrot.lane.b32.xlu1 %v2667_v32, %s8679_s30  ;;  %v3320_v32 = vrot.slane %v3310_v4, 6 }
 0x474   : > { %3136 = vrot.lane.b32.xlu2 %v3129_v16, %s8693_s12  ;;  %v2949_v16 = vrot.slane %v2939_v19, 4 }
 0x476   : > { %v9917_v24 = vpop.permute.xlu2 %3084 }
 0x47a   : > { %2494 = vrot.lane.b32.xlu0 %v2489_v47, %s8696_s16 }
 0x47b   : > { %2448 = vrot.lane.b32.xlu1 %v2443_v0, %s8688_s22  ;;  %v2670_v0 = vrot.slane %v2658_v45, 6  ;;  %v2558_v45 = vld [vmem:[#allocation4 + $0x18] sm:$0x3f] }
 0x47c   : > { %3002 = vrot.lane.b32.xlu2 %v2995_v31, %s8675_s26  ;;  %v2657_v31 = vld [vmem:[#allocation4 + $0x10] sm:$0x3f] }
 0x47d   : > { %v3040_v58 = vpop.permute.xlu1 %3039  ;;  %v2669_v37 = vrot.slane %v2657_v31, 6 }
 0x47e   : > { %v9922_v15 = vpop.permute.xlu2 %3041 }
 0x47f   : > { %v3051_v1 = vsel %vm1221_vm4, %v3040_v58, %v9922_v15  ;;  %v9926_v44 = vpop.permute.xlu0 %2714  ;;  %v2822_v58 = vld [vmem:[#allocation4 + $0x10] sm:$0x3f] }
 0x480   : > { %3061 = vst [vmem:[#allocation5 + $0x1e0] sm:$0x3f] %v3051_v1  ;;  %v2725_v8 = vsel %vm13064_vm7, %v2713_v56, %v9926_v44  ;;  %v2743_v56 = vld [vmem:[#allocation4 + $0x18] sm:$0x3f]  ;;  %v2832_v1 = vrot.slane %v2822_v58, 6 }
 0x481   : > { %2735 = vst [vmem:[#allocation5 + $0xf0] sm:$0x3f] %v2725_v8  ;;  %v2755_v35 = vrot.slane %v2743_v56, 2 }
 0x482   : > { %2402 = vrot.lane.b32.xlu0 %v2397_v51, %s8686_s20 }
 0x483   : > { %2496 = vrot.lane.b32.xlu1 %v2490_v18, %s8696_s16  ;;  %v2984_v18 = vld [vmem:[#allocation4 + $0x18] sm:$0x3f] }
 0x484   : > { %3188 = vrot.lane.b32.xlu2 %v3180_v49, %s8695_s14  ;;  %v2996_v49 = vrot.slane %v2984_v18, 6 }
 0x485   : > { %v9933_v50 = vpop.permute.xlu1 %2532 }
 0x486   : > { %v9935_v11 = vpop.permute.xlu2 %2953 }
 0x487   : > { %v2531_v27 = vpop.permute.xlu0 %2530 }
 0x488   : > { %v2541_v53 = vsel %vm2540_vm5, %v2531_v27, %v9933_v50  ;;  %v3030_v27 = vld [vmem:[#allocation4 + $0x20] sm:$0x3f] }
 0x489   : > { %2550 = vst [vmem:[#allocation5 + $0x78] sm:$0x3f] %v2541_v53 }
 0x48a   : > { %2536 = vrot.lane.b32.xlu0 %v2523_v23, %s8694_s13 }
 0x48b   : > { %2404 = vrot.lane.b32.xlu1 %v2398_v46, %s8686_s20 }
 0x48c   : > { %2911 = vrot.lane.b32.xlu2 %v2905_v29, %s8696_s16  ;;  %v3265_v29 = vld [vmem:[#allocation4 + $0x10] sm:$0x3f] }
 0x48d   : > { %v3135_v9 = vpop.permute.xlu1 %3134  ;;  %v3275_v23 = vrot.slane %v3265_v29, 4 }
 0x48e   : > { %v9942_v14 = vpop.permute.xlu2 %2836 }
 0x48f   : > { %v9944_v48 = vpop.permute.xlu0 %3184 }
 0x492   : > { %3238 = vrot.lane.b32.xlu0 %v3232_v30, %s8686_s20 }
 0x493   : > { %3186 = vrot.lane.b32.xlu1 %v3179_v33, %s8695_s14 }
 0x494   : > { %3282 = vrot.lane.b32.xlu2 %v3276_v25, %s8688_s22  ;;  %v2823_v25 = vld [vmem:[#allocation4 + $0x18] sm:$0x3f] }
 0x495   : > { %v9974_v47 = vpop.permute.xlu1 %3000 }
 0x496   : > { %v9949_v61 = vpop.permute.xlu2 %2623 }
 0x497   : > { %v9951_v42 = vpop.permute.xlu0 %2872 }
 0x498   : > { %v2880_v6 = vsel %vm666_vm6, %v9905_v60, %v9951_v42 }
 0x499   : > { %2889 = vst [vmem:[#allocation5 + $0x168] sm:$0x3f] %v2880_v6  ;;  %v2833_v6 = vrot.slane %v2823_v25, 6 }
 0x49a   : > { %3086 = vrot.lane.b32.xlu0 %v3079_v41, %s8679_s30  ;;  %v2951_v41 = vrot.slane %v2941_v2, 4 }
 0x49b   : > { %2957 = vrot.lane.b32.xlu1 %v2950_v39, %s8694_s13  ;;  %v3234_v39 = vrot.slane %v3224_v57, 2 }
 0x49c   : > { %2913 = vrot.lane.b32.xlu2 %v2906_v12, %s8696_s16 }
 0x49d   : > { %v9984_v38 = vpop.permute.xlu1 %2909 }
 0x49e   : > { %v9959_v21 = vpop.permute.xlu2 %2675 }
 0x4a2   : > { %2955 = vrot.lane.b32.xlu0 %v2949_v16, %s8694_s13  ;;  %v2608_v16 = vld [vmem:[#allocation4 + $0x18] sm:$0x3f] }
 0x4a3   : > { %3326 = vrot.lane.b32.xlu1 %v3320_v32, %s8696_s16  ;;  %v2620_v20 = vrot.slane %v2608_v16, 4 }
 0x4a4   : > { %2764 = vrot.lane.b32.xlu2 %v2755_v35, %s8695_s14  ;;  %v3119_v35 = vld [vmem:[#allocation4 + $0x20] sm:$0x3f] }
 0x4a6   : > { %v9964_v60 = vpop.permute.xlu2 %2573 }
 0x4aa   : > { %3138 = vrot.lane.b32.xlu0 %v3130_v43, %s8693_s12 }
 0x4ab   : > { %3324 = vrot.lane.b32.xlu1 %v3319_v54, %s8696_s16  ;;  %v3321_v54 = vrot.slane %v3311_v22, 6 }
 0x4ac   : > { %2627 = vrot.lane.b32.xlu2 %v2619_v40, %s13159_s29 }
 0x4ae   : > { %v9969_v34 = vpop.permute.xlu2 %2716 }
 0x4af   : > { %v2726_v13 = vsel %vm13064_vm7, %v9926_v44, %v9969_v34  ;;  %v2569_v44 = vrot.slane %v2557_v62, 2 }
 0x4b0   : > { %2736 = vst [vmem:[#allocation5 + $0xf8] sm:$0x3f] %v2726_v13 }
 0x4b2   : > { %3088 = vrot.lane.b32.xlu0 %v3080_v3, %s8679_s30  ;;  %v2481_v3 = vld [vmem:[#allocation4 + $0x10] sm:$0x3f] }
 0x4b3   : > { %2762 = vrot.lane.b32.xlu1 %v2754_v52, %s8695_s14  ;;  %v3069_v52 = vld [vmem:[#allocation4 + $0x20] sm:$0x3f]  ;;  %v2491_v31 = vrot.slane %v2481_v3, 6 }
 0x4b4   : > { %2679 = vrot.lane.b32.xlu2 %v2670_v0, %s8679_s30  ;;  %v2570_v0 = vrot.slane %v2558_v45, 2 }
 0x4b6   : > { %v9979_v10 = vpop.permute.xlu2 %2450 }
 0x4ba   : > { %2838 = vrot.lane.b32.xlu0 %v2832_v1, %s8686_s20  ;;  %v2985_v1 = vld [vmem:[#allocation4 + $0x20] sm:$0x3f] }
 0x4bb   : > { %2677 = vrot.lane.b32.xlu1 %v2669_v37, %s8679_s30  ;;  %v3223_v37 = vld [vmem:[#allocation4 + $0x20] sm:$0x3f] }
 0x4bc   : > { %2577 = vrot.lane.b32.xlu2 %v2569_v44, %s8675_s26 }
 0x4be   : > { %v9986_v8 = vpop.permute.xlu2 %2534 }
 0x4bf   : > { %v2542_v51 = vsel %vm2540_vm5, %v9933_v50, %v9986_v8 }
 0x4c0   : > { %2551 = vst [vmem:[#allocation5 + $0x80] sm:$0x3f] %v2542_v51  ;;  %v3312_v51 = vld [vmem:[#allocation4 + $0x28] sm:$0x3f] }
 0x4c2   : > { %3004 = vrot.lane.b32.xlu0 %v2996_v49, %s8675_s26  ;;  %v3233_v49 = vrot.slane %v3223_v37, 2 }
 0x4c3   : > { %3362 = vrot.lane.b32.xlu1 %v3350_v63, %s8694_s13  ;;  %v2997_v63 = vrot.slane %v2985_v1, 6 }
 0x4c4   : > { %3045 = vrot.lane.b32.xlu2 %v3030_v27, %s13159_s29  ;;  %v9996_v53 = vpop.permute.xlu0 %3360  ;;  %v3322_v27 = vrot.slane %v3312_v51, 6 }
 0x4c5   : > { %v9994_v55 = vpop.permute.xlu1 %3043 }
 0x4c6   : > { %v9998_v46 = vpop.permute.xlu2 %3236  ;;  %v3052_v50 = vsel %vm1221_vm4, %v9922_v15, %v9994_v55 }
 0x4c7   : > { %3062 = vst [vmem:[#allocation5 + $0x1e8] sm:$0x3f] %v3052_v50 }
 0x4ca   : > { %3280 = vrot.lane.b32.xlu0 %v3275_v23, %s8688_s22  ;;  %v3169_v23 = vld [vmem:[#allocation4 + $0x20] sm:$0x3f] }
 0x4cb   : > { %3364 = vrot.lane.b32.xlu1 %v3351_v26, %s8694_s13  ;;  %v2436_v26 = vld [vmem:[#allocation4 + $0x18] sm:$0x3f] }
 0x4cc   : > { %2876 = vrot.lane.b32.xlu2 %v2863_v5, %s8688_s22  ;;  %v2759_v33 = vpop.permute.xlu0 %2758  ;;  %v2390_v5 = vld [vmem:[#allocation4 + $0x18] sm:$0x3f] }
 0x4cd   : > { %v10006_v7 = vpop.permute.xlu1 %2760  ;;  %v2400_v25 = vrot.slane %v2390_v5, 2 }
 0x4ce   : > { %v10008_v30 = vpop.permute.xlu2 %3136  ;;  %v2771_v15 = vsel %vm2770_vm12, %v2759_v33, %v10006_v7  ;;  %v3181_v33 = vrot.slane %v3169_v23, 6  ;;  %v2704_v23 = vld [vmem:[#allocation4 + $0x20] sm:$0x3f] }
 0x4cf   : > { %v3146_v28 = vsel %vm13064_vm7, %v3135_v9, %v10008_v30  ;;  %2781 = vst [vmem:[#allocation5 + $0xf0] sm:$0xc0] %v2771_v15  ;;  %v3131_v9 = vrot.slane %v3119_v35, 4 }
 0x4d0   : > { %3156 = vst [vmem:[#allocation5 + $0x208] sm:$0xf0] %v3146_v28 }
 0x4d1   : > { %3161 = vst [vmem:[#allocation5 + $0x230] sm:$0x3] %v3146_v28 }
 0x4d2   : > { %2786 = vst [vmem:[#allocation5 + $0x118] sm:$0xf] %v2771_v15  ;;  %2840 = vrot.lane.b32.xlu0 %v2833_v6, %s8686_s20  ;;  %v2446_v15 = vrot.slane %v2436_v26, 4 }
 0x4d3   : > { %3242 = vrot.lane.b32.xlu1 %v3234_v39, %s8686_s20  ;;  %v3267_v39 = vld [vmem:[#allocation4 + $0x20] sm:$0x3f] }
 0x4d4   : > { %2959 = vrot.lane.b32.xlu2 %v2951_v41, %s8694_s13  ;;  %v10017_v4 = vpop.permute.xlu0 %2625  ;;  %v2824_v41 = vld [vmem:[#allocation4 + $0x20] sm:$0x3f] }
 0x4d5   : > { %v3359_v12 = vpop.permute.xlu1 %3358  ;;  %v2635_v32 = vsel %vm1221_vm4, %v9949_v61, %v10017_v4  ;;  %v2834_v16 = vrot.slane %v2824_v41, 6 }
 0x4d6   : > { %v10019_v19 = vpop.permute.xlu2 %3002  ;;  %v3368_v56 = vsel %vm2540_vm5, %v3359_v12, %v9996_v53  ;;  %2645 = vst [vmem:[#allocation5 + $0xa0] sm:$0xf0] %v2635_v32 }
 0x4d7   : > { %v3012_v36 = vsel %vm1083_vm2, %v9974_v47, %v10019_v19  ;;  %3377 = vst [vmem:[#allocation5 + $0x2d0] sm:$0x3f] %v3368_v56  ;;  %v3081_v47 = vrot.slane %v3069_v52, 2  ;;  %v3170_v56 = vld [vmem:[#allocation4 + $0x28] sm:$0x3f] }
 0x4d8   : > { %3022 = vst [vmem:[#allocation5 + $0x1b8] sm:$0xfc] %v3012_v36  ;;  %v3182_v35 = vrot.slane %v3170_v56, 6  ;;  %v3482_v56 = vld [vmem:[%s13035_s4 + $0x8] sm:$0xff] }
 0x4d9   : > { %2650 = vst [vmem:[#allocation5 + $0xc8] sm:$0x3] %v2635_v32  ;;  %v3277_v32 = vrot.slane %v3267_v39, 4 }
 0x4da   : > { %2629 = vrot.lane.b32.xlu0 %v2620_v20, %s13159_s29 }
 0x4db   : > { %3140 = vrot.lane.b32.xlu1 %v3131_v9, %s8693_s12 }
 0x4dc   : > { %3328 = vrot.lane.b32.xlu2 %v3321_v54, %s8696_s16  ;;  %v10034_v43 = vpop.permute.xlu0 %2575 }
 0x4dd   : > { %v10032_v61 = vpop.permute.xlu1 %2874  ;;  %v2585_v17 = vsel %vm1083_vm2, %v9964_v60, %v10034_v43 }
 0x4de   : > { %v10036_v40 = vpop.permute.xlu2 %3188  ;;  %v2881_v59 = vsel %vm666_vm6, %v9951_v42, %v10032_v61  ;;  %v3476_v13 = vld [vmem:[#allocation5 + $0x2d0] sm:$0x3f]  ;;  %2595 = vst [vmem:[#allocation5 + $0x78] sm:$0xc0] %v2585_v17 }
 0x4df   : > { %2890 = vst [vmem:[#allocation5 + $0x170] sm:$0x3f] %v2881_v59  ;;  %7760 = vmatpush.msk.msra.mxu0 %vm3500_vm8, %v3476_v13  ;;  %v2897_v59 = vld [vmem:[#allocation4 + $0x20] sm:$0x3f]  ;;  %v2942_v13 = vld [vmem:[#allocation4 + $0x28] sm:$0x3f] }
 0x4e0   : > { %2600 = vst [vmem:[#allocation5 + $0xa0] sm:$0xf] %v2585_v17  ;;  %v3268_v17 = vld [vmem:[#allocation4 + $0x28] sm:$0x3f]  ;;  %v2907_v45 = vrot.slane %v2897_v59, 2  ;;  %v2952_v3 = vrot.slane %v2942_v13, 4 }
 0x4e1   : > { %v3278_v52 = vrot.slane %v3268_v17, 4  ;;  %v2898_v17 = vld [vmem:[#allocation4 + $0x28] sm:$0x3f] }
 0x4e2   : > { %2579 = vrot.lane.b32.xlu0 %v2570_v0, %s8675_s26 }
 0x4e3   : > { %3090 = vrot.lane.b32.xlu1 %v3081_v47, %s8679_s30 }
 0x4e4   : > { %2498 = vrot.lane.b32.xlu2 %v2491_v31, %s8696_s16  ;;  %v10048_v60 = vpop.permute.xlu0 %2718 }
 0x4e5   : > { %v2674_v42 = vpop.permute.xlu1 %2673  ;;  %v2727_v18 = vsel %vm13064_vm7, %v9969_v34, %v10048_v60 }
 0x4e6   : > { %v2912_v58 = vpop.permute.xlu2 %2911  ;;  %v2685_v62 = vsel %vm13235_vm14, %v2674_v42, %v9959_v21  ;;  %2737 = vst [vmem:[#allocation5 + $0x100] sm:$0x3f] %v2727_v18  ;;  %v2864_v18 = vld [vmem:[#allocation4 + $0x28] sm:$0x3f]  ;;  %vm13240_vm14 = vmmov %vm13239_vm10 }
 0x4e7   : > { %v2919_v44 = vsel %vm2504_vm11, %v9984_v38, %v2912_v58  ;;  %2695 = vst [vmem:[#allocation5 + $0xc8] sm:$0xfc] %v2685_v62  ;;  %v2389_v62 = vld [vmem:[#allocation4 + $0x10] sm:$0x3f] }
 0x4e8   : > { %2928 = vst [vmem:[#allocation5 + $0x168] sm:$0xc0] %v2919_v44 }
 0x4e9   : > { %2933 = vst [vmem:[#allocation5 + $0x190] sm:$0xf] %v2919_v44 }
 0x4ea   : > { %3240 = vrot.lane.b32.xlu0 %v3233_v49, %s8686_s20 }
 0x4eb   : > { %3006 = vrot.lane.b32.xlu1 %v2997_v63, %s8675_s26  ;;  %v2482_v63 = vld [vmem:[#allocation4 + $0x18] sm:$0x3f] }
 0x4ec   : > { %3330 = vrot.lane.b32.xlu2 %v3322_v27, %s8696_s16  ;;  %v2495_v38 = vpop.permute.xlu0 %2494  ;;  %v3120_v27 = vld [vmem:[#allocation4 + $0x28] sm:$0x3f] }
 0x4ed   : > { %v2449_v50 = vpop.permute.xlu1 %2448 }
 0x4ee   : > { %v10060_v29 = vpop.permute.xlu2 %3282  ;;  %v2458_v34 = vsel %vm666_vm6, %v2449_v50, %v9979_v10  ;;  %v2492_v50 = vrot.slane %v2482_v63, 6 }
 0x4ef   : > { %2467 = vst [vmem:[#allocation5 + $0x28] sm:$0xf0] %v2458_v34 }
 0x4f0   : > { %2473 = vst [vmem:[#allocation5 + $0x50] sm:$0x3] %v2458_v34  ;;  %v3132_v34 = vrot.slane %v3120_v27, 4 }
 0x4f2   : > { %3190 = vrot.lane.b32.xlu0 %v3181_v33, %s8695_s14 }
 0x4f3   : > { %2454 = vrot.lane.b32.xlu1 %v2446_v15, %s8688_s22 }
 0x4f4   : > { %2408 = vrot.lane.b32.xlu2 %v2400_v25, %s8686_s20  ;;  %v2403_v28 = vpop.permute.xlu0 %2402  ;;  %v3225_v25 = vld [vmem:[#allocation4 + $0x30] sm:$0x3f] }
 0x4f5   : > { %v10067_v57 = vpop.permute.xlu1 %2496 }
 0x4f6   : > { %v10069_v2 = vpop.permute.xlu2 %2913  ;;  %v2505_v6 = vsel %vm2504_vm11, %v2495_v38, %v10067_v57 }
 0x4f7   : > { %v2920_v12 = vsel %vm2504_vm11, %v2912_v58, %v10069_v2  ;;  %2514 = vst [vmem:[#allocation5 + $0x50] sm:$0xfc] %v2505_v6  ;;  %v2435_v58 = vld [vmem:[#allocation4 + $0x10] sm:$0x3f] }
 0x4f8   : > { %2929 = vst [vmem:[#allocation5 + $0x170] sm:$0xc0] %v2920_v12  ;;  %v2445_v44 = vrot.slane %v2435_v58, 4 }
 0x4f9   : > { %2934 = vst [vmem:[#allocation5 + $0x198] sm:$0xf] %v2920_v12  ;;  %v3235_v12 = vrot.slane %v3225_v25, 2 }
 0x4fa   : > { %3284 = vrot.lane.b32.xlu0 %v3277_v32, %s8688_s22 }
 0x4fb   : > { %2842 = vrot.lane.b32.xlu1 %v2834_v16, %s8686_s20 }
 0x4fc   : > { %3192 = vrot.lane.b32.xlu2 %v3182_v35, %s8695_s14  ;;  %v10080_v22 = vpop.permute.xlu0 %2536 }
 0x4fd   : > { %v10078_v36 = vpop.permute.xlu1 %2404  ;;  %v2543_v54 = vsel %vm2540_vm5, %v9986_v8, %v10080_v22 }
 0x4fe   : > { %v2412_v20 = vsel %vm13236_vm15, %v2403_v28, %v10078_v36  ;;  %v10084_v9 = vpop.permute.xlu2 %2764  ;;  %2552 = vst [vmem:[#allocation5 + $0x88] sm:$0x3f] %v2543_v54  ;;  %v3070_v54 = vld [vmem:[#allocation4 + $0x28] sm:$0x3f]  ;;  %vm13241_vm15 = vmmov %vm13239_vm10 }
 0x4ff   : > { %2421 = vst [vmem:[#allocation5] sm:$0xc0] %v2412_v20  ;;  %v3082_v13 = vrot.slane %v3070_v54, 2  ;;  %v3416_v54 = vld [vmem:[#allocation5 + $0xf0] sm:$0xff] }
 0x500   : > { %2427 = vst [vmem:[#allocation5 + $0x28] sm:$0xf] %v2412_v20 }
 0x502   : > { %2915 = vrot.lane.b32.xlu0 %v2907_v45, %s8696_s16  ;;  %v3481_v45 = vld [vmem:[%s13035_s4] sm:$0xff] }
 0x503   : > { %3286 = vrot.lane.b32.xlu1 %v3278_v52, %s8688_s22 }
 0x504   : > { %2961 = vrot.lane.b32.xlu2 %v2952_v3, %s8694_s13  ;;  %v10092_v47 = vpop.permute.xlu0 %3238  ;;  %v2908_v3 = vrot.slane %v2898_v17, 2 }
 0x505   : > { %v3187_v0 = vpop.permute.xlu1 %3186  ;;  %v3246_v1 = vsel %vm13237_vm1, %v9998_v46, %v10092_v47 }
 0x506   : > { %v3196_v8 = vsel %vm2770_vm12, %v9944_v48, %v3187_v0  ;;  %v3197_v31 = vsel %vm2770_vm12, %v3187_v0, %v10036_v40  ;;  %v10098_v42 = vpop.permute.xlu2 %2627  ;;  %v2399_v48 = vrot.slane %v2389_v62, 2  ;;  %3255 = vst [vmem:[#allocation5 + $0x258] sm:$0xc0] %v3246_v1 }
 0x507   : > { %3206 = vst [vmem:[#allocation5 + $0x230] sm:$0xfc] %v3196_v8  ;;  %v2636_v37 = vsel %vm1221_vm4, %v10017_v4, %v10098_v42  ;;  %v3431_v8 = vld [vmem:[#allocation5 + $0x168] sm:$0xff] }
 0x508   : > { %3207 = vst [vmem:[#allocation5 + $0x238] sm:$0xfc] %v3197_v31 }
 0x509   : > { %2646 = vst [vmem:[#allocation5 + $0xa8] sm:$0xf0] %v2636_v37 }
 0x50a   : > { %2651 = vst [vmem:[#allocation5 + $0xd0] sm:$0x3] %v2636_v37  ;;  %2452 = vrot.lane.b32.xlu0 %v2445_v44, %s8688_s22  ;;  %v2986_v37 = vld [vmem:[#allocation4 + $0x28] sm:$0x3f]  ;;  %v3313_v44 = vld [vmem:[#allocation4 + $0x30] sm:$0x3f] }
 0x50b   : > { %2406 = vrot.lane.b32.xlu1 %v2399_v48, %s8686_s20  ;;  %3260 = vst [vmem:[#allocation5 + $0x280] sm:$0xf] %v3246_v1  ;;  %v2744_v1 = vld [vmem:[#allocation4 + $0x20] sm:$0x3f]  ;;  %v3323_v63 = vrot.slane %v3313_v44, 6 }
 0x50c   : > { %2878 = vrot.lane.b32.xlu2 %v2864_v18, %s8688_s22  ;;  %v10111_v4 = vpop.permute.xlu0 %3086  ;;  %v2998_v18 = vrot.slane %v2986_v37, 6 }
 0x50d   : > { %v10109_v51 = vpop.permute.xlu1 %2957  ;;  %v3096_v46 = vsel %vm13238_vm13, %v9917_v24, %v10111_v4  ;;  %v3461_v38 = vld [vmem:[#allocation5 + $0x258] sm:$0xff]  ;;  %vm13242_vm13 = vmmov %vm13237_vm1 }
 0x50e   : > { %v10113_v49 = vpop.permute.xlu2 %2679  ;;  %3106 = vst [vmem:[#allocation5 + $0x1e0] sm:$0xc0] %v3096_v46  ;;  %3516 = vmatpush.msrb.mxu3 %v3461_v38  ;;  %v3456_v26 = vld [vmem:[#allocation5 + $0x230] sm:$0xff] }
 0x50f   : > { %3111 = vst [vmem:[#allocation5 + $0x208] sm:$0xf] %v3096_v46  ;;  %v2756_v46 = vrot.slane %v2744_v1, 2  ;;  %v3396_v1 = vld [vmem:[#allocation5 + $0x50] sm:$0xff] }
 0x510   : > { %3517 = vmatpush.msrb.mxu3 %v3456_v26  ;;  %v2659_v26 = vld [vmem:[#allocation4 + $0x20] sm:$0x3f] }
 0x511   : > { %v2671_v25 = vrot.slane %v2659_v26, 6 }
 0x512   : > { %2500 = vrot.lane.b32.xlu0 %v2492_v50, %s8696_s16 }
 0x513   : > { %3142 = vrot.lane.b32.xlu1 %v3132_v34, %s8693_s12  ;;  %v2825_v34 = vld [vmem:[#allocation4 + $0x28] sm:$0x3f] }
 0x514   : > { %2720 = vrot.lane.b32.xlu2 %v2704_v23, %s8693_s12  ;;  %v2956_v24 = vpop.permute.xlu0 %2955 }
 0x515   : > { %v10121_v5 = vpop.permute.xlu1 %3326  ;;  %v2963_v15 = vsel %vm2540_vm5, %v9935_v11, %v2956_v24  ;;  %v2964_v6 = vsel %vm2540_vm5, %v2956_v24, %v10109_v51  ;;  %v3446_v41 = vld [vmem:[#allocation5 + $0x1e0] sm:$0xff]  ;;  %v3031_v11 = vld [vmem:[#allocation4 + $0x28] sm:$0x3f]  ;;  %v2391_v24 = vld [vmem:[#allocation4 + $0x20] sm:$0x3f] }
 0x516   : > { %v10123_v33 = vpop.permute.xlu2 %2577  ;;  %2972 = vst [vmem:[#allocation5 + $0x190] sm:$0xf0] %v2963_v15  ;;  %v3451_v39 = vld [vmem:[#allocation5 + $0x208] sm:$0xff] }
 0x517   : > { %v2586_v28 = vsel %vm1083_vm2, %v10034_v43, %v10123_v33  ;;  %3518 = vmatpush.msrb.mxu3 %v3451_v39  ;;  %2973 = vst [vmem:[#allocation5 + $0x198] sm:$0xf0] %v2964_v6 }
 0x518   : > { %2596 = vst [vmem:[#allocation5 + $0x80] sm:$0xc0] %v2586_v28 }
 0x519   : > { %2601 = vst [vmem:[#allocation5 + $0xa8] sm:$0xf] %v2586_v28  ;;  %3519 = vmatpush.msrb.mxu3 %v3446_v41  ;;  %v2401_v28 = vrot.slane %v2391_v24, 2 }
 0x51a   : > { %2977 = vst [vmem:[#allocation5 + $0x1b8] sm:$0x3] %v2963_v15  ;;  %3244 = vrot.lane.b32.xlu0 %v3235_v12, %s8686_s20  ;;  %v2609_v12 = vld [vmem:[#allocation4 + $0x20] sm:$0x3f] }
 0x51b   : > { %2978 = vst [vmem:[#allocation5 + $0x1c0] sm:$0x3] %v2964_v6  ;;  %3047 = vrot.lane.b32.xlu1 %v3031_v11, %s13159_s29  ;;  %v2621_v11 = vrot.slane %v2609_v12, 4 }
 0x51c   : > { %3490 = vperm.xlu2 %8563, %v3482_v56   ;;  %v10137_v32 = vpop.permute.xlu0 %3138 }
 0x51d   : > { %v3325_v43 = vpop.permute.xlu1 %3324  ;;  %v3147_v20 = vsel %vm13064_vm7, %v10008_v30, %v10137_v32  ;;  %v3436_v30 = vld [vmem:[#allocation5 + $0x190] sm:$0xff] }
 0x51e   : > { %v3334_v16 = vsel %vm2504_vm11, %v3325_v43, %v10121_v5  ;;  %v10141_v35 = vpop.permute.xlu2 %3045  ;;  %3157 = vst [vmem:[#allocation5 + $0x210] sm:$0xf0] %v3147_v20 }
 0x51f   : > { %3343 = vst [vmem:[#allocation5 + $0x2a8] sm:$0xfc] %v3334_v16  ;;  %v3053_v59 = vsel %vm1221_vm4, %v9994_v55, %v10141_v35  ;;  %v3352_v16 = vld [vmem:[#allocation4 + $0x30] sm:$0x3f] }
 0x520   : > { %3063 = vst [vmem:[#allocation5 + $0x1f0] sm:$0x3f] %v3053_v59 }
 0x521   : > { %3162 = vst [vmem:[#allocation5 + $0x238] sm:$0x3] %v3147_v20  ;;  %v3441_v52 = vld [vmem:[#allocation5 + $0x1b8] sm:$0xff] }
 0x522   : > { %3520 = vmatpush.msrb.mxu3 %v3441_v52  ;;  %3092 = vrot.lane.b32.xlu0 %v3082_v13, %s8679_s30  ;;  %v3421_v20 = vld [vmem:[#allocation5 + $0x118] sm:$0xff] }
 0x523   : > { %2917 = vrot.lane.b32.xlu1 %v2908_v3, %s8696_s16  ;;  %v3269_v3 = vld [vmem:[#allocation4 + $0x30] sm:$0x3f] }
 0x524   : > { %3485 = vperm.xlu2 %8563, %v3481_v45   ;;  %3521 = vmatpush.msrb.mxu3 %v3436_v30  ;;  %v10154_v0 = vpop.permute.xlu0 %3088  ;;  %v2559_v45 = vld [vmem:[#allocation4 + $0x20] sm:$0x3f] }
 0x525   : > { %v2763_v55 = vpop.permute.xlu1 %2762  ;;  %v3411_v30 = vld [vmem:[#allocation5 + $0xc8] sm:$0xff] }
 0x526   : > { %v2772_v31 = vsel %vm2770_vm12, %v10006_v7, %v2763_v55  ;;  %v2773_v58 = vsel %vm2770_vm12, %v2763_v55, %v10084_v9  ;;  %v10160_v62 = vpop.permute.xlu2 %2876  ;;  %3522 = vmatpush.msrb.mxu3 %v3431_v8  ;;  %v3097_v7 = vsel %vm13239_vm10, %v10111_v4, %v10154_v0  ;;  %v2571_v55 = vrot.slane %v2559_v45, 2  ;;  %v3406_v8 = vld [vmem:[#allocation5 + $0xa0] sm:$0xff] }
 0x527   : > { %2782 = vst [vmem:[#allocation5 + $0xf8] sm:$0xc0] %v2772_v31  ;;  %v2882_v48 = vsel %vm666_vm6, %v10032_v61, %v10160_v62  ;;  %vm3493_vm10 = vcmask 179200  }
 0x528   : > { %2783 = vst [vmem:[#allocation5 + $0x100] sm:$0xc0] %v2773_v58 }
 0x529   : > { %2787 = vst [vmem:[#allocation5 + $0x120] sm:$0xf] %v2772_v31  ;;  %v3279_v31 = vrot.slane %v3269_v3, 4 }
 0x52a   : > { %2788 = vst [vmem:[#allocation5 + $0x128] sm:$0xf] %v2773_v58  ;;  %3008 = vrot.lane.b32.xlu0 %v2998_v18, %s8675_s26  ;;  %v3401_v58 = vld [vmem:[#allocation5 + $0x78] sm:$0xff]  ;;  %v3391_v18 = vld [vmem:[#allocation5 + $0x28] sm:$0xff] }
 0x52b   : > { %2891 = vst [vmem:[#allocation5 + $0x178] sm:$0x3f] %v2882_v48  ;;  %2766 = vrot.lane.b32.xlu1 %v2756_v46, %s8695_s14  ;;  %v2483_v46 = vld [vmem:[#allocation4 + $0x20] sm:$0x3f] }
 0x52c   : > { %3107 = vst [vmem:[#allocation5 + $0x1e8] sm:$0xc0] %v3097_v7  ;;  %3332 = vrot.lane.b32.xlu2 %v3323_v63, %s8696_s16  ;;  %v10171_v61 = vpop.permute.xlu0 %2838 }
 0x52d   : > { %3112 = vst [vmem:[#allocation5 + $0x210] sm:$0xf] %v3097_v7  ;;  %v2678_v27 = vpop.permute.xlu1 %2677  ;;  %v2846_v15 = vsel %vm13237_vm1, %v9942_v14, %v10171_v61 }
 0x52e   : > { %v2686_v50 = vsel %vm13240_vm14, %v9959_v21, %v2678_v27  ;;  %v2687_v4 = vsel %vm13241_vm15, %v2678_v27, %v10113_v49  ;;  %v10177_v38 = vpop.permute.xlu2 %2959  ;;  %v2835_v21 = vrot.slane %v2825_v34, 6  ;;  %2855 = vst [vmem:[#allocation5 + $0x140] sm:$0xfc] %v2846_v15  ;;  %v10227_v27 = vld [vmem:[%s13034_s3] sm:$0xff]  ;;  %vm13243_vm15 = vmmov %vm13237_vm1 }
 0x52f   : > { %2696 = vst [vmem:[#allocation5 + $0xd0] sm:$0xfc] %v2686_v50  ;;  %v2965_v23 = vsel %vm2540_vm5, %v10109_v51, %v10177_v38  ;;  %v3386_v50 = vld [vmem:[#allocation5] sm:$0xff] }
 0x530   : > { %2697 = vst [vmem:[#allocation5 + $0xd8] sm:$0xfc] %v2687_v4  ;;  %v2524_v4 = vld [vmem:[#allocation4 + $0x20] sm:$0x3f] }
 0x531   : > { %2974 = vst [vmem:[#allocation5 + $0x1a0] sm:$0xf0] %v2965_v23 }
 0x532   : > { %2979 = vst [vmem:[#allocation5 + $0x1c8] sm:$0x3] %v2965_v23  ;;  %2844 = vrot.lane.b32.xlu0 %v2835_v21, %s8686_s20  ;;  %v2493_v23 = vrot.slane %v2483_v46, 6 }
 0x533   : > { %2681 = vrot.lane.b32.xlu1 %v2671_v25, %s8679_s30 }
 0x534   : > { %2410 = vrot.lane.b32.xlu2 %v2401_v28, %s8686_s20  ;;  %v10188_v6 = vpop.permute.xlu0 %3004  ;;  %v2437_v28 = vld [vmem:[#allocation4 + $0x20] sm:$0x3f] }
 0x535   : > { %v3363_v51 = vpop.permute.xlu1 %3362  ;;  %v3013_v14 = vsel %vm1083_vm2, %v10019_v19, %v10188_v6  ;;  %v3426_v43 = vld [vmem:[#allocation5 + $0x140] sm:$0xff] }
 0x536   : > { %v3369_v39 = vsel %vm2540_vm5, %v9996_v53, %v3363_v51  ;;  %v3329_v41 = vpop.permute.xlu2 %3328  ;;  %3023 = vst [vmem:[#allocation5 + $0x1c0] sm:$0xfc] %v3013_v14  ;;  %3523 = vmatpush.msrb.mxu3 %v3426_v43 }
 0x537   : > { %3378 = vst [vmem:[#allocation5 + $0x2d8] sm:$0x3f] %v3369_v39  ;;  %v3335_v56 = vsel %vm2504_vm11, %v10121_v5, %v3329_v41  ;;  %v2447_v39 = vrot.slane %v2437_v28, 4 }
 0x538   : > { %3344 = vst [vmem:[#allocation5 + $0x2b0] sm:$0xfc] %v3335_v56  ;;  %3524 = vmatpush.msrb.mxu3 %v3421_v20 }
 0x53a   : > { %2631 = vrot.lane.b32.xlu0 %v2621_v11, %s13159_s29  ;;  %3525 = vmatpush.msrb.mxu3 %v3416_v54 }
 0x53b   : > { %3366 = vrot.lane.b32.xlu1 %v3352_v16, %s8694_s13 }
 0x53c   : > { %v3281_v19 = vpop.permute.xlu0 %3280  ;;  %3526 = vmatpush.msrb.mxu3 %v3411_v30 }
 0x53d   : > { %v10199_v53 = vpop.permute.xlu1 %3364  ;;  %v3290_v17 = vsel %vm666_vm6, %v3281_v19, %v10060_v29 }
 0x53e   : > { %v10201_v59 = vpop.permute.xlu2 %2498  ;;  %v3370_v5 = vsel %vm2540_vm5, %v3363_v51, %v10199_v53  ;;  %v3477_v13 = vld [vmem:[#allocation5 + $0x2d8] sm:$0x3f]  ;;  %3299 = vst [vmem:[#allocation5 + $0x280] sm:$0xf0] %v3290_v17  ;;  %3527 = vmatpush.msrb.mxu3 %v3406_v8  ;;  %v10254_v51 = vld [vmem:[%s13034_s3 + $0x10] sm:$0xff]  ;;  %v3452_v8 = vld [vmem:[#allocation5 + $0x210] sm:$0xff] }
 0x53f   : > { %v2506_v52 = vsel %vm2504_vm11, %v10067_v57, %v10201_v59  ;;  %3379 = vst [vmem:[#allocation5 + $0x2e0] sm:$0x3f] %v3370_v5  ;;  %7763 = vmatpush.msk.msra.mxu2 %vm3500_vm8, %v3477_v13 }
 0x540   : > { %2515 = vst [vmem:[#allocation5 + $0x58] sm:$0xfc] %v2506_v52  ;;  %3528 = vmatpush.msrb.mxu3 %v3401_v58  ;;  %v3457_v52 = vld [vmem:[#allocation5 + $0x238] sm:$0xff]  ;;  %v3447_v58 = vld [vmem:[#allocation5 + $0x1e8] sm:$0xff] }
 0x541   : > { %3304 = vst [vmem:[#allocation5 + $0x2a8] sm:$0x3] %v3290_v17 }
 0x542   : > { %2581 = vrot.lane.b32.xlu0 %v2571_v55, %s8675_s26  ;;  %3529 = vmatpush.msrb.mxu3 %v3396_v1 }
 0x543   : > { %3288 = vrot.lane.b32.xlu1 %v3279_v31, %s8688_s22 }
 0x544   : > { %v10215_v37 = vpop.permute.xlu0 %2840  ;;  %3530 = vmatpush.msrb.mxu3 %v3391_v18 }
 0x545   : > { %v10213_v57 = vpop.permute.xlu1 %3242  ;;  %v2847_v48 = vsel %vm13242_vm13, %v10171_v61, %v10215_v37  ;;  %v10232_v61 = vld [vmem:[%s13034_s3 + $0x8] sm:$0xff]  ;;  %vm13244_vm13 = vmmov %vm13237_vm1 }
 0x546   : > { %v10217_v44 = vpop.permute.xlu2 %3330  ;;  %2856 = vst [vmem:[#allocation5 + $0x148] sm:$0xfc] %v2847_v48  ;;  %3531 = vmatpush.msrb.mxu3 %v3386_v50  ;;  %v3466_v34 = vld [vmem:[#allocation5 + $0x280] sm:$0xff] }
 0x547   : > { %v3336_v7 = vsel %vm2504_vm11, %v3329_v41, %v10217_v44  ;;  %3532 = vmatmul.f32.vlgmr.msrb.gmra.mxu3 %v10227_v27  ;;  %v10259_v41 = vld [vmem:[%s13034_s3 + $0x18] sm:$0xff] }
 0x548   : > { %3345 = vst [vmem:[#allocation5 + $0x2b8] sm:$0xfc] %v3336_v7  ;;  %v3471_v63 = vld [vmem:[#allocation5 + $0x2a8] sm:$0xff]  ;;  %v3437_v7 = vld [vmem:[#allocation5 + $0x198] sm:$0xff] }
 0x549   : > { %3553 = vmatpush.msra.mxu0 %v3471_v63 }
 0x54a   : > { %2538 = vrot.lane.b32.xlu0 %v2524_v4, %s8694_s13  ;;  %v3432_v4 = vld [vmem:[#allocation5 + $0x170] sm:$0xff] }
 0x54b   : > { %3554 = vmatpush.msra.mxu0 %v3466_v34  ;;  %2502 = vrot.lane.b32.xlu1 %v2493_v23, %s8696_s16 }
 0x54c   : > { %v10239_v24 = vpop.permute.xlu0 %2629  ;;  %7761 = vmatmul.msk.f32.vlgmr.msra.gmra.mxu0 %vm3493_vm10, %v10232_v61 }
 0x54d   : > { %v10237_v26 = vpop.permute.xlu1 %3140  ;;  %v2637_v25 = vsel %vm1221_vm4, %v10098_v42, %v10239_v24  ;;  %v3427_v23 = vld [vmem:[#allocation5 + $0x148] sm:$0xff] }
 0x54e   : > { %v10243_v15 = vpop.permute.xlu2 %2408  ;;  %v3148_v21 = vsel %vm13064_vm7, %v10137_v32, %v10237_v26  ;;  %2647 = vst [vmem:[#allocation5 + $0xb0] sm:$0xf0] %v2637_v25 }
 0x54f   : > { %3158 = vst [vmem:[#allocation5 + $0x218] sm:$0xf0] %v3148_v21  ;;  %3535 = vmatmul.f32.gmra.mxu3 %v10254_v51 }
 0x550   : > { %3163 = vst [vmem:[#allocation5 + $0x240] sm:$0x3] %v3148_v21 }
 0x551   : > { %2652 = vst [vmem:[#allocation5 + $0xd8] sm:$0x3] %v2637_v25  ;;  %v3422_v25 = vld [vmem:[#allocation5 + $0x120] sm:$0xff] }
 0x552   : > { %2456 = vrot.lane.b32.xlu0 %v2447_v39, %s8688_s22  ;;  %v3478_v39 = vld [vmem:[#allocation5 + $0x2e0] sm:$0x3f] }
 0x554   : > { %v10265_v32 = vpop.permute.xlu0 %2579  ;;  %7762 = vmatmul.msk.f32.gmra.mxu0 %vm3493_vm10, %v10259_v41 }
 0x555   : > { %v10263_v42 = vpop.permute.xlu1 %3090  ;;  %v2587_v56 = vsel %vm1083_vm2, %v10123_v33, %v10265_v32 }
 0x556   : > { %v3098_v14 = vsel %vm13240_vm14, %v10154_v0, %v10263_v42  ;;  %v10272_v12 = vpop.permute.xlu2 %3192  ;;  %2597 = vst [vmem:[#allocation5 + $0x88] sm:$0xc0] %v2587_v56  ;;  %vm13245_vm14 = vmmov %vm13237_vm1 }
 0x557   : > { %3108 = vst [vmem:[#allocation5 + $0x1f0] sm:$0xc0] %v3098_v14 }
 0x558   : > { %3113 = vst [vmem:[#allocation5 + $0x218] sm:$0xf] %v3098_v14  ;;  %v3417_v14 = vld [vmem:[#allocation5 + $0xf8] sm:$0xff] }
 0x559   : > { %2602 = vst [vmem:[#allocation5 + $0xb0] sm:$0xf] %v2587_v56 }
 0x55c   : > { %v3241_v43 = vpop.permute.xlu0 %3240 }
 0x55d   : > { %v10277_v11 = vpop.permute.xlu1 %3006  ;;  %v3247_v33 = vsel %vm13243_vm15, %v10092_v47, %v3241_v43  ;;  %v3248_v19 = vsel %vm13237_vm1, %v3241_v43, %v10213_v57  ;;  %vm13246_vm15 = vmmov %vm13237_vm1  ;;  %vm2518_vm1 = vcmask 678914  }
 0x55e   : > { %v3014_v16 = vsel %vm1083_vm2, %v10188_v6, %v10277_v11  ;;  %v2962_v20 = vpop.permute.xlu2 %2961  ;;  %3256 = vst [vmem:[#allocation5 + $0x260] sm:$0xc0] %v3247_v33 }
 0x55f   : > { %3024 = vst [vmem:[#allocation5 + $0x1c8] sm:$0xfc] %v3014_v16  ;;  %v2966_v0 = vsel %vm2540_vm5, %v10177_v38, %v2962_v20  ;;  %v3453_v48 = vld [vmem:[#allocation5 + $0x218] sm:$0xff] }
 0x560   : > { %2975 = vst [vmem:[#allocation5 + $0x1a8] sm:$0xf0] %v2966_v0 }
 0x561   : > { %2976 = vst.msk [vmem:[#allocation5 + $0x1b0] sm:$0xf0] %vm2471_vm3, %v2962_v20 }
 0x562   : > { %2980 = vst [vmem:[#allocation5 + $0x1d0] sm:$0x3] %v2966_v0  ;;  %v3412_v0 = vld [vmem:[#allocation5 + $0xd0] sm:$0xff] }
 0x563   : > { %2981 = vst.msk [vmem:[#allocation5 + $0x1d8] sm:$0x3] %vm2477_vm9, %v2962_v20 }
 0x564   : > { %3257 = vst [vmem:[#allocation5 + $0x268] sm:$0xc0] %v3248_v19  ;;  %v3191_v54 = vpop.permute.xlu0 %3190 }
 0x565   : > { %v10290_v6 = vpop.permute.xlu1 %2454  ;;  %3261 = vst [vmem:[#allocation5 + $0x288] sm:$0xf] %v3247_v33  ;;  %v3198_v47 = vsel %vm2770_vm12, %v10036_v40, %v3191_v54  ;;  %v3199_v17 = vsel %vm2770_vm12, %v3191_v54, %v10272_v12  ;;  %v3462_v13 = vld [vmem:[#allocation5 + $0x260] sm:$0xff]  ;;  %v3407_v54 = vld [vmem:[#allocation5 + $0xa8] sm:$0xff] }
 0x566   : > { %v2879_v5 = vpop.permute.xlu2 %2878  ;;  %3262 = vst [vmem:[#allocation5 + $0x290] sm:$0xf] %v3248_v19  ;;  %3562 = vmatpush.msra.mxu1 %v3462_v13  ;;  %v3443_v34 = vld [vmem:[#allocation5 + $0x1c8] sm:$0xff] }
 0x567   : > { %v2883_v38 = vsel %vm666_vm6, %v10160_v62, %v2879_v5  ;;  %2893 = vst.msk [vmem:[#allocation5 + $0x188] sm:$0x3f] %vm2385_vm0, %v2879_v5 }
 0x568   : > { %2892 = vst [vmem:[#allocation5 + $0x180] sm:$0x3f] %v2883_v38  ;;  %3563 = vmatpush.msra.mxu1 %v3457_v52 }
 0x569   : > { %3208 = vst [vmem:[#allocation5 + $0x240] sm:$0xfc] %v3198_v47  ;;  %v3402_v47 = vld [vmem:[#allocation5 + $0x80] sm:$0xff] }
 0x56a   : > { %3209 = vst [vmem:[#allocation5 + $0x248] sm:$0xfc] %v3199_v17  ;;  %3564 = vmatpush.msra.mxu1 %v3452_v8 }
 0x56b   : > { %v3463_v45 = vld [vmem:[#allocation5 + $0x268] sm:$0xff] }
 0x56c   : > { %3608 = vmatpush.msrb.mxu0 %v3463_v45  ;;  %v3285_v30 = vpop.permute.xlu0 %3284  ;;  %3565 = vmatpush.msra.mxu1 %v3447_v58  ;;  %v3408_v58 = vld [vmem:[#allocation5 + $0xb0] sm:$0xff] }
 0x56d   : > { %v10299_v3 = vpop.permute.xlu1 %2842  ;;  %v3291_v55 = vsel %vm666_vm6, %v10060_v29, %v3285_v30  ;;  %v3448_v29 = vld [vmem:[#allocation5 + $0x1f0] sm:$0xff] }
 0x56e   : > { %v2848_v40 = vsel %vm13244_vm13, %v10215_v37, %v10299_v3  ;;  %v10304_v62 = vpop.permute.xlu2 %2720  ;;  %3300 = vst [vmem:[#allocation5 + $0x288] sm:$0xf0] %v3291_v55  ;;  %v3442_v37 = vld [vmem:[#allocation5 + $0x1c0] sm:$0xff]  ;;  %vm2425_vm13 = vcmask 678918  }
 0x56f   : > { %2857 = vst [vmem:[#allocation5 + $0x150] sm:$0xfc] %v2848_v40  ;;  %v2728_v31 = vsel %vm13064_vm7, %v10048_v60, %v10304_v62  ;;  %3566 = vmatpush.msra.mxu1 %v3442_v37 }
 0x570   : > { %2738 = vst [vmem:[#allocation5 + $0x108] sm:$0x3f] %v2728_v31  ;;  %v3458_v1 = vld [vmem:[#allocation5 + $0x240] sm:$0xff] }
 0x571   : > { %3305 = vst [vmem:[#allocation5 + $0x2b0] sm:$0x3] %v3291_v55  ;;  %3609 = vmatpush.msrb.mxu0 %v3458_v1  ;;  %3567 = vmatpush.msra.mxu1 %v3437_v7  ;;  %v3423_v55 = vld [vmem:[#allocation5 + $0x128] sm:$0xff]  ;;  %v3418_v31 = vld [vmem:[#allocation5 + $0x100] sm:$0xff] }
 0x573   : > { %3610 = vmatpush.msrb.mxu0 %v3453_v48  ;;  %3568 = vmatpush.msra.mxu1 %v3432_v4 }
 0x574   : > { %v10313_v46 = vpop.permute.xlu0 %2915 }
 0x575   : > { %v10311_v18 = vpop.permute.xlu1 %3286  ;;  %3611 = vmatpush.msrb.mxu0 %v3448_v29  ;;  %v2921_v50 = vsel %vm2504_vm11, %v10069_v2, %v10313_v46  ;;  %3569 = vmatpush.msra.mxu1 %v3427_v23  ;;  %v3467_v28 = vld [vmem:[#allocation5 + $0x288] sm:$0xff] }
 0x576   : > { %v3292_v60 = vsel %vm666_vm6, %v3285_v30, %v10311_v18  ;;  %v10317_v63 = vpop.permute.xlu2 %3490  ;;  %2930 = vst [vmem:[#allocation5 + $0x178] sm:$0xc0] %v2921_v50 }
 0x577   : > { %3301 = vst [vmem:[#allocation5 + $0x290] sm:$0xf0] %v3292_v60  ;;  %3612 = vmatpush.msrb.mxu0 %v3443_v34  ;;  %3570 = vmatpush.msra.mxu1 %v3422_v25 }
 0x578   : > { %3306 = vst [vmem:[#allocation5 + $0x2b8] sm:$0x3] %v3292_v60  ;;  %v3472_v21 = vld [vmem:[#allocation5 + $0x2b0] sm:$0xff]  ;;  %v3403_v60 = vld [vmem:[#allocation5 + $0x88] sm:$0xff] }
 0x579   : > { %2935 = vst [vmem:[#allocation5 + $0x1a0] sm:$0xf] %v2921_v50  ;;  %3599 = vmatpush.msra.mxu2 %v3472_v21  ;;  %3571 = vmatpush.msra.mxu1 %v3417_v14 }
 0x57b   : > { %3600 = vmatpush.msra.mxu2 %v3467_v28  ;;  %3572 = vmatpush.msra.mxu1 %v3412_v0 }
 0x57c   : > { %v2453_v56 = vpop.permute.xlu0 %2452  ;;  %7764 = vmatmul.msk.f32.vlgmr.msra.gmra.mxu2 %vm3493_vm10, %v10232_v61 }
 0x57d   : > { %7766 = vmatpush.msk.msrb.mxu2 %vm3500_vm8, %v3478_v39  ;;  %v2407_v2 = vpop.permute.xlu1 %2406  ;;  %v2459_v19 = vsel %vm666_vm6, %v9979_v10, %v2453_v56  ;;  %3573 = vmatpush.msra.mxu1 %v3407_v54  ;;  %v3433_v17 = vld [vmem:[#allocation5 + $0x178] sm:$0xff]  ;;  %v3428_v10 = vld [vmem:[#allocation5 + $0x150] sm:$0xff] }
 0x57e   : > { %v2413_v43 = vsel %vm13245_vm14, %v10078_v36, %v2407_v2  ;;  %v2414_v16 = vsel %vm13246_vm15, %v2407_v2, %v10243_v15  ;;  %v10327_v20 = vpop.permute.xlu2 %3485  ;;  %v2460_v36 = vsel %vm666_vm6, %v2453_v56, %v10290_v6  ;;  %v3468_v38 = vld [vmem:[#allocation5 + $0x290] sm:$0xff]  ;;  %2468 = vst [vmem:[#allocation5 + $0x30] sm:$0xf0] %v2459_v19  ;;  %vm2431_vm15 = vcmask 674816  }
 0x57f   : > { %2422 = vst [vmem:[#allocation5 + $0x8] sm:$0xc0] %v2413_v43  ;;  %v3473_v33 = vld [vmem:[#allocation5 + $0x2b8] sm:$0xff]  ;;  %3574 = vmatpush.msra.mxu1 %v3402_v47 }
 0x580   : > { %2423 = vst [vmem:[#allocation5 + $0x10] sm:$0xc0] %v2414_v16  ;;  %3645 = vmatpush.msrb.mxu2 %v3473_v33  ;;  %v3438_v5 = vld [vmem:[#allocation5 + $0x1a0] sm:$0xff] }
 0x581   : > { %2428 = vst [vmem:[#allocation5 + $0x30] sm:$0xf] %v2413_v43  ;;  %3613 = vmatpush.msrb.mxu0 %v3438_v5 }
 0x582   : > { %2429 = vst [vmem:[#allocation5 + $0x38] sm:$0xf] %v2414_v16  ;;  %3646 = vmatpush.msrb.mxu2 %v3468_v38 }
 0x583   : > { %2469 = vst [vmem:[#allocation5 + $0x38] sm:$0xf0] %v2460_v36  ;;  %3614 = vmatpush.msrb.mxu0 %v3433_v17 }
 0x584   : > { %2474 = vst [vmem:[#allocation5 + $0x58] sm:$0x3] %v2459_v19  ;;  %v10335_v13 = vpop.permute.xlu0 %2500  ;;  %7765 = vmatmul.msk.f32.gmra.mxu2 %vm3493_vm10, %v10259_v41 }
 0x585   : > { %2475 = vst [vmem:[#allocation5 + $0x60] sm:$0x3] %v2460_v36  ;;  %3615 = vmatpush.msrb.mxu0 %v3428_v10  ;;  %v10337_v45 = vpop.permute.xlu1 %3142  ;;  %v2507_v8 = vsel %vm2504_vm11, %v10201_v59, %v10335_v13 }
 0x586   : > { %v3333_v52 = vpop.permute.xlu2 %3332  ;;  %v3149_v30 = vsel %vm13064_vm7, %v10237_v26, %v10337_v45  ;;  %2516 = vst [vmem:[#allocation5 + $0x60] sm:$0xfc] %v2507_v8  ;;  %v3413_v26 = vld [vmem:[#allocation5 + $0xd8] sm:$0xff]  ;;  %v3387_v50 = vld [vmem:[#allocation5 + $0x8] sm:$0xff]  ;;  %vm13247_vm7 = vmmov %vm13245_vm14 }
 0x587   : > { %v3337_v40 = vsel %vm2504_vm11, %v10217_v44, %v3333_v52  ;;  %3347 = vst.msk [vmem:[#allocation5 + $0x2c8] sm:$0xfc] %vm2518_vm1, %v3333_v52  ;;  %3616 = vmatpush.msrb.mxu0 %v3423_v55  ;;  %v3388_v21 = vld [vmem:[#allocation5 + $0x10] sm:$0xff] }
 0x588   : > { %3159 = vst [vmem:[#allocation5 + $0x220] sm:$0xf0] %v3149_v30  ;;  %v3392_v37 = vld [vmem:[#allocation5 + $0x30] sm:$0xff] }
 0x589   : > { %3164 = vst [vmem:[#allocation5 + $0x248] sm:$0x3] %v3149_v30  ;;  %3617 = vmatpush.msrb.mxu0 %v3418_v31 }
 0x58a   : > { %3346 = vst [vmem:[#allocation5 + $0x2c0] sm:$0xfc] %v3337_v40 }
 0x58b   : > { %v3397_v44 = vld [vmem:[#allocation5 + $0x58] sm:$0xff]  ;;  %3618 = vmatpush.msrb.mxu0 %v3413_v26 }
 0x58c   : > { %3575 = vmatpush.msra.mxu1 %v3397_v44  ;;  %v3245_v1 = vpop.permute.xlu0 %3244  ;;  %7767 = vmatmul.msk.f32.vlgmr.msrb.gmra.mxu2 %vm3493_vm10, %v10232_v61 }
 0x58d   : > { %3619 = vmatpush.msrb.mxu0 %v3408_v58  ;;  %v10350_v48 = vpop.permute.xlu1 %3047  ;;  %3259 = vst.msk [vmem:[#allocation5 + $0x278] sm:$0xc0] %vm2425_vm13, %v3245_v1  ;;  %v3249_v4 = vsel %vm13247_vm7, %v10213_v57, %v3245_v1  ;;  %vm13248_vm7 = vcmask 490496  }
 0x58e   : > { %v2411_v7 = vpop.permute.xlu2 %2410  ;;  %3576 = vmatpush.msra.mxu1 %v3392_v37  ;;  %v3054_v59 = vsel %vm1221_vm4, %v10141_v35, %v10350_v48  ;;  %v3398_v35 = vld [vmem:[#allocation5 + $0x60] sm:$0xff]  ;;  %3258 = vst [vmem:[#allocation5 + $0x270] sm:$0xc0] %v3249_v4 }
 0x58f   : > { %v2415_v29 = vsel %vm13245_vm14, %v10243_v15, %v2411_v7  ;;  %2426 = vst.msk [vmem:[#allocation5 + $0x20] sm:$0xc0] %vm2425_vm13, %v2411_v7  ;;  %3620 = vmatpush.msrb.mxu0 %v3403_v60  ;;  %v3393_v15 = vld [vmem:[#allocation5 + $0x38] sm:$0xff] }
 0x590   : > { %3064 = vst [vmem:[#allocation5 + $0x1f8] sm:$0x3f] %v3054_v59  ;;  %3577 = vmatpush.msra.mxu1 %v3387_v50 }
 0x591   : > { %2424 = vst [vmem:[#allocation5 + $0x18] sm:$0xc0] %v2415_v29  ;;  %3578 = vmatmul.f32.vlgmr.msra.gmra.mxu1 %v10227_v27  ;;  %3621 = vmatpush.msrb.mxu0 %v3398_v35 }
 0x592   : > { %2430 = vst [vmem:[#allocation5 + $0x40] sm:$0xf] %v2415_v29 }
 0x593   : > { %2432 = vst.msk [vmem:[#allocation5 + $0x48] sm:$0xf] %vm2431_vm15, %v2411_v7  ;;  %3622 = vmatpush.msrb.mxu0 %v3393_v15 }
 0x594   : > { %3263 = vst [vmem:[#allocation5 + $0x298] sm:$0xf] %v3249_v4  ;;  %v10365_v34 = vpop.permute.xlu0 %3092  ;;  %v3465_v23 = vld [vmem:[#allocation5 + $0x278] sm:$0xff]  ;;  %7768 = vmatmul.msk.f32.gmra.mxu2 %vm3493_vm10, %v10259_v41 }
 0x595   : > { %3264 = vst.msk [vmem:[#allocation5 + $0x2a0] sm:$0xf] %vm2431_vm15, %v3245_v1  ;;  %v2918_v25 = vpop.permute.xlu1 %2917  ;;  %3700 = vmatpush.msrb.mxu1 %v3465_v23  ;;  %3623 = vmatpush.msrb.mxu0 %v3388_v21  ;;  %v3099_v28 = vsel %vm13248_vm7, %v10263_v42, %v10365_v34  ;;  %v3464_v39 = vld [vmem:[#allocation5 + $0x270] sm:$0xff] }
 0x596   : > { %v2922_v57 = vsel %vm2504_vm11, %v10313_v46, %v2918_v25  ;;  %2932 = vst.msk [vmem:[#allocation5 + $0x188] sm:$0xc0] %vm2425_vm13, %v2918_v25  ;;  %3624 = vmatmul.f32.vlgmr.msrb.gmra.mxu0 %v10227_v27  ;;  %v3459_v46 = vld [vmem:[#allocation5 + $0x248] sm:$0xff] }
 0x597   : > { %2931 = vst [vmem:[#allocation5 + $0x180] sm:$0xc0] %v2922_v57  ;;  %3654 = vmatpush.msra.mxu0 %v3464_v39 }
 0x598   : > { %2936 = vst [vmem:[#allocation5 + $0x1a8] sm:$0xf] %v2922_v57 }
 0x599   : > { %3581 = vmatmul.f32.gmra.mxu1 %v10254_v51  ;;  %2937 = vst.msk [vmem:[#allocation5 + $0x1b0] sm:$0xf] %vm2431_vm15, %v2918_v25  ;;  %3655 = vmatpush.msra.mxu0 %v3459_v46  ;;  %v3121_v46 = vld [vmem:[#allocation4 + $0x30] sm:$0x3f] }
 0x59a   : > { %3109 = vst [vmem:[#allocation5 + $0x1f8] sm:$0xc0] %v3099_v28 }
 0x59b   : > { %3114 = vst [vmem:[#allocation5 + $0x220] sm:$0xf] %v3099_v28 }
 0x59c   : > { %v10379_v14 = vpop.permute.xlu0 %3008 }
 0x59d   : > { %v10381_v2 = vpop.permute.xlu1 %2766  ;;  %v3015_v56 = vsel %vm1083_vm2, %v10277_v11, %v10379_v14 }
 0x59e   : > { %v2774_v42 = vsel %vm2770_vm12, %v10084_v9, %v10381_v2  ;;  %3025 = vst [vmem:[#allocation5 + $0x1d0] sm:$0xfc] %v3015_v56  ;;  %3627 = vmatmul.f32.gmra.mxu0 %v10254_v51  ;;  %v3434_v36 = vld [vmem:[#allocation5 + $0x180] sm:$0xff]  ;;  %v3133_v56 = vrot.slane %v3121_v46, 4 }
 0x59f   : > { %2784 = vst [vmem:[#allocation5 + $0x108] sm:$0xc0] %v2774_v42  ;;  %v3439_v54 = vld [vmem:[#allocation5 + $0x1a8] sm:$0xff] }
 0x5a0   : > { %2789 = vst [vmem:[#allocation5 + $0x130] sm:$0xf] %v2774_v42  ;;  %v3032_v42 = vld [vmem:[#allocation4 + $0x30] sm:$0x3f] }
 0x5a1   : > { %v3449_v16 = vld [vmem:[#allocation5 + $0x1f8] sm:$0xff] }
 0x5a2   : > { %v3454_v43 = vld [vmem:[#allocation5 + $0x220] sm:$0xff] }
 0x5a3   : > { %3656 = vmatpush.msra.mxu0 %v3454_v43 }
 0x5a4   : > { %v2845_v0 = vpop.permute.xlu0 %2844 }
 0x5a5   : > { %3657 = vmatpush.msra.mxu0 %v3449_v16  ;;  %v10390_v33 = vpop.permute.xlu1 %2681  ;;  %v2849_v19 = vsel %vm13245_vm14, %v10299_v3, %v2845_v0  ;;  %2859 = vst.msk [vmem:[#allocation5 + $0x160] sm:$0xfc] %vm2518_vm1, %v2845_v0  ;;  %v3444_v11 = vld [vmem:[#allocation5 + $0x1d0] sm:$0xff] }
 0x5a6   : > { %v2688_v9 = vsel %vm13248_vm7, %v10113_v49, %v10390_v33  ;;  %2858 = vst [vmem:[#allocation5 + $0x158] sm:$0xfc] %v2849_v19  ;;  %v3419_v10 = vld [vmem:[#allocation5 + $0x108] sm:$0xff] }
 0x5a7   : > { %2698 = vst [vmem:[#allocation5 + $0xe0] sm:$0xfc] %v2688_v9  ;;  %3658 = vmatpush.msra.mxu0 %v3444_v11  ;;  %v3424_v49 = vld [vmem:[#allocation5 + $0x130] sm:$0xff] }
 0x5a9   : > { %3659 = vmatpush.msra.mxu0 %v3439_v54 }
 0x5ab   : > { %3660 = vmatpush.msra.mxu0 %v3434_v36 }
 0x5ac   : > { %v10398_v5 = vpop.permute.xlu0 %2631 }
 0x5ad   : > { %v3367_v38 = vpop.permute.xlu1 %3366  ;;  %v2638_v3 = vsel %vm1221_vm4, %v10239_v24, %v10398_v5  ;;  %v3429_v47 = vld [vmem:[#allocation5 + $0x158] sm:$0xff] }
 0x5ae   : > { %v3371_v17 = vsel %vm2540_vm5, %v10199_v53, %v3367_v38  ;;  %3381 = vst.msk [vmem:[#allocation5 + $0x2f0] sm:$0x3f] %vm2385_vm0, %v3367_v38  ;;  %3661 = vmatpush.msra.mxu0 %v3429_v47 }
 0x5af   : > { %3380 = vst [vmem:[#allocation5 + $0x2e8] sm:$0x3f] %v3371_v17 }
 0x5b0   : > { %2648 = vst [vmem:[#allocation5 + $0xb8] sm:$0xf0] %v2638_v3  ;;  %3662 = vmatpush.msra.mxu0 %v3424_v49 }
 0x5b1   : > { %2653 = vst [vmem:[#allocation5 + $0xe0] sm:$0x3] %v2638_v3 }
 0x5b2   : > { %3663 = vmatpush.msra.mxu0 %v3419_v10 }
 0x5b4   : > { %v10406_v52 = vpop.permute.xlu0 %2581 }
 0x5b5   : > { %v3289_v30 = vpop.permute.xlu1 %3288  ;;  %v2588_v53 = vsel %vm1083_vm2, %v10265_v32, %v10406_v52  ;;  %v3480_v35 = vld [vmem:[#allocation5 + $0x2f0] sm:$0x3f] }
 0x5b6   : > { %v3293_v24 = vsel %vm666_vm6, %v10311_v18, %v3289_v30  ;;  %3303 = vst.msk [vmem:[#allocation5 + $0x2a0] sm:$0xf0] %vm2471_vm3, %v3289_v30  ;;  %v3479_v40 = vld [vmem:[#allocation5 + $0x2e8] sm:$0x3f] }
 0x5b7   : > { %3302 = vst [vmem:[#allocation5 + $0x298] sm:$0xf0] %v3293_v24  ;;  %7769 = vmatpush.msk.msra.mxu2 %vm3500_vm8, %v3479_v40 }
 0x5b8   : > { %3307 = vst [vmem:[#allocation5 + $0x2c0] sm:$0x3] %v3293_v24  ;;  %v3414_v55 = vld [vmem:[#allocation5 + $0xe0] sm:$0xff] }
 0x5b9   : > { %3308 = vst.msk [vmem:[#allocation5 + $0x2c8] sm:$0x3] %vm2477_vm9, %v3289_v30  ;;  %3664 = vmatpush.msra.mxu0 %v3414_v55  ;;  %v3171_v55 = vld [vmem:[#allocation4 + $0x30] sm:$0x3f] }
 0x5ba   : > { %2598 = vst [vmem:[#allocation5 + $0x90] sm:$0xc0] %v2588_v53 }
 0x5bb   : > { %2603 = vst [vmem:[#allocation5 + $0xb8] sm:$0xf] %v2588_v53 }
 0x5bc   : > { %v2539_v8 = vpop.permute.xlu0 %2538 }
 0x5bd   : > { %v2544_v18 = vsel %vm2540_vm5, %v10080_v22, %v2539_v8  ;;  %2554 = vst.msk [vmem:[#allocation5 + $0x98] sm:$0x3f] %vm2385_vm0, %v2539_v8  ;;  %v2503_v31 = vpop.permute.xlu1 %2502  ;;  %v3470_v57 = vld [vmem:[#allocation5 + $0x2a0] sm:$0xff]  ;;  %v3183_v8 = vrot.slane %v3171_v55, 6 }
 0x5be   : > { %2553 = vst [vmem:[#allocation5 + $0x90] sm:$0x3f] %v2544_v18  ;;  %v2508_v32 = vsel %vm2504_vm11, %v10335_v13, %v2503_v31  ;;  %v3469_v44 = vld [vmem:[#allocation5 + $0x298] sm:$0xff]  ;;  %vm13251_vm11 = vmmov %vm13245_vm14 }
 0x5bf   : > { %2519 = vst.msk [vmem:[#allocation5 + $0x70] sm:$0xfc] %vm2518_vm1, %v2503_v31  ;;  %v3474_v26 = vld [vmem:[#allocation5 + $0x2c0] sm:$0xff]  ;;  %v3071_v18 = vld [vmem:[#allocation4 + $0x30] sm:$0x3f] }
 0x5c0   : > { %2517 = vst [vmem:[#allocation5 + $0x68] sm:$0xfc] %v2508_v32  ;;  %3691 = vmatpush.msra.mxu2 %v3474_v26  ;;  %v3475_v21 = vld [vmem:[#allocation5 + $0x2c8] sm:$0xff]  ;;  %v2987_v31 = vld [vmem:[#allocation4 + $0x30] sm:$0x3f]  ;;  %v3083_v32 = vrot.slane %v3071_v18, 2 }
 0x5c1   : > { %v2999_v26 = vrot.slane %v2987_v31, 6 }
 0x5c2   : > { %v3409_v58 = vld [vmem:[#allocation5 + $0xb8] sm:$0xff]  ;;  %3692 = vmatpush.msra.mxu2 %v3469_v44  ;;  %v2745_v44 = vld [vmem:[#allocation4 + $0x28] sm:$0x3f] }
 0x5c3   : > { %3665 = vmatpush.msra.mxu0 %v3409_v58  ;;  %7770 = vmatmul.msk.f32.vlgmr.msra.gmra.mxu2 %vm3493_vm10, %v10232_v61  ;;  %v2757_v58 = vrot.slane %v2745_v44, 2  ;;  %v3430_v44 = vld [vmem:[#allocation5 + $0x160] sm:$0xff] }
 0x5c4   : > { %v2457_v22 = vpop.permute.xlu0 %2456 }
 0x5c5   : > { %v2461_v1 = vsel %vm666_vm6, %v10290_v6, %v2457_v22  ;;  %2472 = vst.msk [vmem:[#allocation5 + $0x48] sm:$0xf0] %vm2471_vm3, %v2457_v22  ;;  %v3404_v37 = vld [vmem:[#allocation5 + $0x90] sm:$0xff]  ;;  %v3389_v6 = vld [vmem:[#allocation5 + $0x18] sm:$0xff]  ;;  %vm13249_vm6 = vcmask 474112  }
 0x5c6   : > { %2470 = vst [vmem:[#allocation5 + $0x40] sm:$0xf0] %v2461_v1  ;;  %3666 = vmatpush.msra.mxu0 %v3404_v37 }
 0x5c7   : > { %2476 = vst [vmem:[#allocation5 + $0x68] sm:$0x3] %v2461_v1  ;;  %v2560_v1 = vld [vmem:[#allocation4 + $0x28] sm:$0x3f] }
 0x5c8   : > { %2478 = vst.msk [vmem:[#allocation5 + $0x70] sm:$0x3] %vm2477_vm9, %v2457_v22  ;;  %v2705_v22 = vld [vmem:[#allocation4 + $0x28] sm:$0x3f]  ;;  %v2572_v37 = vrot.slane %v2560_v1, 2 }
 0x5c9   : > { %v3556_v13 = vpop.f32.mrf.mxu0 }
 0x5ca   : > { %v3533_v7 = vpop.f32.mrf.mxu3 }
 0x5cb   : > { %7771 = vmatmul.msk.f32.gmra.mxu2 %vm3493_vm10, %v10259_v41  ;;  %v3534_v29 = vadd.f32 %v3533_v7, %v10327_v20 }
 0x5cd   : > { %v3394_v60 = vld [vmem:[#allocation5 + $0x40] sm:$0xff]  ;;  %v10431_v50 = vadd.f32 %v3556_v13, %v3534_v29 }
 0x5ce   : > { %v3399_v59 = vld [vmem:[#allocation5 + $0x68] sm:$0xff] }
 0x5cf   : > { %3667 = vmatpush.msra.mxu0 %v3399_v59  ;;  %v3746_v4 = vmax.f32 %v10431_v50, 0.0 }
 0x5d1   : > { %3668 = vmatpush.msra.mxu0 %v3394_v60  ;;  %v3559_v23 = vpop.f32.mrf.mxu0 }
 0x5d2   : > { %v3536_v15 = vpop.f32.mrf.mxu3 }
 0x5d3   : > { %3669 = vmatpush.msra.mxu0 %v3389_v6  ;;  %v3537_v25 = vadd.f32 %v3536_v15, %v10317_v63 }
 0x5d4   : > { %3670 = vmatmul.f32.vlgmr.msra.gmra.mxu0 %v10227_v27 }
 0x5d5   : > { %7772 = vmatpush.msk.msrb.mxu0 %vm3500_vm8, %v3480_v35  ;;  %v10437_v28 = vadd.f32 %v3559_v23, %v3537_v25  ;;  %vm13250_vm8 = vmmov %vm13248_vm7 }
 0x5d7   : > { %3737 = vmatpush.msrb.mxu0 %v3475_v21  ;;  %v3751_v39 = vmax.f32 %v10437_v28, 0.0 }
 0x5d9   : > { %3738 = vmatpush.msrb.mxu0 %v3470_v57  ;;  %3797 = vrot.lane.b32.xlu0 %v3751_v39, %s8686_s20 }
 0x5dc   : > { %3673 = vmatmul.f32.gmra.mxu0 %v10254_v51 }
 0x5e1   : > { %3787 = vrot.lane.b32.xlu0 %v3746_v4, %s8686_s20 }
 0x5e4   : > { %7773 = vmatmul.msk.f32.vlgmr.msrb.gmra.mxu0 %vm3493_vm10, %v10232_v61 }
 0x5e9   : > { %3144 = vrot.lane.b32.xlu0 %v3133_v56, %s8693_s12 }
 0x5ec   : > { %7774 = vmatmul.msk.f32.gmra.mxu0 %vm3493_vm10, %v10259_v41  ;;  %vm13252_vm10 = vmmov %vm13251_vm11 }
 0x5ed   : > { %vm13253_vm14 = vmmov %vm13252_vm10 }
 0x5ee   : > { %vm13254_vm7 = vmmov %vm13252_vm10 }
 0x5f1   : > { %3049 = vrot.lane.b32.xlu0 %v3032_v42, %s13159_s29 }
 0x5ff   : > { %v3602_v43 = vpop.f32.mrf.mxu2 }
 0x607   : > { %v3605_v16 = vpop.f32.mrf.mxu2 }
 0x60e   : > { %v3579_v0 = vpop.f32.mrf.mxu1 }
 0x60f   : > { %v3580_v19 = vadd.f32 %v3579_v0, %v10327_v20  ;;  %v3648_v11 = vpop.f32.mrf.mxu2 }
 0x611   : > { %v10454_v61 = vadd.f32 %v3602_v43, %v3580_v19 }
 0x613   : > { %v3747_v9 = vmax.f32 %v10454_v61, 0.0  ;;  %v3625_v54 = vpop.f32.mrf.mxu0  ;;  %v2660_v61 = vld [vmem:[#allocation4 + $0x28] sm:$0x3f] }
 0x614   : > { %v3626_v36 = vadd.f32 %v3625_v54, %v10327_v20  ;;  %v2672_v28 = vrot.slane %v2660_v61, 6 }
 0x616   : > { %v3582_v38 = vpop.f32.mrf.mxu1  ;;  %v10459_v3 = vadd.f32 %v3648_v11, %v3626_v36 }
 0x617   : > { %v3583_v41 = vadd.f32 %v3582_v38, %v10317_v63  ;;  %v3651_v30 = vpop.f32.mrf.mxu2 }
 0x618   : > { %v3748_v17 = vmax.f32 %v10459_v3, 0.0  ;;  %v3925_v3 = vld [vmem:[%s13036_s5 + $0x30] sm:$0xff] }
 0x619   : > { %v10461_v47 = vadd.f32 %v3605_v16, %v3583_v41 }
 0x61b   : > { %v3752_v49 = vmax.f32 %v10461_v47, 0.0  ;;  %v3628_v10 = vpop.f32.mrf.mxu0 }
 0x61c   : > { %v3629_v24 = vadd.f32 %v3628_v10, %v10317_v63 }
 0x61d   : > { %3799 = vrot.lane.b32.xlu1 %v3752_v49, %s8686_s20 }
 0x61e   : > { %v10469_v40 = vadd.f32 %v3651_v30, %v3629_v24 }
 0x620   : > { %v3753_v53 = vmax.f32 %v10469_v40, 0.0  ;;  %v3926_v40 = vld [vmem:[%s13036_s5 + $0x38] sm:$0xff] }
 0x622   : > { %3801 = vrot.lane.b32.xlu2 %v3753_v53, %s8686_s20 }
 0x625   : > { %3789 = vrot.lane.b32.xlu1 %v3747_v9, %s8686_s20 }
 0x62a   : > { %3791 = vrot.lane.b32.xlu2 %v3748_v17, %s8686_s20 }
 0x62d   : > { %3194 = vrot.lane.b32.xlu1 %v3183_v8, %s8695_s14 }
 0x632   : > { %3094 = vrot.lane.b32.xlu2 %v3083_v32, %s8679_s30 }
 0x635   : > { %3010 = vrot.lane.b32.xlu1 %v2999_v26, %s8675_s26  ;;  %v3435_v26 = vld [vmem:[#allocation5 + $0x188] sm:$0xff] }
 0x63d   : > { %2768 = vrot.lane.b32.xlu1 %v2757_v58, %s8695_s14 }
 0x645   : > { %2722 = vrot.lane.b32.xlu1 %v2705_v22, %s8693_s12  ;;  %s8526_s12 = sshll.u32 %s13423_s18, 4 }
 0x646   : > { %v3694_v13 = vpop.f32.mrf.mxu2  ;;  %s388_s25 = scalar_lea.vmem %s13042_s11, %s8526_s12 }
 0x64b   : > { %v3798_v7 = vpop.permute.xlu0 %3797 }
 0x64d   : > { %2583 = vrot.lane.b32.xlu1 %v2572_v37, %s8675_s26 }
 0x64e   : > { %v3697_v23 = vpop.f32.mrf.mxu2 }
 0x651   : > { %v3671_v59 = vpop.f32.mrf.mxu0 }
 0x652   : > { %v3672_v29 = vadd.f32 %v3671_v59, %v10327_v20 }
 0x653   : > { %v3788_v35 = vpop.permute.xlu0 %3787 }
 0x654   : > { %v10488_v60 = vadd.f32 %v3694_v13, %v3672_v29 }
 0x656   : > { %v3749_v6 = vmax.f32 %v10488_v60, 0.0 }
 0x659   : > { %v3674_v15 = vpop.f32.mrf.mxu0 }
 0x65a   : > { %v3675_v21 = vadd.f32 %v3674_v15, %v10317_v63 }
 0x65b   : > { %v3145_v46 = vpop.permute.xlu0 %3144 }
 0x65c   : > { %v10492_v25 = vadd.f32 %v3697_v23, %v3675_v21  ;;  %v3150_v56 = vsel %vm13249_vm6, %v10337_v45, %v3145_v46 }
 0x65d   : > { %3160 = vst.msk [vmem:[#allocation5 + $0x228] sm:$0xf0] %vm2471_vm3, %v3150_v56 }
 0x65e   : > { %v3754_v57 = vmax.f32 %v10492_v25, 0.0  ;;  %3165 = vst.msk [vmem:[#allocation5 + $0x250] sm:$0x3] %vm2477_vm9, %v3150_v56 }
 0x663   : > { %v3050_v42 = vpop.permute.xlu0 %3049 }
 0x664   : > { %v3055_v43 = vsel %vm1221_vm4, %v10350_v48, %v3050_v42 }
 0x665   : > { %3065 = vst.msk [vmem:[#allocation5 + $0x200] sm:$0x3f] %vm2385_vm0, %v3055_v43 }
 0x67c   : > { %v10502_v16 = vpop.permute.xlu2 %3801 }
 0x684   : > { %v10504_v0 = vpop.permute.xlu2 %3791 }
 0x68c   : > { %v3095_v19 = vpop.permute.xlu2 %3094 }
 0x68d   : > { %v3100_v11 = vsel %vm13250_vm8, %v10365_v34, %v3095_v19 }
 0x68e   : > { %3110 = vst.msk [vmem:[#allocation5 + $0x200] sm:$0xc0] %vm2425_vm13, %v3100_v11 }
 0x68f   : > { %v3800_v54 = vpop.permute.xlu1 %3799  ;;  %3115 = vst.msk [vmem:[#allocation5 + $0x228] sm:$0xf] %vm2431_vm15, %v3100_v11 }
 0x690   : > { %v3811_v34 = vsel %vm13253_vm14, %v3798_v7, %v3800_v54  ;;  %v3812_v10 = vsel %vm13254_vm7, %v3800_v54, %v10502_v16  ;;  %v3395_v54 = vld [vmem:[#allocation5 + $0x48] sm:$0xff] }
 0x691   : > { %v3830_v50 = vmax.f32 %v3751_v39, %v3811_v34  ;;  %v7790_v34 = vld [vmem:[%s13036_s5 + $0x78] sm:$0xff] }
 0x696   : > { %v3455_v47 = vld [vmem:[#allocation5 + $0x228] sm:$0xff] }
 0x697   : > { %v3790_v45 = vpop.permute.xlu1 %3789 }
 0x698   : > { %v3807_v36 = vsel %vm13251_vm11, %v3788_v35, %v3790_v45  ;;  %v3808_v48 = vsel %vm13252_vm10, %v3790_v45, %v10504_v0  ;;  %v3390_v45 = vld [vmem:[#allocation5 + $0x20] sm:$0xff]  ;;  %vm7680_vm11 = vcmask 1024  }
 0x699   : > { %v3825_v38 = vmax.f32 %v3746_v4, %v3807_v36  ;;  %v10517_v41 = vmax.f32 %v3747_v9, %v3808_v48  ;;  %v10531_v4 = vmax.f32 %v3752_v49, %v3812_v10  ;;  %v2610_v9 = vld [vmem:[#allocation4 + $0x28] sm:$0x3f]  ;;  %v3450_v49 = vld [vmem:[#allocation5 + $0x200] sm:$0xff] }
 0x69a   : > { %v2622_v39 = vrot.slane %v2610_v9, 4 }
 0x69b   : > { %3847 = vrot.lane.b32.xlu0 %v10517_v41, %s8675_s26  ;;  %3845 = vrot.lane.b32.xlu2 %v3825_v38, %s8675_s26 }
 0x69f   : > { %v3195_v30 = vpop.permute.xlu1 %3194 }
 0x6a0   : > { %v3200_v24 = vsel %vm2770_vm12, %v10272_v12, %v3195_v30 }
 0x6a1   : > { %3210 = vst.msk [vmem:[#allocation5 + $0x250] sm:$0xfc] %vm2518_vm1, %v3200_v24 }
 0x6a3   : > { %3857 = vrot.lane.b32.xlu0 %v10531_v4, %s8675_s26  ;;  %3855 = vrot.lane.b32.xlu2 %v3830_v50, %s8675_s26 }
 0x6a7   : > { %v3011_v55 = vpop.permute.xlu1 %3010 }
 0x6a8   : > { %v3016_v12 = vsel %vm1083_vm2, %v10379_v14, %v3011_v55  ;;  %v3460_v8 = vld [vmem:[#allocation5 + $0x250] sm:$0xff] }
 0x6a9   : > { %3026 = vst.msk [vmem:[#allocation5 + $0x1d8] sm:$0xfc] %vm2518_vm1, %v3016_v12  ;;  %3701 = vmatpush.msrb.mxu1 %v3460_v8  ;;  %v3440_v14 = vld [vmem:[#allocation5 + $0x1b0] sm:$0xff] }
 0x6ab   : > { %2683 = vrot.lane.b32.xlu0 %v2672_v28, %s8679_s30  ;;  %2633 = vrot.lane.b32.xlu2 %v2622_v39, %s13159_s29  ;;  %s8697_s30 = smov 112   ;;  %s8698_s29 = smov 116  }
 0x6ac   : > { %3702 = vmatpush.msrb.mxu1 %v3455_v47  ;;  %v7791_v47 = vld [vmem:[%s13036_s5 + $0x80] sm:$0xff] }
 0x6ae   : > { %3703 = vmatpush.msrb.mxu1 %v3450_v49 }
 0x6af   : > { %v2769_v18 = vpop.permute.xlu1 %2768 }
 0x6b0   : > { %v2775_v31 = vsel %vm2770_vm12, %v10381_v2, %v2769_v18  ;;  %v3445_v32 = vld [vmem:[#allocation5 + $0x1d8] sm:$0xff]  ;;  %vm3760_vm12 = vcmask 678912  }
 0x6b1   : > { %2785 = vst.msk [vmem:[#allocation5 + $0x110] sm:$0xc0] %vm2425_vm13, %v2775_v31  ;;  %3704 = vmatpush.msrb.mxu1 %v3445_v32 }
 0x6b2   : > { %2790 = vst.msk [vmem:[#allocation5 + $0x138] sm:$0xf] %vm2431_vm15, %v2775_v31  ;;  %v3927_v31 = vld [vmem:[%s13036_s5 + $0x40] sm:$0xff] }
 0x6b3   : > { %3705 = vmatpush.msrb.mxu1 %v3440_v14  ;;  %v3919_v14 = vld [vmem:[%s13036_s5] sm:$0xff] }
 0x6b5   : > { %3706 = vmatpush.msrb.mxu1 %v3435_v26 }
 0x6b7   : > { %v2723_v58 = vpop.permute.xlu1 %2722  ;;  %3707 = vmatpush.msrb.mxu1 %v3430_v44 }
 0x6b8   : > { %v2729_v22 = vsel %vm13249_vm6, %v10304_v62, %v2723_v58 }
 0x6b9   : > { %2739 = vst.msk [vmem:[#allocation5 + $0x110] sm:$0x3f] %vm2385_vm0, %v2729_v22  ;;  %v3425_v1 = vld [vmem:[#allocation5 + $0x138] sm:$0xff]  ;;  %vm3936_vm0 = vcmask 130048  }
 0x6ba   : > { %3708 = vmatpush.msrb.mxu1 %v3425_v1  ;;  %v7795_v22 = vld [vmem:[%s13036_s5 + $0xa0] sm:$0xff]  ;;  %v3928_v1 = vld [vmem:[%s13036_s5 + $0x48] sm:$0xff] }
 0x6bf   : > { %v2584_v2 = vpop.permute.xlu1 %2583 }
 0x6c0   : > { %v2589_v37 = vsel %vm1083_vm2, %v10406_v52, %v2584_v2  ;;  %v3420_v13 = vld [vmem:[#allocation5 + $0x110] sm:$0xff] }
 0x6c1   : > { %2599 = vst.msk [vmem:[#allocation5 + $0x98] sm:$0xc0] %vm2425_vm13, %v2589_v37  ;;  %3709 = vmatpush.msrb.mxu1 %v3420_v13 }
 0x6c2   : > { %2604 = vst.msk [vmem:[#allocation5 + $0xc0] sm:$0xf] %vm2431_vm15, %v2589_v37  ;;  %vm3897_vm15 = vcmask 138240  }
 0x6c8   : > { %v3405_v11 = vld [vmem:[#allocation5 + $0x98] sm:$0xff] }
 0x6f5   : > { %v3846_v7 = vpop.permute.xlu2 %3845 }
 0x6fd   : > { %v3856_v59 = vpop.permute.xlu2 %3855 }
 0x705   : > { %v2634_v29 = vpop.permute.xlu2 %2633 }
 0x706   : > { %v2639_v62 = vsel %vm1221_vm4, %v10398_v5, %v2634_v29  ;;  %vm13255_vm4 = vmmov %vm13250_vm8  ;;  %v7796_v29 = vld [vmem:[%s13036_s5 + $0xa8] sm:$0xff]  ;;  %vm7678_vm8 = vcmask 7168  }
 0x707   : > { %2649 = vst.msk [vmem:[#allocation5 + $0xc0] sm:$0xf0] %vm2471_vm3, %v2639_v62  ;;  %vm13256_vm3 = vmmov %vm13254_vm7 }
 0x708   : > { %2654 = vst.msk [vmem:[#allocation5 + $0xe8] sm:$0x3] %vm2477_vm9, %v2639_v62  ;;  %vm13257_vm9 = vmmov %vm13256_vm3  ;;  %v3929_v62 = vld [vmem:[%s13036_s5 + $0x50] sm:$0xff] }
 0x70d   : > { %v10557_v35 = vpop.permute.xlu0 %3847 }
 0x70e   : > { %v3865_v52 = vsel %vm1083_vm2, %v3846_v7, %v10557_v35  ;;  %v3410_v19 = vld [vmem:[#allocation5 + $0xc0] sm:$0xff] }
 0x70f   : > { %v3883_v15 = vmax.f32 %v3825_v38, %v3865_v52  ;;  %v7798_v52 = vld [vmem:[%s13036_s5 + $0xb8] sm:$0xff] }
 0x715   : > { %v10561_v23 = vpop.permute.xlu0 %3857 }
 0x716   : > { %v3869_v21 = vsel %vm1083_vm2, %v3856_v59, %v10561_v23 }
 0x717   : > { %v3888_v46 = vmax.f32 %v3830_v50, %v3869_v21  ;;  %v3921_v21 = vld [vmem:[%s13036_s5 + $0x10] sm:$0xff] }
 0x719   : > { %8527 = vmatpush.msrb.mxu2 %v3888_v46  ;;  %v8574_v56 = vpack.i.bf16 %v3883_v15, %v3888_v46 }
 0x71b   : > { %8575 = vrot.lane.b32.xlu1 %v8574_v56, %s8694_s13  ;;  %8570 = vrot.lane.b32.xlu0 %v8574_v56, %s8697_s30 }
 0x71c   : > { %8565 = vrot.lane.b32.xlu2 %v8574_v56, %s8688_s22  ;;  %8528 = vmatpush.msrb.mxu2 %v3883_v15 }
 0x71d   : > { %v2684_v5 = vpop.permute.xlu0 %2683  ;;  %7781 = vmatmul.msk.f32.vlgmr.msrb.gmra.mxu2 %vm3936_vm0, %v3925_v3 }
 0x71e   : > { %v2689_v42 = vsel %vm13255_vm4, %v10390_v33, %v2684_v5  ;;  %v3400_v33 = vld [vmem:[#allocation5 + $0x70] sm:$0xff]  ;;  %v7800_v5 = vld [vmem:[%s13036_s5 + $0xc8] sm:$0xff] }
 0x71f   : > { %2699 = vst.msk [vmem:[#allocation5 + $0xe8] sm:$0xfc] %vm2518_vm1, %v2689_v42  ;;  %v3922_v42 = vld [vmem:[%s13036_s5 + $0x18] sm:$0xff]  ;;  %vm13265_vm1 = vmmov %vm13256_vm3 }
 0x720   : > { %vm13270_vm13 = vmmov %vm13265_vm1 }
 0x723   : > { %3793 = vrot.lane.b32.xlu1 %v3749_v6, %s8686_s20  ;;  %3803 = vrot.lane.b32.xlu0 %v3754_v57, %s8686_s20 }
 0x724   : > { %8580 = vrot.lane.b32.xlu2 %v8574_v56, %s8698_s29  ;;  %v7820_v56 = vld [vmem:[%s13036_s5 + $0xf0] sm:$0xff] }
 0x725   : > { %7782 = vmatmul.msk.f32.gmra.mxu2 %vm3936_vm0, %v3926_v40  ;;  %v7853_v40 = vld [vmem:[%s13036_s5 + $0x180] sm:$0xff] }
 0x726   : > { %v3415_v43 = vld [vmem:[#allocation5 + $0xe8] sm:$0xff] }
 0x727   : > { %3710 = vmatpush.msrb.mxu1 %v3415_v43  ;;  %v3931_v43 = vld [vmem:[%s13036_s5 + $0x60] sm:$0xff] }
 0x729   : > { %3711 = vmatpush.msrb.mxu1 %v3410_v19  ;;  %v7821_v19 = vld [vmem:[%s13036_s5 + $0xf8] sm:$0xff] }
 0x72b   : > { %3712 = vmatpush.msrb.mxu1 %v3405_v11  ;;  %v7801_v11 = vld [vmem:[%s13036_s5 + $0xd0] sm:$0xff] }
 0x72d   : > { %3713 = vmatpush.msrb.mxu1 %v3400_v33  ;;  %7783 = vmatmul.msk.f32.gmra.mxu2 %vm3936_vm0, %v3927_v31  ;;  %v3923_v33 = vld [vmem:[%s13036_s5 + $0x20] sm:$0xff] }
 0x72f   : > { %3714 = vmatpush.msrb.mxu1 %v3395_v54  ;;  %v3932_v54 = vld [vmem:[%s13036_s5 + $0x68] sm:$0xff] }
 0x731   : > { %3715 = vmatpush.msrb.mxu1 %v3390_v45  ;;  %v7802_v45 = vld [vmem:[%s13036_s5 + $0xd8] sm:$0xff] }
 0x732   : > { %3716 = vmatmul.f32.vlgmr.msrb.gmra.mxu1 %v10227_v27 }
 0x733   : > { %3996 = vmatpush.msra.mxu1 %v3888_v46  ;;  %v3930_v46 = vld [vmem:[%s13036_s5 + $0x58] sm:$0xff] }
 0x735   : > { %3997 = vmatpush.msra.mxu1 %v3883_v15  ;;  %7784 = vmatmul.msk.f32.gmra.mxu2 %vm3936_vm0, %v3928_v1  ;;  %v7799_v15 = vld [vmem:[%s13036_s5 + $0xc0] sm:$0xff]  ;;  %v7912_v1 = vld [vmem:[%s13036_s5 + $0x268] sm:$0xff] }
 0x73a   : > { %3719 = vmatmul.f32.gmra.mxu1 %v10254_v51 }
 0x73d   : > { %7785 = vmatmul.msk.f32.gmra.mxu2 %vm3936_vm0, %v3929_v62  ;;  %v7886_v62 = vld [vmem:[%s13036_s5 + $0x210] sm:$0xff] }
 0x742   : > { %7775 = vmatmul.msk.f32.vlgmr.msra.gmra.mxu1 %vm3936_vm0, %v3919_v14  ;;  %v7827_v14 = vld [vmem:[%s13036_s5 + $0x128] sm:$0xff] }
 0x745   : > { %7786 = vmatmul.msk.f32.gmra.mxu2 %vm3936_vm0, %v3930_v46  ;;  %v7830_v46 = vld [vmem:[%s13036_s5 + $0x140] sm:$0xff] }
 0x74d   : > { %7787 = vmatmul.msk.f32.gmra.mxu2 %vm3936_vm0, %v3931_v43  ;;  %v7858_v43 = vld [vmem:[%s13036_s5 + $0x1a8] sm:$0xff] }
 0x755   : > { %7788 = vmatmul.msk.f32.gmra.mxu2 %vm3936_vm0, %v3932_v54 }
 0x776   : > { %v8566_v36 = vpop.permute.xlu2 %8565 }
 0x777   : > { %v8567_v48 = vunpack.i.l.bf16 %v8566_v36  ;;  %v8568_v38 = vunpack.i.h.bf16 %v8566_v36  ;;  %v3924_v36 = vld [vmem:[%s13036_s5 + $0x28] sm:$0xff] }
 0x779   : > { %4142 = vmatpush.msra.mxu3 %v8567_v48  ;;  %v3933_v48 = vld [vmem:[%s13036_s5 + $0x70] sm:$0xff] }
 0x77a   : > { %7789 = vmatmul.msk.f32.gmra.mxu2 %vm3936_vm0, %v3933_v48  ;;  %v7832_v48 = vld [vmem:[%s13036_s5 + $0x150] sm:$0xff] }
 0x77b   : > { %4143 = vmatpush.msra.mxu3 %v8568_v38  ;;  %v7822_v38 = vld [vmem:[%s13036_s5 + $0x100] sm:$0xff] }
 0x77c   : > { %7805 = vmatmul.msk.f32.vlgmr.msra.gmra.mxu3 %vm3936_vm0, %v7790_v34 }
 0x77e   : > { %v8581_v10 = vpop.permute.xlu2 %8580 }
 0x77f   : > { %v8582_v30 = vunpack.i.l.bf16 %v8581_v10  ;;  %v8583_v24 = vunpack.i.h.bf16 %v8581_v10 }
 0x781   : > { %4430 = vmatpush.msrb.mxu1 %v8582_v30 }
 0x783   : > { %4431 = vmatpush.msrb.mxu1 %v8583_v24  ;;  %v7803_v24 = vld [vmem:[%s13036_s5 + $0xe0] sm:$0xff] }
 0x784   : > { %7806 = vmatmul.msk.f32.gmra.mxu3 %vm3936_vm0, %v7791_v47 }
 0x78d   : > { %v8576_v27 = vpop.permute.xlu1 %8575  ;;  %v8571_v50 = vpop.permute.xlu0 %8570 }
 0x78e   : > { %v8577_v51 = vunpack.i.l.bf16 %v8576_v27  ;;  %v8572_v61 = vunpack.i.l.bf16 %v8571_v50  ;;  %v8578_v9 = vunpack.i.h.bf16 %v8576_v27  ;;  %v8573_v55 = vunpack.i.h.bf16 %v8571_v50  ;;  %v7850_v27 = vld [vmem:[%s13036_s5 + $0x168] sm:$0xff] }
 0x78f   : > { %v7823_v50 = vld [vmem:[%s13036_s5 + $0x108] sm:$0xff] }
 0x790   : > { %4286 = vmatpush.msra.mxu0 %v8577_v51  ;;  %4574 = vmatpush.msra.mxu2 %v8572_v61  ;;  %v7880_v51 = vld [vmem:[%s13036_s5 + $0x1e0] sm:$0xff]  ;;  %v7824_v61 = vld [vmem:[%s13036_s5 + $0x110] sm:$0xff] }
 0x792   : > { %4287 = vmatpush.msra.mxu0 %v8578_v9  ;;  %4575 = vmatpush.msra.mxu2 %v8573_v55  ;;  %v7881_v9 = vld [vmem:[%s13036_s5 + $0x1e8] sm:$0xff]  ;;  %v7852_v55 = vld [vmem:[%s13036_s5 + $0x178] sm:$0xff] }
 0x793   : > { %7835 = vmatmul.msk.f32.vlgmr.msra.gmra.mxu0 %vm3936_vm0, %v7820_v56  ;;  %7895 = vmatmul.msk.f32.vlgmr.msra.gmra.mxu2 %vm3936_vm0, %v7880_v51  ;;  %v7887_v56 = vld [vmem:[%s13036_s5 + $0x218] sm:$0xff] }
 0x794   : > { %v7833_v51 = vld [vmem:[%s13036_s5 + $0x158] sm:$0xff] }
 0x795   : > { %v10584_v12 = vpop.permute.xlu1 %3793  ;;  %v10586_v8 = vpop.permute.xlu0 %3803 }
 0x796   : > { %v3809_v28 = vsel %vm13256_vm3, %v10504_v0, %v10584_v12  ;;  %v3813_v39 = vsel %vm13257_vm9, %v10502_v16, %v10586_v8  ;;  %v7792_v16 = vld [vmem:[%s13036_s5 + $0x88] sm:$0xff]  ;;  %v3740_v0 = vpop.f32.mrf.mxu0 }
 0x797   : > { %v10599_v49 = vmax.f32 %v3748_v17, %v3809_v28  ;;  %v10603_v18 = vmax.f32 %v3753_v53, %v3813_v39  ;;  %7807 = vmatmul.msk.f32.gmra.mxu3 %vm3936_vm0, %v7792_v16  ;;  %v7793_v17 = vld [vmem:[%s13036_s5 + $0x90] sm:$0xff]  ;;  %v7794_v53 = vld [vmem:[%s13036_s5 + $0x98] sm:$0xff] }
 0x798   : > { %v7825_v28 = vld [vmem:[%s13036_s5 + $0x118] sm:$0xff]  ;;  %v7882_v39 = vld [vmem:[%s13036_s5 + $0x1f0] sm:$0xff] }
 0x799   : > { %3849 = vrot.lane.b32.xlu0 %v10599_v49, %s8675_s26  ;;  %3859 = vrot.lane.b32.xlu2 %v10603_v18, %s8675_s26 }
 0x79b   : > { %7836 = vmatmul.msk.f32.gmra.mxu0 %vm3936_vm0, %v7821_v19  ;;  %7896 = vmatmul.msk.f32.gmra.mxu2 %vm3936_vm0, %v7881_v9  ;;  %v7918_v9 = vld [vmem:[%s13036_s5 + $0x298] sm:$0xff] }
 0x79e   : > { %v3743_v37 = vpop.f32.mrf.mxu0 }
 0x79f   : > { %7808 = vmatmul.msk.f32.gmra.mxu3 %vm3936_vm0, %v7793_v17  ;;  %v7910_v17 = vld [vmem:[%s13036_s5 + $0x258] sm:$0xff] }
 0x7a3   : > { %7837 = vmatmul.msk.f32.gmra.mxu0 %vm3936_vm0, %v7822_v38  ;;  %7897 = vmatmul.msk.f32.gmra.mxu2 %vm3936_vm0, %v7882_v39  ;;  %v7834_v39 = vld [vmem:[%s13036_s5 + $0x160] sm:$0xff] }
 0x7a7   : > { %7809 = vmatmul.msk.f32.gmra.mxu3 %vm3936_vm0, %v7794_v53 }
 0x7ab   : > { %7838 = vmatmul.msk.f32.gmra.mxu0 %vm3936_vm0, %v7823_v50  ;;  %v7860_v50 = vld [vmem:[%s13036_s5 + $0x1b8] sm:$0xff] }
 0x7af   : > { %v3717_v32 = vpop.f32.mrf.mxu1  ;;  %7810 = vmatmul.msk.f32.gmra.mxu3 %vm3936_vm0, %v7795_v22 }
 0x7b0   : > { %v3718_v26 = vadd.f32 %v3717_v32, %v10327_v20  ;;  %v3920_v20 = vld [vmem:[%s13036_s5 + $0x8] sm:$0xff] }
 0x7b1   : > { %7776 = vmatmul.msk.f32.gmra.mxu1 %vm3936_vm0, %v3920_v20  ;;  %v7854_v32 = vld [vmem:[%s13036_s5 + $0x188] sm:$0xff] }
 0x7b2   : > { %v3741_v44 = vadd.f32 %v3740_v0, %v3718_v26  ;;  %v7826_v0 = vld [vmem:[%s13036_s5 + $0x120] sm:$0xff]  ;;  %v7885_v20 = vld [vmem:[%s13036_s5 + $0x208] sm:$0xff] }
 0x7b3   : > { %7839 = vmatmul.msk.f32.gmra.mxu0 %vm3936_vm0, %v7824_v61 }
 0x7b4   : > { %v3750_v58 = vmax.f32 %v3741_v44, 0.0  ;;  %v7884_v44 = vld [vmem:[%s13036_s5 + $0x200] sm:$0xff] }
 0x7b6   : > { %3761 = vst.msk [vmem:[#allocation6 + $0x20] sm:$0xff] %vm3760_vm12, %v3750_v58 }
 0x7b7   : > { %v3720_v2 = vpop.f32.mrf.mxu1  ;;  %7811 = vmatmul.msk.f32.gmra.mxu3 %vm3936_vm0, %v7796_v29  ;;  %v7829_v29 = vld [vmem:[%s13036_s5 + $0x138] sm:$0xff] }
 0x7b8   : > { %v3721_v13 = vadd.f32 %v3720_v2, %v10317_v63  ;;  %v7797_v63 = vld [vmem:[%s13036_s5 + $0xb0] sm:$0xff] }
 0x7b9   : > { %7777 = vmatmul.msk.f32.gmra.mxu1 %vm3936_vm0, %v3921_v21  ;;  %v7855_v2 = vld [vmem:[%s13036_s5 + $0x190] sm:$0xff]  ;;  %v7857_v21 = vld [vmem:[%s13036_s5 + $0x1a0] sm:$0xff] }
 0x7ba   : > { %v3744_v7 = vadd.f32 %v3743_v37, %v3721_v13  ;;  %v7828_v37 = vld [vmem:[%s13036_s5 + $0x130] sm:$0xff] }
 0x7bb   : > { %7840 = vmatmul.msk.f32.gmra.mxu0 %vm3936_vm0, %v7825_v28 }
 0x7bc   : > { %v3755_v59 = vmax.f32 %v3744_v7, 0.0  ;;  %v7913_v7 = vld [vmem:[%s13036_s5 + $0x270] sm:$0xff] }
 0x7bd   : > { %v10816_v26 = vld [vmem:[#allocation6 + $0x20] sm:$0xff] }
 0x7be   : > { %3766 = vst.msk [vmem:[#allocation6 + $0x48] sm:$0xff] %vm3760_vm12, %v3755_v59  ;;  %v7856_v59 = vld [vmem:[%s13036_s5 + $0x198] sm:$0xff] }
 0x7bf   : > { %7812 = vmatmul.msk.f32.gmra.mxu3 %vm3936_vm0, %v7797_v63 }
 0x7c1   : > { %7778 = vmatmul.msk.f32.gmra.mxu1 %vm3936_vm0, %v3922_v42  ;;  %v7915_v42 = vld [vmem:[%s13036_s5 + $0x280] sm:$0xff] }
 0x7c3   : > { %7841 = vmatmul.msk.f32.gmra.mxu0 %vm3936_vm0, %v7826_v0  ;;  %v7892_v0 = vld [vmem:[%s13036_s5 + $0x240] sm:$0xff] }
 0x7c5   : > { %v10825_v58 = vld [vmem:[#allocation6 + $0x48] sm:$0xff] }
 0x7c7   : > { %7813 = vmatmul.msk.f32.gmra.mxu3 %vm3936_vm0, %v7798_v52  ;;  %v10870_v52 = vpop.f32.mrf.mxu2 }
 0x7c9   : > { %7779 = vmatmul.msk.f32.gmra.mxu1 %vm3936_vm0, %v3923_v33  ;;  %v7888_v33 = vld [vmem:[%s13036_s5 + $0x220] sm:$0xff] }
 0x7cb   : > { %7842 = vmatmul.msk.f32.gmra.mxu0 %vm3936_vm0, %v7827_v14  ;;  %v7920_v14 = vld [vmem:[%s13036_s5 + $0x2a8] sm:$0xff] }
 0x7cf   : > { %7814 = vmatmul.msk.f32.gmra.mxu3 %vm3936_vm0, %v7799_v15  ;;  %v7914_v15 = vld [vmem:[%s13036_s5 + $0x278] sm:$0xff]  ;;  %v10896_v19 = vpop.f32.mrf.mxu2 }
 0x7d1   : > { %7780 = vmatmul.msk.f32.gmra.mxu1 %vm3936_vm0, %v3924_v36  ;;  %v7859_v36 = vld [vmem:[%s13036_s5 + $0x1b0] sm:$0xff] }
 0x7d3   : > { %7843 = vmatmul.msk.f32.gmra.mxu0 %vm3936_vm0, %v7828_v37 }
 0x7d7   : > { %7815 = vmatmul.msk.f32.gmra.mxu3 %vm3936_vm0, %v7800_v5  ;;  %v10919_v38 = vpop.f32.mrf.mxu2 }
 0x7d9   : > { %7865 = vmatmul.msk.f32.vlgmr.msrb.gmra.mxu1 %vm3936_vm0, %v7850_v27  ;;  %v10933_v27 = vpop.f32.mrf.mxu1 }
 0x7db   : > { %7844 = vmatmul.msk.f32.gmra.mxu0 %vm3936_vm0, %v7829_v29 }
 0x7df   : > { %7816 = vmatmul.msk.f32.gmra.mxu3 %vm3936_vm0, %v7801_v11  ;;  %v7831_v11 = vld [vmem:[%s13036_s5 + $0x148] sm:$0xff] }
 0x7e3   : > { %7845 = vmatmul.msk.f32.gmra.mxu0 %vm3936_vm0, %v7830_v46 }
 0x7e7   : > { %7817 = vmatmul.msk.f32.gmra.mxu3 %vm3936_vm0, %v7802_v45  ;;  %v7916_v45 = vld [vmem:[%s13036_s5 + $0x288] sm:$0xff] }
 0x7eb   : > { %7846 = vmatmul.msk.f32.gmra.mxu0 %vm3936_vm0, %v7831_v11 }
 0x7ef   : > { %7818 = vmatmul.msk.f32.gmra.mxu3 %vm3936_vm0, %v7803_v24  ;;  %v7917_v24 = vld [vmem:[%s13036_s5 + $0x290] sm:$0xff] }
 0x7f3   : > { %v10730_v34 = vpop.permute.xlu2 %3859  ;;  %7847 = vmatmul.msk.f32.gmra.mxu0 %vm3936_vm0, %v7832_v48 }
 0x7f4   : > { %v3870_v10 = vsel %vm1083_vm2, %v10561_v23, %v10730_v34  ;;  %v7851_v23 = vld [vmem:[%s13036_s5 + $0x170] sm:$0xff] }
 0x7f5   : > { %v3889_v30 = vmax.f32 %v10531_v4, %v3870_v10  ;;  %v7804_v4 = vld [vmem:[%s13036_s5 + $0xe8] sm:$0xff]  ;;  %7866 = vmatmul.msk.f32.gmra.mxu1 %vm3936_vm0, %v7851_v23  ;;  %v10946_v23 = vpop.f32.mrf.mxu2 }
 0x7f6   : > { %v7889_v10 = vld [vmem:[%s13036_s5 + $0x228] sm:$0xff] }
 0x7f7   : > { %4714 = vmatpush.msrb.mxu3 %v3889_v30 }
 0x7f8   : > { %7819 = vmatmul.msk.f32.gmra.mxu3 %vm3936_vm0, %v7804_v4  ;;  %v7890_v4 = vld [vmem:[%s13036_s5 + $0x230] sm:$0xff] }
 0x7fb   : > { %7848 = vmatmul.msk.f32.gmra.mxu0 %vm3936_vm0, %v7833_v51 }
 0x7fd   : > { %7867 = vmatmul.msk.f32.gmra.mxu1 %vm3936_vm0, %v7852_v55  ;;  %v7861_v55 = vld [vmem:[%s13036_s5 + $0x1c0] sm:$0xff] }
 0x7ff   : > { %v10796_v31 = vpop.f32.mrf.mxu3 }
 0x803   : > { %7849 = vmatmul.msk.f32.gmra.mxu0 %vm3936_vm0, %v7834_v39  ;;  %v3904_v39 = vld [vmem:[%s13037_s6] sm:$0xff] }
 0x805   : > { %7868 = vmatmul.msk.f32.gmra.mxu1 %vm3936_vm0, %v7853_v40  ;;  %v7919_v40 = vld [vmem:[%s13036_s5 + $0x2a0] sm:$0xff] }
 0x807   : > { %v10829_v22 = vpop.f32.mrf.mxu3 }
 0x80b   : > { %v10780_v47 = vpop.permute.xlu0 %3849 }
 0x80c   : > { %v3866_v16 = vsel %vm1083_vm2, %v10557_v35, %v10780_v47  ;;  %v7911_v35 = vld [vmem:[%s13036_s5 + $0x260] sm:$0xff] }
 0x80d   : > { %v3884_v3 = vmax.f32 %v10517_v41, %v3866_v16  ;;  %v7883_v41 = vld [vmem:[%s13036_s5 + $0x1f8] sm:$0xff]  ;;  %7869 = vmatmul.msk.f32.gmra.mxu1 %vm3936_vm0, %v7854_v32 }
 0x80e   : > { %7898 = vmatmul.msk.f32.gmra.mxu2 %vm3936_vm0, %v7883_v41  ;;  %v7891_v16 = vld [vmem:[%s13036_s5 + $0x238] sm:$0xff] }
 0x80f   : > { %4715 = vmatpush.msrb.mxu3 %v3884_v3  ;;  %v8594_v53 = vpack.i.bf16 %v3884_v3, %v3889_v30 }
 0x810   : > { %7925 = vmatmul.msk.f32.vlgmr.msrb.gmra.mxu3 %vm3936_vm0, %v7910_v17  ;;  %v10972_v17 = vpop.f32.mrf.mxu2  ;;  %v10990_v32 = vpop.f32.mrf.mxu0 }
 0x811   : > { %8595 = vrot.lane.b32.xlu0 %v8594_v53, %s8694_s13  ;;  %8590 = vrot.lane.b32.xlu2 %v8594_v53, %s8688_s22  ;;  %13258 = vst [vmem:[#allocation28_spill] sm:$0xff] %v10972_v17  ;;  %v8096_v17 = vld [vmem:[%s13036_s5 + $0x558] sm:$0xff] }
 0x812   : > { %8585 = vrot.lane.b32.xlu1 %v8594_v53, %s8698_s29 }
 0x815   : > { %7870 = vmatmul.msk.f32.gmra.mxu1 %vm3936_vm0, %v7855_v2  ;;  %v7893_v2 = vld [vmem:[%s13036_s5 + $0x248] sm:$0xff] }
 0x816   : > { %7899 = vmatmul.msk.f32.gmra.mxu2 %vm3936_vm0, %v7884_v44 }
 0x818   : > { %7926 = vmatmul.msk.f32.gmra.mxu3 %vm3936_vm0, %v7911_v35  ;;  %v10995_v44 = vpop.f32.mrf.mxu2  ;;  %v11016_v29 = vpop.f32.mrf.mxu0 }
 0x819   : > { %3795 = vrot.lane.b32.xlu2 %v10816_v26, %s8686_s20  ;;  %13260 = vst [vmem:[#allocation19_spill] sm:$0xff] %v10995_v44 }
 0x81a   : > { %3805 = vrot.lane.b32.xlu1 %v10825_v58, %s8686_s20  ;;  %v10848_v13 = vpop.f32.mrf.mxu3 }
 0x81d   : > { %7871 = vmatmul.msk.f32.gmra.mxu1 %vm3936_vm0, %v7856_v59  ;;  %v7864_v59 = vld [vmem:[%s13036_s5 + $0x1d8] sm:$0xff] }
 0x81e   : > { %7900 = vmatmul.msk.f32.gmra.mxu2 %vm3936_vm0, %v7885_v20 }
 0x820   : > { %7927 = vmatmul.msk.f32.gmra.mxu3 %vm3936_vm0, %v7912_v1  ;;  %v7863_v1 = vld [vmem:[%s13036_s5 + $0x1d0] sm:$0xff] }
 0x821   : > { %8600 = vrot.lane.b32.xlu2 %v8594_v53, %s8697_s30  ;;  %v7862_v53 = vld [vmem:[%s13036_s5 + $0x1c8] sm:$0xff] }
 0x822   : > { %v10866_v63 = vpop.f32.mrf.mxu3 }
 0x825   : > { %7872 = vmatmul.msk.f32.gmra.mxu1 %vm3936_vm0, %v7857_v21 }
 0x826   : > { %7901 = vmatmul.msk.f32.gmra.mxu2 %vm3936_vm0, %v7886_v62  ;;  %v11018_v62 = vpop.f32.mrf.mxu2 }
 0x827   : > { %13262 = vst [vmem:[#allocation20_spill] sm:$0xff] %v11018_v62 }
 0x828   : > { %7928 = vmatmul.msk.f32.gmra.mxu3 %vm3936_vm0, %v7913_v7  ;;  %v7921_v7 = vld [vmem:[%s13036_s5 + $0x2b0] sm:$0xff] }
 0x82a   : > { %v10886_v5 = vpop.f32.mrf.mxu3 }
 0x82d   : > { %7873 = vmatmul.msk.f32.gmra.mxu1 %vm3936_vm0, %v7858_v43 }
 0x82e   : > { %7902 = vmatmul.msk.f32.gmra.mxu2 %vm3936_vm0, %v7887_v56  ;;  %v10958_v28 = vpop.f32.mrf.mxu1 }
 0x830   : > { %7929 = vmatmul.msk.f32.gmra.mxu3 %vm3936_vm0, %v7914_v15  ;;  %v7894_v15 = vld [vmem:[%s13036_s5 + $0x250] sm:$0xff] }
 0x832   : > { %v10906_v54 = vpop.f32.mrf.mxu3 }
 0x835   : > { %7874 = vmatmul.msk.f32.gmra.mxu1 %vm3936_vm0, %v7859_v36  ;;  %v11040_v36 = vpop.f32.mrf.mxu2 }
 0x836   : > { %7903 = vmatmul.msk.f32.gmra.mxu2 %vm3936_vm0, %v7888_v33  ;;  %v10985_v41 = vpop.f32.mrf.mxu1  ;;  %v7940_v33 = vld [vmem:[%s13036_s5 + $0x2d0] sm:$0xff]  ;;  %13264 = vst [vmem:[#allocation60_spill] sm:$0xff] %v11040_v36 }
 0x838   : > { %7930 = vmatmul.msk.f32.gmra.mxu3 %vm3936_vm0, %v7915_v42  ;;  %v7922_v42 = vld [vmem:[%s13036_s5 + $0x2b8] sm:$0xff] }
 0x83a   : > { %v10926_v30 = vpop.f32.mrf.mxu3 }
 0x83d   : > { %7875 = vmatmul.msk.f32.gmra.mxu1 %vm3936_vm0, %v7860_v50  ;;  %v7923_v50 = vld [vmem:[%s13036_s5 + $0x2c0] sm:$0xff] }
 0x83e   : > { %7904 = vmatmul.msk.f32.gmra.mxu2 %vm3936_vm0, %v7889_v10  ;;  %v11007_v20 = vpop.f32.mrf.mxu1 }
 0x840   : > { %7931 = vmatmul.msk.f32.gmra.mxu3 %vm3936_vm0, %v7916_v45  ;;  %v11037_v45 = vpop.f32.mrf.mxu0 }
 0x842   : > { %v10948_v61 = vpop.f32.mrf.mxu3 }
 0x845   : > { %7876 = vmatmul.msk.f32.gmra.mxu1 %vm3936_vm0, %v7861_v55 }
 0x846   : > { %7905 = vmatmul.msk.f32.gmra.mxu2 %vm3936_vm0, %v7890_v4  ;;  %v11031_v43 = vpop.f32.mrf.mxu1  ;;  %v7941_v4 = vld [vmem:[%s13036_s5 + $0x2d8] sm:$0xff] }
 0x848   : > { %7932 = vmatmul.msk.f32.gmra.mxu3 %vm3936_vm0, %v7917_v24  ;;  %v11065_v60 = vpop.f32.mrf.mxu0 }
 0x84a   : > { %v10968_v3 = vpop.f32.mrf.mxu3 }
 0x84d   : > { %7877 = vmatmul.msk.f32.gmra.mxu1 %vm3936_vm0, %v7862_v53  ;;  %v7924_v53 = vld [vmem:[%s13036_s5 + $0x2c8] sm:$0xff] }
 0x84e   : > { %7906 = vmatmul.msk.f32.gmra.mxu2 %vm3936_vm0, %v7891_v16 }
 0x850   : > { %7933 = vmatmul.msk.f32.gmra.mxu3 %vm3936_vm0, %v7918_v9  ;;  %v11061_v9 = vpop.f32.mrf.mxu1 }
 0x852   : > { %v10987_v35 = vpop.f32.mrf.mxu3 }
 0x853   : > { %13259 = vst [vmem:[#allocation16_spill] sm:$0xff] %v10987_v35  ;;  %v8097_v35 = vld [vmem:[%s13036_s5 + $0x560] sm:$0xff] }
 0x855   : > { %7878 = vmatmul.msk.f32.gmra.mxu1 %vm3936_vm0, %v7863_v1 }
 0x856   : > { %7907 = vmatmul.msk.f32.gmra.mxu2 %vm3936_vm0, %v7892_v0 }
 0x858   : > { %7934 = vmatmul.msk.f32.gmra.mxu3 %vm3936_vm0, %v7919_v40  ;;  %v7942_v40 = vld [vmem:[%s13036_s5 + $0x2e0] sm:$0xff]  ;;  %v4433_v1 = vpop.f32.mrf.mxu1 }
 0x85a   : > { %v11005_v37 = vpop.f32.mrf.mxu3 }
 0x85b   : > { %13261 = vst [vmem:[#allocation58_spill] sm:$0xff] %v11005_v37  ;;  %v8095_v37 = vld [vmem:[%s13036_s5 + $0x550] sm:$0xff] }
 0x85d   : > { %7879 = vmatmul.msk.f32.gmra.mxu1 %vm3936_vm0, %v7864_v59 }
 0x85e   : > { %7908 = vmatmul.msk.f32.gmra.mxu2 %vm3936_vm0, %v7893_v2 }
 0x860   : > { %7935 = vmatmul.msk.f32.gmra.mxu3 %vm3936_vm0, %v7920_v14  ;;  %v4044_v14 = vadd.f32 %v10933_v27, %v3904_v39 }
 0x862   : > { %v11025_v46 = vpop.f32.mrf.mxu3 }
 0x863   : > { %13263 = vst [vmem:[#allocation21_spill] sm:$0xff] %v11025_v46  ;;  %v8180_v46 = vld [vmem:[%s13036_s5 + $0x690] sm:$0xff] }
 0x866   : > { %7909 = vmatmul.msk.f32.gmra.mxu2 %vm3936_vm0, %v7894_v15 }
 0x868   : > { %7936 = vmatmul.msk.f32.gmra.mxu3 %vm3936_vm0, %v7921_v7  ;;  %v4190_v7 = vadd.f32 %v10796_v31, %v4044_v14  ;;  %v7970_v31 = vld [vmem:[%s13036_s5 + $0x348] sm:$0xff] }
 0x86a   : > { %v11054_v51 = vpop.f32.mrf.mxu3 }
 0x86b   : > { %v8591_v21 = vpop.permute.xlu2 %8590  ;;  %13266 = vst [vmem:[#allocation25_spill] sm:$0xff] %v11054_v51 }
 0x86c   : > { %v8592_v56 = vunpack.i.l.bf16 %v8591_v21  ;;  %v8593_v11 = vunpack.i.h.bf16 %v8591_v21  ;;  %v11084_v21 = vpop.f32.mrf.mxu0 }
 0x86e   : > { %4860 = vmatpush.msrb.mxu0 %v8592_v56  ;;  %v3905_v56 = vld [vmem:[%s13037_s6 + $0x8] sm:$0xff] }
 0x870   : > { %4861 = vmatpush.msrb.mxu0 %v8593_v11  ;;  %7937 = vmatmul.msk.f32.gmra.mxu3 %vm3936_vm0, %v7922_v42 }
 0x871   : > { %7955 = vmatmul.msk.f32.vlgmr.msrb.gmra.mxu0 %vm3936_vm0, %v7940_v33  ;;  %v7943_v33 = vld [vmem:[%s13036_s5 + $0x2e8] sm:$0xff] }
 0x872   : > { %v11078_v0 = vpop.f32.mrf.mxu3 }
 0x873   : > { %v11042_v48 = vpop.permute.xlu2 %3795  ;;  %13268 = vst [vmem:[#allocation68_spill] sm:$0xff] %v11078_v0 }
 0x874   : > { %v3810_v10 = vsel %vm13265_vm1, %v10584_v12, %v11042_v48  ;;  %v11067_v12 = vpop.f32.mrf.mxu2 }
 0x875   : > { %v11049_v24 = vmax.f32 %v3749_v6, %v3810_v10  ;;  %13267 = vst [vmem:[#allocation31_spill] sm:$0xff] %v11067_v12 }
 0x877   : > { %3851 = vrot.lane.b32.xlu1 %v11049_v24, %s8675_s26 }
 0x878   : > { %7938 = vmatmul.msk.f32.gmra.mxu3 %vm3936_vm0, %v7923_v50  ;;  %v8000_v50 = vld [vmem:[%s13036_s5 + $0x3c0] sm:$0xff] }
 0x879   : > { %7956 = vmatmul.msk.f32.gmra.mxu0 %vm3936_vm0, %v7941_v4  ;;  %v4045_v4 = vadd.f32 %v10958_v28, %v3905_v56 }
 0x87b   : > { %v8601_v6 = vpop.permute.xlu2 %8600  ;;  %v11104_v39 = vpop.f32.mrf.mxu3  ;;  %v4191_v28 = vadd.f32 %v10829_v22, %v4045_v4  ;;  %v7944_v22 = vld [vmem:[%s13036_s5 + $0x2f0] sm:$0xff] }
 0x87c   : > { %v8602_v55 = vunpack.i.l.bf16 %v8601_v6  ;;  %v8603_v16 = vunpack.i.h.bf16 %v8601_v6  ;;  %v4577_v11 = vpop.f32.mrf.mxu2  ;;  %v4334_v6 = vadd.f32 %v10990_v32, %v4190_v7  ;;  %13269 = vst [vmem:[#allocation61_spill] sm:$0xff] %v11104_v39 }
 0x87e   : > { %5292 = vmatpush.msra.mxu3 %v8602_v55  ;;  %v8030_v55 = vld [vmem:[%s13036_s5 + $0x438] sm:$0xff] }
 0x880   : > { %5293 = vmatpush.msra.mxu3 %v8603_v16  ;;  %v4436_v16 = vpop.f32.mrf.mxu1 }
 0x881   : > { %7957 = vmatmul.msk.f32.gmra.mxu0 %vm3936_vm0, %v7942_v40  ;;  %7939 = vmatmul.msk.f32.gmra.mxu3 %vm3936_vm0, %v7924_v53  ;;  %v4478_v40 = vadd.f32 %v4433_v1, %v4334_v6  ;;  %v3906_v53 = vld [vmem:[%s13037_s6 + $0x10] sm:$0xff]  ;;  %v4335_v1 = vadd.f32 %v11016_v29, %v4191_v28  ;;  %v8032_v6 = vld [vmem:[%s13036_s5 + $0x448] sm:$0xff] }
 0x883   : > { %v8596_v2 = vpop.permute.xlu0 %8595  ;;  %v4622_v56 = vadd.f32 %v4577_v11, %v4478_v40  ;;  %v4479_v29 = vadd.f32 %v4436_v16, %v4335_v1  ;;  %v7945_v11 = vld [vmem:[%s13036_s5 + $0x2f8] sm:$0xff] }
 0x884   : > { %v8597_v59 = vunpack.i.l.bf16 %v8596_v2  ;;  %v8586_v15 = vpop.permute.xlu1 %8585  ;;  %v8598_v27 = vunpack.i.h.bf16 %v8596_v2  ;;  %v4580_v25 = vpop.f32.mrf.mxu2 }
 0x885   : > { %v8587_v42 = vunpack.i.l.bf16 %v8586_v15  ;;  %v8588_v10 = vunpack.i.h.bf16 %v8586_v15  ;;  %v8031_v15 = vld [vmem:[%s13036_s5 + $0x440] sm:$0xff] }
 0x886   : > { %5004 = vmatpush.msra.mxu1 %v8597_v59  ;;  %v11125_v59 = vpop.f32.mrf.mxu0 }
 0x887   : > { %5148 = vmatpush.msrb.mxu2 %v8587_v42 }
 0x888   : > { %5005 = vmatpush.msra.mxu1 %v8598_v27 }
 0x889   : > { %5149 = vmatpush.msrb.mxu2 %v8588_v10  ;;  %7958 = vmatmul.msk.f32.gmra.mxu0 %vm3936_vm0, %v7943_v33  ;;  %v3907_v33 = vld [vmem:[%s13037_s6 + $0x18] sm:$0xff]  ;;  %v4439_v10 = vpop.f32.mrf.mxu1 }
 0x88a   : > { %7985 = vmatmul.msk.f32.vlgmr.msra.gmra.mxu1 %vm3936_vm0, %v7970_v31  ;;  %8015 = vmatmul.msk.f32.vlgmr.msrb.gmra.mxu2 %vm3936_vm0, %v8000_v50  ;;  %v7972_v31 = vld [vmem:[%s13036_s5 + $0x358] sm:$0xff]  ;;  %v4047_v50 = vadd.f32 %v11007_v20, %v3907_v33  ;;  %v7947_v33 = vld [vmem:[%s13036_s5 + $0x308] sm:$0xff] }
 0x88b   : > { %8045 = vmatmul.msk.f32.vlgmr.msra.gmra.mxu3 %vm3936_vm0, %v8030_v55  ;;  %v4623_v55 = vadd.f32 %v4580_v25, %v4479_v29  ;;  %v3909_v29 = vld [vmem:[%s13037_s6 + $0x28] sm:$0xff] }
 0x88c   : > { %v3806_v32 = vpop.permute.xlu1 %3805  ;;  %v4583_v28 = vpop.f32.mrf.mxu2  ;;  %v4193_v20 = vadd.f32 %v10866_v63, %v4047_v50 }
 0x88d   : > { %v3814_v14 = vsel %vm13270_vm13, %v10586_v8, %v3806_v32  ;;  %v11116_v2 = vmax.f32 %v10825_v58, %v3806_v32  ;;  %v7971_v8 = vld [vmem:[%s13036_s5 + $0x350] sm:$0xff]  ;;  %v8001_v58 = vld [vmem:[%s13036_s5 + $0x3c8] sm:$0xff] }
 0x88e   : > { %v11120_v7 = vmax.f32 %v3754_v57, %v3814_v14  ;;  %v4046_v57 = vadd.f32 %v10985_v41, %v3906_v53  ;;  %v11166_v16 = vpop.f32.mrf.mxu0  ;;  %v3908_v53 = vld [vmem:[%s13037_s6 + $0x20] sm:$0xff]  ;;  %v4337_v25 = vadd.f32 %v11065_v60, %v4193_v20  ;;  %v7948_v20 = vld [vmem:[%s13036_s5 + $0x310] sm:$0xff] }
 0x88f   : > { %3863 = vrot.lane.b32.xlu2 %v11116_v2, %s8675_s26  ;;  %v7946_v14 = vld [vmem:[%s13036_s5 + $0x300] sm:$0xff] }
 0x890   : > { %3861 = vrot.lane.b32.xlu0 %v11120_v7, %s8675_s26  ;;  %v4192_v41 = vadd.f32 %v10848_v13, %v4046_v57  ;;  %v8002_v13 = vld [vmem:[%s13036_s5 + $0x3d0] sm:$0xff] }
 0x891   : > { %7959 = vmatmul.msk.f32.gmra.mxu0 %vm3936_vm0, %v7944_v22  ;;  %v7973_v22 = vld [vmem:[%s13036_s5 + $0x360] sm:$0xff]  ;;  %v4442_v63 = vpop.f32.mrf.mxu1  ;;  %v8033_v57 = vld [vmem:[%s13036_s5 + $0x450] sm:$0xff] }
 0x892   : > { %7986 = vmatmul.msk.f32.gmra.mxu1 %vm3936_vm0, %v7971_v8  ;;  %8016 = vmatmul.msk.f32.gmra.mxu2 %vm3936_vm0, %v8001_v58  ;;  %v4336_v4 = vadd.f32 %v11037_v45, %v4192_v41  ;;  %v8003_v8 = vld [vmem:[%s13036_s5 + $0x3d8] sm:$0xff]  ;;  %v4048_v58 = vadd.f32 %v11031_v43, %v3908_v53  ;;  %v4481_v60 = vadd.f32 %v4442_v63, %v4337_v25  ;;  %v8005_v53 = vld [vmem:[%s13036_s5 + $0x3e8] sm:$0xff] }
 0x893   : > { %8046 = vmatmul.msk.f32.gmra.mxu3 %vm3936_vm0, %v8031_v15  ;;  %v4717_v42 = vpop.f32.mrf.mxu3 }
 0x894   : > { %v11147_v27 = vadd.f32 %v4717_v42, %v4622_v56  ;;  %v4480_v45 = vadd.f32 %v4439_v10, %v4336_v4  ;;  %v4586_v42 = vpop.f32.mrf.mxu2  ;;  %v4194_v43 = vadd.f32 %v10886_v5, %v4048_v58  ;;  %v7974_v10 = vld [vmem:[%s13036_s5 + $0x368] sm:$0xff]  ;;  %v4049_v5 = vadd.f32 %v11061_v9, %v3909_v29 }
 0x895   : > { %v4625_v50 = vadd.f32 %v4586_v42, %v4481_v60 }
 0x896   : > { %v4624_v1 = vadd.f32 %v4583_v28, %v4480_v45  ;;  %v11195_v15 = vpop.f32.mrf.mxu0  ;;  %v7975_v45 = vld [vmem:[%s13036_s5 + $0x370] sm:$0xff] }
 0x899   : > { %7960 = vmatmul.msk.f32.gmra.mxu0 %vm3936_vm0, %v7945_v11  ;;  %v8004_v11 = vld [vmem:[%s13036_s5 + $0x3e0] sm:$0xff]  ;;  %v4445_v4 = vpop.f32.mrf.mxu1 }
 0x89a   : > { %7987 = vmatmul.msk.f32.gmra.mxu1 %vm3936_vm0, %v7972_v31  ;;  %8017 = vmatmul.msk.f32.gmra.mxu2 %vm3936_vm0, %v8002_v13  ;;  %v4338_v31 = vadd.f32 %v11084_v21, %v4194_v43  ;;  %v8034_v13 = vld [vmem:[%s13036_s5 + $0x458] sm:$0xff]  ;;  %v8036_v43 = vld [vmem:[%s13036_s5 + $0x468] sm:$0xff] }
 0x89b   : > { %8047 = vmatmul.msk.f32.gmra.mxu3 %vm3936_vm0, %v8032_v6  ;;  %v4720_v32 = vpop.f32.mrf.mxu3 }
 0x89c   : > { %v11173_v40 = vadd.f32 %v4720_v32, %v4623_v55  ;;  %v4195_v55 = vadd.f32 %v10906_v54, %v4049_v5  ;;  %v4482_v9 = vadd.f32 %v4445_v4, %v4338_v31  ;;  %v4589_v32 = vpop.f32.mrf.mxu2  ;;  %v8007_v5 = vld [vmem:[%s13036_s5 + $0x3f8] sm:$0xff]  ;;  %v8037_v31 = vld [vmem:[%s13036_s5 + $0x470] sm:$0xff]  ;;  %v7978_v4 = vld [vmem:[%s13036_s5 + $0x388] sm:$0xff] }
 0x89e   : > { %v11225_v21 = vpop.f32.mrf.mxu0  ;;  %v4339_v54 = vadd.f32 %v11125_v59, %v4195_v55  ;;  %v7949_v59 = vld [vmem:[%s13036_s5 + $0x318] sm:$0xff] }
 0x89f   : > { %v8038_v55 = vld [vmem:[%s13036_s5 + $0x478] sm:$0xff] }
 0x8a1   : > { %7961 = vmatmul.msk.f32.gmra.mxu0 %vm3936_vm0, %v7946_v14  ;;  %v8035_v14 = vld [vmem:[%s13036_s5 + $0x460] sm:$0xff] }
 0x8a2   : > { %7988 = vmatmul.msk.f32.gmra.mxu1 %vm3936_vm0, %v7973_v22  ;;  %8018 = vmatmul.msk.f32.gmra.mxu2 %vm3936_vm0, %v8003_v8  ;;  %v4626_v22 = vadd.f32 %v4589_v32, %v4482_v9  ;;  %v4448_v8 = vpop.f32.mrf.mxu1  ;;  %v7952_v32 = vld [vmem:[%s13036_s5 + $0x330] sm:$0xff] }
 0x8a3   : > { %8048 = vmatmul.msk.f32.gmra.mxu3 %vm3936_vm0, %v8033_v57  ;;  %v4723_v56 = vpop.f32.mrf.mxu3  ;;  %v4483_v58 = vadd.f32 %v4448_v8, %v4339_v54  ;;  %v8010_v8 = vld [vmem:[%s13036_s5 + $0x410] sm:$0xff] }
 0x8a4   : > { %v11199_v41 = vadd.f32 %v4723_v56, %v4624_v1  ;;  %v7976_v1 = vld [vmem:[%s13036_s5 + $0x378] sm:$0xff]  ;;  %v8006_v56 = vld [vmem:[%s13036_s5 + $0x3f0] sm:$0xff]  ;;  %v4592_v42 = vpop.f32.mrf.mxu2 }
 0x8a5   : > { %v4627_v60 = vadd.f32 %v4592_v42, %v4483_v58  ;;  %v8041_v42 = vld [vmem:[%s13036_s5 + $0x490] sm:$0xff] }
 0x8a6   : > { %v11249_v57 = vpop.f32.mrf.mxu0 }
 0x8a7   : > { %13271 = vst [vmem:[#allocation67_spill] sm:$0xff] %v11249_v57 }
 0x8a9   : > { %7962 = vmatmul.msk.f32.gmra.mxu0 %vm3936_vm0, %v7947_v33 }
 0x8aa   : > { %7989 = vmatmul.msk.f32.gmra.mxu1 %vm3936_vm0, %v7974_v10  ;;  %8019 = vmatmul.msk.f32.gmra.mxu2 %vm3936_vm0, %v8004_v11  ;;  %v7950_v10 = vld [vmem:[%s13036_s5 + $0x320] sm:$0xff] }
 0x8ab   : > { %8049 = vmatmul.msk.f32.gmra.mxu3 %vm3936_vm0, %v8034_v13  ;;  %v4726_v6 = vpop.f32.mrf.mxu3  ;;  %v7977_v11 = vld [vmem:[%s13036_s5 + $0x380] sm:$0xff] }
 0x8ac   : > { %v11223_v28 = vadd.f32 %v4726_v6, %v4625_v50  ;;  %v7951_v50 = vld [vmem:[%s13036_s5 + $0x328] sm:$0xff]  ;;  %v8008_v6 = vld [vmem:[%s13036_s5 + $0x400] sm:$0xff] }
 0x8ae   : > { %v11278_v13 = vpop.f32.mrf.mxu0 }
 0x8af   : > { %13272 = vst [vmem:[#allocation46_spill] sm:$0xff] %v11278_v13 }
 0x8b1   : > { %7963 = vmatmul.msk.f32.gmra.mxu0 %vm3936_vm0, %v7948_v20  ;;  %v7979_v20 = vld [vmem:[%s13036_s5 + $0x390] sm:$0xff] }
 0x8b2   : > { %7990 = vmatmul.msk.f32.gmra.mxu1 %vm3936_vm0, %v7975_v45  ;;  %8020 = vmatmul.msk.f32.gmra.mxu2 %vm3936_vm0, %v8005_v53  ;;  %v8009_v45 = vld [vmem:[%s13036_s5 + $0x408] sm:$0xff]  ;;  %v8039_v53 = vld [vmem:[%s13036_s5 + $0x480] sm:$0xff] }
 0x8b3   : > { %8050 = vmatmul.msk.f32.gmra.mxu3 %vm3936_vm0, %v8035_v14  ;;  %v4729_v63 = vpop.f32.mrf.mxu3  ;;  %v7953_v14 = vld [vmem:[%s13036_s5 + $0x338] sm:$0xff] }
 0x8b4   : > { %v11244_v25 = vadd.f32 %v4729_v63, %v4626_v22  ;;  %v7980_v22 = vld [vmem:[%s13036_s5 + $0x398] sm:$0xff]  ;;  %v8040_v63 = vld [vmem:[%s13036_s5 + $0x488] sm:$0xff] }
 0x8b6   : > { %v11299_v9 = vpop.f32.mrf.mxu0 }
 0x8b7   : > { %13273 = vst [vmem:[#allocation59_spill] sm:$0xff] %v11299_v9 }
 0x8b9   : > { %7964 = vmatmul.msk.f32.gmra.mxu0 %vm3936_vm0, %v7949_v59  ;;  %v7954_v59 = vld [vmem:[%s13036_s5 + $0x340] sm:$0xff] }
 0x8ba   : > { %7991 = vmatmul.msk.f32.gmra.mxu1 %vm3936_vm0, %v7976_v1  ;;  %8021 = vmatmul.msk.f32.gmra.mxu2 %vm3936_vm0, %v8006_v56  ;;  %v7981_v1 = vld [vmem:[%s13036_s5 + $0x3a0] sm:$0xff]  ;;  %v8011_v56 = vld [vmem:[%s13036_s5 + $0x418] sm:$0xff] }
 0x8bb   : > { %8051 = vmatmul.msk.f32.gmra.mxu3 %vm3936_vm0, %v8036_v43  ;;  %v4732_v29 = vpop.f32.mrf.mxu3  ;;  %v7982_v43 = vld [vmem:[%s13036_s5 + $0x3a8] sm:$0xff] }
 0x8bc   : > { %v11264_v33 = vadd.f32 %v4732_v29, %v4627_v60  ;;  %v8012_v60 = vld [vmem:[%s13036_s5 + $0x420] sm:$0xff] }
 0x8be   : > { %v11318_v54 = vpop.f32.mrf.mxu0 }
 0x8bf   : > { %13274 = vst [vmem:[#allocation64_spill] sm:$0xff] %v11318_v54 }
 0x8c1   : > { %7965 = vmatmul.msk.f32.gmra.mxu0 %vm3936_vm0, %v7950_v10  ;;  %v8042_v10 = vld [vmem:[%s13036_s5 + $0x498] sm:$0xff] }
 0x8c2   : > { %7992 = vmatmul.msk.f32.gmra.mxu1 %vm3936_vm0, %v7977_v11  ;;  %8022 = vmatmul.msk.f32.gmra.mxu2 %vm3936_vm0, %v8007_v5 }
 0x8c3   : > { %8052 = vmatmul.msk.f32.gmra.mxu3 %vm3936_vm0, %v8037_v31 }
 0x8c6   : > { %v11336_v58 = vpop.f32.mrf.mxu0 }
 0x8c7   : > { %13275 = vst [vmem:[#allocation66_spill] sm:$0xff] %v11336_v58 }
 0x8c9   : > { %7966 = vmatmul.msk.f32.gmra.mxu0 %vm3936_vm0, %v7951_v50 }
 0x8ca   : > { %7993 = vmatmul.msk.f32.gmra.mxu1 %vm3936_vm0, %v7978_v4  ;;  %8023 = vmatmul.msk.f32.gmra.mxu2 %vm3936_vm0, %v8008_v6  ;;  %v7983_v6 = vld [vmem:[%s13036_s5 + $0x3b0] sm:$0xff] }
 0x8cb   : > { %8053 = vmatmul.msk.f32.gmra.mxu3 %vm3936_vm0, %v8038_v55  ;;  %v7984_v55 = vld [vmem:[%s13036_s5 + $0x3b8] sm:$0xff] }
 0x8ce   : > { %v11360_v29 = vpop.f32.mrf.mxu0 }
 0x8cf   : > { %13276 = vst [vmem:[#allocation48_spill] sm:$0xff] %v11360_v29 }
 0x8d1   : > { %7967 = vmatmul.msk.f32.gmra.mxu0 %vm3936_vm0, %v7952_v32  ;;  %v8014_v32 = vld [vmem:[%s13036_s5 + $0x430] sm:$0xff] }
 0x8d2   : > { %7994 = vmatmul.msk.f32.gmra.mxu1 %vm3936_vm0, %v7979_v20  ;;  %8024 = vmatmul.msk.f32.gmra.mxu2 %vm3936_vm0, %v8009_v45  ;;  %v8044_v20 = vld [vmem:[%s13036_s5 + $0x4a8] sm:$0xff] }
 0x8d3   : > { %8054 = vmatmul.msk.f32.gmra.mxu3 %vm3936_vm0, %v8039_v53 }
 0x8d9   : > { %7968 = vmatmul.msk.f32.gmra.mxu0 %vm3936_vm0, %v7953_v14 }
 0x8da   : > { %7995 = vmatmul.msk.f32.gmra.mxu1 %vm3936_vm0, %v7980_v22  ;;  %8025 = vmatmul.msk.f32.gmra.mxu2 %vm3936_vm0, %v8010_v8 }
 0x8db   : > { %8055 = vmatmul.msk.f32.gmra.mxu3 %vm3936_vm0, %v8040_v63 }
 0x8e1   : > { %7969 = vmatmul.msk.f32.gmra.mxu0 %vm3936_vm0, %v7954_v59 }
 0x8e2   : > { %7996 = vmatmul.msk.f32.gmra.mxu1 %vm3936_vm0, %v7981_v1  ;;  %8026 = vmatmul.msk.f32.gmra.mxu2 %vm3936_vm0, %v8011_v56  ;;  %v8060_v56 = vld [vmem:[%s13036_s5 + $0x4b0] sm:$0xff] }
 0x8e3   : > { %8056 = vmatmul.msk.f32.gmra.mxu3 %vm3936_vm0, %v8041_v42 }
 0x8e9   : > { %v3864_v11 = vpop.permute.xlu2 %3863  ;;  %v11365_v5 = vpop.permute.xlu1 %3851 }
 0x8ea   : > { %v3892_v31 = vmax.f32 %v11116_v2, %v3864_v11  ;;  %7997 = vmatmul.msk.f32.gmra.mxu1 %vm3936_vm0, %v7982_v43  ;;  %v3867_v50 = vsel %vm1083_vm2, %v10780_v47, %v11365_v5  ;;  %8027 = vmatmul.msk.f32.gmra.mxu2 %vm3936_vm0, %v8012_v60  ;;  %v8013_v2 = vld [vmem:[%s13036_s5 + $0x428] sm:$0xff]  ;;  %v8043_v47 = vld [vmem:[%s13036_s5 + $0x4a0] sm:$0xff]  ;;  %v11434_v43 = vpop.f32.mrf.mxu2 }
 0x8eb   : > { %v3885_v4 = vmax.f32 %v10599_v49, %v3867_v50  ;;  %8057 = vmatmul.msk.f32.gmra.mxu3 %vm3936_vm0, %v8042_v10  ;;  %v11445_v10 = vpop.f32.mrf.mxu3 }
 0x8ec   : > { %3903 = vst.msk [vmem:[#allocation7 + $0x48] sm:$0xff] %vm3897_vm15, %v3892_v31  ;;  %v8063_v31 = vld [vmem:[%s13036_s5 + $0x4c8] sm:$0xff] }
 0x8ee   : > { %v11387_v49 = vpop.f32.mrf.mxu0 }
 0x8f2   : > { %7998 = vmatmul.msk.f32.gmra.mxu1 %vm3936_vm0, %v7983_v6  ;;  %8028 = vmatmul.msk.f32.gmra.mxu2 %vm3936_vm0, %v8013_v2  ;;  %v8064_v2 = vld [vmem:[%s13036_s5 + $0x4d0] sm:$0xff] }
 0x8f3   : > { %8058 = vmatmul.msk.f32.gmra.mxu3 %vm3936_vm0, %v8043_v47  ;;  %v11457_v6 = vpop.f32.mrf.mxu3 }
 0x8f4   : > { %13278 = vst [vmem:[#allocation9_spill] sm:$0xff] %v11457_v6 }
 0x8f6   : > { %v11402_v45 = vpop.f32.mrf.mxu0 }
 0x8fa   : > { %7999 = vmatmul.msk.f32.gmra.mxu1 %vm3936_vm0, %v7984_v55  ;;  %8029 = vmatmul.msk.f32.gmra.mxu2 %vm3936_vm0, %v8014_v32 }
 0x8fb   : > { %8059 = vmatmul.msk.f32.gmra.mxu3 %vm3936_vm0, %v8044_v20  ;;  %v8065_v20 = vld [vmem:[%s13036_s5 + $0x4d8] sm:$0xff] }
 0x8fe   : > { %v11411_v1 = vpop.f32.mrf.mxu0 }
 0x902   : > { %v3862_v53 = vpop.permute.xlu0 %3861 }
 0x903   : > { %v3871_v14 = vsel %vm1083_vm2, %v10730_v34, %v3862_v53  ;;  %v3872_v22 = vsel %vm1083_vm2, %v3862_v53, %v3864_v11  ;;  %v11423_v34 = vpop.f32.mrf.mxu1  ;;  %v11447_v11 = vpop.f32.mrf.mxu2 }
 0x904   : > { %v3890_v8 = vmax.f32 %v10603_v18, %v3871_v14  ;;  %v11409_v63 = vmax.f32 %v11120_v7, %v3872_v22  ;;  %v11421_v18 = vmax.f32 %v10816_v26, %v11042_v48  ;;  %v8061_v7 = vld [vmem:[%s13036_s5 + $0x4b8] sm:$0xff]  ;;  %v8062_v26 = vld [vmem:[%s13036_s5 + $0x4c0] sm:$0xff]  ;;  %v11472_v53 = vpop.f32.mrf.mxu3 }
 0x905   : > { %13281 = vst [vmem:[#allocation65_spill] sm:$0xff] %v11472_v53 }
 0x906   : > { %5432 = vmatpush.msra.mxu0 %v3890_v8  ;;  %v8609_v59 = vpack.i.bf16 %v3885_v4, %v3890_v8  ;;  %v11431_v42 = vpop.f32.mrf.mxu0  ;;  %v8066_v8 = vld [vmem:[%s13036_s5 + $0x4e0] sm:$0xff] }
 0x908   : > { %8610 = vrot.lane.b32.xlu1 %v8609_v59, %s8688_s22  ;;  %8605 = vrot.lane.b32.xlu0 %v8609_v59, %s8694_s13 }
 0x909   : > { %5433 = vmatpush.msra.mxu0 %v3885_v4 }
 0x90a   : > { %8075 = vmatmul.msk.f32.vlgmr.msra.gmra.mxu0 %vm3936_vm0, %v8060_v56 }
 0x90b   : > { %v11440_v48 = vpop.f32.mrf.mxu1  ;;  %v11462_v47 = vpop.f32.mrf.mxu2 }
 0x90c   : > { %13279 = vst [vmem:[#allocation63_spill] sm:$0xff] %v11462_v47  ;;  %v11485_v56 = vpop.f32.mrf.mxu3  ;;  %v8125_v47 = vld [vmem:[%s13036_s5 + $0x5c8] sm:$0xff] }
 0x90d   : > { %13285 = vst [vmem:[#allocation39_spill] sm:$0xff] %v11485_v56 }
 0x90e   : > { %v11443_v60 = vpop.f32.mrf.mxu0 }
 0x910   : > { %8615 = vrot.lane.b32.xlu1 %v8609_v59, %s8698_s29  ;;  %3853 = vrot.lane.b32.xlu0 %v11421_v18, %s8675_s26 }
 0x912   : > { %8076 = vmatmul.msk.f32.gmra.mxu0 %vm3936_vm0, %v8061_v7 }
 0x913   : > { %v11453_v50 = vpop.f32.mrf.mxu1  ;;  %v11475_v14 = vpop.f32.mrf.mxu2 }
 0x914   : > { %13277 = vst [vmem:[#allocation62_spill] sm:$0xff] %v11453_v50 }
 0x915   : > { %13282 = vst [vmem:[#allocation14_spill] sm:$0xff] %v11475_v14 }
 0x916   : > { %v11455_v4 = vpop.f32.mrf.mxu0 }
 0x918   : > { %8625 = vrot.lane.b32.xlu0 %v8609_v59, %s8697_s30 }
 0x91a   : > { %8077 = vmatmul.msk.f32.gmra.mxu0 %vm3936_vm0, %v8062_v26  ;;  %v8067_v26 = vld [vmem:[%s13036_s5 + $0x4e8] sm:$0xff] }
 0x91b   : > { %v11465_v55 = vpop.f32.mrf.mxu1  ;;  %v11487_v7 = vpop.f32.mrf.mxu2 }
 0x91c   : > { %13280 = vst [vmem:[#allocation51_spill] sm:$0xff] %v11465_v55 }
 0x91d   : > { %13286 = vst [vmem:[#allocation11_spill] sm:$0xff] %v11487_v7 }
 0x91e   : > { %v11467_v32 = vpop.f32.mrf.mxu0 }
 0x922   : > { %8078 = vmatmul.msk.f32.gmra.mxu0 %vm3936_vm0, %v8063_v31 }
 0x923   : > { %v11477_v22 = vpop.f32.mrf.mxu1  ;;  %v11499_v29 = vpop.f32.mrf.mxu2 }
 0x924   : > { %13283 = vst [vmem:[#allocation8_spill] sm:$0xff] %v11477_v22 }
 0x925   : > { %13290 = vst [vmem:[#allocation22_spill] sm:$0xff] %v11499_v29 }
 0x926   : > { %v11482_v59 = vpop.f32.mrf.mxu0 }
 0x927   : > { %13284 = vst [vmem:[#allocation10_spill] sm:$0xff] %v11482_v59  ;;  %v8126_v59 = vld [vmem:[%s13036_s5 + $0x5d0] sm:$0xff] }
 0x92a   : > { %8079 = vmatmul.msk.f32.gmra.mxu0 %vm3936_vm0, %v8064_v2 }
 0x92b   : > { %v11492_v31 = vpop.f32.mrf.mxu1  ;;  %v11514_v0 = vpop.f32.mrf.mxu2 }
 0x92c   : > { %13287 = vst [vmem:[#allocation17_spill] sm:$0xff] %v11492_v31 }
 0x92d   : > { %13294 = vst [vmem:[#allocation12_spill] sm:$0xff] %v11514_v0 }
 0x92e   : > { %v11495_v2 = vpop.f32.mrf.mxu0 }
 0x92f   : > { %13288 = vst [vmem:[#allocation41_spill] sm:$0xff] %v11495_v2  ;;  %v8094_v2 = vld [vmem:[%s13036_s5 + $0x548] sm:$0xff] }
 0x932   : > { %8080 = vmatmul.msk.f32.gmra.mxu0 %vm3936_vm0, %v8065_v20  ;;  %v11497_v20 = vpop.f32.mrf.mxu3 }
 0x933   : > { %13289 = vst [vmem:[#allocation52_spill] sm:$0xff] %v11497_v20  ;;  %v11505_v39 = vpop.f32.mrf.mxu1 }
 0x934   : > { %13291 = vst [vmem:[#allocation53_spill] sm:$0xff] %v11505_v39 }
 0x936   : > { %v11507_v58 = vpop.f32.mrf.mxu0 }
 0x937   : > { %13292 = vst [vmem:[#allocation44_spill] sm:$0xff] %v11507_v58  ;;  %v8120_v58 = vld [vmem:[%s13036_s5 + $0x5a0] sm:$0xff] }
 0x93a   : > { %8081 = vmatmul.msk.f32.gmra.mxu0 %vm3936_vm0, %v8066_v8  ;;  %v8068_v8 = vld [vmem:[%s13036_s5 + $0x4f0] sm:$0xff]  ;;  %v11509_v12 = vpop.f32.mrf.mxu3 }
 0x93b   : > { %13293 = vst [vmem:[#allocation54_spill] sm:$0xff] %v11509_v12  ;;  %v11517_v29 = vpop.f32.mrf.mxu1  ;;  %v11527_v12 = vpop.f32.mrf.mxu2 }
 0x93c   : > { %13295 = vst [vmem:[#allocation55_spill] sm:$0xff] %v11517_v29 }
 0x93d   : > { %13298 = vst [vmem:[#allocation57_spill] sm:$0xff] %v11527_v12 }
 0x93e   : > { %v11519_v54 = vpop.f32.mrf.mxu0 }
 0x93f   : > { %13296 = vst [vmem:[#allocation56_spill] sm:$0xff] %v11519_v54 }
 0x942   : > { %8082 = vmatmul.msk.f32.gmra.mxu0 %vm3936_vm0, %v8067_v26  ;;  %v8069_v26 = vld [vmem:[%s13036_s5 + $0x4f8] sm:$0xff]  ;;  %v11524_v39 = vpop.f32.mrf.mxu3 }
 0x943   : > { %13297 = vst [vmem:[#allocation47_spill] sm:$0xff] %v11524_v39  ;;  %v11529_v36 = vpop.f32.mrf.mxu1  ;;  %v11539_v54 = vpop.f32.mrf.mxu2 }
 0x944   : > { %13299 = vst [vmem:[#allocation50_spill] sm:$0xff] %v11529_v36 }
 0x945   : > { %13302 = vst [vmem:[#allocation45_spill] sm:$0xff] %v11539_v54 }
 0x946   : > { %v11534_v0 = vpop.f32.mrf.mxu0 }
 0x947   : > { %13300 = vst [vmem:[#allocation34_spill] sm:$0xff] %v11534_v0 }
 0x94a   : > { %8083 = vmatmul.msk.f32.gmra.mxu0 %vm3936_vm0, %v8068_v8  ;;  %v8070_v8 = vld [vmem:[%s13036_s5 + $0x500] sm:$0xff]  ;;  %v11537_v29 = vpop.f32.mrf.mxu3 }
 0x94b   : > { %13301 = vst [vmem:[#allocation37_spill] sm:$0xff] %v11537_v29  ;;  %v11544_v39 = vpop.f32.mrf.mxu1  ;;  %v11551_v20 = vpop.f32.mrf.mxu2 }
 0x94e   : > { %v11547_v36 = vpop.f32.mrf.mxu0 }
 0x94f   : > { %13303 = vst [vmem:[#allocation36_spill] sm:$0xff] %v11547_v36 }
 0x952   : > { %8084 = vmatmul.msk.f32.gmra.mxu0 %vm3936_vm0, %v8069_v26  ;;  %v8071_v26 = vld [vmem:[%s13036_s5 + $0x508] sm:$0xff]  ;;  %v11549_v12 = vpop.f32.mrf.mxu3 }
 0x953   : > { %13304 = vst [vmem:[#allocation49_spill] sm:$0xff] %v11549_v12  ;;  %v11557_v54 = vpop.f32.mrf.mxu1  ;;  %v11566_v36 = vpop.f32.mrf.mxu2 }
 0x956   : > { %v11559_v29 = vpop.f32.mrf.mxu0 }
 0x957   : > { %13305 = vst [vmem:[#allocation26_spill] sm:$0xff] %v11559_v29  ;;  %v8090_v29 = vld [vmem:[%s13036_s5 + $0x528] sm:$0xff] }
 0x95a   : > { %8085 = vmatmul.msk.f32.gmra.mxu0 %vm3936_vm0, %v8070_v8  ;;  %v8072_v8 = vld [vmem:[%s13036_s5 + $0x510] sm:$0xff]  ;;  %v11561_v0 = vpop.f32.mrf.mxu3 }
 0x95b   : > { %v11569_v9 = vpop.f32.mrf.mxu1 }
 0x95e   : > { %v11577_v56 = vpop.f32.mrf.mxu0 }
 0x95f   : > { %13306 = vst [vmem:[#allocation40_spill] sm:$0xff] %v11577_v56 }
 0x962   : > { %8086 = vmatmul.msk.f32.gmra.mxu0 %vm3936_vm0, %v8071_v26  ;;  %v8073_v26 = vld [vmem:[%s13036_s5 + $0x518] sm:$0xff] }
 0x96a   : > { %8087 = vmatmul.msk.f32.gmra.mxu0 %vm3936_vm0, %v8072_v8  ;;  %v8074_v8 = vld [vmem:[%s13036_s5 + $0x520] sm:$0xff] }
 0x972   : > { %8088 = vmatmul.msk.f32.gmra.mxu0 %vm3936_vm0, %v8073_v26 }
 0x97a   : > { %8089 = vmatmul.msk.f32.gmra.mxu0 %vm3936_vm0, %v8074_v8  ;;  %v8611_v12 = vpop.permute.xlu1 %8610  ;;  %v8606_v31 = vpop.permute.xlu0 %8605 }
 0x97b   : > { %v8612_v51 = vunpack.i.l.bf16 %v8611_v12  ;;  %v8607_v7 = vunpack.i.l.bf16 %v8606_v31  ;;  %v8613_v26 = vunpack.i.h.bf16 %v8611_v12  ;;  %v8608_v62 = vunpack.i.h.bf16 %v8606_v31  ;;  %v11581_v12 = vpop.f32.mrf.mxu3  ;;  %v11584_v31 = vpop.f32.mrf.mxu2 }
 0x97d   : > { %5578 = vmatpush.msrb.mxu1 %v8612_v51  ;;  %5722 = vmatpush.msra.mxu2 %v8607_v7 }
 0x97f   : > { %5579 = vmatpush.msrb.mxu1 %v8613_v26  ;;  %5723 = vmatpush.msra.mxu2 %v8608_v62 }
 0x980   : > { %8105 = vmatmul.msk.f32.vlgmr.msrb.gmra.mxu1 %vm3936_vm0, %v8090_v29  ;;  %8135 = vmatmul.msk.f32.vlgmr.msra.gmra.mxu2 %vm3936_vm0, %v8120_v58  ;;  %v8091_v58 = vld [vmem:[%s13036_s5 + $0x530] sm:$0xff]  ;;  %v8121_v29 = vld [vmem:[%s13036_s5 + $0x5a8] sm:$0xff] }
 0x981   : > { %6150 = vmatpush.msra.mxu1 %v11409_v63 }
 0x982   : > { %v8616_v51 = vpop.permute.xlu1 %8615  ;;  %v3854_v7 = vpop.permute.xlu0 %3853 }
 0x983   : > { %v8617_v8 = vunpack.i.l.bf16 %v8616_v51  ;;  %v3868_v22 = vsel %vm1083_vm2, %v11365_v5, %v3854_v7  ;;  %v3887_v56 = vmax.f32 %v11421_v18, %v3854_v7  ;;  %v8618_v26 = vunpack.i.h.bf16 %v8616_v51  ;;  %v8150_v5 = vld [vmem:[%s13036_s5 + $0x618] sm:$0xff]  ;;  %v11611_v51 = vpop.f32.mrf.mxu3 }
 0x984   : > { %v3886_v62 = vmax.f32 %v11049_v24, %v3868_v22  ;;  %v11601_v24 = vpop.f32.mrf.mxu1  ;;  %vm7651_vm2 = vcmask 1043456  }
 0x985   : > { %3898 = vst.msk [vmem:[#allocation7 + $0x20] sm:$0xff] %vm3897_vm15, %v3887_v56  ;;  %5866 = vmatpush.msrb.mxu3 %v8617_v8  ;;  %v11615_v8 = vpop.f32.mrf.mxu2 }
 0x986   : > { %6151 = vmatpush.msra.mxu1 %v3886_v62  ;;  %v8639_v18 = vpack.i.bf16 %v3886_v62, %v11409_v63 }
 0x987   : > { %v11603_v22 = vpop.f32.mrf.mxu0  ;;  %5867 = vmatpush.msrb.mxu3 %v8618_v26  ;;  %v8092_v26 = vld [vmem:[%s13036_s5 + $0x538] sm:$0xff] }
 0x988   : > { %8106 = vmatmul.msk.f32.gmra.mxu1 %vm3936_vm0, %v8091_v58  ;;  %8136 = vmatmul.msk.f32.gmra.mxu2 %vm3936_vm0, %v8121_v29  ;;  %v8122_v58 = vld [vmem:[%s13036_s5 + $0x5b0] sm:$0xff]  ;;  %v11623_v29 = vld [vmem:[#allocation7 + $0x48] sm:$0xff] }
 0x989   : > { %8165 = vmatmul.msk.f32.vlgmr.msrb.gmra.mxu3 %vm3936_vm0, %v8150_v5  ;;  %8640 = vrot.lane.b32.xlu0 %v8639_v18, %s8697_s30  ;;  %v8151_v5 = vld [vmem:[%s13036_s5 + $0x620] sm:$0xff] }
 0x98a   : > { %v8626_v56 = vpop.permute.xlu0 %8625  ;;  %8630 = vrot.lane.b32.xlu1 %v8639_v18, %s8694_s13  ;;  %8620 = vrot.lane.b32.xlu2 %v8639_v18, %s8688_s22 }
 0x98b   : > { %v8627_v63 = vunpack.i.l.bf16 %v8626_v56  ;;  %v8628_v62 = vunpack.i.h.bf16 %v8626_v56  ;;  %v11644_v13 = vpop.f32.mrf.mxu3 }
 0x98c   : > { %v11613_v7 = vld [vmem:[#allocation7 + $0x20] sm:$0xff]  ;;  %v11637_v14 = vpop.f32.mrf.mxu1 }
 0x98d   : > { %6010 = vmatpush.msrb.mxu0 %v8627_v63  ;;  %v8654_v56 = vpack.i.bf16 %v11613_v7, %v11623_v29 }
 0x98f   : > { %v11633_v63 = vpop.f32.mrf.mxu0  ;;  %6011 = vmatpush.msrb.mxu0 %v8628_v62  ;;  %v8093_v62 = vld [vmem:[%s13036_s5 + $0x540] sm:$0xff] }
 0x990   : > { %8107 = vmatmul.msk.f32.gmra.mxu1 %vm3936_vm0, %v8092_v26  ;;  %8137 = vmatmul.msk.f32.gmra.mxu2 %vm3936_vm0, %v8122_v58  ;;  %v8123_v26 = vld [vmem:[%s13036_s5 + $0x5b8] sm:$0xff] }
 0x991   : > { %8166 = vmatmul.msk.f32.gmra.mxu3 %vm3936_vm0, %v8151_v5  ;;  %8195 = vmatmul.msk.f32.vlgmr.msrb.gmra.mxu0 %vm3936_vm0, %v8180_v46  ;;  %v8152_v46 = vld [vmem:[%s13036_s5 + $0x628] sm:$0xff]  ;;  %v8181_v58 = vld [vmem:[%s13036_s5 + $0x698] sm:$0xff]  ;;  %v11658_v5 = vpop.f32.mrf.mxu2 }
 0x992   : > { %8655 = vrot.lane.b32.xlu0 %v8654_v56, %s8694_s13  ;;  %8645 = vrot.lane.b32.xlu1 %v8654_v56, %s8688_s22 }
 0x993   : > { %8635 = vrot.lane.b32.xlu2 %v8639_v18, %s8698_s29 }
 0x994   : > { %v11667_v44 = vpop.f32.mrf.mxu1 }
 0x997   : > { %v11660_v18 = vpop.f32.mrf.mxu0 }
 0x998   : > { %8108 = vmatmul.msk.f32.gmra.mxu1 %vm3936_vm0, %v8093_v62  ;;  %8138 = vmatmul.msk.f32.gmra.mxu2 %vm3936_vm0, %v8123_v26  ;;  %v8124_v62 = vld [vmem:[%s13036_s5 + $0x5c0] sm:$0xff]  ;;  %v8153_v26 = vld [vmem:[%s13036_s5 + $0x630] sm:$0xff] }
 0x999   : > { %8167 = vmatmul.msk.f32.gmra.mxu3 %vm3936_vm0, %v8152_v46  ;;  %8196 = vmatmul.msk.f32.gmra.mxu0 %vm3936_vm0, %v8181_v58  ;;  %v8182_v46 = vld [vmem:[%s13036_s5 + $0x6a0] sm:$0xff]  ;;  %v11682_v58 = vpop.f32.mrf.mxu3 }
 0x99a   : > { %8660 = vrot.lane.b32.xlu1 %v8654_v56, %s8698_s29 }
 0x99b   : > { %8650 = vrot.lane.b32.xlu2 %v8654_v56, %s8697_s30  ;;  %v11688_v56 = vpop.f32.mrf.mxu2 }
 0x99c   : > { %v11692_v55 = vpop.f32.mrf.mxu1 }
 0x99d   : > { %13307 = vst [vmem:[#allocation35_spill] sm:$0xff] %v11692_v55 }
 0x99f   : > { %v11684_v53 = vpop.f32.mrf.mxu0 }
 0x9a0   : > { %8109 = vmatmul.msk.f32.gmra.mxu1 %vm3936_vm0, %v8094_v2  ;;  %8139 = vmatmul.msk.f32.gmra.mxu2 %vm3936_vm0, %v8124_v62  ;;  %v8154_v2 = vld [vmem:[%s13036_s5 + $0x638] sm:$0xff]  ;;  %v8183_v62 = vld [vmem:[%s13036_s5 + $0x6a8] sm:$0xff] }
 0x9a1   : > { %8168 = vmatmul.msk.f32.gmra.mxu3 %vm3936_vm0, %v8153_v26  ;;  %8197 = vmatmul.msk.f32.gmra.mxu0 %vm3936_vm0, %v8182_v46  ;;  %v11710_v46 = vpop.f32.mrf.mxu3 }
 0x9a3   : > { %v11714_v57 = vpop.f32.mrf.mxu2 }
 0x9a4   : > { %13308 = vst [vmem:[#allocation29_spill] sm:$0xff] %v11714_v57  ;;  %v8100_v57 = vld [vmem:[%s13036_s5 + $0x578] sm:$0xff] }
 0x9a7   : > { %v11706_v26 = vpop.f32.mrf.mxu0 }
 0x9a8   : > { %8110 = vmatmul.msk.f32.gmra.mxu1 %vm3936_vm0, %v8095_v37  ;;  %8140 = vmatmul.msk.f32.gmra.mxu2 %vm3936_vm0, %v8125_v47  ;;  %v8155_v37 = vld [vmem:[%s13036_s5 + $0x640] sm:$0xff]  ;;  %v8184_v47 = vld [vmem:[%s13036_s5 + $0x6b0] sm:$0xff] }
 0x9a9   : > { %8169 = vmatmul.msk.f32.gmra.mxu3 %vm3936_vm0, %v8154_v2  ;;  %8198 = vmatmul.msk.f32.gmra.mxu0 %vm3936_vm0, %v8183_v62  ;;  %v11728_v2 = vpop.f32.mrf.mxu1  ;;  %v11736_v6 = vpop.f32.mrf.mxu3 }
 0x9aa   : > { %13309 = vst [vmem:[#allocation43_spill] sm:$0xff] %v11728_v2  ;;  %v8127_v2 = vld [vmem:[%s13036_s5 + $0x5d8] sm:$0xff] }
 0x9ab   : > { %13310 = vst [vmem:[#allocation38_spill] sm:$0xff] %v11736_v6  ;;  %v11738_v50 = vpop.f32.mrf.mxu2  ;;  %v8098_v6 = vld [vmem:[%s13036_s5 + $0x568] sm:$0xff] }
 0x9ac   : > { %13311 = vst [vmem:[#allocation32_spill] sm:$0xff] %v11738_v50 }
 0x9af   : > { %v11730_v62 = vpop.f32.mrf.mxu0 }
 0x9b0   : > { %8111 = vmatmul.msk.f32.gmra.mxu1 %vm3936_vm0, %v8096_v17  ;;  %8141 = vmatmul.msk.f32.gmra.mxu2 %vm3936_vm0, %v8126_v59  ;;  %v8156_v17 = vld [vmem:[%s13036_s5 + $0x648] sm:$0xff]  ;;  %v8185_v59 = vld [vmem:[%s13036_s5 + $0x6b8] sm:$0xff] }
 0x9b1   : > { %8170 = vmatmul.msk.f32.gmra.mxu3 %vm3936_vm0, %v8155_v37  ;;  %8199 = vmatmul.msk.f32.gmra.mxu0 %vm3936_vm0, %v8184_v47  ;;  %v11756_v47 = vpop.f32.mrf.mxu1  ;;  %v11760_v50 = vpop.f32.mrf.mxu3 }
 0x9b2   : > { %13313 = vst [vmem:[#allocation42_spill] sm:$0xff] %v11756_v47 }
 0x9b3   : > { %13314 = vst [vmem:[#allocation15_spill] sm:$0xff] %v11760_v50  ;;  %v8099_v50 = vld [vmem:[%s13036_s5 + $0x570] sm:$0xff] }
 0x9b7   : > { %v11752_v37 = vpop.f32.mrf.mxu0 }
 0x9b8   : > { %13312 = vst [vmem:[#allocation18_spill] sm:$0xff] %v11752_v37  ;;  %8112 = vmatmul.msk.f32.gmra.mxu1 %vm3936_vm0, %v8097_v35  ;;  %8142 = vmatmul.msk.f32.gmra.mxu2 %vm3936_vm0, %v8127_v2  ;;  %v8128_v37 = vld [vmem:[%s13036_s5 + $0x5e0] sm:$0xff]  ;;  %v8157_v35 = vld [vmem:[%s13036_s5 + $0x650] sm:$0xff] }
 0x9b9   : > { %8171 = vmatmul.msk.f32.gmra.mxu3 %vm3936_vm0, %v8156_v17  ;;  %8200 = vmatmul.msk.f32.gmra.mxu0 %vm3936_vm0, %v8185_v59  ;;  %v8186_v2 = vld [vmem:[%s13036_s5 + $0x6c0] sm:$0xff]  ;;  %v11774_v17 = vpop.f32.mrf.mxu2  ;;  %v11782_v47 = vpop.f32.mrf.mxu1 }
 0x9ba   : > { %13315 = vst [vmem:[#allocation27_spill] sm:$0xff] %v11774_v17  ;;  %v8129_v17 = vld [vmem:[%s13036_s5 + $0x5e8] sm:$0xff] }
 0x9bb   : > { %13317 = vst [vmem:[#allocation30_spill] sm:$0xff] %v11782_v47 }
 0x9bf   : > { %v11776_v59 = vpop.f32.mrf.mxu0 }
 0x9c0   : > { %13316 = vst [vmem:[#allocation33_spill] sm:$0xff] %v11776_v59  ;;  %8113 = vmatmul.msk.f32.gmra.mxu1 %vm3936_vm0, %v8098_v6  ;;  %8143 = vmatmul.msk.f32.gmra.mxu2 %vm3936_vm0, %v8128_v37  ;;  %v8158_v6 = vld [vmem:[%s13036_s5 + $0x658] sm:$0xff]  ;;  %v8187_v37 = vld [vmem:[%s13036_s5 + $0x6c8] sm:$0xff] }
 0x9c1   : > { %8172 = vmatmul.msk.f32.gmra.mxu3 %vm3936_vm0, %v8157_v35  ;;  %8201 = vmatmul.msk.f32.gmra.mxu0 %vm3936_vm0, %v8186_v2  ;;  %v11796_v35 = vpop.f32.mrf.mxu3  ;;  %v11800_v2 = vpop.f32.mrf.mxu2 }
 0x9c2   : > { %13318 = vst [vmem:[#allocation69_spill] sm:$0xff] %v11796_v35  ;;  %v11806_v59 = vpop.f32.mrf.mxu1 }
 0x9c3   : > { %13319 = vst [vmem:[#allocation13_spill] sm:$0xff] %v11800_v2 }
 0x9c4   : > { %13321 = vst [vmem:[#allocation24_spill] sm:$0xff] %v11806_v59 }
 0x9c7   : > { %v11804_v47 = vpop.f32.mrf.mxu0 }
 0x9c8   : > { %8114 = vmatmul.msk.f32.gmra.mxu1 %vm3936_vm0, %v8099_v50  ;;  %8144 = vmatmul.msk.f32.gmra.mxu2 %vm3936_vm0, %v8129_v17  ;;  %13320 = vst [vmem:[#allocation23_spill] sm:$0xff] %v11804_v47  ;;  %v8130_v50 = vld [vmem:[%s13036_s5 + $0x5f0] sm:$0xff]  ;;  %v8159_v17 = vld [vmem:[%s13036_s5 + $0x660] sm:$0xff] }
 0x9c9   : > { %8173 = vmatmul.msk.f32.gmra.mxu3 %vm3936_vm0, %v8158_v6  ;;  %8202 = vmatmul.msk.f32.gmra.mxu0 %vm3936_vm0, %v8187_v37  ;;  %v8188_v6 = vld [vmem:[%s13036_s5 + $0x6d0] sm:$0xff]  ;;  %v11822_v37 = vpop.f32.mrf.mxu3  ;;  %v11826_v59 = vpop.f32.mrf.mxu2  ;;  %v8101_v47 = vld [vmem:[%s13036_s5 + $0x580] sm:$0xff] }
 0x9ca   : > { %13322 = vst [vmem:[#allocation70_spill] sm:$0xff] %v11822_v37  ;;  %v8102_v37 = vld [vmem:[%s13036_s5 + $0x588] sm:$0xff] }
 0x9cb   : > { %13323 = vst [vmem:[#allocation71_spill] sm:$0xff] %v11826_v59 }
 0x9cf   : > { %v11828_v2 = vpop.f32.mrf.mxu0 }
 0x9d0   : > { %8115 = vmatmul.msk.f32.gmra.mxu1 %vm3936_vm0, %v8100_v57  ;;  %8145 = vmatmul.msk.f32.gmra.mxu2 %vm3936_vm0, %v8130_v50  ;;  %13324 = vst [vmem:[#allocation72_spill] sm:$0xff] %v11828_v2  ;;  %v8131_v57 = vld [vmem:[%s13036_s5 + $0x5f8] sm:$0xff]  ;;  %v8160_v50 = vld [vmem:[%s13036_s5 + $0x668] sm:$0xff] }
 0x9d1   : > { %8174 = vmatmul.msk.f32.gmra.mxu3 %vm3936_vm0, %v8159_v17  ;;  %8203 = vmatmul.msk.f32.gmra.mxu0 %vm3936_vm0, %v8188_v6  ;;  %v8189_v17 = vld [vmem:[%s13036_s5 + $0x6d8] sm:$0xff]  ;;  %v11842_v6 = vpop.f32.mrf.mxu1  ;;  %v11848_v59 = vpop.f32.mrf.mxu3 }
 0x9d2   : > { %13325 = vst [vmem:[#allocation73_spill] sm:$0xff] %v11842_v6  ;;  %v11850_v2 = vpop.f32.mrf.mxu2  ;;  %v8132_v6 = vld [vmem:[%s13036_s5 + $0x600] sm:$0xff] }
 0x9d3   : > { %13326 = vst [vmem:[#allocation74_spill] sm:$0xff] %v11848_v59  ;;  %v8133_v59 = vld [vmem:[%s13036_s5 + $0x608] sm:$0xff] }
 0x9d4   : > { %13327 = vst [vmem:[#allocation75_spill] sm:$0xff] %v11850_v2 }
 0x9d7   : > { %v11858_v35 = vpop.f32.mrf.mxu0 }
 0x9d8   : > { %8116 = vmatmul.msk.f32.gmra.mxu1 %vm3936_vm0, %v8101_v47  ;;  %8146 = vmatmul.msk.f32.gmra.mxu2 %vm3936_vm0, %v8131_v57  ;;  %13328 = vst [vmem:[#allocation76_spill] sm:$0xff] %v11858_v35  ;;  %v8161_v47 = vld [vmem:[%s13036_s5 + $0x670] sm:$0xff]  ;;  %v8190_v57 = vld [vmem:[%s13036_s5 + $0x6e0] sm:$0xff] }
 0x9d9   : > { %8175 = vmatmul.msk.f32.gmra.mxu3 %vm3936_vm0, %v8160_v50  ;;  %8204 = vmatmul.msk.f32.gmra.mxu0 %vm3936_vm0, %v8189_v17  ;;  %v11868_v50 = vpop.f32.mrf.mxu1  ;;  %v11872_v2 = vpop.f32.mrf.mxu3  ;;  %v8103_v35 = vld [vmem:[%s13036_s5 + $0x590] sm:$0xff] }
 0x9da   : > { %13329 = vst [vmem:[#allocation77_spill] sm:$0xff] %v11868_v50 }
 0x9db   : > { %13330 = vst [vmem:[#allocation78_spill] sm:$0xff] %v11872_v2 }
 0x9df   : > { %v11888_v50 = vpop.f32.mrf.mxu0 }
 0x9e0   : > { %8117 = vmatmul.msk.f32.gmra.mxu1 %vm3936_vm0, %v8102_v37  ;;  %8147 = vmatmul.msk.f32.gmra.mxu2 %vm3936_vm0, %v8132_v6  ;;  %v8162_v6 = vld [vmem:[%s13036_s5 + $0x678] sm:$0xff]  ;;  %13332 = vst [vmem:[#allocation80_spill] sm:$0xff] %v11888_v50 }
 0x9e1   : > { %8176 = vmatmul.msk.f32.gmra.mxu3 %vm3936_vm0, %v8161_v47  ;;  %8205 = vmatmul.msk.f32.gmra.mxu0 %vm3936_vm0, %v8190_v57  ;;  %v8191_v47 = vld [vmem:[%s13036_s5 + $0x6e8] sm:$0xff]  ;;  %v11886_v57 = vpop.f32.mrf.mxu2  ;;  %v11894_v55 = vpop.f32.mrf.mxu1 }
 0x9e2   : > { %13331 = vst [vmem:[#allocation79_spill] sm:$0xff] %v11886_v57 }
 0x9e3   : > { %13333 = vst [vmem:[#allocation81_spill] sm:$0xff] %v11894_v55 }
 0x9e4   : > { %v8621_v17 = vpop.permute.xlu2 %8620 }
 0x9e5   : > { %v8622_v37 = vunpack.i.l.bf16 %v8621_v17  ;;  %v8623_v2 = vunpack.i.h.bf16 %v8621_v17  ;;  %v11910_v17 = vpop.f32.mrf.mxu3 }
 0x9e6   : > { %13334 = vst [vmem:[#allocation82_spill] sm:$0xff] %v11910_v17  ;;  %v8210_v17 = vld [vmem:[%s13036_s5 + $0x708] sm:$0xff] }
 0x9e7   : > { %6296 = vmatpush.msrb.mxu2 %v8622_v37  ;;  %v8104_v37 = vld [vmem:[%s13036_s5 + $0x598] sm:$0xff] }
 0x9e8   : > { %8118 = vmatmul.msk.f32.gmra.mxu1 %vm3936_vm0, %v8103_v35  ;;  %8148 = vmatmul.msk.f32.gmra.mxu2 %vm3936_vm0, %v8133_v59  ;;  %v8134_v35 = vld [vmem:[%s13036_s5 + $0x610] sm:$0xff]  ;;  %v8163_v59 = vld [vmem:[%s13036_s5 + $0x680] sm:$0xff] }
 0x9e9   : > { %8177 = vmatmul.msk.f32.gmra.mxu3 %vm3936_vm0, %v8162_v6  ;;  %8206 = vmatmul.msk.f32.gmra.mxu0 %vm3936_vm0, %v8191_v47  ;;  %v11914_v6 = vpop.f32.mrf.mxu2  ;;  %v11920_v55 = vpop.f32.mrf.mxu1 }
 0x9ea   : > { %6297 = vmatpush.msrb.mxu2 %v8623_v2  ;;  %v8192_v2 = vld [vmem:[%s13036_s5 + $0x6f0] sm:$0xff]  ;;  %13335 = vst [vmem:[#allocation83_spill] sm:$0xff] %v11914_v6 }
 0x9eb   : > { %13337 = vst [vmem:[#allocation85_spill] sm:$0xff] %v11920_v55 }
 0x9ec   : > { %6868 = vmatpush.msra.mxu2 %v11623_v29 }
 0x9ed   : > { %v8636_v57 = vpop.permute.xlu2 %8635  ;;  %v11939_v55 = vpop.f32.mrf.mxu3 }
 0x9ee   : > { %6869 = vmatpush.msra.mxu2 %v11613_v7  ;;  %v8637_v29 = vunpack.i.l.bf16 %v8636_v57  ;;  %v11918_v7 = vpop.f32.mrf.mxu0  ;;  %v8638_v47 = vunpack.i.h.bf16 %v8636_v57  ;;  %v8164_v57 = vld [vmem:[%s13036_s5 + $0x688] sm:$0xff] }
 0x9ef   : > { %13336 = vst [vmem:[#allocation84_spill] sm:$0xff] %v11918_v7 }
 0x9f0   : > { %8119 = vmatmul.msk.f32.gmra.mxu1 %vm3936_vm0, %v8104_v37  ;;  %8149 = vmatmul.msk.f32.gmra.mxu2 %vm3936_vm0, %v8134_v35  ;;  %v8240_v37 = vld [vmem:[%s13036_s5 + $0x780] sm:$0xff] }
 0x9f1   : > { %8178 = vmatmul.msk.f32.gmra.mxu3 %vm3936_vm0, %v8163_v59  ;;  %8207 = vmatmul.msk.f32.gmra.mxu0 %vm3936_vm0, %v8192_v2  ;;  %v4908_v59 = vadd.f32 %v11387_v49, %v11147_v27  ;;  %v8193_v2 = vld [vmem:[%s13036_s5 + $0x6f8] sm:$0xff]  ;;  %v11944_v6 = vpop.f32.mrf.mxu2 }
 0x9f2   : > { %6584 = vmatpush.msra.mxu0 %v8637_v29  ;;  %13338 = vst [vmem:[#allocation86_spill] sm:$0xff] %v11944_v6 }
 0x9f3   : > { %v5052_v29 = vadd.f32 %v11544_v39, %v4908_v59  ;;  %v8211_v59 = vld [vmem:[%s13036_s5 + $0x710] sm:$0xff] }
 0x9f4   : > { %6585 = vmatpush.msra.mxu0 %v8638_v47 }
 0x9f5   : > { %v8651_v35 = vpop.permute.xlu2 %8650  ;;  %v5196_v27 = vadd.f32 %v11551_v20, %v5052_v29  ;;  %v8194_v29 = vld [vmem:[%s13036_s5 + $0x700] sm:$0xff] }
 0x9f6   : > { %v8652_v47 = vunpack.i.l.bf16 %v8651_v35  ;;  %v8653_v49 = vunpack.i.h.bf16 %v8651_v35  ;;  %v11946_v50 = vpop.f32.mrf.mxu0  ;;  %v4909_v35 = vadd.f32 %v11402_v45, %v11173_v40 }
 0x9f7   : > { %13339 = vst [vmem:[#allocation87_spill] sm:$0xff] %v11946_v50 }
 0x9f8   : > { %8225 = vmatmul.msk.f32.vlgmr.msra.gmra.mxu1 %vm3936_vm0, %v8210_v17  ;;  %8255 = vmatmul.msk.f32.vlgmr.msrb.gmra.mxu2 %vm3936_vm0, %v8240_v37  ;;  %v5053_v6 = vadd.f32 %v11557_v54, %v4909_v35 }
 0x9f9   : > { %8179 = vmatmul.msk.f32.gmra.mxu3 %vm3936_vm0, %v8164_v57  ;;  %8208 = vmatmul.msk.f32.gmra.mxu0 %vm3936_vm0, %v8193_v2  ;;  %v8241_v57 = vld [vmem:[%s13036_s5 + $0x788] sm:$0xff]  ;;  %v5340_v2 = vadd.f32 %v11561_v0, %v5196_v27  ;;  %v11970_v27 = vpop.f32.mrf.mxu3 }
 0x9fa   : > { %7446 = vmatpush.msrb.mxu2 %v8652_v47  ;;  %v5197_v40 = vadd.f32 %v11566_v36, %v5053_v6  ;;  %v4910_v6 = vadd.f32 %v11411_v1, %v11199_v41 }
 0x9fb   : > { %v8641_v7 = vpop.permute.xlu0 %8640  ;;  %v5480_v50 = vadd.f32 %v11603_v22, %v5340_v2 }
 0x9fc   : > { %7447 = vmatpush.msrb.mxu2 %v8653_v49  ;;  %v8631_v39 = vpop.permute.xlu1 %8630  ;;  %v8642_v17 = vunpack.i.l.bf16 %v8641_v7  ;;  %v8270_v49 = vld [vmem:[%s13036_s5 + $0x7f8] sm:$0xff]  ;;  %v8643_v0 = vunpack.i.h.bf16 %v8641_v7 }
 0x9fd   : > { %v5581_v37 = vpop.f32.mrf.mxu1  ;;  %v8632_v20 = vunpack.i.l.bf16 %v8631_v39  ;;  %v8633_v47 = vunpack.i.h.bf16 %v8631_v39  ;;  %v8212_v7 = vld [vmem:[%s13036_s5 + $0x718] sm:$0xff] }
 0x9fe   : > { %6728 = vmatpush.msrb.mxu1 %v8642_v17  ;;  %v5626_v45 = vadd.f32 %v5581_v37, %v5480_v50  ;;  %v5341_v37 = vadd.f32 %v11581_v12, %v5197_v40 }
 0x9ff   : > { %6440 = vmatpush.msra.mxu3 %v8632_v20 }
 0xa00   : > { %8226 = vmatmul.msk.f32.gmra.mxu1 %vm3936_vm0, %v8211_v59  ;;  %8256 = vmatmul.msk.f32.gmra.mxu2 %vm3936_vm0, %v8241_v57  ;;  %v8242_v59 = vld [vmem:[%s13036_s5 + $0x790] sm:$0xff]  ;;  %v11981_v57 = vpop.f32.mrf.mxu0  ;;  %v5481_v41 = vadd.f32 %v11633_v63, %v5341_v37 }
 0xa01   : > { %8209 = vmatmul.msk.f32.gmra.mxu0 %vm3936_vm0, %v8194_v29  ;;  %6441 = vmatpush.msra.mxu3 %v8633_v47  ;;  %v8271_v29 = vld [vmem:[%s13036_s5 + $0x800] sm:$0xff]  ;;  %v8300_v47 = vld [vmem:[%s13036_s5 + $0x870] sm:$0xff] }
 0xa02   : > { %6729 = vmatpush.msrb.mxu1 %v8643_v0  ;;  %8285 = vmatmul.msk.f32.vlgmr.msra.gmra.mxu3 %vm3936_vm0, %v8270_v49  ;;  %v5054_v49 = vadd.f32 %v11569_v9, %v4910_v6 }
 0xa03   : > { %v5725_v39 = vpop.f32.mrf.mxu2 }
 0xa04   : > { %v5770_v54 = vadd.f32 %v5725_v39, %v5626_v45  ;;  %v8646_v17 = vpop.permute.xlu1 %8645  ;;  %v8656_v22 = vpop.permute.xlu0 %8655  ;;  %v5198_v1 = vadd.f32 %v11584_v31, %v5054_v49  ;;  %v8243_v31 = vld [vmem:[%s13036_s5 + $0x798] sm:$0xff]  ;;  %v4912_v49 = vadd.f32 %v11443_v60, %v11244_v25 }
 0xa05   : > { %v5584_v20 = vpop.f32.mrf.mxu1  ;;  %v8647_v36 = vunpack.i.l.bf16 %v8646_v17  ;;  %v8657_v50 = vunpack.i.l.bf16 %v8656_v22  ;;  %v8648_v35 = vunpack.i.h.bf16 %v8646_v17  ;;  %v8658_v2 = vunpack.i.h.bf16 %v8656_v22  ;;  %v8213_v17 = vld [vmem:[%s13036_s5 + $0x720] sm:$0xff] }
 0xa06   : > { %v5627_v12 = vadd.f32 %v5584_v20, %v5481_v41  ;;  %v4911_v20 = vadd.f32 %v11431_v42, %v11223_v28 }
 0xa07   : > { %7014 = vmatpush.msrb.mxu3 %v8647_v36  ;;  %7158 = vmatpush.msrb.mxu0 %v8657_v50  ;;  %v8301_v50 = vld [vmem:[%s13036_s5 + $0x878] sm:$0xff] }
 0xa08   : > { %8227 = vmatmul.msk.f32.gmra.mxu1 %vm3936_vm0, %v8212_v7  ;;  %8257 = vmatmul.msk.f32.gmra.mxu2 %vm3936_vm0, %v8242_v59  ;;  %v5342_v7 = vadd.f32 %v11611_v51, %v5198_v1  ;;  %v5055_v6 = vadd.f32 %v11601_v24, %v4911_v20 }
 0xa09   : > { %7015 = vmatpush.msrb.mxu3 %v8648_v35  ;;  %7159 = vmatpush.msrb.mxu0 %v8658_v2  ;;  %v3910_v35 = vld [vmem:[%s13037_s6 + $0x30] sm:$0xff] }
 0xa0a   : > { %8286 = vmatmul.msk.f32.gmra.mxu3 %vm3936_vm0, %v8271_v29  ;;  %8315 = vmatmul.msk.f32.vlgmr.msra.gmra.mxu0 %vm3936_vm0, %v8300_v47  ;;  %v5482_v37 = vadd.f32 %v11660_v18, %v5342_v7  ;;  %v5199_v28 = vadd.f32 %v11615_v8, %v5055_v6  ;;  %v8214_v47 = vld [vmem:[%s13036_s5 + $0x728] sm:$0xff]  ;;  %v8244_v8 = vld [vmem:[%s13036_s5 + $0x7a0] sm:$0xff] }
 0xa0b   : > { %v5728_v0 = vpop.f32.mrf.mxu2  ;;  %v8303_v6 = vld [vmem:[%s13036_s5 + $0x888] sm:$0xff] }
 0xa0c   : > { %v5771_v40 = vadd.f32 %v5728_v0, %v5627_v12  ;;  %v5869_v45 = vpop.f32.mrf.mxu3  ;;  %v8661_v39 = vpop.permute.xlu1 %8660  ;;  %v5343_v41 = vadd.f32 %v11644_v13, %v5199_v28  ;;  %v4050_v12 = vadd.f32 %v10870_v52, %v3910_v35  ;;  %v8273_v0 = vld [vmem:[%s13036_s5 + $0x810] sm:$0xff] }
 0xa0d   : > { %v11996_v9 = vadd.f32 %v5869_v45, %v5770_v54  ;;  %v5587_v63 = vpop.f32.mrf.mxu1  ;;  %v8662_v22 = vunpack.i.l.bf16 %v8661_v39  ;;  %v8663_v36 = vunpack.i.h.bf16 %v8661_v39  ;;  %v8272_v54 = vld [vmem:[%s13036_s5 + $0x808] sm:$0xff]  ;;  %v5056_v45 = vadd.f32 %v11637_v14, %v4912_v49  ;;  %v3911_v14 = vld [vmem:[%s13037_s6 + $0x38] sm:$0xff]  ;;  %v8304_v49 = vld [vmem:[%s13036_s5 + $0x890] sm:$0xff] }
 0xa0e   : > { %v12007_v59 = vpop.f32.mrf.mxu0  ;;  %v5628_v42 = vadd.f32 %v5587_v63, %v5482_v37  ;;  %v5483_v39 = vadd.f32 %v11684_v53, %v5343_v41  ;;  %v4196_v52 = vadd.f32 %v10926_v30, %v4050_v12  ;;  %v4913_v30 = vadd.f32 %v11455_v4, %v11264_v33 }
 0xa0f   : > { %7302 = vmatpush.msra.mxu1 %v8662_v22  ;;  %v5200_v25 = vadd.f32 %v11658_v5, %v5056_v45  ;;  %v8215_v5 = vld [vmem:[%s13036_s5 + $0x730] sm:$0xff]  ;;  %v8245_v22 = vld [vmem:[%s13036_s5 + $0x7a8] sm:$0xff] }
 0xa10   : > { %8228 = vmatmul.msk.f32.gmra.mxu1 %vm3936_vm0, %v8213_v17  ;;  %8258 = vmatmul.msk.f32.gmra.mxu2 %vm3936_vm0, %v8243_v31  ;;  %v5057_v37 = vadd.f32 %v11667_v44, %v4913_v30  ;;  %v3912_v44 = vld [vmem:[%s13037_s6 + $0x40] sm:$0xff] }
 0xa11   : > { %7303 = vmatpush.msra.mxu1 %v8663_v36  ;;  %v5344_v20 = vadd.f32 %v11682_v58, %v5200_v25  ;;  %v4051_v36 = vadd.f32 %v10896_v19, %v3911_v14 }
 0xa12   : > { %8287 = vmatmul.msk.f32.gmra.mxu3 %vm3936_vm0, %v8272_v54  ;;  %8316 = vmatmul.msk.f32.gmra.mxu0 %vm3936_vm0, %v8301_v50  ;;  %v4340_v54 = vadd.f32 %v11166_v16, %v4196_v52  ;;  %v8274_v50 = vld [vmem:[%s13036_s5 + $0x818] sm:$0xff]  ;;  %v5201_v19 = vadd.f32 %v11688_v56, %v5057_v37 }
 0xa13   : > { %v5731_v51 = vpop.f32.mrf.mxu2  ;;  %v5484_v33 = vadd.f32 %v11706_v26, %v5344_v20  ;;  %v4197_v16 = vadd.f32 %v10948_v61, %v4051_v36  ;;  %v8216_v56 = vld [vmem:[%s13036_s5 + $0x738] sm:$0xff]  ;;  %v8246_v61 = vld [vmem:[%s13036_s5 + $0x7b0] sm:$0xff]  ;;  %v13344_v20 = vld [vmem:[#allocation9_spill] sm:$0xff] }
 0xa14   : > { %v5772_v24 = vadd.f32 %v5731_v51, %v5628_v42  ;;  %v5872_v2 = vpop.f32.mrf.mxu3  ;;  %v4484_v58 = vadd.f32 %v11423_v34, %v4340_v54  ;;  %v5345_v34 = vadd.f32 %v11710_v46, %v5201_v19 }
 0xa15   : > { %v12025_v18 = vadd.f32 %v5872_v2, %v5771_v40  ;;  %v5590_v29 = vpop.f32.mrf.mxu1  ;;  %v8302_v40 = vld [vmem:[%s13036_s5 + $0x880] sm:$0xff]  ;;  %v4052_v2 = vadd.f32 %v10919_v38, %v3912_v44 }
 0xa16   : > { %v12036_v1 = vpop.f32.mrf.mxu0  ;;  %v5629_v13 = vadd.f32 %v5590_v29, %v5483_v39  ;;  %v4341_v29 = vadd.f32 %v11195_v15, %v4197_v16  ;;  %v5485_v41 = vadd.f32 %v11730_v62, %v5345_v34  ;;  %v3913_v62 = vld [vmem:[%s13037_s6 + $0x48] sm:$0xff]  ;;  %v13347_v44 = vld [vmem:[#allocation28_spill] sm:$0xff] }
 0xa17   : > { %v4198_v38 = vadd.f32 %v10968_v3, %v4052_v2  ;;  %v8217_v3 = vld [vmem:[%s13036_s5 + $0x740] sm:$0xff]  ;;  %v13350_v2 = vld [vmem:[#allocation43_spill] sm:$0xff] }
 0xa18   : > { %8229 = vmatmul.msk.f32.gmra.mxu1 %vm3936_vm0, %v8214_v47  ;;  %8259 = vmatmul.msk.f32.gmra.mxu2 %vm3936_vm0, %v8244_v8  ;;  %v4628_v47 = vadd.f32 %v11434_v43, %v4484_v58  ;;  %v8275_v8 = vld [vmem:[%s13036_s5 + $0x820] sm:$0xff]  ;;  %v4485_v15 = vadd.f32 %v11440_v48, %v4341_v29  ;;  %v8247_v48 = vld [vmem:[%s13036_s5 + $0x7b8] sm:$0xff]  ;;  %v8218_v58 = vld [vmem:[%s13036_s5 + $0x748] sm:$0xff] }
 0xa19   : > { %v4342_v52 = vadd.f32 %v11225_v21, %v4198_v38  ;;  %v13342_v21 = vld [vmem:[#allocation16_spill] sm:$0xff] }
 0xa1a   : > { %8288 = vmatmul.msk.f32.gmra.mxu3 %vm3936_vm0, %v8273_v0  ;;  %8317 = vmatmul.msk.f32.gmra.mxu0 %vm3936_vm0, %v8302_v40  ;;  %v4768_v43 = vadd.f32 %v11445_v10, %v4628_v47  ;;  %v13351_v47 = vld [vmem:[#allocation18_spill] sm:$0xff] }
 0xa1b   : > { %v5734_v60 = vpop.f32.mrf.mxu2 }
 0xa1c   : > { %v5773_v63 = vadd.f32 %v5734_v60, %v5629_v13  ;;  %v5875_v53 = vpop.f32.mrf.mxu3  ;;  %v4914_v45 = vadd.f32 %v11467_v32, %v4768_v43  ;;  %v4053_v13 = vadd.f32 %v10946_v23, %v3913_v62  ;;  %v4629_v60 = vadd.f32 %v11447_v11, %v4485_v15  ;;  %v13340_v32 = vld [vmem:[#allocation35_spill] sm:$0xff]  ;;  %v13353_v43 = vld [vmem:[#allocation58_spill] sm:$0xff] }
 0xa1d   : > { %v12056_v17 = vadd.f32 %v5875_v53, %v5772_v24  ;;  %v5593_v31 = vpop.f32.mrf.mxu1  ;;  %v8305_v53 = vld [vmem:[%s13036_s5 + $0x898] sm:$0xff] }
 0xa1e   : > { %v12067_v7 = vpop.f32.mrf.mxu0  ;;  %v5630_v4 = vadd.f32 %v5593_v31, %v5484_v33  ;;  %v5058_v14 = vadd.f32 %v13340_v32, %v4914_v45  ;;  %v13341_v31 = vld [vmem:[#allocation29_spill] sm:$0xff]  ;;  %v4199_v11 = vadd.f32 %v13342_v21, %v4053_v13  ;;  %v4769_v36 = vadd.f32 %v13344_v20, %v4629_v60  ;;  %v13346_v33 = vld [vmem:[#allocation38_spill] sm:$0xff]  ;;  %v3915_v62 = vld [vmem:[%s13037_s6 + $0x58] sm:$0xff] }
 0xa1f   : > { %v13355_v45 = vld [vmem:[#allocation65_spill] sm:$0xff]  ;;  %v13358_v21 = vld [vmem:[#allocation19_spill] sm:$0xff]  ;;  %v13360_v20 = vld [vmem:[#allocation14_spill] sm:$0xff] }
 0xa20   : > { %8230 = vmatmul.msk.f32.gmra.mxu1 %vm3936_vm0, %v8215_v5  ;;  %8260 = vmatmul.msk.f32.gmra.mxu2 %vm3936_vm0, %v8245_v22  ;;  %v5202_v23 = vadd.f32 %v13341_v31, %v5058_v14  ;;  %v3914_v5 = vld [vmem:[%s13037_s6 + $0x50] sm:$0xff]  ;;  %v13356_v60 = vld [vmem:[#allocation41_spill] sm:$0xff] }
 0xa21   : > { %v13343_v22 = vld [vmem:[#allocation62_spill] sm:$0xff] }
 0xa22   : > { %8289 = vmatmul.msk.f32.gmra.mxu3 %vm3936_vm0, %v8274_v50  ;;  %8318 = vmatmul.msk.f32.gmra.mxu0 %vm3936_vm0, %v8303_v6  ;;  %v4486_v30 = vadd.f32 %v13343_v22, %v4342_v52  ;;  %v13345_v6 = vld [vmem:[#allocation10_spill] sm:$0xff]  ;;  %v5346_v19 = vadd.f32 %v13346_v33, %v5202_v23  ;;  %v8249_v23 = vld [vmem:[%s13036_s5 + $0x7c8] sm:$0xff]  ;;  %v8278_v33 = vld [vmem:[%s13036_s5 + $0x838] sm:$0xff] }
 0xa23   : > { %v5737_v28 = vpop.f32.mrf.mxu2  ;;  %v4915_v37 = vadd.f32 %v13345_v6, %v4769_v36  ;;  %v8219_v31 = vld [vmem:[%s13036_s5 + $0x750] sm:$0xff]  ;;  %v13362_v6 = vld [vmem:[#allocation33_spill] sm:$0xff] }
 0xa24   : > { %v5774_v26 = vadd.f32 %v5737_v28, %v5630_v4  ;;  %v5878_v42 = vpop.f32.mrf.mxu3  ;;  %v8248_v28 = vld [vmem:[%s13036_s5 + $0x7c0] sm:$0xff]  ;;  %v13359_v22 = vld [vmem:[#allocation46_spill] sm:$0xff] }
 0xa25   : > { %v12089_v51 = vadd.f32 %v5878_v42, %v5773_v63  ;;  %v5596_v35 = vpop.f32.mrf.mxu1  ;;  %v8276_v63 = vld [vmem:[%s13036_s5 + $0x828] sm:$0xff]  ;;  %v5059_v29 = vadd.f32 %v13350_v2, %v4915_v37  ;;  %v13366_v2 = vld [vmem:[#allocation39_spill] sm:$0xff] }
 0xa26   : > { %v12098_v24 = vpop.f32.mrf.mxu0  ;;  %v5631_v46 = vadd.f32 %v5596_v35, %v5485_v41  ;;  %v13348_v35 = vld [vmem:[#allocation67_spill] sm:$0xff]  ;;  %v8306_v41 = vld [vmem:[%s13036_s5 + $0x8a0] sm:$0xff] }
 0xa28   : > { %8231 = vmatmul.msk.f32.gmra.mxu1 %vm3936_vm0, %v8216_v56  ;;  %8261 = vmatmul.msk.f32.gmra.mxu2 %vm3936_vm0, %v8246_v61  ;;  %v4343_v56 = vadd.f32 %v13348_v35, %v4199_v11  ;;  %v13349_v61 = vld [vmem:[#allocation63_spill] sm:$0xff]  ;;  %v4055_v11 = vadd.f32 %v13358_v21, %v3915_v62  ;;  %v8250_v62 = vld [vmem:[%s13036_s5 + $0x7d0] sm:$0xff]  ;;  %v13374_v21 = vld [vmem:[#allocation13_spill] sm:$0xff] }
 0xa29   : > { %v4630_v34 = vadd.f32 %v13349_v61, %v4486_v30  ;;  %v13365_v61 = vld [vmem:[#allocation8_spill] sm:$0xff] }
 0xa2a   : > { %8290 = vmatmul.msk.f32.gmra.mxu3 %vm3936_vm0, %v8275_v8  ;;  %8319 = vmatmul.msk.f32.gmra.mxu0 %vm3936_vm0, %v8304_v49  ;;  %v5486_v8 = vadd.f32 %v13351_v47, %v5346_v19  ;;  %v8277_v49 = vld [vmem:[%s13036_s5 + $0x830] sm:$0xff]  ;;  %v8307_v19 = vld [vmem:[%s13036_s5 + $0x8a8] sm:$0xff] }
 0xa2b   : > { %v5740_v12 = vpop.f32.mrf.mxu2 }
 0xa2c   : > { %v5775_v0 = vadd.f32 %v5740_v12, %v5631_v46  ;;  %v5881_v40 = vpop.f32.mrf.mxu3  ;;  %v13352_v46 = vld [vmem:[#allocation32_spill] sm:$0xff] }
 0xa2d   : > { %v12121_v39 = vadd.f32 %v5881_v40, %v5774_v26  ;;  %v5599_v25 = vpop.f32.mrf.mxu1  ;;  %v4054_v26 = vadd.f32 %v13347_v44, %v3914_v5  ;;  %v5203_v38 = vadd.f32 %v13352_v46, %v5059_v29 }
 0xa2e   : > { %v12129_v10 = vpop.f32.mrf.mxu0  ;;  %v5632_v15 = vadd.f32 %v5599_v25, %v5486_v8  ;;  %v13357_v25 = vld [vmem:[#allocation15_spill] sm:$0xff] }
 0xa2f   : > { %v4200_v12 = vadd.f32 %v13353_v43, %v4054_v26  ;;  %v5347_v14 = vadd.f32 %v13357_v25, %v5203_v38  ;;  %v13364_v26 = vld [vmem:[#allocation21_spill] sm:$0xff]  ;;  %v13373_v25 = vld [vmem:[#allocation23_spill] sm:$0xff] }
 0xa30   : > { %8232 = vmatmul.msk.f32.gmra.mxu1 %vm3936_vm0, %v8217_v3  ;;  %8262 = vmatmul.msk.f32.gmra.mxu2 %vm3936_vm0, %v8247_v48  ;;  %v4770_v3 = vadd.f32 %v13355_v45, %v4630_v34  ;;  %v4201_v35 = vadd.f32 %v13364_v26, %v4055_v11 }
 0xa31   : > { %v4344_v30 = vadd.f32 %v13359_v22, %v4200_v12  ;;  %v5487_v37 = vadd.f32 %v13362_v6, %v5347_v14  ;;  %v8220_v12 = vld [vmem:[%s13036_s5 + $0x758] sm:$0xff]  ;;  %v13377_v6 = vld [vmem:[#allocation52_spill] sm:$0xff] }
 0xa32   : > { %8291 = vmatmul.msk.f32.gmra.mxu3 %vm3936_vm0, %v8276_v63  ;;  %8320 = vmatmul.msk.f32.gmra.mxu0 %vm3936_vm0, %v8305_v53  ;;  %v4916_v32 = vadd.f32 %v13356_v60, %v4770_v3  ;;  %v13370_v3 = vld [vmem:[#allocation59_spill] sm:$0xff]  ;;  %v13372_v60 = vld [vmem:[#allocation30_spill] sm:$0xff] }
 0xa33   : > { %v5743_v54 = vpop.f32.mrf.mxu2  ;;  %v4488_v34 = vadd.f32 %v13365_v61, %v4344_v30  ;;  %v13375_v30 = vld [vmem:[#allocation25_spill] sm:$0xff]  ;;  %v8221_v61 = vld [vmem:[%s13036_s5 + $0x760] sm:$0xff] }
 0xa34   : > { %v5884_v50 = vpop.f32.mrf.mxu3  ;;  %v5776_v48 = vadd.f32 %v5743_v54, %v5632_v15  ;;  %v13361_v54 = vld [vmem:[#allocation42_spill] sm:$0xff] }
 0xa35   : > { %v12154_v4 = vadd.f32 %v5884_v50, %v5775_v0  ;;  %v5602_v16 = vpop.f32.mrf.mxu1  ;;  %v13354_v0 = vld [vmem:[#allocation51_spill] sm:$0xff]  ;;  %v5060_v50 = vadd.f32 %v13361_v54, %v4916_v32  ;;  %v13376_v54 = vld [vmem:[#allocation17_spill] sm:$0xff] }
 0xa36   : > { %v12163_v42 = vpop.f32.mrf.mxu0  ;;  %v4487_v40 = vadd.f32 %v13354_v0, %v4343_v56  ;;  %v5633_v44 = vadd.f32 %v5602_v16, %v5487_v37  ;;  %v3916_v56 = vld [vmem:[%s13037_s6 + $0x60] sm:$0xff]  ;;  %v13368_v16 = vld [vmem:[#allocation69_spill] sm:$0xff] }
 0xa37   : > { %v13369_v0 = vld [vmem:[#allocation20_spill] sm:$0xff] }
 0xa38   : > { %8233 = vmatmul.msk.f32.gmra.mxu1 %vm3936_vm0, %v8218_v58  ;;  %8263 = vmatmul.msk.f32.gmra.mxu2 %vm3936_vm0, %v8248_v28  ;;  %v4631_v36 = vadd.f32 %v13360_v20, %v4487_v40  ;;  %v13363_v58 = vld [vmem:[#allocation27_spill] sm:$0xff]  ;;  %v4056_v40 = vadd.f32 %v13369_v0, %v3916_v56  ;;  %v8280_v0 = vld [vmem:[%s13036_s5 + $0x848] sm:$0xff] }
 0xa39   : > { %v5204_v28 = vadd.f32 %v13363_v58, %v5060_v50 }
 0xa3a   : > { %8292 = vmatmul.msk.f32.gmra.mxu3 %vm3936_vm0, %v8277_v49  ;;  %8321 = vmatmul.msk.f32.gmra.mxu0 %vm3936_vm0, %v8306_v41  ;;  %v4771_v29 = vadd.f32 %v13366_v2, %v4631_v36  ;;  %v13367_v41 = vld [vmem:[#allocation44_spill] sm:$0xff]  ;;  %v4202_v20 = vadd.f32 %v13375_v30, %v4056_v40  ;;  %v3917_v36 = vld [vmem:[%s13037_s6 + $0x68] sm:$0xff]  ;;  %v8309_v40 = vld [vmem:[%s13036_s5 + $0x8b8] sm:$0xff] }
 0xa3b   : > { %v5746_v13 = vpop.f32.mrf.mxu2  ;;  %v5348_v38 = vadd.f32 %v13368_v16, %v5204_v28  ;;  %v13378_v28 = vld [vmem:[#allocation56_spill] sm:$0xff]  ;;  %v13389_v30 = vld [vmem:[#allocation34_spill] sm:$0xff] }
 0xa3c   : > { %v5887_v52 = vpop.f32.mrf.mxu3  ;;  %v5777_v47 = vadd.f32 %v5746_v13, %v5633_v44  ;;  %v4917_v46 = vadd.f32 %v13367_v41, %v4771_v29  ;;  %v13371_v13 = vld [vmem:[#allocation11_spill] sm:$0xff]  ;;  %v13380_v2 = vld [vmem:[#allocation60_spill] sm:$0xff]  ;;  %v13382_v41 = vld [vmem:[#allocation22_spill] sm:$0xff] }
 0xa3d   : > { %v12188_v63 = vadd.f32 %v5887_v52, %v5776_v48  ;;  %v5605_v53 = vpop.f32.mrf.mxu1  ;;  %v4345_v48 = vadd.f32 %v13370_v3, %v4201_v35  ;;  %v4632_v52 = vadd.f32 %v13371_v13, %v4488_v34  ;;  %v5488_v14 = vadd.f32 %v13373_v25, %v5348_v38  ;;  %v8251_v34 = vld [vmem:[%s13036_s5 + $0x7d8] sm:$0xff]  ;;  %v13383_v16 = vld [vmem:[#allocation24_spill] sm:$0xff]  ;;  %v13387_v25 = vld [vmem:[#allocation53_spill] sm:$0xff] }
 0xa3e   : > { %v12197_v5 = vpop.f32.mrf.mxu0  ;;  %v5061_v32 = vadd.f32 %v13372_v60, %v4917_v46  ;;  %v4057_v29 = vadd.f32 %v13380_v2, %v3917_v36  ;;  %v13385_v3 = vld [vmem:[#allocation71_spill] sm:$0xff]  ;;  %v13395_v2 = vld [vmem:[#allocation76_spill] sm:$0xff] }
 0xa3f   : > { %v5634_v22 = vadd.f32 %v5605_v53, %v5488_v14  ;;  %v4489_v50 = vadd.f32 %v13376_v54, %v4345_v48  ;;  %v4772_v37 = vadd.f32 %v13377_v6, %v4632_v52  ;;  %v13379_v53 = vld [vmem:[#allocation70_spill] sm:$0xff]  ;;  %v13386_v52 = vld [vmem:[#allocation68_spill] sm:$0xff]  ;;  %v8222_v6 = vld [vmem:[%s13036_s5 + $0x768] sm:$0xff] }
 0xa40   : > { %8234 = vmatmul.msk.f32.gmra.mxu1 %vm3936_vm0, %v8219_v31  ;;  %8264 = vmatmul.msk.f32.gmra.mxu2 %vm3936_vm0, %v8249_v23  ;;  %v8279_v31 = vld [vmem:[%s13036_s5 + $0x840] sm:$0xff]  ;;  %v8308_v23 = vld [vmem:[%s13036_s5 + $0x8b0] sm:$0xff]  ;;  %v5205_v11 = vadd.f32 %v13374_v21, %v5061_v32  ;;  %v4203_v60 = vadd.f32 %v13386_v52, %v4057_v29 }
 0xa41   : > { %v4918_v44 = vadd.f32 %v13378_v28, %v4772_v37  ;;  %v4633_v46 = vadd.f32 %v13382_v41, %v4489_v50  ;;  %v3918_v32 = vld [vmem:[%s13037_s6 + $0x70] sm:$0xff]  ;;  %v8252_v37 = vld [vmem:[%s13036_s5 + $0x7e0] sm:$0xff]  ;;  %v13396_v41 = vld [vmem:[#allocation75_spill] sm:$0xff] }
 0xa42   : > { %8293 = vmatmul.msk.f32.gmra.mxu3 %vm3936_vm0, %v8278_v33  ;;  %8322 = vmatmul.msk.f32.gmra.mxu0 %vm3936_vm0, %v8307_v19  ;;  %v5349_v26 = vadd.f32 %v13379_v53, %v5205_v11  ;;  %v13392_v28 = vld [vmem:[#allocation66_spill] sm:$0xff]  ;;  %v13393_v53 = vld [vmem:[#allocation12_spill] sm:$0xff] }
 0xa43   : > { %v5749_v8 = vpop.f32.mrf.mxu2  ;;  %v5062_v38 = vadd.f32 %v13383_v16, %v4918_v44  ;;  %v4347_v44 = vadd.f32 %v13392_v28, %v4203_v60  ;;  %v13400_v60 = vld [vmem:[#allocation36_spill] sm:$0xff]  ;;  %v8311_v28 = vld [vmem:[%s13036_s5 + $0x8c8] sm:$0xff] }
 0xa44   : > { %v5890_v49 = vpop.f32.mrf.mxu3  ;;  %v5778_v33 = vadd.f32 %v5749_v8, %v5634_v22  ;;  %v13381_v8 = vld [vmem:[#allocation64_spill] sm:$0xff] }
 0xa45   : > { %v12222_v15 = vadd.f32 %v5890_v49, %v5777_v47  ;;  %v5608_v43 = vpop.f32.mrf.mxu1  ;;  %v4346_v49 = vadd.f32 %v13381_v8, %v4202_v20  ;;  %v5206_v48 = vadd.f32 %v13385_v3, %v5062_v38  ;;  %v8281_v8 = vld [vmem:[%s13036_s5 + $0x850] sm:$0xff]  ;;  %v13397_v38 = vld [vmem:[#allocation61_spill] sm:$0xff] }
 0xa46   : > { %v12231_v45 = vpop.f32.mrf.mxu0 }
 0xa47   : > { %v4490_v14 = vadd.f32 %v13387_v25, %v4346_v49  ;;  %v8310_v49 = vld [vmem:[%s13036_s5 + $0x8c0] sm:$0xff]  ;;  %v13401_v25 = vld [vmem:[#allocation78_spill] sm:$0xff] }
 0xa48   : > { %8235 = vmatmul.msk.f32.gmra.mxu1 %vm3936_vm0, %v8220_v12  ;;  %8265 = vmatmul.msk.f32.gmra.mxu2 %vm3936_vm0, %v8250_v62  ;;  %v13384_v12 = vld [vmem:[#allocation72_spill] sm:$0xff] }
 0xa49   : > { %v5489_v62 = vadd.f32 %v13384_v12, %v5349_v26  ;;  %v4634_v26 = vadd.f32 %v13393_v53, %v4490_v14 }
 0xa4a   : > { %8294 = vmatmul.msk.f32.gmra.mxu3 %vm3936_vm0, %v8279_v31  ;;  %8323 = vmatmul.msk.f32.gmra.mxu0 %vm3936_vm0, %v8308_v23  ;;  %v13388_v31 = vld [vmem:[#allocation54_spill] sm:$0xff] }
 0xa4b   : > { %v5752_v19 = vpop.f32.mrf.mxu2  ;;  %v5635_v13 = vadd.f32 %v5608_v43, %v5489_v62  ;;  %v4773_v23 = vadd.f32 %v13388_v31, %v4633_v46  ;;  %v13390_v43 = vld [vmem:[#allocation74_spill] sm:$0xff]  ;;  %v13398_v62 = vld [vmem:[#allocation55_spill] sm:$0xff] }
 0xa4c   : > { %v5893_v58 = vpop.f32.mrf.mxu3  ;;  %v5350_v36 = vadd.f32 %v13390_v43, %v5206_v48 }
 0xa4d   : > { %v12256_v35 = vadd.f32 %v5893_v58, %v5778_v33  ;;  %v5611_v56 = vpop.f32.mrf.mxu1  ;;  %v5779_v21 = vadd.f32 %v5752_v19, %v5635_v13  ;;  %v4919_v20 = vadd.f32 %v13389_v30, %v4773_v23  ;;  %v13391_v33 = vld [vmem:[#allocation31_spill] sm:$0xff]  ;;  %v8223_v23 = vld [vmem:[%s13036_s5 + $0x770] sm:$0xff] }
 0xa4e   : > { %v12265_v47 = vpop.f32.mrf.mxu0  ;;  %v4058_v58 = vadd.f32 %v13391_v33, %v3918_v32  ;;  %v5490_v29 = vadd.f32 %v13395_v2, %v5350_v36  ;;  %v13404_v36 = vld [vmem:[#allocation77_spill] sm:$0xff] }
 0xa4f   : > { %v13408_v2 = vld [vmem:[#allocation37_spill] sm:$0xff] }
 0xa50   : > { %8236 = vmatmul.msk.f32.gmra.mxu1 %vm3936_vm0, %v8221_v61  ;;  %8266 = vmatmul.msk.f32.gmra.mxu2 %vm3936_vm0, %v8251_v34  ;;  %v13394_v61 = vld [vmem:[#allocation73_spill] sm:$0xff]  ;;  %v5636_v16 = vadd.f32 %v5611_v56, %v5490_v29  ;;  %v4204_v12 = vadd.f32 %v13397_v38, %v4058_v58  ;;  %v8282_v58 = vld [vmem:[%s13036_s5 + $0x858] sm:$0xff]  ;;  %v13410_v38 = vld [vmem:[#allocation82_spill] sm:$0xff] }
 0xa51   : > { %v5063_v34 = vadd.f32 %v13394_v61, %v4919_v20  ;;  %v13403_v20 = vld [vmem:[#allocation57_spill] sm:$0xff]  ;;  %v13407_v61 = vld [vmem:[#allocation50_spill] sm:$0xff] }
 0xa52   : > { %8295 = vmatmul.msk.f32.gmra.mxu3 %vm3936_vm0, %v8280_v0  ;;  %8324 = vmatmul.msk.f32.gmra.mxu0 %vm3936_vm0, %v8309_v40  ;;  %v4491_v0 = vadd.f32 %v13398_v62, %v4347_v44  ;;  %v13399_v40 = vld [vmem:[#allocation47_spill] sm:$0xff] }
 0xa53   : > { %v5755_v11 = vpop.f32.mrf.mxu2  ;;  %v5207_v46 = vadd.f32 %v13396_v41, %v5063_v34  ;;  %v4774_v3 = vadd.f32 %v13399_v40, %v4634_v26  ;;  %v13406_v44 = vld [vmem:[#allocation79_spill] sm:$0xff]  ;;  %v8254_v40 = vld [vmem:[%s13036_s5 + $0x7f0] sm:$0xff] }
 0xa54   : > { %v5896_v22 = vpop.f32.mrf.mxu3  ;;  %v5780_v48 = vadd.f32 %v5755_v11, %v5636_v16  ;;  %v13402_v11 = vld [vmem:[#allocation48_spill] sm:$0xff]  ;;  %v4635_v43 = vadd.f32 %v13403_v20, %v4491_v0  ;;  %v13415_v20 = vld [vmem:[#allocation49_spill] sm:$0xff] }
 0xa55   : > { %v12290_v54 = vadd.f32 %v5896_v22, %v5779_v21  ;;  %v5614_v50 = vpop.f32.mrf.mxu1  ;;  %v4920_v32 = vadd.f32 %v13400_v60, %v4774_v3  ;;  %v5351_v14 = vadd.f32 %v13401_v25, %v5207_v46  ;;  %v8253_v21 = vld [vmem:[%s13036_s5 + $0x7e8] sm:$0xff]  ;;  %v4348_v30 = vadd.f32 %v13402_v11, %v4204_v12  ;;  %v13409_v46 = vld [vmem:[#allocation26_spill] sm:$0xff] }
 0xa56   : > { %v12299_v19 = vpop.f32.mrf.mxu0  ;;  %v4775_v29 = vadd.f32 %v13408_v2, %v4635_v43 }
 0xa57   : > { %v4492_v34 = vadd.f32 %v13407_v61, %v4348_v30 }
 0xa58   : > { %8237 = vmatmul.msk.f32.gmra.mxu1 %vm3936_vm0, %v8222_v6  ;;  %8267 = vmatmul.msk.f32.gmra.mxu2 %vm3936_vm0, %v8252_v37  ;;  %v5064_v6 = vadd.f32 %v13404_v36, %v4920_v32  ;;  %v13405_v37 = vld [vmem:[#allocation80_spill] sm:$0xff]  ;;  %v4921_v16 = vadd.f32 %v13409_v46, %v4775_v29  ;;  %v13418_v29 = vld [vmem:[#allocation87_spill] sm:$0xff] }
 0xa59   : > { %v5491_v33 = vadd.f32 %v13405_v37, %v5351_v14  ;;  %v13413_v32 = vld [vmem:[#allocation84_spill] sm:$0xff] }
 0xa5a   : > { %8296 = vmatmul.msk.f32.gmra.mxu3 %vm3936_vm0, %v8281_v8  ;;  %8325 = vmatmul.msk.f32.gmra.mxu0 %vm3936_vm0, %v8310_v49  ;;  %v5208_v53 = vadd.f32 %v13406_v44, %v5064_v6  ;;  %v8283_v14 = vld [vmem:[%s13036_s5 + $0x860] sm:$0xff] }
 0xa5b   : > { %v5758_v13 = vpop.f32.mrf.mxu2  ;;  %v5637_v26 = vadd.f32 %v5614_v50, %v5491_v33  ;;  %v8224_v50 = vld [vmem:[%s13036_s5 + $0x778] sm:$0xff]  ;;  %v13416_v33 = vld [vmem:[#allocation40_spill] sm:$0xff] }
 0xa5c   : > { %v5899_v52 = vpop.f32.mrf.mxu3  ;;  %v5352_v12 = vadd.f32 %v13410_v38, %v5208_v53 }
 0xa5d   : > { %v12321_v31 = vadd.f32 %v5899_v52, %v5780_v48  ;;  %v5617_v56 = vpop.f32.mrf.mxu1  ;;  %v5781_v8 = vadd.f32 %v5758_v13, %v5637_v26  ;;  %v13411_v48 = vld [vmem:[#allocation45_spill] sm:$0xff]  ;;  %v8360_v26 = vld [vmem:[%s13036_s5 + $0x960] sm:$0xff] }
 0xa5e   : > { %v12329_v22 = vpop.f32.mrf.mxu0  ;;  %v4636_v13 = vadd.f32 %v13411_v48, %v4492_v34  ;;  %v13412_v52 = vld [vmem:[#allocation81_spill] sm:$0xff]  ;;  %v5492_v25 = vadd.f32 %v13413_v32, %v5352_v12 }
 0xa5f   : > { %v5065_v60 = vadd.f32 %v13412_v52, %v4921_v16  ;;  %v13417_v34 = vld [vmem:[#allocation85_spill] sm:$0xff]  ;;  %v8331_v52 = vld [vmem:[%s13036_s5 + $0x8f0] sm:$0xff] }
 0xa60   : > { %8238 = vmatmul.msk.f32.gmra.mxu1 %vm3936_vm0, %v8223_v23  ;;  %8268 = vmatmul.msk.f32.gmra.mxu2 %vm3936_vm0, %v8253_v21  ;;  %v8312_v23 = vld [vmem:[%s13036_s5 + $0x8d0] sm:$0xff]  ;;  %v13414_v21 = vld [vmem:[#allocation83_spill] sm:$0xff]  ;;  %v5638_v30 = vadd.f32 %v5617_v56, %v5492_v25  ;;  %v4776_v43 = vadd.f32 %v13415_v20, %v4636_v13  ;;  %v8330_v56 = vld [vmem:[%s13036_s5 + $0x8e8] sm:$0xff] }
 0xa61   : > { %v5209_v11 = vadd.f32 %v13414_v21, %v5065_v60  ;;  %v8314_v25 = vld [vmem:[%s13036_s5 + $0x8e0] sm:$0xff] }
 0xa62   : > { %8297 = vmatmul.msk.f32.gmra.mxu3 %vm3936_vm0, %v8282_v58  ;;  %8326 = vmatmul.msk.f32.gmra.mxu0 %vm3936_vm0, %v8311_v28  ;;  %v4922_v58 = vadd.f32 %v13416_v33, %v4776_v43  ;;  %v8420_v33 = vld [vmem:[%s13036_s5 + $0xa50] sm:$0xff] }
 0xa63   : > { %v5761_v49 = vpop.f32.mrf.mxu2  ;;  %v5353_v28 = vadd.f32 %v11939_v55, %v5209_v11  ;;  %v8284_v55 = vld [vmem:[%s13036_s5 + $0x868] sm:$0xff] }
 0xa64   : > { %v5902_v41 = vpop.f32.mrf.mxu3  ;;  %v5782_v36 = vadd.f32 %v5761_v49, %v5638_v30  ;;  %v5066_v2 = vadd.f32 %v13417_v34, %v4922_v58  ;;  %v8313_v49 = vld [vmem:[%s13036_s5 + $0x8d8] sm:$0xff]  ;;  %v6059_v58 = vadd.f32 %v12036_v1, %v12025_v18  ;;  %v8333_v34 = vld [vmem:[%s13036_s5 + $0x900] sm:$0xff] }
 0xa65   : > { %v12350_v62 = vadd.f32 %v5902_v41, %v5781_v8  ;;  %v5620_v0 = vpop.f32.mrf.mxu1  ;;  %v5493_v8 = vadd.f32 %v13418_v29, %v5353_v28  ;;  %v13419_v41 = vld [vmem:[#allocation86_spill] sm:$0xff]  ;;  %v8363_v18 = vld [vmem:[%s13036_s5 + $0x978] sm:$0xff] }
 0xa66   : > { %v12358_v3 = vpop.f32.mrf.mxu0  ;;  %v5210_v46 = vadd.f32 %v13419_v41, %v5066_v2 }
 0xa67   : > { %v5639_v16 = vadd.f32 %v5620_v0, %v5493_v8  ;;  %v8361_v0 = vld [vmem:[%s13036_s5 + $0x968] sm:$0xff] }
 0xa68   : > { %8239 = vmatmul.msk.f32.gmra.mxu1 %vm3936_vm0, %v8224_v50  ;;  %8269 = vmatmul.msk.f32.gmra.mxu2 %vm3936_vm0, %v8254_v40  ;;  %v5354_v40 = vadd.f32 %v11970_v27, %v5210_v46  ;;  %v8390_v27 = vld [vmem:[%s13036_s5 + $0x9d8] sm:$0xff]  ;;  %v8392_v8 = vld [vmem:[%s13036_s5 + $0x9e8] sm:$0xff] }
 0xa6a   : > { %8298 = vmatmul.msk.f32.gmra.mxu3 %vm3936_vm0, %v8283_v14  ;;  %8327 = vmatmul.msk.f32.gmra.mxu0 %vm3936_vm0, %v8312_v23  ;;  %v5494_v32 = vadd.f32 %v11981_v57, %v5354_v40  ;;  %v6058_v14 = vadd.f32 %v12007_v59, %v11996_v9  ;;  %v8332_v9 = vld [vmem:[%s13036_s5 + $0x8f8] sm:$0xff]  ;;  %v8362_v59 = vld [vmem:[%s13036_s5 + $0x970] sm:$0xff] }
 0xa6b   : > { %v5764_v6 = vpop.f32.mrf.mxu2 }
 0xa6c   : > { %v5905_v37 = vpop.f32.mrf.mxu3  ;;  %v5783_v38 = vadd.f32 %v5764_v6, %v5639_v16 }
 0xa6d   : > { %v12377_v44 = vadd.f32 %v5905_v37, %v5782_v36  ;;  %v5623_v53 = vpop.f32.mrf.mxu1  ;;  %v8391_v37 = vld [vmem:[%s13036_s5 + $0x9e0] sm:$0xff] }
 0xa6e   : > { %v12385_v61 = vpop.f32.mrf.mxu0  ;;  %v5640_v23 = vadd.f32 %v5623_v53, %v5494_v32 }
 0xa70   : > { %8345 = vmatmul.msk.f32.vlgmr.msrb.gmra.mxu1 %vm3936_vm0, %v8330_v56  ;;  %8375 = vmatmul.msk.f32.vlgmr.msra.gmra.mxu2 %vm3936_vm0, %v8360_v26 }
 0xa72   : > { %8299 = vmatmul.msk.f32.gmra.mxu3 %vm3936_vm0, %v8284_v55  ;;  %8328 = vmatmul.msk.f32.gmra.mxu0 %vm3936_vm0, %v8313_v49  ;;  %v8421_v55 = vld [vmem:[%s13036_s5 + $0xa58] sm:$0xff]  ;;  %v6060_v49 = vadd.f32 %v12067_v7, %v12056_v17  ;;  %v8364_v17 = vld [vmem:[%s13036_s5 + $0x980] sm:$0xff] }
 0xa73   : > { %v5767_v12 = vpop.f32.mrf.mxu2 }
 0xa74   : > { %v5908_v50 = vpop.f32.mrf.mxu3  ;;  %v5784_v57 = vadd.f32 %v5767_v12, %v5640_v23  ;;  %v8334_v12 = vld [vmem:[%s13036_s5 + $0x908] sm:$0xff]  ;;  %v8335_v23 = vld [vmem:[%s13036_s5 + $0x910] sm:$0xff] }
 0xa75   : > { %v12401_v48 = vadd.f32 %v5908_v50, %v5783_v38  ;;  %v6153_v13 = vpop.f32.mrf.mxu1 }
 0xa76   : > { %v12409_v60 = vpop.f32.mrf.mxu0  ;;  %v6198_v21 = vadd.f32 %v6153_v13, %v6058_v14  ;;  %v8393_v13 = vld [vmem:[%s13036_s5 + $0x9f0] sm:$0xff] }
 0xa78   : > { %8346 = vmatmul.msk.f32.gmra.mxu1 %vm3936_vm0, %v8331_v52  ;;  %8376 = vmatmul.msk.f32.gmra.mxu2 %vm3936_vm0, %v8361_v0  ;;  %v8422_v52 = vld [vmem:[%s13036_s5 + $0xa60] sm:$0xff]  ;;  %v6061_v0 = vadd.f32 %v12098_v24, %v12089_v51  ;;  %v8365_v51 = vld [vmem:[%s13036_s5 + $0x988] sm:$0xff] }
 0xa7a   : > { %8329 = vmatmul.msk.f32.gmra.mxu0 %vm3936_vm0, %v8314_v25  ;;  %8405 = vmatmul.msk.f32.vlgmr.msrb.gmra.mxu3 %vm3936_vm0, %v8390_v27 }
 0xa7b   : > { %v6299_v11 = vpop.f32.mrf.mxu2 }
 0xa7c   : > { %v5911_v30 = vpop.f32.mrf.mxu3  ;;  %v6344_v20 = vadd.f32 %v6299_v11, %v6198_v21  ;;  %v8394_v11 = vld [vmem:[%s13036_s5 + $0x9f8] sm:$0xff] }
 0xa7d   : > { %v12424_v43 = vadd.f32 %v5911_v30, %v5784_v57  ;;  %v6156_v36 = vpop.f32.mrf.mxu1  ;;  %v8423_v30 = vld [vmem:[%s13036_s5 + $0xa68] sm:$0xff] }
 0xa7e   : > { %v12432_v6 = vpop.f32.mrf.mxu0  ;;  %v6199_v28 = vadd.f32 %v6156_v36, %v6059_v58 }
 0xa80   : > { %8347 = vmatmul.msk.f32.gmra.mxu1 %vm3936_vm0, %v8332_v9  ;;  %8377 = vmatmul.msk.f32.gmra.mxu2 %vm3936_vm0, %v8362_v59 }
 0xa82   : > { %8406 = vmatmul.msk.f32.gmra.mxu3 %vm3936_vm0, %v8391_v37  ;;  %8435 = vmatmul.msk.f32.vlgmr.msrb.gmra.mxu0 %vm3936_vm0, %v8420_v33  ;;  %v8336_v33 = vld [vmem:[%s13036_s5 + $0x918] sm:$0xff] }
 0xa83   : > { %v6302_v53 = vpop.f32.mrf.mxu2 }
 0xa84   : > { %v6345_v56 = vadd.f32 %v6302_v53, %v6199_v28  ;;  %v8395_v53 = vld [vmem:[%s13036_s5 + $0xa00] sm:$0xff] }
 0xa85   : > { %v6159_v26 = vpop.f32.mrf.mxu1  ;;  %v6443_v1 = vpop.f32.mrf.mxu3 }
 0xa86   : > { %v12452_v2 = vadd.f32 %v6443_v1, %v6344_v20  ;;  %v6200_v41 = vadd.f32 %v6159_v26, %v6060_v49  ;;  %v6062_v20 = vadd.f32 %v12129_v10, %v12121_v39  ;;  %v8366_v39 = vld [vmem:[%s13036_s5 + $0x990] sm:$0xff]  ;;  %v6063_v26 = vadd.f32 %v12163_v42, %v12154_v4  ;;  %v8367_v4 = vld [vmem:[%s13036_s5 + $0x998] sm:$0xff] }
 0xa87   : > { %v12454_v29 = vpop.f32.mrf.mxu0 }
 0xa88   : > { %8348 = vmatmul.msk.f32.gmra.mxu1 %vm3936_vm0, %v8333_v34  ;;  %8378 = vmatmul.msk.f32.gmra.mxu2 %vm3936_vm0, %v8363_v18 }
 0xa8a   : > { %8407 = vmatmul.msk.f32.gmra.mxu3 %vm3936_vm0, %v8392_v8  ;;  %8436 = vmatmul.msk.f32.gmra.mxu0 %vm3936_vm0, %v8421_v55  ;;  %v8337_v55 = vld [vmem:[%s13036_s5 + $0x920] sm:$0xff] }
 0xa8b   : > { %v6305_v46 = vpop.f32.mrf.mxu2 }
 0xa8c   : > { %v6346_v16 = vadd.f32 %v6305_v46, %v6200_v41  ;;  %v8396_v46 = vld [vmem:[%s13036_s5 + $0xa08] sm:$0xff] }
 0xa8d   : > { %v6162_v38 = vpop.f32.mrf.mxu1  ;;  %v6446_v7 = vpop.f32.mrf.mxu3 }
 0xa8e   : > { %v12474_v50 = vadd.f32 %v6446_v7, %v6345_v56  ;;  %v6201_v32 = vadd.f32 %v6162_v38, %v6061_v0  ;;  %v8424_v56 = vld [vmem:[%s13036_s5 + $0xa70] sm:$0xff]  ;;  %v6064_v38 = vadd.f32 %v12197_v5, %v12188_v63  ;;  %v8368_v63 = vld [vmem:[%s13036_s5 + $0x9a0] sm:$0xff] }
 0xa8f   : > { %v12476_v40 = vpop.f32.mrf.mxu0 }
 0xa90   : > { %8349 = vmatmul.msk.f32.gmra.mxu1 %vm3936_vm0, %v8334_v12  ;;  %8379 = vmatmul.msk.f32.gmra.mxu2 %vm3936_vm0, %v8364_v17 }
 0xa92   : > { %8408 = vmatmul.msk.f32.gmra.mxu3 %vm3936_vm0, %v8393_v13  ;;  %8437 = vmatmul.msk.f32.gmra.mxu0 %vm3936_vm0, %v8422_v52  ;;  %v8338_v52 = vld [vmem:[%s13036_s5 + $0x928] sm:$0xff] }
 0xa93   : > { %v6308_v25 = vpop.f32.mrf.mxu2 }
 0xa94   : > { %v6347_v27 = vadd.f32 %v6308_v25, %v6201_v32  ;;  %v8397_v25 = vld [vmem:[%s13036_s5 + $0xa10] sm:$0xff] }
 0xa95   : > { %v6165_v14 = vpop.f32.mrf.mxu1  ;;  %v6449_v24 = vpop.f32.mrf.mxu3 }
 0xa96   : > { %v12496_v21 = vadd.f32 %v6449_v24, %v6346_v16  ;;  %v6202_v36 = vadd.f32 %v6165_v14, %v6062_v20  ;;  %v8425_v16 = vld [vmem:[%s13036_s5 + $0xa78] sm:$0xff]  ;;  %v6065_v14 = vadd.f32 %v12231_v45, %v12222_v15  ;;  %v8369_v15 = vld [vmem:[%s13036_s5 + $0x9a8] sm:$0xff] }
 0xa97   : > { %v12498_v57 = vpop.f32.mrf.mxu0 }
 0xa98   : > { %8350 = vmatmul.msk.f32.gmra.mxu1 %vm3936_vm0, %v8335_v23  ;;  %8380 = vmatmul.msk.f32.gmra.mxu2 %vm3936_vm0, %v8365_v51 }
 0xa9a   : > { %8409 = vmatmul.msk.f32.gmra.mxu3 %vm3936_vm0, %v8394_v11  ;;  %8438 = vmatmul.msk.f32.gmra.mxu0 %vm3936_vm0, %v8423_v30  ;;  %v8339_v30 = vld [vmem:[%s13036_s5 + $0x930] sm:$0xff] }
 0xa9b   : > { %v6311_v9 = vpop.f32.mrf.mxu2 }
 0xa9c   : > { %v6348_v59 = vadd.f32 %v6311_v9, %v6202_v36  ;;  %v8398_v36 = vld [vmem:[%s13036_s5 + $0xa18] sm:$0xff]  ;;  %v8427_v9 = vld [vmem:[%s13036_s5 + $0xa88] sm:$0xff] }
 0xa9d   : > { %v6168_v37 = vpop.f32.mrf.mxu1  ;;  %v6452_v10 = vpop.f32.mrf.mxu3 }
 0xa9e   : > { %v12518_v58 = vadd.f32 %v6452_v10, %v6347_v27  ;;  %v6203_v34 = vadd.f32 %v6168_v37, %v6063_v26  ;;  %v8426_v27 = vld [vmem:[%s13036_s5 + $0xa80] sm:$0xff] }
 0xa9f   : > { %v12520_v28 = vpop.f32.mrf.mxu0  ;;  %v8399_v26 = vld [vmem:[%s13036_s5 + $0xa20] sm:$0xff] }
 0xaa0   : > { %8351 = vmatmul.msk.f32.gmra.mxu1 %vm3936_vm0, %v8336_v33  ;;  %8381 = vmatmul.msk.f32.gmra.mxu2 %vm3936_vm0, %v8366_v39 }
 0xaa2   : > { %8410 = vmatmul.msk.f32.gmra.mxu3 %vm3936_vm0, %v8395_v53  ;;  %8439 = vmatmul.msk.f32.gmra.mxu0 %vm3936_vm0, %v8424_v56  ;;  %v8340_v53 = vld [vmem:[%s13036_s5 + $0x938] sm:$0xff] }
 0xaa3   : > { %v6314_v18 = vpop.f32.mrf.mxu2 }
 0xaa4   : > { %v6349_v1 = vadd.f32 %v6314_v18, %v6203_v34  ;;  %v8428_v34 = vld [vmem:[%s13036_s5 + $0xa90] sm:$0xff]  ;;  %v6067_v18 = vadd.f32 %v12299_v19, %v12290_v54  ;;  %v8371_v54 = vld [vmem:[%s13036_s5 + $0x9b8] sm:$0xff] }
 0xaa5   : > { %v6171_v8 = vpop.f32.mrf.mxu1  ;;  %v6455_v42 = vpop.f32.mrf.mxu3 }
 0xaa6   : > { %v12540_v49 = vadd.f32 %v6455_v42, %v6348_v59  ;;  %v6204_v12 = vadd.f32 %v6171_v8, %v6064_v38  ;;  %v6066_v59 = vadd.f32 %v12265_v47, %v12256_v35  ;;  %v8370_v35 = vld [vmem:[%s13036_s5 + $0x9b0] sm:$0xff]  ;;  %v8341_v42 = vld [vmem:[%s13036_s5 + $0x940] sm:$0xff]  ;;  %v8400_v38 = vld [vmem:[%s13036_s5 + $0xa28] sm:$0xff] }
 0xaa7   : > { %v12542_v41 = vpop.f32.mrf.mxu0 }
 0xaa8   : > { %8352 = vmatmul.msk.f32.gmra.mxu1 %vm3936_vm0, %v8337_v55  ;;  %8382 = vmatmul.msk.f32.gmra.mxu2 %vm3936_vm0, %v8367_v4 }
 0xaaa   : > { %8411 = vmatmul.msk.f32.gmra.mxu3 %vm3936_vm0, %v8396_v46  ;;  %8440 = vmatmul.msk.f32.gmra.mxu0 %vm3936_vm0, %v8425_v16 }
 0xaab   : > { %v6317_v17 = vpop.f32.mrf.mxu2 }
 0xaac   : > { %v12556_v7 = vadd.f32 %v6317_v17, %v6204_v12  ;;  %v8429_v12 = vld [vmem:[%s13036_s5 + $0xa98] sm:$0xff]  ;;  %v6068_v17 = vadd.f32 %v12329_v22, %v12321_v31  ;;  %v8372_v31 = vld [vmem:[%s13036_s5 + $0x9c0] sm:$0xff] }
 0xaad   : > { %v6174_v13 = vpop.f32.mrf.mxu1  ;;  %v6458_v5 = vpop.f32.mrf.mxu3 }
 0xaae   : > { %v12564_v0 = vadd.f32 %v6458_v5, %v6349_v1  ;;  %v6205_v23 = vadd.f32 %v6174_v13, %v6065_v14 }
 0xaaf   : > { %v12566_v32 = vpop.f32.mrf.mxu0 }
 0xab0   : > { %8353 = vmatmul.msk.f32.gmra.mxu1 %vm3936_vm0, %v8338_v52  ;;  %8383 = vmatmul.msk.f32.gmra.mxu2 %vm3936_vm0, %v8368_v63 }
 0xab2   : > { %8412 = vmatmul.msk.f32.gmra.mxu3 %vm3936_vm0, %v8397_v25  ;;  %8441 = vmatmul.msk.f32.gmra.mxu0 %vm3936_vm0, %v8426_v27  ;;  %v8342_v27 = vld [vmem:[%s13036_s5 + $0x948] sm:$0xff] }
 0xab3   : > { %v6320_v51 = vpop.f32.mrf.mxu2 }
 0xab4   : > { %v12580_v24 = vadd.f32 %v6320_v51, %v6205_v23  ;;  %v8401_v51 = vld [vmem:[%s13036_s5 + $0xa30] sm:$0xff] }
 0xab5   : > { %v6177_v11 = vpop.f32.mrf.mxu1  ;;  %v12588_v45 = vpop.f32.mrf.mxu3 }
 0xab6   : > { %v6206_v37 = vadd.f32 %v6177_v11, %v6066_v59  ;;  %v8430_v11 = vld [vmem:[%s13036_s5 + $0xaa0] sm:$0xff] }
 0xab7   : > { %v12590_v20 = vpop.f32.mrf.mxu0 }
 0xab8   : > { %8354 = vmatmul.msk.f32.gmra.mxu1 %vm3936_vm0, %v8339_v30  ;;  %8384 = vmatmul.msk.f32.gmra.mxu2 %vm3936_vm0, %v8369_v15  ;;  %v6069_v30 = vadd.f32 %v12358_v3, %v12350_v62  ;;  %v8373_v62 = vld [vmem:[%s13036_s5 + $0x9c8] sm:$0xff] }
 0xaba   : > { %8413 = vmatmul.msk.f32.gmra.mxu3 %vm3936_vm0, %v8398_v36  ;;  %8442 = vmatmul.msk.f32.gmra.mxu0 %vm3936_vm0, %v8427_v9 }
 0xabb   : > { %v6323_v33 = vpop.f32.mrf.mxu2 }
 0xabc   : > { %v6352_v39 = vadd.f32 %v6323_v33, %v6206_v37  ;;  %v8343_v33 = vld [vmem:[%s13036_s5 + $0x950] sm:$0xff] }
 0xabd   : > { %v6180_v10 = vpop.f32.mrf.mxu1  ;;  %v12610_v47 = vpop.f32.mrf.mxu3 }
 0xabe   : > { %v6207_v1 = vadd.f32 %v6180_v10, %v6067_v18 }
 0xabf   : > { %v12612_v56 = vpop.f32.mrf.mxu0 }
 0xac0   : > { %8355 = vmatmul.msk.f32.gmra.mxu1 %vm3936_vm0, %v8340_v53  ;;  %8385 = vmatmul.msk.f32.gmra.mxu2 %vm3936_vm0, %v8370_v35  ;;  %v8402_v53 = vld [vmem:[%s13036_s5 + $0xa38] sm:$0xff]  ;;  %v8431_v35 = vld [vmem:[%s13036_s5 + $0xaa8] sm:$0xff] }
 0xac2   : > { %8414 = vmatmul.msk.f32.gmra.mxu3 %vm3936_vm0, %v8399_v26  ;;  %8443 = vmatmul.msk.f32.gmra.mxu0 %vm3936_vm0, %v8428_v34  ;;  %v6070_v26 = vadd.f32 %v12385_v61, %v12377_v44  ;;  %v8374_v44 = vld [vmem:[%s13036_s5 + $0x9d0] sm:$0xff] }
 0xac3   : > { %v6326_v8 = vpop.f32.mrf.mxu2 }
 0xac4   : > { %v6353_v55 = vadd.f32 %v6326_v8, %v6207_v1 }
 0xac5   : > { %v6183_v4 = vpop.f32.mrf.mxu1  ;;  %v6467_v19 = vpop.f32.mrf.mxu3 }
 0xac6   : > { %v6496_v46 = vadd.f32 %v6467_v19, %v6352_v39  ;;  %v6208_v52 = vadd.f32 %v6183_v4, %v6068_v17  ;;  %v8344_v4 = vld [vmem:[%s13036_s5 + $0x958] sm:$0xff]  ;;  %v8403_v19 = vld [vmem:[%s13036_s5 + $0xa40] sm:$0xff] }
 0xac7   : > { %v6611_v16 = vpop.f32.mrf.mxu0 }
 0xac8   : > { %8356 = vmatmul.msk.f32.gmra.mxu1 %vm3936_vm0, %v8341_v42  ;;  %8386 = vmatmul.msk.f32.gmra.mxu2 %vm3936_vm0, %v8371_v54  ;;  %v12642_v13 = vadd.f32 %v6611_v16, %v6496_v46  ;;  %v8432_v46 = vld [vmem:[%s13036_s5 + $0xab0] sm:$0xff]  ;;  %v6071_v16 = vadd.f32 %v12409_v60, %v12401_v48  ;;  %v8480_v48 = vld [vmem:[%s13036_s5 + $0xb40] sm:$0xff] }
 0xaca   : > { %8415 = vmatmul.msk.f32.gmra.mxu3 %vm3936_vm0, %v8400_v38  ;;  %8444 = vmatmul.msk.f32.gmra.mxu0 %vm3936_vm0, %v8429_v12 }
 0xacb   : > { %v6329_v63 = vpop.f32.mrf.mxu2 }
 0xacc   : > { %v6354_v5 = vadd.f32 %v6329_v63, %v6208_v52 }
 0xacd   : > { %v6186_v25 = vpop.f32.mrf.mxu1  ;;  %v6470_v22 = vpop.f32.mrf.mxu3 }
 0xace   : > { %v6497_v14 = vadd.f32 %v6470_v22, %v6353_v55  ;;  %v6209_v36 = vadd.f32 %v6186_v25, %v6069_v30  ;;  %v8433_v22 = vld [vmem:[%s13036_s5 + $0xab8] sm:$0xff] }
 0xacf   : > { %v6614_v23 = vpop.f32.mrf.mxu0 }
 0xad0   : > { %8357 = vmatmul.msk.f32.gmra.mxu1 %vm3936_vm0, %v8342_v27  ;;  %8387 = vmatmul.msk.f32.gmra.mxu2 %vm3936_vm0, %v8372_v31  ;;  %v12662_v15 = vadd.f32 %v6614_v23, %v6497_v14  ;;  %v8404_v31 = vld [vmem:[%s13036_s5 + $0xa48] sm:$0xff]  ;;  %v6072_v14 = vadd.f32 %v12432_v6, %v12424_v43 }
 0xad1   : > { %v8481_v43 = vld [vmem:[%s13036_s5 + $0xb48] sm:$0xff] }
 0xad2   : > { %8416 = vmatmul.msk.f32.gmra.mxu3 %vm3936_vm0, %v8401_v51  ;;  %8445 = vmatmul.msk.f32.gmra.mxu0 %vm3936_vm0, %v8430_v11 }
 0xad3   : > { %v6332_v9 = vpop.f32.mrf.mxu2 }
 0xad4   : > { %v6355_v59 = vadd.f32 %v6332_v9, %v6209_v36  ;;  %v8451_v9 = vld [vmem:[%s13036_s5 + $0xad0] sm:$0xff] }
 0xad5   : > { %v6189_v37 = vpop.f32.mrf.mxu1  ;;  %v6473_v3 = vpop.f32.mrf.mxu3 }
 0xad6   : > { %v6498_v39 = vadd.f32 %v6473_v3, %v6354_v5  ;;  %v6210_v18 = vadd.f32 %v6189_v37, %v6070_v26  ;;  %v8450_v5 = vld [vmem:[%s13036_s5 + $0xac8] sm:$0xff]  ;;  %v8452_v26 = vld [vmem:[%s13036_s5 + $0xad8] sm:$0xff] }
 0xad7   : > { %v6617_v10 = vpop.f32.mrf.mxu0 }
 0xad8   : > { %8358 = vmatmul.msk.f32.gmra.mxu1 %vm3936_vm0, %v8343_v33  ;;  %8388 = vmatmul.msk.f32.gmra.mxu2 %vm3936_vm0, %v8373_v62  ;;  %v12682_v34 = vadd.f32 %v6617_v10, %v6498_v39  ;;  %v8434_v33 = vld [vmem:[%s13036_s5 + $0xac0] sm:$0xff]  ;;  %v6632_v62 = vadd.f32 %v12454_v29, %v12452_v2  ;;  %v8482_v2 = vld [vmem:[%s13036_s5 + $0xb50] sm:$0xff] }
 0xada   : > { %8417 = vmatmul.msk.f32.gmra.mxu3 %vm3936_vm0, %v8402_v53  ;;  %8446 = vmatmul.msk.f32.gmra.mxu0 %vm3936_vm0, %v8431_v35 }
 0xadb   : > { %v6335_v1 = vpop.f32.mrf.mxu2 }
 0xadc   : > { %v6356_v8 = vadd.f32 %v6335_v1, %v6210_v18 }
 0xadd   : > { %v6192_v55 = vpop.f32.mrf.mxu1  ;;  %v6476_v61 = vpop.f32.mrf.mxu3 }
 0xade   : > { %v6499_v42 = vadd.f32 %v6476_v61, %v6355_v59  ;;  %v6211_v12 = vadd.f32 %v6192_v55, %v6071_v16  ;;  %v6634_v16 = vadd.f32 %v12498_v57, %v12496_v21 }
 0xadf   : > { %v6620_v54 = vpop.f32.mrf.mxu0 }
 0xae0   : > { %8359 = vmatmul.msk.f32.gmra.mxu1 %vm3936_vm0, %v8344_v4  ;;  %8389 = vmatmul.msk.f32.gmra.mxu2 %vm3936_vm0, %v8374_v44  ;;  %v12702_v38 = vadd.f32 %v6620_v54, %v6499_v42  ;;  %v8453_v54 = vld [vmem:[%s13036_s5 + $0xae0] sm:$0xff] }
 0xae2   : > { %8418 = vmatmul.msk.f32.gmra.mxu3 %vm3936_vm0, %v8403_v19  ;;  %8447 = vmatmul.msk.f32.gmra.mxu0 %vm3936_vm0, %v8432_v46  ;;  %v8483_v19 = vld [vmem:[%s13036_s5 + $0xb58] sm:$0xff] }
 0xae3   : > { %v6338_v17 = vpop.f32.mrf.mxu2 }
 0xae4   : > { %v6357_v52 = vadd.f32 %v6338_v17, %v6211_v12 }
 0xae5   : > { %v6195_v63 = vpop.f32.mrf.mxu1  ;;  %v6479_v60 = vpop.f32.mrf.mxu3 }
 0xae6   : > { %v6500_v25 = vadd.f32 %v6479_v60, %v6356_v8  ;;  %v6212_v51 = vadd.f32 %v6195_v63, %v6072_v14  ;;  %v6633_v8 = vadd.f32 %v12476_v40, %v12474_v50  ;;  %v8484_v60 = vld [vmem:[%s13036_s5 + $0xb60] sm:$0xff] }
 0xae7   : > { %v6623_v27 = vpop.f32.mrf.mxu0 }
 0xae8   : > { %8465 = vmatmul.msk.f32.vlgmr.msra.gmra.mxu1 %vm3936_vm0, %v8450_v5  ;;  %8495 = vmatmul.msk.f32.vlgmr.msrb.gmra.mxu2 %vm3936_vm0, %v8480_v48  ;;  %v12722_v23 = vadd.f32 %v6623_v27, %v6500_v25  ;;  %v8454_v48 = vld [vmem:[%s13036_s5 + $0xae8] sm:$0xff]  ;;  %v6635_v27 = vadd.f32 %v12520_v28, %v12518_v58 }
 0xaea   : > { %8419 = vmatmul.msk.f32.gmra.mxu3 %vm3936_vm0, %v8404_v31  ;;  %8448 = vmatmul.msk.f32.gmra.mxu0 %vm3936_vm0, %v8433_v22 }
 0xaeb   : > { %v6341_v11 = vpop.f32.mrf.mxu2 }
 0xaec   : > { %v6358_v30 = vadd.f32 %v6341_v11, %v6212_v51 }
 0xaed   : > { %v6731_v36 = vpop.f32.mrf.mxu1  ;;  %v6482_v6 = vpop.f32.mrf.mxu3 }
 0xaee   : > { %v6501_v59 = vadd.f32 %v6482_v6, %v6357_v52  ;;  %v6776_v39 = vadd.f32 %v6731_v36, %v6632_v62  ;;  %v8485_v36 = vld [vmem:[%s13036_s5 + $0xb68] sm:$0xff] }
 0xaef   : > { %v6626_v37 = vpop.f32.mrf.mxu0 }
 0xaf0   : > { %8466 = vmatmul.msk.f32.gmra.mxu1 %vm3936_vm0, %v8451_v9  ;;  %8496 = vmatmul.msk.f32.gmra.mxu2 %vm3936_vm0, %v8481_v43  ;;  %v12739_v3 = vadd.f32 %v6626_v37, %v6501_v59  ;;  %v6636_v43 = vadd.f32 %v12542_v41, %v12540_v49 }
 0xaf2   : > { %8449 = vmatmul.msk.f32.gmra.mxu0 %vm3936_vm0, %v8434_v33 }
 0xaf3   : > { %v6871_v10 = vpop.f32.mrf.mxu2 }
 0xaf4   : > { %v6916_v53 = vadd.f32 %v6871_v10, %v6776_v39  ;;  %v8456_v39 = vld [vmem:[%s13036_s5 + $0xaf8] sm:$0xff]  ;;  %v8486_v10 = vld [vmem:[%s13036_s5 + $0xb70] sm:$0xff] }
 0xaf5   : > { %v6734_v35 = vpop.f32.mrf.mxu1  ;;  %v6485_v29 = vpop.f32.mrf.mxu3 }
 0xaf6   : > { %v6502_v18 = vadd.f32 %v6485_v29, %v6358_v30  ;;  %v6777_v4 = vadd.f32 %v6734_v35, %v6633_v8  ;;  %v8455_v30 = vld [vmem:[%s13036_s5 + $0xaf0] sm:$0xff]  ;;  %v6637_v35 = vadd.f32 %v12566_v32, %v12564_v0 }
 0xaf7   : > { %v6629_v1 = vpop.f32.mrf.mxu0 }
 0xaf8   : > { %8467 = vmatmul.msk.f32.gmra.mxu1 %vm3936_vm0, %v8452_v26  ;;  %8497 = vmatmul.msk.f32.gmra.mxu2 %vm3936_vm0, %v8482_v2  ;;  %v12752_v55 = vadd.f32 %v6629_v1, %v6502_v18  ;;  %v6494_v26 = vadd.f32 %v12588_v45, %v12556_v7  ;;  %v8487_v7 = vld [vmem:[%s13036_s5 + $0xb78] sm:$0xff] }
 0xafa   : > { %v6638_v1 = vadd.f32 %v12590_v20, %v6494_v26  ;;  %v8492_v26 = vld [vmem:[%s13036_s5 + $0xba0] sm:$0xff] }
 0xafb   : > { %v6874_v44 = vpop.f32.mrf.mxu2 }
 0xafc   : > { %v6917_v61 = vadd.f32 %v6874_v44, %v6777_v4  ;;  %v8457_v44 = vld [vmem:[%s13036_s5 + $0xb00] sm:$0xff] }
 0xafd   : > { %v6737_v42 = vpop.f32.mrf.mxu1  ;;  %v7017_v46 = vpop.f32.mrf.mxu3 }
 0xafe   : > { %v7062_v50 = vadd.f32 %v7017_v46, %v6916_v53  ;;  %v6778_v17 = vadd.f32 %v6737_v42, %v6634_v16  ;;  %v6495_v42 = vadd.f32 %v12610_v47, %v12580_v24  ;;  %v8488_v16 = vld [vmem:[%s13036_s5 + $0xb80] sm:$0xff] }
 0xaff   : > { %v7161_v40 = vpop.f32.mrf.mxu0 }
 0xb00   : > { %8468 = vmatmul.msk.f32.gmra.mxu1 %vm3936_vm0, %v8453_v54  ;;  %8498 = vmatmul.msk.f32.gmra.mxu2 %vm3936_vm0, %v8483_v19  ;;  %v12764_v12 = vadd.f32 %v7161_v40, %v7062_v50  ;;  %v6639_v19 = vadd.f32 %v12612_v56, %v6495_v42  ;;  %v8458_v40 = vld [vmem:[%s13036_s5 + $0xb08] sm:$0xff] }
 0xb03   : > { %v6877_v52 = vpop.f32.mrf.mxu2 }
 0xb04   : > { %v6918_v63 = vadd.f32 %v6877_v52, %v6778_v17 }
 0xb05   : > { %v6740_v5 = vpop.f32.mrf.mxu1  ;;  %v7020_v25 = vpop.f32.mrf.mxu3 }
 0xb06   : > { %v7063_v21 = vadd.f32 %v7020_v25, %v6917_v61  ;;  %v6779_v22 = vadd.f32 %v6740_v5, %v6635_v27  ;;  %v8489_v25 = vld [vmem:[%s13036_s5 + $0xb88] sm:$0xff] }
 0xb07   : > { %v7164_v57 = vpop.f32.mrf.mxu0 }
 0xb08   : > { %8469 = vmatmul.msk.f32.gmra.mxu1 %vm3936_vm0, %v8454_v48  ;;  %8499 = vmatmul.msk.f32.gmra.mxu2 %vm3936_vm0, %v8484_v60  ;;  %v12776_v31 = vadd.f32 %v7164_v57, %v7063_v21  ;;  %v8459_v60 = vld [vmem:[%s13036_s5 + $0xb10] sm:$0xff] }
 0xb0b   : > { %v6880_v14 = vpop.f32.mrf.mxu2 }
 0xb0c   : > { %v6919_v51 = vadd.f32 %v6880_v14, %v6779_v22 }
 0xb0d   : > { %v6743_v11 = vpop.f32.mrf.mxu1  ;;  %v7023_v9 = vpop.f32.mrf.mxu3 }
 0xb0e   : > { %v7064_v58 = vadd.f32 %v7023_v9, %v6918_v63  ;;  %v6780_v59 = vadd.f32 %v6743_v11, %v6636_v43 }
 0xb0f   : > { %v7167_v28 = vpop.f32.mrf.mxu0 }
 0xb10   : > { %8470 = vmatmul.msk.f32.gmra.mxu1 %vm3936_vm0, %v8455_v30  ;;  %8500 = vmatmul.msk.f32.gmra.mxu2 %vm3936_vm0, %v8485_v36  ;;  %v12788_v6 = vadd.f32 %v7167_v28, %v7064_v58  ;;  %v8460_v36 = vld [vmem:[%s13036_s5 + $0xb18] sm:$0xff] }
 0xb13   : > { %v6883_v37 = vpop.f32.mrf.mxu2 }
 0xb14   : > { %v6920_v33 = vadd.f32 %v6883_v37, %v6780_v59 }
 0xb15   : > { %v6746_v62 = vpop.f32.mrf.mxu1  ;;  %v7026_v53 = vpop.f32.mrf.mxu3 }
 0xb16   : > { %v7065_v49 = vadd.f32 %v7026_v53, %v6919_v51  ;;  %v6781_v29 = vadd.f32 %v6746_v62, %v6637_v35  ;;  %v8462_v35 = vld [vmem:[%s13036_s5 + $0xb28] sm:$0xff] }
 0xb17   : > { %v7170_v41 = vpop.f32.mrf.mxu0 }
 0xb18   : > { %8471 = vmatmul.msk.f32.gmra.mxu1 %vm3936_vm0, %v8456_v39  ;;  %8501 = vmatmul.msk.f32.gmra.mxu2 %vm3936_vm0, %v8486_v10  ;;  %v12802_v2 = vadd.f32 %v7170_v41, %v7065_v49  ;;  %v8461_v39 = vld [vmem:[%s13036_s5 + $0xb20] sm:$0xff] }
 0xb1b   : > { %v6886_v18 = vpop.f32.mrf.mxu2 }
 0xb1c   : > { %v6921_v8 = vadd.f32 %v6886_v18, %v6781_v29 }
 0xb1d   : > { %v6749_v4 = vpop.f32.mrf.mxu1  ;;  %v7029_v0 = vpop.f32.mrf.mxu3 }
 0xb1e   : > { %v6782_v32 = vadd.f32 %v6749_v4, %v6638_v1  ;;  %v7066_v45 = vadd.f32 %v7029_v0, %v6920_v33  ;;  %v8493_v4 = vld [vmem:[%s13036_s5 + $0xba8] sm:$0xff] }
 0xb1f   : > { %v7173_v61 = vpop.f32.mrf.mxu0 }
 0xb20   : > { %8472 = vmatmul.msk.f32.gmra.mxu1 %vm3936_vm0, %v8457_v44  ;;  %8502 = vmatmul.msk.f32.gmra.mxu2 %vm3936_vm0, %v8487_v7  ;;  %v12815_v20 = vadd.f32 %v7173_v61, %v7066_v45  ;;  %v8494_v45 = vld [vmem:[%s13036_s5 + $0xbb0] sm:$0xff] }
 0xb23   : > { %v6889_v54 = vpop.f32.mrf.mxu2 }
 0xb24   : > { %v6922_v46 = vadd.f32 %v6889_v54, %v6782_v32  ;;  %v8464_v32 = vld [vmem:[%s13036_s5 + $0xb38] sm:$0xff] }
 0xb25   : > { %v6752_v50 = vpop.f32.mrf.mxu1  ;;  %v7032_v24 = vpop.f32.mrf.mxu3 }
 0xb26   : > { %v6783_v47 = vadd.f32 %v6752_v50, %v6639_v19  ;;  %v7067_v17 = vadd.f32 %v7032_v24, %v6921_v8  ;;  %v8463_v8 = vld [vmem:[%s13036_s5 + $0xb30] sm:$0xff] }
 0xb27   : > { %v7176_v52 = vpop.f32.mrf.mxu0 }
 0xb28   : > { %8473 = vmatmul.msk.f32.gmra.mxu1 %vm3936_vm0, %v8458_v40  ;;  %8503 = vmatmul.msk.f32.gmra.mxu2 %vm3936_vm0, %v8488_v16  ;;  %v12826_v63 = vadd.f32 %v7176_v52, %v7067_v17 }
 0xb2b   : > { %v6892_v56 = vpop.f32.mrf.mxu2 }
 0xb2c   : > { %v6923_v5 = vadd.f32 %v6892_v56, %v6783_v47 }
 0xb2d   : > { %v6755_v48 = vpop.f32.mrf.mxu1  ;;  %v7035_v21 = vpop.f32.mrf.mxu3 }
 0xb2e   : > { %v6784_v57 = vadd.f32 %v6755_v48, %v12642_v13  ;;  %v7068_v27 = vadd.f32 %v7035_v21, %v6922_v46  ;;  %v8490_v13 = vld [vmem:[%s13036_s5 + $0xb90] sm:$0xff] }
 0xb2f   : > { %v7179_v22 = vpop.f32.mrf.mxu0 }
 0xb30   : > { %8474 = vmatmul.msk.f32.gmra.mxu1 %vm3936_vm0, %v8459_v60  ;;  %8504 = vmatmul.msk.f32.gmra.mxu2 %vm3936_vm0, %v8489_v25  ;;  %v12837_v14 = vadd.f32 %v7179_v22, %v7068_v27 }
 0xb33   : > { %v6895_v51 = vpop.f32.mrf.mxu2 }
 0xb34   : > { %v12839_v11 = vadd.f32 %v6895_v51, %v6784_v57 }
 0xb35   : > { %v6758_v30 = vpop.f32.mrf.mxu1  ;;  %v7038_v9 = vpop.f32.mrf.mxu3 }
 0xb36   : > { %v6785_v58 = vadd.f32 %v6758_v30, %v12662_v15  ;;  %v7069_v28 = vadd.f32 %v7038_v9, %v6923_v5  ;;  %v8491_v15 = vld [vmem:[%s13036_s5 + $0xb98] sm:$0xff] }
 0xb37   : > { %v7182_v43 = vpop.f32.mrf.mxu0 }
 0xb38   : > { %8475 = vmatmul.msk.f32.gmra.mxu1 %vm3936_vm0, %v8460_v36  ;;  %8505 = vmatmul.msk.f32.gmra.mxu2 %vm3936_vm0, %v8490_v13  ;;  %v12850_v59 = vadd.f32 %v7182_v43, %v7069_v28 }
 0xb3b   : > { %v6898_v37 = vpop.f32.mrf.mxu2 }
 0xb3c   : > { %v12852_v33 = vadd.f32 %v6898_v37, %v6785_v58 }
 0xb3d   : > { %v6761_v62 = vpop.f32.mrf.mxu1  ;;  %v7041_v9 = vpop.f32.mrf.mxu3 }
 0xb3e   : > { %v6786_v10 = vadd.f32 %v6761_v62, %v12682_v34 }
 0xb40   : > { %8476 = vmatmul.msk.f32.gmra.mxu1 %vm3936_vm0, %v8461_v39  ;;  %8506 = vmatmul.msk.f32.gmra.mxu2 %vm3936_vm0, %v8491_v15 }
 0xb43   : > { %v6901_v53 = vpop.f32.mrf.mxu2 }
 0xb44   : > { %v12863_v49 = vadd.f32 %v6901_v53, %v6786_v10 }
 0xb45   : > { %v6764_v41 = vpop.f32.mrf.mxu1  ;;  %v7044_v39 = vpop.f32.mrf.mxu3 }
 0xb46   : > { %v6787_v29 = vadd.f32 %v6764_v41, %v12702_v38 }
 0xb48   : > { %8477 = vmatmul.msk.f32.gmra.mxu1 %vm3936_vm0, %v8462_v35  ;;  %8507 = vmatmul.msk.f32.gmra.mxu2 %vm3936_vm0, %v8492_v26 }
 0xb4b   : > { %v6904_v34 = vpop.f32.mrf.mxu2 }
 0xb4c   : > { %v12874_v18 = vadd.f32 %v6904_v34, %v6787_v29 }
 0xb4d   : > { %v6767_v1 = vpop.f32.mrf.mxu1  ;;  %v7047_v41 = vpop.f32.mrf.mxu3 }
 0xb4e   : > { %v6788_v44 = vadd.f32 %v6767_v1, %v12722_v23 }
 0xb50   : > { %8478 = vmatmul.msk.f32.gmra.mxu1 %vm3936_vm0, %v8463_v8  ;;  %8508 = vmatmul.msk.f32.gmra.mxu2 %vm3936_vm0, %v8493_v4 }
 0xb53   : > { %v6907_v38 = vpop.f32.mrf.mxu2 }
 0xb54   : > { %v12885_v7 = vadd.f32 %v6907_v38, %v6788_v44 }
 0xb55   : > { %v6770_v0 = vpop.f32.mrf.mxu1  ;;  %v7050_v34 = vpop.f32.mrf.mxu3 }
 0xb56   : > { %v6789_v61 = vadd.f32 %v6770_v0, %v12739_v3 }
 0xb58   : > { %8479 = vmatmul.msk.f32.gmra.mxu1 %vm3936_vm0, %v8464_v32  ;;  %8509 = vmatmul.msk.f32.gmra.mxu2 %vm3936_vm0, %v8494_v45 }
 0xb5b   : > { %v6910_v23 = vpop.f32.mrf.mxu2 }
 0xb5c   : > { %v6929_v42 = vadd.f32 %v6910_v23, %v6789_v61 }
 0xb5d   : > { %v6773_v54 = vpop.f32.mrf.mxu1  ;;  %v7053_v44 = vpop.f32.mrf.mxu3 }
 0xb5e   : > { %v6790_v19 = vadd.f32 %v6773_v54, %v12752_v55 }
 0xb63   : > { %v6913_v46 = vpop.f32.mrf.mxu2 }
 0xb64   : > { %v6930_v50 = vadd.f32 %v6913_v46, %v6790_v19 }
 0xb65   : > { %v7305_v40 = vpop.f32.mrf.mxu1  ;;  %v7056_v45 = vpop.f32.mrf.mxu3 }
 0xb66   : > { %v7350_v16 = vadd.f32 %v7305_v40, %v12764_v12  ;;  %v7075_v40 = vadd.f32 %v7056_v45, %v6929_v42 }
 0xb6b   : > { %v7449_v24 = vpop.f32.mrf.mxu2 }
 0xb6c   : > { %v12898_v47 = vadd.f32 %v7449_v24, %v7350_v16 }
 0xb6d   : > { %v7308_v17 = vpop.f32.mrf.mxu1  ;;  %v7059_v19 = vpop.f32.mrf.mxu3 }
 0xb6e   : > { %v7351_v3 = vadd.f32 %v7308_v17, %v12776_v31  ;;  %v7076_v16 = vadd.f32 %v7059_v19, %v6930_v50  ;;  %v7074_v17 = vadd.f32 %v7053_v44, %v12885_v7 }
 0xb73   : > { %v7452_v52 = vpop.f32.mrf.mxu2 }
 0xb74   : > { %v12901_v56 = vadd.f32 %v7452_v52, %v7351_v3  ;;  %v7073_v52 = vadd.f32 %v7050_v34, %v12874_v18 }
 0xb75   : > { %v7311_v5 = vpop.f32.mrf.mxu1 }
 0xb76   : > { %v7352_v48 = vadd.f32 %v7311_v5, %v12788_v6 }
 0xb7b   : > { %v7455_v60 = vpop.f32.mrf.mxu2 }
 0xb7c   : > { %v12904_v25 = vadd.f32 %v7455_v60, %v7352_v48  ;;  %v7072_v60 = vadd.f32 %v7047_v41, %v12863_v49 }
 0xb7d   : > { %v7314_v55 = vpop.f32.mrf.mxu1 }
 0xb7e   : > { %v7353_v21 = vadd.f32 %v7314_v55, %v12802_v2  ;;  %v7185_v2 = vpop.f32.mrf.mxu0 }
 0xb83   : > { %v7458_v57 = vpop.f32.mrf.mxu2 }
 0xb84   : > { %v12907_v12 = vadd.f32 %v7458_v57, %v7353_v21 }
 0xb85   : > { %v7317_v27 = vpop.f32.mrf.mxu1 }
 0xb86   : > { %v7354_v22 = vadd.f32 %v7317_v27, %v12815_v20  ;;  %v7188_v15 = vpop.f32.mrf.mxu0  ;;  %v7071_v27 = vadd.f32 %v7044_v39, %v12852_v33 }
 0xb8b   : > { %v7461_v51 = vpop.f32.mrf.mxu2 }
 0xb8c   : > { %v12910_v31 = vadd.f32 %v7461_v51, %v7354_v22 }
 0xb8d   : > { %v7320_v30 = vpop.f32.mrf.mxu1 }
 0xb8e   : > { %v7355_v36 = vadd.f32 %v7320_v30, %v12826_v63  ;;  %v7191_v26 = vpop.f32.mrf.mxu0 }
 0xb8f   : > { %v7216_v7 = vadd.f32 %v7191_v26, %v7072_v60 }
 0xb93   : > { %v7464_v13 = vpop.f32.mrf.mxu2 }
 0xb94   : > { %v12913_v6 = vadd.f32 %v7464_v13, %v7355_v36  ;;  %v7070_v36 = vadd.f32 %v7041_v9, %v12839_v11 }
 0xb95   : > { %v7323_v58 = vpop.f32.mrf.mxu1 }
 0xb96   : > { %v7356_v28 = vadd.f32 %v7323_v58, %v12837_v14  ;;  %v7194_v8 = vpop.f32.mrf.mxu0 }
 0xb97   : > { %v7217_v51 = vadd.f32 %v7194_v8, %v7073_v52  ;;  %v7543_v52 = vld [vmem:[%s13039_s8 + $0x40] sm:$0xff] }
 0xb9b   : > { %v7467_v43 = vpop.f32.mrf.mxu2 }
 0xb9c   : > { %v12916_v37 = vadd.f32 %v7467_v43, %v7356_v28  ;;  %v7215_v28 = vadd.f32 %v7188_v15, %v7071_v27  ;;  %v7541_v27 = vld [vmem:[%s13039_s8 + $0x30] sm:$0xff] }
 0xb9d   : > { %v7326_v62 = vpop.f32.mrf.mxu1 }
 0xb9e   : > { %v7357_v20 = vadd.f32 %v7326_v62, %v12850_v59  ;;  %v7197_v0 = vpop.f32.mrf.mxu0 }
 0xb9f   : > { %v7218_v55 = vadd.f32 %v7197_v0, %v7074_v17  ;;  %v7533_v0 = vld [vmem:[%s13038_s7 + $0x48] sm:$0xff] }
 0xba0   : > { %v7544_v17 = vld [vmem:[%s13039_s8 + $0x48] sm:$0xff] }
 0xba3   : > { %v7470_v10 = vpop.f32.mrf.mxu2 }
 0xba4   : > { %v12919_v53 = vadd.f32 %v7470_v10, %v7357_v20  ;;  %v7214_v20 = vadd.f32 %v7185_v2, %v7070_v36  ;;  %v7515_v2 = vmax.f32 %v12916_v37, 0.0  ;;  %v7530_v37 = vld [vmem:[%s13038_s7 + $0x30] sm:$0xff]  ;;  %v7539_v36 = vld [vmem:[%s13039_s8 + $0x20] sm:$0xff] }
 0xba5   : > { %v7329_v63 = vpop.f32.mrf.mxu1 }
 0xba6   : > { %v7200_v61 = vpop.f32.mrf.mxu0  ;;  %v7358_v39 = vadd.f32 %v7329_v63, %v7214_v20  ;;  %v7516_v15 = vmax.f32 %v12919_v53, 0.0  ;;  %v7513_v63 = vmax.f32 %v12910_v31, 0.0  ;;  %v7509_v53 = vmax.f32 %v12898_v47, 0.0  ;;  %v7527_v47 = vld [vmem:[%s13038_s7 + $0x18] sm:$0xff]  ;;  %v7529_v31 = vld [vmem:[%s13038_s7 + $0x28] sm:$0xff] }
 0xba7   : > { %v7219_v5 = vadd.f32 %v7200_v61, %v7075_v40  ;;  %v7536_v20 = vld [vmem:[%s13039_s8 + $0x8] sm:$0xff] }
 0xbab   : > { %v7473_v35 = vpop.f32.mrf.mxu2 }
 0xbac   : > { %v7502_v44 = vadd.f32 %v7473_v35, %v7358_v39  ;;  %v7512_v35 = vmax.f32 %v12907_v12, 0.0  ;;  %v7525_v12 = vld [vmem:[%s13038_s7 + $0x8] sm:$0xff] }
 0xbad   : > { %v7332_v29 = vpop.f32.mrf.mxu1 }
 0xbae   : > { %v7203_v24 = vpop.f32.mrf.mxu0  ;;  %v7359_v10 = vadd.f32 %v7332_v29, %v7215_v28  ;;  %v7517_v26 = vmax.f32 %v7502_v44, 0.0  ;;  %v7514_v29 = vmax.f32 %v12913_v6, 0.0  ;;  %v7524_v6 = vld [vmem:[%s13038_s7] sm:$0xff] }
 0xbaf   : > { %v7220_v48 = vadd.f32 %v7203_v24, %v7076_v16 }
 0xbb3   : > { %v7476_v1 = vpop.f32.mrf.mxu2 }
 0xbb4   : > { %v7503_v34 = vadd.f32 %v7476_v1, %v7359_v10  ;;  %v7511_v1 = vmax.f32 %v12904_v25, 0.0  ;;  %v7528_v25 = vld [vmem:[%s13038_s7 + $0x20] sm:$0xff] }
 0xbb5   : > { %v7335_v14 = vpop.f32.mrf.mxu1 }
 0xbb6   : > { %v7360_v43 = vadd.f32 %v7335_v14, %v7216_v7  ;;  %v7518_v9 = vmax.f32 %v7503_v34, 0.0  ;;  %v7510_v14 = vmax.f32 %v12901_v56, 0.0  ;;  %v7526_v56 = vld [vmem:[%s13038_s7 + $0x10] sm:$0xff] }
 0xbbb   : > { %v7479_v4 = vpop.f32.mrf.mxu2 }
 0xbbc   : > { %v7504_v41 = vadd.f32 %v7479_v4, %v7360_v43  ;;  %v7531_v4 = vld [vmem:[%s13038_s7 + $0x38] sm:$0xff]  ;;  %v7537_v43 = vld [vmem:[%s13039_s8 + $0x10] sm:$0xff] }
 0xbbd   : > { %v7338_v38 = vpop.f32.mrf.mxu1 }
 0xbbe   : > { %v7361_v13 = vadd.f32 %v7338_v38, %v7217_v51  ;;  %v7519_v11 = vmax.f32 %v7504_v41, 0.0  ;;  %v7532_v38 = vld [vmem:[%s13038_s7 + $0x40] sm:$0xff] }
 0xbc3   : > { %v7482_v32 = vpop.f32.mrf.mxu2 }
 0xbc4   : > { %v7505_v62 = vadd.f32 %v7482_v32, %v7361_v13  ;;  %v7534_v32 = vld [vmem:[%s13038_s7 + $0x50] sm:$0xf] }
 0xbc5   : > { %v7341_v59 = vpop.f32.mrf.mxu1 }
 0xbc6   : > { %v7362_v30 = vadd.f32 %v7341_v59, %v7218_v55  ;;  %v7520_v8 = vmax.f32 %v7505_v62, 0.0  ;;  %v7542_v55 = vld [vmem:[%s13039_s8 + $0x38] sm:$0xff] }
 0xbcb   : > { %v7485_v23 = vpop.f32.mrf.mxu2 }
 0xbcc   : > { %v7506_v58 = vadd.f32 %v7485_v23, %v7362_v30  ;;  %v7540_v30 = vld [vmem:[%s13039_s8 + $0x28] sm:$0xff] }
 0xbcd   : > { %v7344_v54 = vpop.f32.mrf.mxu1 }
 0xbce   : > { %v7363_v21 = vadd.f32 %v7344_v54, %v7219_v5  ;;  %v7521_v33 = vmax.f32 %v7506_v58, 0.0  ;;  %v7538_v58 = vld [vmem:[%s13039_s8 + $0x18] sm:$0xff] }
 0xbd3   : > { %v7488_v46 = vpop.f32.mrf.mxu2 }
 0xbd4   : > { %v7507_v42 = vadd.f32 %v7488_v46, %v7363_v21 }
 0xbd5   : > { %v7347_v3 = vpop.f32.mrf.mxu1 }
 0xbd6   : > { %v7364_v57 = vadd.f32 %v7347_v3, %v7220_v48  ;;  %v7522_v49 = vmax.f32 %v7507_v42, 0.0  ;;  %v7545_v3 = vld [vmem:[%s13039_s8 + $0x50] sm:$0xf] }
 0xbdb   : > { %v7491_v22 = vpop.f32.mrf.mxu2 }
 0xbdc   : > { %v7508_v50 = vadd.f32 %v7491_v22, %v7364_v57 }
 0xbde   : > { %v7523_v18 = vmax.f32 %v7508_v50, 0.0 }
 0xbe0   : > { %7580 = vmatpush.msra.mxu3 %v7523_v18 }
 0xbe2   : > { %7581 = vmatpush.msra.mxu3 %v7522_v49 }
 0xbe4   : > { %7582 = vmatpush.msra.mxu3 %v7521_v33  ;;  %v7535_v33 = vld [vmem:[%s13039_s8] sm:$0xff] }
 0xbe6   : > { %7583 = vmatpush.msra.mxu3 %v7520_v8 }
 0xbe8   : > { %7584 = vmatpush.msra.mxu3 %v7519_v11 }
 0xbea   : > { %7585 = vmatpush.msra.mxu3 %v7518_v9 }
 0xbec   : > { %7586 = vmatpush.msra.mxu3 %v7517_v26  ;;  %v7640_v26 = vld [vmem:[%s13040_s9] sm:$0xff] }
 0xbee   : > { %7587 = vmatpush.msra.mxu3 %v7516_v15  ;;  %v7641_v15 = vld [vmem:[%s13040_s9 + $0x8] sm:$0x3] }
 0xbf0   : > { %7588 = vmatpush.msra.mxu3 %v7515_v2  ;;  %v7642_v2 = vld [vmem:[%s13041_s10] sm:$0xff] }
 0xbf2   : > { %7589 = vmatpush.msra.mxu3 %v7514_v29 }
 0xbf4   : > { %7590 = vmatpush.msra.mxu3 %v7513_v63 }
 0xbf6   : > { %7591 = vmatpush.msra.mxu3 %v7512_v35  ;;  %v7643_v35 = vld [vmem:[%s13041_s10 + $0x8] sm:$0x3] }
 0xbf8   : > { %7592 = vmatpush.msra.mxu3 %v7511_v1 }
 0xbfa   : > { %7593 = vmatpush.msra.mxu3 %v7510_v14 }
 0xbfc   : > { %7594 = vmatpush.msra.mxu3 %v7509_v53 }
 0xbfd   : > { %8510 = vmatmul.msk.f32.vlgmr.msra.gmra.mxu3 %vm2540_vm5, %v7524_v6 }
 0xc05   : > { %8511 = vmatmul.msk.f32.gmra.mxu3 %vm2540_vm5, %v7525_v12 }
 0xc0d   : > { %8512 = vmatmul.msk.f32.gmra.mxu3 %vm2540_vm5, %v7526_v56 }
 0xc15   : > { %8513 = vmatmul.msk.f32.gmra.mxu3 %vm2540_vm5, %v7527_v47 }
 0xc1d   : > { %8514 = vmatmul.msk.f32.gmra.mxu3 %vm2540_vm5, %v7528_v25 }
 0xc25   : > { %8515 = vmatmul.msk.f32.gmra.mxu3 %vm2540_vm5, %v7529_v31 }
 0xc2d   : > { %8516 = vmatmul.msk.f32.gmra.mxu3 %vm2540_vm5, %v7530_v37 }
 0xc35   : > { %8517 = vmatmul.msk.f32.gmra.mxu3 %vm2540_vm5, %v7531_v4 }
 0xc3d   : > { %8518 = vmatmul.msk.f32.gmra.mxu3 %vm2540_vm5, %v7532_v38 }
 0xc45   : > { %8519 = vmatmul.msk.f32.gmra.mxu3 %vm2540_vm5, %v7533_v0 }
 0xc4d   : > { %8520 = vmatmul.msk.f32.gmra.mxu3 %vm2540_vm5, %v7534_v32  ;;  %vm7644_vm5 = vcmask 687104  }
 0xc80   : > { %v7596_v59 = vpop.f32.mrf.mxu3 }
 0xc81   : > { %v7597_v8 = vadd.f32 %v7596_v59, %v7535_v33 }
 0xc83   : > { %v7629_v9 = vmax.f32 %v7597_v8, 0.0 }
 0xc88   : > { %v7599_v45 = vpop.f32.mrf.mxu3 }
 0xc89   : > { %v7600_v39 = vadd.f32 %v7599_v45, %v7536_v20 }
 0xc8b   : > { %v7630_v11 = vmax.f32 %v7600_v39, 0.0 }
 0xc90   : > { %v7602_v61 = vpop.f32.mrf.mxu3 }
 0xc91   : > { %v7603_v10 = vadd.f32 %v7602_v61, %v7537_v43 }
 0xc93   : > { %v7631_v44 = vmax.f32 %v7603_v10, 0.0 }
 0xc98   : > { %v7605_v23 = vpop.f32.mrf.mxu3 }
 0xc99   : > { %v7606_v62 = vadd.f32 %v7605_v23, %v7538_v58 }
 0xc9b   : > { %v7632_v34 = vmax.f32 %v7606_v62, 0.0 }
 0xca0   : > { %v7608_v54 = vpop.f32.mrf.mxu3 }
 0xca1   : > { %v7609_v18 = vadd.f32 %v7608_v54, %v7539_v36 }
 0xca3   : > { %v7633_v41 = vmax.f32 %v7609_v18, 0.0 }
 0xca8   : > { %v7611_v19 = vpop.f32.mrf.mxu3 }
 0xca9   : > { %v7612_v7 = vadd.f32 %v7611_v19, %v7540_v30 }
 0xcab   : > { %v7634_v49 = vmax.f32 %v7612_v7, 0.0 }
 0xcb0   : > { %v7614_v46 = vpop.f32.mrf.mxu3 }
 0xcb1   : > { %v7615_v42 = vadd.f32 %v7614_v46, %v7541_v27 }
 0xcb3   : > { %v7635_v28 = vmax.f32 %v7615_v42, 0.0 }
 0xcb8   : > { %v7617_v40 = vpop.f32.mrf.mxu3 }
 0xcb9   : > { %v7618_v22 = vadd.f32 %v7617_v40, %v7542_v55 }
 0xcbb   : > { %v7636_v13 = vmax.f32 %v7618_v22, 0.0 }
 0xcc0   : > { %v7620_v16 = vpop.f32.mrf.mxu3 }
 0xcc1   : > { %v7621_v21 = vadd.f32 %v7620_v16, %v7543_v52 }
 0xcc3   : > { %v7637_v50 = vmax.f32 %v7621_v21, 0.0 }
 0xcc8   : > { %v7623_v24 = vpop.f32.mrf.mxu3 }
 0xcc9   : > { %v7624_v48 = vadd.f32 %v7623_v24, %v7544_v17 }
 0xccb   : > { %v7638_v51 = vmax.f32 %v7624_v48, 0.0 }
 0xcd0   : > { %v7626_v5 = vpop.f32.mrf.mxu3 }
 0xcd1   : > { %v7627_v60 = vadd.f32 %v7626_v5, %v7545_v3 }
 0xcd3   : > { %v7639_v57 = vmax.f32 %v7627_v60, 0.0 }
 0xcd5   : > { %8521 = vmatpush.msk.msra.mxu0 %vm7651_vm2, %v7639_v57 }
 0xcd7   : > { %7661 = vmatpush.msra.mxu0 %v7638_v51 }
 0xcd9   : > { %7662 = vmatpush.msra.mxu0 %v7637_v50 }
 0xcdb   : > { %7663 = vmatpush.msra.mxu0 %v7636_v13 }
 0xcdd   : > { %7664 = vmatpush.msra.mxu0 %v7635_v28 }
 0xcdf   : > { %7665 = vmatpush.msra.mxu0 %v7634_v49 }
 0xce1   : > { %7666 = vmatpush.msra.mxu0 %v7633_v41 }
 0xce3   : > { %7667 = vmatpush.msra.mxu0 %v7632_v34 }
 0xce5   : > { %7668 = vmatpush.msra.mxu0 %v7631_v44 }
 0xce7   : > { %7669 = vmatpush.msra.mxu0 %v7630_v11 }
 0xce9   : > { %7670 = vmatpush.msra.mxu0 %v7629_v9 }
 0xcea   : > { %8522 = vmatmul.msk.f32.vlgmr.msra.gmra.mxu0 %vm7644_vm5, %v7640_v26 }
 0xcf2   : > { %8523 = vmatmul.msk.f32.gmra.mxu0 %vm7644_vm5, %v7641_v15 }
 0xd67   : > { %v7672_v29 = vpop.f32.mrf.mxu0 }
 0xd68   : > { %v7673_v63 = vadd.f32 %v7672_v29, %v7642_v2 }
 0xd6a   : > { %7679 = vst.msk [vmem:[%s388_s25] sm:$0xff] %vm7678_vm8, %v7673_v63 }
 0xd6f   : > { %v7675_v1 = vpop.f32.mrf.mxu0 }
 0xd70   : > { %v7676_v14 = vadd.f32 %v7675_v1, %v7643_v35 }
 0xd72   : > { %7681 = vst.msk [vmem:[%s388_s25 + $0x8] sm:$0x3] %vm7680_vm11, %v7676_v14 }
 0xd73 PF: > { %s21_s17 = sadd.s32 1, %s8671_s17  }
 0xd74   : > { %p18_p5 = scmp.ge.s32.totalorder %s21_s17, 4  }
 0xd76   :  { %20 = sbr.rel (!%p18_p5) target bundleno = 1 (0x1), region = 196 }

</bundles_post_ra>
